<compile_context>
chip_gen: v5e
topology: v5e:2x2
jax: 0.10.0
libtpu: 0.0.40
codegen_flags: <defaults>
</compile_context>

<pallas_src>
import functools

import jax
import jax.numpy as jnp
from jax.experimental import pallas as pl
from jax.experimental.pallas import tpu as pltpu


# ----------------------------------------------------------------------------
# Pallas kernel: K-folded conv-as-matmul with fused epilogue.
# ----------------------------------------------------------------------------
def _conv_kernel(*refs, has_res, fuse_px, act, alpha):
    it = iter(refs)
    p_ref = next(it)            # (TM, K) bf16 patches
    w_ref = next(it)            # (K, Cout) bf16 weights
    b_ref = next(it)            # (1, Cout) f32 bias
    r_ref = next(it) if has_res else None
    if fuse_px:
        wpx_ref = next(it)      # (1, Cout) f32
        bpx_ref = next(it)      # (1, 1)    f32
    o_ref = next(it)

    y = jnp.dot(p_ref[...], w_ref[...], preferred_element_type=jnp.float32)
    y = y + b_ref[...]
    if has_res:
        y = y + r_ref[...]                       # ResBlock skip (pre-activation)
    if act == "leaky_relu":
        y = jnp.where(y >= 0, y, alpha * y)
    elif act == "sigmoid":
        y = jax.nn.sigmoid(y)

    if fuse_px:
        # nb_classes == 1: the 1x1 px conv is a channel reduction + sigmoid.
        z = jnp.sum(y * wpx_ref[...], axis=-1, keepdims=True) + bpx_ref[...]
        o_ref[...] = jax.nn.sigmoid(z).astype(o_ref.dtype)
    else:
        o_ref[...] = y.astype(o_ref.dtype)


def _round_up(x, m):
    return (x + m - 1) // m * m


def _conv_mm(patches, wf, bias, *, residual=None, px=None, act=None, alpha=0.01):
    M, K = patches.shape
    Cout = wf.shape[1]

    # TM <= 2048: double-buffered bf16 patches (+ f32 out / residual) stay well
    # under the default scoped VMEM on v5e/v6e and under v7x's 64 MiB.
    TM = min(2048, _round_up(M, 8))
    Mp = _round_up(M, TM)
    if Mp != M:
        patches = jnp.pad(patches, ((0, Mp - M), (0, 0)))
        if residual is not None:
            residual = jnp.pad(residual, ((0, Mp - M), (0, 0)))

    inputs = [patches, wf, bias.reshape(1, Cout).astype(jnp.float32)]
    in_specs = [
        pl.BlockSpec((TM, K), lambda i: (i, 0)),
        pl.BlockSpec((K, Cout), lambda i: (0, 0)),
        pl.BlockSpec((1, Cout), lambda i: (0, 0)),
    ]
    has_res = residual is not None
    if has_res:
        inputs.append(residual.astype(jnp.float32))
        in_specs.append(pl.BlockSpec((TM, Cout), lambda i: (i, 0)))
    fuse_px = px is not None
    out_c = Cout
    if fuse_px:
        wpx, bpx = px
        out_c = 1
        inputs.append(wpx.reshape(1, Cout).astype(jnp.float32))
        inputs.append(bpx.reshape(1, 1).astype(jnp.float32))
        in_specs.append(pl.BlockSpec((1, Cout), lambda i: (0, 0)))
        in_specs.append(pl.BlockSpec((1, 1), lambda i: (0, 0)))

    out = pl.pallas_call(
        functools.partial(_conv_kernel, has_res=has_res, fuse_px=fuse_px,
                          act=act, alpha=alpha),
        out_shape=jax.ShapeDtypeStruct((Mp, out_c), jnp.float32),
        grid_spec=pltpu.PrefetchScalarGridSpec(
            num_scalar_prefetch=0,
            grid=(Mp // TM,),
            in_specs=in_specs,
            out_specs=pl.BlockSpec((TM, out_c), lambda i: (i, 0)),
        ),
        compiler_params=pltpu.CompilerParams(
            dimension_semantics=("parallel",)),
    )(*inputs)
    return out[:M]


def conv(xs, ws, b, *, ksize, padding, act=None, alpha=0.01,
         residual=None, px=None):
    """Stride-1 conv over a (virtual) channel-concat of NHWC sources `xs`.

    xs[i]: (N, H, W, Cin_i); ws[i]: (ksize, ksize, Cin_i, Cout); the channel
    concat is folded into the im2col K axis (never materialized as NHWC).
    """
    N, H, W, _ = xs[0].shape
    KH = KW = ksize
    Ho = H + 2 * padding - (KH - 1)
    Wo = W + 2 * padding - (KW - 1)
    Cout = ws[0].shape[-1]
    M = N * Ho * Wo

    pats, wcols = [], []
    for x, w in zip(xs, ws):
        Cin = x.shape[-1]
        if ksize == 1:
            p_ = x.reshape(M, Cin)
        else:
            xp = jnp.pad(x, ((0, 0), (padding, padding),
                             (padding, padding), (0, 0)))
            cols = [xp[:, kh:kh + Ho, kw:kw + Wo, :]
                    for kh in range(KH) for kw in range(KW)]
            p_ = jnp.concatenate(cols, axis=-1).reshape(M, KH * KW * Cin)
        pats.append(p_.astype(jnp.bfloat16))
        wcols.append(w.reshape(KH * KW * Cin, Cout).astype(jnp.bfloat16))
    patches = pats[0] if len(pats) == 1 else jnp.concatenate(pats, axis=-1)
    wf = wcols[0] if len(wcols) == 1 else jnp.concatenate(wcols, axis=0)

    res2d = None if residual is None else residual.reshape(M, Cout)
    out2d = _conv_mm(patches, wf, b, residual=res2d, px=px, act=act, alpha=alpha)
    return out2d.reshape(N, Ho, Wo, out2d.shape[-1])


# ----------------------------------------------------------------------------
# Cheap glue ops (pooling / bilinear upsampling).
# ----------------------------------------------------------------------------
def maxpool2(x):  # NHWC, kernel 2, stride 2
    n, h, w, c = x.shape
    return x.reshape(n, h // 2, 2, w // 2, 2, c).max(axis=(2, 4))


def _up2_axis(x, axis):
    # 1-D x2 linear interpolation, align_corners=False (PyTorch semantics).
    L = x.shape[axis]
    idx = jnp.arange(L)
    xm = jnp.take(x, jnp.clip(idx - 1, 0, L - 1), axis=axis)
    xp = jnp.take(x, jnp.clip(idx + 1, 0, L - 1), axis=axis)
    even = 0.25 * xm + 0.75 * x
    odd = 0.75 * x + 0.25 * xp
    y = jnp.stack([even, odd], axis=axis + 1)
    shp = list(x.shape)
    shp[axis] = 2 * L
    return y.reshape(shp)


def upsample2_bilinear(x):  # NHWC; matches F.interpolate(scale=2, mode='bilinear')
    return _up2_axis(_up2_axis(x, 1), 2)


# ----------------------------------------------------------------------------
# Residual blocks / modules (dcnn.py ResBlock / ResModule semantics).
# ----------------------------------------------------------------------------
def res_block(xs, ws_c0, blk, *, alpha=0.01):
    x0 = conv(xs, ws_c0, blk["c0"][1], ksize=1, padding=0, act=None)
    h = conv([x0], [blk["c1"][0]], blk["c1"][1], ksize=3, padding=1,
             act="leaky_relu", alpha=alpha)
    # residual add + LeakyReLU fused into the c2 conv epilogue.
    return conv([h], [blk["c2"][0]], blk["c2"][1], ksize=3, padding=1,
                act="leaky_relu", alpha=alpha, residual=x0)


def res_module(xs, mod, *, alpha=0.01):
    # Split the first ResBlock's 1x1 conv weight along Cin to match the
    # (virtual) channel-concat of `xs`.
    w0 = mod["rb1"]["c0"][0]
    offs = [0]
    for x in xs:
        offs.append(offs[-1] + x.shape[-1])
    ws0 = [w0[:, :, offs[i]:offs[i + 1], :] for i in range(len(xs))]
    y = res_block(xs, ws0, mod["rb1"], alpha=alpha)
    y = res_block([y], [mod["rb2"]["c0"][0]], mod["rb2"], alpha=alpha)
    return y


# ----------------------------------------------------------------------------
# Parameter construction (PyTorch Conv2d default init; weights in KHWC-out).
# ----------------------------------------------------------------------------
def _conv_init(key, ks, cin, cout):
    kw_, kb_ = jax.random.split(key)
    bound = 1.0 / (ks * ks * cin) ** 0.5
    w = jax.random.uniform(kw_, (ks, ks, cin, cout), jnp.float32, -bound, bound)
    b = jax.random.uniform(kb_, (cout,), jnp.float32, -bound, bound)
    return w, b


def init_params(key, nf=32, nb_classes=1):
    def rm(cin, cout):
        return {"rb1": {"c0": (1, cin, cout), "c1": (3, cout, cout),
                        "c2": (3, cout, cout)},
                "rb2": {"c0": (1, cout, cout), "c1": (3, cout, cout),
                        "c2": (3, cout, cout)}}
    spec = {
        "c1": (3, 1, nf),
        "c2": rm(nf, 2 * nf),
        "bn": rm(2 * nf, 4 * nf),
        "up1": (1, 4 * nf, 2 * nf),
        "c3": rm(4 * nf, 2 * nf),
        "up2": (1, 2 * nf, nf),
        "c4": (3, 2 * nf, nf),
        "px": (1, nf, nb_classes),
    }
    flat = []

    def collect(s, path):
        if isinstance(s, dict):
            for k in sorted(s):
                collect(s[k], path + (k,))
        else:
            flat.append((path, s))

    collect(spec, ())
    keys = jax.random.split(key, len(flat))
    params = {}
    for (path, (ks, cin, cout)), kk in zip(flat, keys):
        d = params
        for name in path[:-1]:
            d = d.setdefault(name, {})
        d[path[-1]] = _conv_init(kk, ks, cin, cout)
    return params


# ----------------------------------------------------------------------------
# Forward pass (mirrors resatomsegnet_s2.forward, nb_classes = 1).
# ----------------------------------------------------------------------------
def resatomsegnet_s2_forward(p, x_nchw):
    x = jnp.transpose(x_nchw, (0, 2, 3, 1))           # NCHW -> NHWC

    c1 = conv([x], [p["c1"][0]], p["c1"][1], ksize=3, padding=1,
              act="leaky_relu")
    d1 = maxpool2(c1)
    c2 = res_module([d1], p["c2"])
    d2 = maxpool2(c2)
    bn = res_module([d2], p["bn"])

    # upsample_block1: bilinear x2 then 1x1 conv; the 1x1 conv commutes exactly
    # with bilinear interpolation, so conv at low res first, then upsample.
    u2 = upsample2_bilinear(
        conv([bn], [p["up1"][0]], p["up1"][1], ksize=1, padding=0, act=None))
    # torch.cat([c2, u2], dim=1) folded into c3's first 1x1 conv.
    u2 = res_module([c2, u2], p["c3"])

    u1 = upsample2_bilinear(
        conv([u2], [p["up2"][0]], p["up2"][1], ksize=1, padding=0, act=None))
    # c4 (3x3 + LeakyReLU) on cat([c1, u1]) with the px 1x1 conv + sigmoid
    # fused into the same kernel epilogue (nb_classes == 1 -> sigmoid branch).
    # TODO(synk): nb_classes > 1 (log_softmax branch) not implemented.
    w4 = p["c4"][0]
    s = c1.shape[-1]
    px = conv([c1, u1], [w4[:, :, :s, :], w4[:, :, s:, :]], p["c4"][1],
              ksize=3, padding=1, act="leaky_relu",
              px=(p["px"][0], p["px"][1]))
    return jnp.transpose(px, (0, 3, 1, 2))            # NHWC -> NCHW


if __name__ == "__main__":
    key = jax.random.PRNGKey(0)
    kx, kp = jax.random.split(key)

    N, C, H, W = 2, 1, 16, 16                 # NCHW; Conv2d(1, nb_filters)
    nb_filters, nb_classes = 16, 1

    x = jax.random.normal(kx, (N, C, H, W), jnp.float32)
    params = init_params(kp, nf=nb_filters, nb_classes=nb_classes)

    fwd = jax.jit(resatomsegnet_s2_forward)
    out = jax.block_until_ready(fwd(params, x))

    assert out.shape == (N, nb_classes, H, W), out.shape
    assert bool(jnp.all(jnp.isfinite(out)))
    assert bool(jnp.all((out >= 0.0) & (out <= 1.0)))   # sigmoid range
    print("KERNEL_OK")
</pallas_src>

<mosaic_0001>
module attributes {stable_mosaic.version = 11 : i64} {
  func.func @_conv_kernel(%arg0: i32, %arg1: memref<512x9xbf16, #tpu.memory_space<vmem>>, %arg2: memref<9x16xbf16, #tpu.memory_space<vmem>>, %arg3: memref<1x16xf32, #tpu.memory_space<vmem>>, %arg4: memref<512x16xf32, #tpu.memory_space<vmem>>) attributes {dimension_semantics = [#tpu.dimension_semantics<parallel>], iteration_bounds = array<i64: 1>, scalar_prefetch = 0 : i64, scratch_operands = 0 : i64, tpu.core_type = #tpu.core_type<tc>, window_params = [{transform_indices = @transform_0, window_bounds = array<i64: 512, 9>}, {pipeline_mode = #tpu.pipeline_mode<synchronous>, transform_indices = @transform_1, window_bounds = array<i64: 9, 16>}, {pipeline_mode = #tpu.pipeline_mode<synchronous>, transform_indices = @transform_2, window_bounds = array<i64: 1, 16>}, {transform_indices = @transform_3, window_bounds = array<i64: 512, 16>}]} {
    %c0 = arith.constant 0 : index
    %c0_0 = arith.constant 0 : index
    %0 = vector.load %arg1[%c0, %c0_0] : memref<512x9xbf16, #tpu.memory_space<vmem>>, vector<512x9xbf16>
    %c0_1 = arith.constant 0 : index
    %c0_2 = arith.constant 0 : index
    %1 = vector.load %arg2[%c0_1, %c0_2] : memref<9x16xbf16, #tpu.memory_space<vmem>>, vector<9x16xbf16>
    %cst = arith.constant dense<0.000000e+00> : vector<512x16xf32>
    %2 = tpu.matmul %0, %1, %cst {dimension_numbers = #tpu.dot_dimension_numbers<[1], [0], [0], [1], [0, 0, 1, 1], [], []>} : vector<512x9xbf16>, vector<9x16xbf16>, vector<512x16xf32> -> vector<512x16xf32>
    %c0_3 = arith.constant 0 : index
    %c0_4 = arith.constant 0 : index
    %3 = vector.load %arg3[%c0_3, %c0_4] : memref<1x16xf32, #tpu.memory_space<vmem>>, vector<1x16xf32>
    %4 = vector.broadcast %3 : vector<1x16xf32> to vector<512x16xf32>
    %5 = arith.addf %2, %4 : vector<512x16xf32>
    %cst_5 = arith.constant 0.000000e+00 : f32
    %6 = vector.broadcast %cst_5 : f32 to vector<512x16xf32>
    %7 = arith.cmpf oge, %5, %6 : vector<512x16xf32>
    %cst_6 = arith.constant 0.00999999977 : f32
    %8 = vector.broadcast %cst_6 : f32 to vector<512x16xf32>
    %9 = arith.mulf %8, %5 : vector<512x16xf32>
    %10 = arith.select %7, %5, %9 : vector<512x16xi1>, vector<512x16xf32>
    %c0_7 = arith.constant 0 : index
    %c0_8 = arith.constant 0 : index
    %11 = vector.load %arg4[%c0_7, %c0_8] : memref<512x16xf32, #tpu.memory_space<vmem>>, vector<512x16xf32>
    tpu.vector_store %arg4[%c0_7, %c0_8], %10 {strides = array<i32>} : memref<512x16xf32, #tpu.memory_space<vmem>>, vector<512x16xf32>,
    return
  }
  func.func @transform_0(%arg0: i32) -> (i32, i32) {
    %c0_i32 = arith.constant 0 : i32
    %c0_i32_0 = arith.constant 0 : i32
    return %arg0, %c0_i32 : i32, i32
  }
  func.func @transform_1(%arg0: i32) -> (i32, i32) {
    %c0_i32 = arith.constant 0 : i32
    %c0_i32_0 = arith.constant 0 : i32
    %c0_i32_1 = arith.constant 0 : i32
    return %c0_i32, %c0_i32_0 : i32, i32
  }
  func.func @transform_2(%arg0: i32) -> (i32, i32) {
    %c0_i32 = arith.constant 0 : i32
    %c0_i32_0 = arith.constant 0 : i32
    %c0_i32_1 = arith.constant 0 : i32
    return %c0_i32, %c0_i32_0 : i32, i32
  }
  func.func @transform_3(%arg0: i32) -> (i32, i32) {
    %c0_i32 = arith.constant 0 : i32
    %c0_i32_0 = arith.constant 0 : i32
    return %arg0, %c0_i32 : i32, i32
  }
}

module attributes {stable_mosaic.version = 11 : i64} {
  func.func @_conv_kernel(%arg0: i32, %arg1: memref<128x16xbf16, #tpu.memory_space<vmem>>, %arg2: memref<16x32xbf16, #tpu.memory_space<vmem>>, %arg3: memref<1x32xf32, #tpu.memory_space<vmem>>, %arg4: memref<128x32xf32, #tpu.memory_space<vmem>>) attributes {dimension_semantics = [#tpu.dimension_semantics<parallel>], iteration_bounds = array<i64: 1>, scalar_prefetch = 0 : i64, scratch_operands = 0 : i64, tpu.core_type = #tpu.core_type<tc>, window_params = [{transform_indices = @transform_0, window_bounds = array<i64: 128, 16>}, {pipeline_mode = #tpu.pipeline_mode<synchronous>, transform_indices = @transform_1, window_bounds = array<i64: 16, 32>}, {pipeline_mode = #tpu.pipeline_mode<synchronous>, transform_indices = @transform_2, window_bounds = array<i64: 1, 32>}, {transform_indices = @transform_3, window_bounds = array<i64: 128, 32>}]} {
    %c0 = arith.constant 0 : index
    %c0_0 = arith.constant 0 : index
    %0 = vector.load %arg1[%c0, %c0_0] : memref<128x16xbf16, #tpu.memory_space<vmem>>, vector<128x16xbf16>
    %c0_1 = arith.constant 0 : index
    %c0_2 = arith.constant 0 : index
    %1 = vector.load %arg2[%c0_1, %c0_2] : memref<16x32xbf16, #tpu.memory_space<vmem>>, vector<16x32xbf16>
    %cst = arith.constant dense<0.000000e+00> : vector<128x32xf32>
    %2 = tpu.matmul %0, %1, %cst {dimension_numbers = #tpu.dot_dimension_numbers<[1], [0], [0], [1], [0, 0, 1, 1], [], []>} : vector<128x16xbf16>, vector<16x32xbf16>, vector<128x32xf32> -> vector<128x32xf32>
    %c0_3 = arith.constant 0 : index
    %c0_4 = arith.constant 0 : index
    %3 = vector.load %arg3[%c0_3, %c0_4] : memref<1x32xf32, #tpu.memory_space<vmem>>, vector<1x32xf32>
    %4 = vector.broadcast %3 : vector<1x32xf32> to vector<128x32xf32>
    %5 = arith.addf %2, %4 : vector<128x32xf32>
    %c0_5 = arith.constant 0 : index
    %c0_6 = arith.constant 0 : index
    %6 = vector.load %arg4[%c0_5, %c0_6] : memref<128x32xf32, #tpu.memory_space<vmem>>, vector<128x32xf32>
    tpu.vector_store %arg4[%c0_5, %c0_6], %5 {strides = array<i32>} : memref<128x32xf32, #tpu.memory_space<vmem>>, vector<128x32xf32>,
    return
  }
  func.func @transform_0(%arg0: i32) -> (i32, i32) {
    %c0_i32 = arith.constant 0 : i32
    %c0_i32_0 = arith.constant 0 : i32
    return %arg0, %c0_i32 : i32, i32
  }
  func.func @transform_1(%arg0: i32) -> (i32, i32) {
    %c0_i32 = arith.constant 0 : i32
    %c0_i32_0 = arith.constant 0 : i32
    %c0_i32_1 = arith.constant 0 : i32
    return %c0_i32, %c0_i32_0 : i32, i32
  }
  func.func @transform_2(%arg0: i32) -> (i32, i32) {
    %c0_i32 = arith.constant 0 : i32
    %c0_i32_0 = arith.constant 0 : i32
    %c0_i32_1 = arith.constant 0 : i32
    return %c0_i32, %c0_i32_0 : i32, i32
  }
  func.func @transform_3(%arg0: i32) -> (i32, i32) {
    %c0_i32 = arith.constant 0 : i32
    %c0_i32_0 = arith.constant 0 : i32
    return %arg0, %c0_i32 : i32, i32
  }
}

module attributes {stable_mosaic.version = 11 : i64} {
  func.func @_conv_kernel(%arg0: i32, %arg1: memref<128x288xbf16, #tpu.memory_space<vmem>>, %arg2: memref<288x32xbf16, #tpu.memory_space<vmem>>, %arg3: memref<1x32xf32, #tpu.memory_space<vmem>>, %arg4: memref<128x32xf32, #tpu.memory_space<vmem>>) attributes {dimension_semantics = [#tpu.dimension_semantics<parallel>], iteration_bounds = array<i64: 1>, scalar_prefetch = 0 : i64, scratch_operands = 0 : i64, tpu.core_type = #tpu.core_type<tc>, window_params = [{transform_indices = @transform_0, window_bounds = array<i64: 128, 288>}, {pipeline_mode = #tpu.pipeline_mode<synchronous>, transform_indices = @transform_1, window_bounds = array<i64: 288, 32>}, {pipeline_mode = #tpu.pipeline_mode<synchronous>, transform_indices = @transform_2, window_bounds = array<i64: 1, 32>}, {transform_indices = @transform_3, window_bounds = array<i64: 128, 32>}]} {
    %c0 = arith.constant 0 : index
    %c0_0 = arith.constant 0 : index
    %0 = vector.load %arg1[%c0, %c0_0] : memref<128x288xbf16, #tpu.memory_space<vmem>>, vector<128x288xbf16>
    %c0_1 = arith.constant 0 : index
    %c0_2 = arith.constant 0 : index
    %1 = vector.load %arg2[%c0_1, %c0_2] : memref<288x32xbf16, #tpu.memory_space<vmem>>, vector<288x32xbf16>
    %cst = arith.constant dense<0.000000e+00> : vector<128x32xf32>
    %2 = tpu.matmul %0, %1, %cst {dimension_numbers = #tpu.dot_dimension_numbers<[1], [0], [0], [1], [0, 0, 1, 1], [], []>} : vector<128x288xbf16>, vector<288x32xbf16>, vector<128x32xf32> -> vector<128x32xf32>
    %c0_3 = arith.constant 0 : index
    %c0_4 = arith.constant 0 : index
    %3 = vector.load %arg3[%c0_3, %c0_4] : memref<1x32xf32, #tpu.memory_space<vmem>>, vector<1x32xf32>
    %4 = vector.broadcast %3 : vector<1x32xf32> to vector<128x32xf32>
    %5 = arith.addf %2, %4 : vector<128x32xf32>
    %cst_5 = arith.constant 0.000000e+00 : f32
    %6 = vector.broadcast %cst_5 : f32 to vector<128x32xf32>
    %7 = arith.cmpf oge, %5, %6 : vector<128x32xf32>
    %cst_6 = arith.constant 0.00999999977 : f32
    %8 = vector.broadcast %cst_6 : f32 to vector<128x32xf32>
    %9 = arith.mulf %8, %5 : vector<128x32xf32>
    %10 = arith.select %7, %5, %9 : vector<128x32xi1>, vector<128x32xf32>
    %c0_7 = arith.constant 0 : index
    %c0_8 = arith.constant 0 : index
    %11 = vector.load %arg4[%c0_7, %c0_8] : memref<128x32xf32, #tpu.memory_space<vmem>>, vector<128x32xf32>
    tpu.vector_store %arg4[%c0_7, %c0_8], %10 {strides = array<i32>} : memref<128x32xf32, #tpu.memory_space<vmem>>, vector<128x32xf32>,
    return
  }
  func.func @transform_0(%arg0: i32) -> (i32, i32) {
    %c0_i32 = arith.constant 0 : i32
    %c0_i32_0 = arith.constant 0 : i32
    return %arg0, %c0_i32 : i32, i32
  }
  func.func @transform_1(%arg0: i32) -> (i32, i32) {
    %c0_i32 = arith.constant 0 : i32
    %c0_i32_0 = arith.constant 0 : i32
    %c0_i32_1 = arith.constant 0 : i32
    return %c0_i32, %c0_i32_0 : i32, i32
  }
  func.func @transform_2(%arg0: i32) -> (i32, i32) {
    %c0_i32 = arith.constant 0 : i32
    %c0_i32_0 = arith.constant 0 : i32
    %c0_i32_1 = arith.constant 0 : i32
    return %c0_i32, %c0_i32_0 : i32, i32
  }
  func.func @transform_3(%arg0: i32) -> (i32, i32) {
    %c0_i32 = arith.constant 0 : i32
    %c0_i32_0 = arith.constant 0 : i32
    return %arg0, %c0_i32 : i32, i32
  }
}

module attributes {stable_mosaic.version = 11 : i64} {
  func.func @_conv_kernel(%arg0: i32, %arg1: memref<128x32xbf16, #tpu.memory_space<vmem>>, %arg2: memref<32x32xbf16, #tpu.memory_space<vmem>>, %arg3: memref<1x32xf32, #tpu.memory_space<vmem>>, %arg4: memref<128x32xf32, #tpu.memory_space<vmem>>) attributes {dimension_semantics = [#tpu.dimension_semantics<parallel>], iteration_bounds = array<i64: 1>, scalar_prefetch = 0 : i64, scratch_operands = 0 : i64, tpu.core_type = #tpu.core_type<tc>, window_params = [{transform_indices = @transform_0, window_bounds = array<i64: 128, 32>}, {pipeline_mode = #tpu.pipeline_mode<synchronous>, transform_indices = @transform_1, window_bounds = array<i64: 32, 32>}, {pipeline_mode = #tpu.pipeline_mode<synchronous>, transform_indices = @transform_2, window_bounds = array<i64: 1, 32>}, {transform_indices = @transform_3, window_bounds = array<i64: 128, 32>}]} {
    %c0 = arith.constant 0 : index
    %c0_0 = arith.constant 0 : index
    %0 = vector.load %arg1[%c0, %c0_0] : memref<128x32xbf16, #tpu.memory_space<vmem>>, vector<128x32xbf16>
    %c0_1 = arith.constant 0 : index
    %c0_2 = arith.constant 0 : index
    %1 = vector.load %arg2[%c0_1, %c0_2] : memref<32x32xbf16, #tpu.memory_space<vmem>>, vector<32x32xbf16>
    %cst = arith.constant dense<0.000000e+00> : vector<128x32xf32>
    %2 = tpu.matmul %0, %1, %cst {dimension_numbers = #tpu.dot_dimension_numbers<[1], [0], [0], [1], [0, 0, 1, 1], [], []>} : vector<128x32xbf16>, vector<32x32xbf16>, vector<128x32xf32> -> vector<128x32xf32>
    %c0_3 = arith.constant 0 : index
    %c0_4 = arith.constant 0 : index
    %3 = vector.load %arg3[%c0_3, %c0_4] : memref<1x32xf32, #tpu.memory_space<vmem>>, vector<1x32xf32>
    %4 = vector.broadcast %3 : vector<1x32xf32> to vector<128x32xf32>
    %5 = arith.addf %2, %4 : vector<128x32xf32>
    %c0_5 = arith.constant 0 : index
    %c0_6 = arith.constant 0 : index
    %6 = vector.load %arg4[%c0_5, %c0_6] : memref<128x32xf32, #tpu.memory_space<vmem>>, vector<128x32xf32>
    tpu.vector_store %arg4[%c0_5, %c0_6], %5 {strides = array<i32>} : memref<128x32xf32, #tpu.memory_space<vmem>>, vector<128x32xf32>,
    return
  }
  func.func @transform_0(%arg0: i32) -> (i32, i32) {
    %c0_i32 = arith.constant 0 : i32
    %c0_i32_0 = arith.constant 0 : i32
    return %arg0, %c0_i32 : i32, i32
  }
  func.func @transform_1(%arg0: i32) -> (i32, i32) {
    %c0_i32 = arith.constant 0 : i32
    %c0_i32_0 = arith.constant 0 : i32
    %c0_i32_1 = arith.constant 0 : i32
    return %c0_i32, %c0_i32_0 : i32, i32
  }
  func.func @transform_2(%arg0: i32) -> (i32, i32) {
    %c0_i32 = arith.constant 0 : i32
    %c0_i32_0 = arith.constant 0 : i32
    %c0_i32_1 = arith.constant 0 : i32
    return %c0_i32, %c0_i32_0 : i32, i32
  }
  func.func @transform_3(%arg0: i32) -> (i32, i32) {
    %c0_i32 = arith.constant 0 : i32
    %c0_i32_0 = arith.constant 0 : i32
    return %arg0, %c0_i32 : i32, i32
  }
}

module attributes {stable_mosaic.version = 11 : i64} {
  func.func @_conv_kernel(%arg0: i32, %arg1: memref<128x288xbf16, #tpu.memory_space<vmem>>, %arg2: memref<288x32xbf16, #tpu.memory_space<vmem>>, %arg3: memref<1x32xf32, #tpu.memory_space<vmem>>, %arg4: memref<128x32xf32, #tpu.memory_space<vmem>>, %arg5: memref<128x32xf32, #tpu.memory_space<vmem>>) attributes {dimension_semantics = [#tpu.dimension_semantics<parallel>], iteration_bounds = array<i64: 1>, scalar_prefetch = 0 : i64, scratch_operands = 0 : i64, tpu.core_type = #tpu.core_type<tc>, window_params = [{transform_indices = @transform_0, window_bounds = array<i64: 128, 288>}, {pipeline_mode = #tpu.pipeline_mode<synchronous>, transform_indices = @transform_1, window_bounds = array<i64: 288, 32>}, {pipeline_mode = #tpu.pipeline_mode<synchronous>, transform_indices = @transform_2, window_bounds = array<i64: 1, 32>}, {transform_indices = @transform_3, window_bounds = array<i64: 128, 32>}, {transform_indices = @transform_4, window_bounds = array<i64: 128, 32>}]} {
    %c0 = arith.constant 0 : index
    %c0_0 = arith.constant 0 : index
    %0 = vector.load %arg1[%c0, %c0_0] : memref<128x288xbf16, #tpu.memory_space<vmem>>, vector<128x288xbf16>
    %c0_1 = arith.constant 0 : index
    %c0_2 = arith.constant 0 : index
    %1 = vector.load %arg2[%c0_1, %c0_2] : memref<288x32xbf16, #tpu.memory_space<vmem>>, vector<288x32xbf16>
    %cst = arith.constant dense<0.000000e+00> : vector<128x32xf32>
    %2 = tpu.matmul %0, %1, %cst {dimension_numbers = #tpu.dot_dimension_numbers<[1], [0], [0], [1], [0, 0, 1, 1], [], []>} : vector<128x288xbf16>, vector<288x32xbf16>, vector<128x32xf32> -> vector<128x32xf32>
    %c0_3 = arith.constant 0 : index
    %c0_4 = arith.constant 0 : index
    %3 = vector.load %arg3[%c0_3, %c0_4] : memref<1x32xf32, #tpu.memory_space<vmem>>, vector<1x32xf32>
    %4 = vector.broadcast %3 : vector<1x32xf32> to vector<128x32xf32>
    %5 = arith.addf %2, %4 : vector<128x32xf32>
    %c0_5 = arith.constant 0 : index
    %c0_6 = arith.constant 0 : index
    %6 = vector.load %arg4[%c0_5, %c0_6] : memref<128x32xf32, #tpu.memory_space<vmem>>, vector<128x32xf32>
    %7 = arith.addf %5, %6 : vector<128x32xf32>
    %cst_7 = arith.constant 0.000000e+00 : f32
    %8 = vector.broadcast %cst_7 : f32 to vector<128x32xf32>
    %9 = arith.cmpf oge, %7, %8 : vector<128x32xf32>
    %cst_8 = arith.constant 0.00999999977 : f32
    %10 = vector.broadcast %cst_8 : f32 to vector<128x32xf32>
    %11 = arith.mulf %10, %7 : vector<128x32xf32>
    %12 = arith.select %9, %7, %11 : vector<128x32xi1>, vector<128x32xf32>
    %c0_9 = arith.constant 0 : index
    %c0_10 = arith.constant 0 : index
    %13 = vector.load %arg5[%c0_9, %c0_10] : memref<128x32xf32, #tpu.memory_space<vmem>>, vector<128x32xf32>
    tpu.vector_store %arg5[%c0_9, %c0_10], %12 {strides = array<i32>} : memref<128x32xf32, #tpu.memory_space<vmem>>, vector<128x32xf32>,
    return
  }
  func.func @transform_0(%arg0: i32) -> (i32, i32) {
    %c0_i32 = arith.constant 0 : i32
    %c0_i32_0 = arith.constant 0 : i32
    return %arg0, %c0_i32 : i32, i32
  }
  func.func @transform_1(%arg0: i32) -> (i32, i32) {
    %c0_i32 = arith.constant 0 : i32
    %c0_i32_0 = arith.constant 0 : i32
    %c0_i32_1 = arith.constant 0 : i32
    return %c0_i32, %c0_i32_0 : i32, i32
  }
  func.func @transform_2(%arg0: i32) -> (i32, i32) {
    %c0_i32 = arith.constant 0 : i32
    %c0_i32_0 = arith.constant 0 : i32
    %c0_i32_1 = arith.constant 0 : i32
    return %c0_i32, %c0_i32_0 : i32, i32
  }
  func.func @transform_3(%arg0: i32) -> (i32, i32) {
    %c0_i32 = arith.constant 0 : i32
    %c0_i32_0 = arith.constant 0 : i32
    return %arg0, %c0_i32 : i32, i32
  }
  func.func @transform_4(%arg0: i32) -> (i32, i32) {
    %c0_i32 = arith.constant 0 : i32
    %c0_i32_0 = arith.constant 0 : i32
    return %arg0, %c0_i32 : i32, i32
  }
}

module attributes {stable_mosaic.version = 11 : i64} {
  func.func @_conv_kernel(%arg0: i32, %arg1: memref<32x32xbf16, #tpu.memory_space<vmem>>, %arg2: memref<32x64xbf16, #tpu.memory_space<vmem>>, %arg3: memref<1x64xf32, #tpu.memory_space<vmem>>, %arg4: memref<32x64xf32, #tpu.memory_space<vmem>>) attributes {dimension_semantics = [#tpu.dimension_semantics<parallel>], iteration_bounds = array<i64: 1>, scalar_prefetch = 0 : i64, scratch_operands = 0 : i64, tpu.core_type = #tpu.core_type<tc>, window_params = [{transform_indices = @transform_0, window_bounds = array<i64: 32, 32>}, {pipeline_mode = #tpu.pipeline_mode<synchronous>, transform_indices = @transform_1, window_bounds = array<i64: 32, 64>}, {pipeline_mode = #tpu.pipeline_mode<synchronous>, transform_indices = @transform_2, window_bounds = array<i64: 1, 64>}, {transform_indices = @transform_3, window_bounds = array<i64: 32, 64>}]} {
    %c0 = arith.constant 0 : index
    %c0_0 = arith.constant 0 : index
    %0 = vector.load %arg1[%c0, %c0_0] : memref<32x32xbf16, #tpu.memory_space<vmem>>, vector<32x32xbf16>
    %c0_1 = arith.constant 0 : index
    %c0_2 = arith.constant 0 : index
    %1 = vector.load %arg2[%c0_1, %c0_2] : memref<32x64xbf16, #tpu.memory_space<vmem>>, vector<32x64xbf16>
    %cst = arith.constant dense<0.000000e+00> : vector<32x64xf32>
    %2 = tpu.matmul %0, %1, %cst {dimension_numbers = #tpu.dot_dimension_numbers<[1], [0], [0], [1], [0, 0, 1, 1], [], []>} : vector<32x32xbf16>, vector<32x64xbf16>, vector<32x64xf32> -> vector<32x64xf32>
    %c0_3 = arith.constant 0 : index
    %c0_4 = arith.constant 0 : index
    %3 = vector.load %arg3[%c0_3, %c0_4] : memref<1x64xf32, #tpu.memory_space<vmem>>, vector<1x64xf32>
    %4 = vector.broadcast %3 : vector<1x64xf32> to vector<32x64xf32>
    %5 = arith.addf %2, %4 : vector<32x64xf32>
    %c0_5 = arith.constant 0 : index
    %c0_6 = arith.constant 0 : index
    %6 = vector.load %arg4[%c0_5, %c0_6] : memref<32x64xf32, #tpu.memory_space<vmem>>, vector<32x64xf32>
    tpu.vector_store %arg4[%c0_5, %c0_6], %5 {strides = array<i32>} : memref<32x64xf32, #tpu.memory_space<vmem>>, vector<32x64xf32>,
    return
  }
  func.func @transform_0(%arg0: i32) -> (i32, i32) {
    %c0_i32 = arith.constant 0 : i32
    %c0_i32_0 = arith.constant 0 : i32
    return %arg0, %c0_i32 : i32, i32
  }
  func.func @transform_1(%arg0: i32) -> (i32, i32) {
    %c0_i32 = arith.constant 0 : i32
    %c0_i32_0 = arith.constant 0 : i32
    %c0_i32_1 = arith.constant 0 : i32
    return %c0_i32, %c0_i32_0 : i32, i32
  }
  func.func @transform_2(%arg0: i32) -> (i32, i32) {
    %c0_i32 = arith.constant 0 : i32
    %c0_i32_0 = arith.constant 0 : i32
    %c0_i32_1 = arith.constant 0 : i32
    return %c0_i32, %c0_i32_0 : i32, i32
  }
  func.func @transform_3(%arg0: i32) -> (i32, i32) {
    %c0_i32 = arith.constant 0 : i32
    %c0_i32_0 = arith.constant 0 : i32
    return %arg0, %c0_i32 : i32, i32
  }
}

module attributes {stable_mosaic.version = 11 : i64} {
  func.func @_conv_kernel(%arg0: i32, %arg1: memref<32x576xbf16, #tpu.memory_space<vmem>>, %arg2: memref<576x64xbf16, #tpu.memory_space<vmem>>, %arg3: memref<1x64xf32, #tpu.memory_space<vmem>>, %arg4: memref<32x64xf32, #tpu.memory_space<vmem>>, %arg5: memref<32x64xf32, #tpu.memory_space<vmem>>) attributes {dimension_semantics = [#tpu.dimension_semantics<parallel>], iteration_bounds = array<i64: 1>, scalar_prefetch = 0 : i64, scratch_operands = 0 : i64, tpu.core_type = #tpu.core_type<tc>, window_params = [{transform_indices = @transform_0, window_bounds = array<i64: 32, 576>}, {pipeline_mode = #tpu.pipeline_mode<synchronous>, transform_indices = @transform_1, window_bounds = array<i64: 576, 64>}, {pipeline_mode = #tpu.pipeline_mode<synchronous>, transform_indices = @transform_2, window_bounds = array<i64: 1, 64>}, {transform_indices = @transform_3, window_bounds = array<i64: 32, 64>}, {transform_indices = @transform_4, window_bounds = array<i64: 32, 64>}]} {
    %c0 = arith.constant 0 : index
    %c0_0 = arith.constant 0 : index
    %0 = vector.load %arg1[%c0, %c0_0] : memref<32x576xbf16, #tpu.memory_space<vmem>>, vector<32x576xbf16>
    %c0_1 = arith.constant 0 : index
    %c0_2 = arith.constant 0 : index
    %1 = vector.load %arg2[%c0_1, %c0_2] : memref<576x64xbf16, #tpu.memory_space<vmem>>, vector<576x64xbf16>
    %cst = arith.constant dense<0.000000e+00> : vector<32x64xf32>
    %2 = tpu.matmul %0, %1, %cst {dimension_numbers = #tpu.dot_dimension_numbers<[1], [0], [0], [1], [0, 0, 1, 1], [], []>} : vector<32x576xbf16>, vector<576x64xbf16>, vector<32x64xf32> -> vector<32x64xf32>
    %c0_3 = arith.constant 0 : index
    %c0_4 = arith.constant 0 : index
    %3 = vector.load %arg3[%c0_3, %c0_4] : memref<1x64xf32, #tpu.memory_space<vmem>>, vector<1x64xf32>
    %4 = vector.broadcast %3 : vector<1x64xf32> to vector<32x64xf32>
    %5 = arith.addf %2, %4 : vector<32x64xf32>
    %c0_5 = arith.constant 0 : index
    %c0_6 = arith.constant 0 : index
    %6 = vector.load %arg4[%c0_5, %c0_6] : memref<32x64xf32, #tpu.memory_space<vmem>>, vector<32x64xf32>
    %7 = arith.addf %5, %6 : vector<32x64xf32>
    %cst_7 = arith.constant 0.000000e+00 : f32
    %8 = vector.broadcast %cst_7 : f32 to vector<32x64xf32>
    %9 = arith.cmpf oge, %7, %8 : vector<32x64xf32>
    %cst_8 = arith.constant 0.00999999977 : f32
    %10 = vector.broadcast %cst_8 : f32 to vector<32x64xf32>
    %11 = arith.mulf %10, %7 : vector<32x64xf32>
    %12 = arith.select %9, %7, %11 : vector<32x64xi1>, vector<32x64xf32>
    %c0_9 = arith.constant 0 : index
    %c0_10 = arith.constant 0 : index
    %13 = vector.load %arg5[%c0_9, %c0_10] : memref<32x64xf32, #tpu.memory_space<vmem>>, vector<32x64xf32>
    tpu.vector_store %arg5[%c0_9, %c0_10], %12 {strides = array<i32>} : memref<32x64xf32, #tpu.memory_space<vmem>>, vector<32x64xf32>,
    return
  }
  func.func @transform_0(%arg0: i32) -> (i32, i32) {
    %c0_i32 = arith.constant 0 : i32
    %c0_i32_0 = arith.constant 0 : i32
    return %arg0, %c0_i32 : i32, i32
  }
  func.func @transform_1(%arg0: i32) -> (i32, i32) {
    %c0_i32 = arith.constant 0 : i32
    %c0_i32_0 = arith.constant 0 : i32
    %c0_i32_1 = arith.constant 0 : i32
    return %c0_i32, %c0_i32_0 : i32, i32
  }
  func.func @transform_2(%arg0: i32) -> (i32, i32) {
    %c0_i32 = arith.constant 0 : i32
    %c0_i32_0 = arith.constant 0 : i32
    %c0_i32_1 = arith.constant 0 : i32
    return %c0_i32, %c0_i32_0 : i32, i32
  }
  func.func @transform_3(%arg0: i32) -> (i32, i32) {
    %c0_i32 = arith.constant 0 : i32
    %c0_i32_0 = arith.constant 0 : i32
    return %arg0, %c0_i32 : i32, i32
  }
  func.func @transform_4(%arg0: i32) -> (i32, i32) {
    %c0_i32 = arith.constant 0 : i32
    %c0_i32_0 = arith.constant 0 : i32
    return %arg0, %c0_i32 : i32, i32
  }
}

module attributes {stable_mosaic.version = 11 : i64} {
  func.func @_conv_kernel(%arg0: i32, %arg1: memref<32x576xbf16, #tpu.memory_space<vmem>>, %arg2: memref<576x64xbf16, #tpu.memory_space<vmem>>, %arg3: memref<1x64xf32, #tpu.memory_space<vmem>>, %arg4: memref<32x64xf32, #tpu.memory_space<vmem>>) attributes {dimension_semantics = [#tpu.dimension_semantics<parallel>], iteration_bounds = array<i64: 1>, scalar_prefetch = 0 : i64, scratch_operands = 0 : i64, tpu.core_type = #tpu.core_type<tc>, window_params = [{transform_indices = @transform_0, window_bounds = array<i64: 32, 576>}, {pipeline_mode = #tpu.pipeline_mode<synchronous>, transform_indices = @transform_1, window_bounds = array<i64: 576, 64>}, {pipeline_mode = #tpu.pipeline_mode<synchronous>, transform_indices = @transform_2, window_bounds = array<i64: 1, 64>}, {transform_indices = @transform_3, window_bounds = array<i64: 32, 64>}]} {
    %c0 = arith.constant 0 : index
    %c0_0 = arith.constant 0 : index
    %0 = vector.load %arg1[%c0, %c0_0] : memref<32x576xbf16, #tpu.memory_space<vmem>>, vector<32x576xbf16>
    %c0_1 = arith.constant 0 : index
    %c0_2 = arith.constant 0 : index
    %1 = vector.load %arg2[%c0_1, %c0_2] : memref<576x64xbf16, #tpu.memory_space<vmem>>, vector<576x64xbf16>
    %cst = arith.constant dense<0.000000e+00> : vector<32x64xf32>
    %2 = tpu.matmul %0, %1, %cst {dimension_numbers = #tpu.dot_dimension_numbers<[1], [0], [0], [1], [0, 0, 1, 1], [], []>} : vector<32x576xbf16>, vector<576x64xbf16>, vector<32x64xf32> -> vector<32x64xf32>
    %c0_3 = arith.constant 0 : index
    %c0_4 = arith.constant 0 : index
    %3 = vector.load %arg3[%c0_3, %c0_4] : memref<1x64xf32, #tpu.memory_space<vmem>>, vector<1x64xf32>
    %4 = vector.broadcast %3 : vector<1x64xf32> to vector<32x64xf32>
    %5 = arith.addf %2, %4 : vector<32x64xf32>
    %cst_5 = arith.constant 0.000000e+00 : f32
    %6 = vector.broadcast %cst_5 : f32 to vector<32x64xf32>
    %7 = arith.cmpf oge, %5, %6 : vector<32x64xf32>
    %cst_6 = arith.constant 0.00999999977 : f32
    %8 = vector.broadcast %cst_6 : f32 to vector<32x64xf32>
    %9 = arith.mulf %8, %5 : vector<32x64xf32>
    %10 = arith.select %7, %5, %9 : vector<32x64xi1>, vector<32x64xf32>
    %c0_7 = arith.constant 0 : index
    %c0_8 = arith.constant 0 : index
    %11 = vector.load %arg4[%c0_7, %c0_8] : memref<32x64xf32, #tpu.memory_space<vmem>>, vector<32x64xf32>
    tpu.vector_store %arg4[%c0_7, %c0_8], %10 {strides = array<i32>} : memref<32x64xf32, #tpu.memory_space<vmem>>, vector<32x64xf32>,
    return
  }
  func.func @transform_0(%arg0: i32) -> (i32, i32) {
    %c0_i32 = arith.constant 0 : i32
    %c0_i32_0 = arith.constant 0 : i32
    return %arg0, %c0_i32 : i32, i32
  }
  func.func @transform_1(%arg0: i32) -> (i32, i32) {
    %c0_i32 = arith.constant 0 : i32
    %c0_i32_0 = arith.constant 0 : i32
    %c0_i32_1 = arith.constant 0 : i32
    return %c0_i32, %c0_i32_0 : i32, i32
  }
  func.func @transform_2(%arg0: i32) -> (i32, i32) {
    %c0_i32 = arith.constant 0 : i32
    %c0_i32_0 = arith.constant 0 : i32
    %c0_i32_1 = arith.constant 0 : i32
    return %c0_i32, %c0_i32_0 : i32, i32
  }
  func.func @transform_3(%arg0: i32) -> (i32, i32) {
    %c0_i32 = arith.constant 0 : i32
    %c0_i32_0 = arith.constant 0 : i32
    return %arg0, %c0_i32 : i32, i32
  }
}

module attributes {stable_mosaic.version = 11 : i64} {
  func.func @_conv_kernel(%arg0: i32, %arg1: memref<32x64xbf16, #tpu.memory_space<vmem>>, %arg2: memref<64x64xbf16, #tpu.memory_space<vmem>>, %arg3: memref<1x64xf32, #tpu.memory_space<vmem>>, %arg4: memref<32x64xf32, #tpu.memory_space<vmem>>) attributes {dimension_semantics = [#tpu.dimension_semantics<parallel>], iteration_bounds = array<i64: 1>, scalar_prefetch = 0 : i64, scratch_operands = 0 : i64, tpu.core_type = #tpu.core_type<tc>, window_params = [{transform_indices = @transform_0, window_bounds = array<i64: 32, 64>}, {pipeline_mode = #tpu.pipeline_mode<synchronous>, transform_indices = @transform_1, window_bounds = array<i64: 64, 64>}, {pipeline_mode = #tpu.pipeline_mode<synchronous>, transform_indices = @transform_2, window_bounds = array<i64: 1, 64>}, {transform_indices = @transform_3, window_bounds = array<i64: 32, 64>}]} {
    %c0 = arith.constant 0 : index
    %c0_0 = arith.constant 0 : index
    %0 = vector.load %arg1[%c0, %c0_0] : memref<32x64xbf16, #tpu.memory_space<vmem>>, vector<32x64xbf16>
    %c0_1 = arith.constant 0 : index
    %c0_2 = arith.constant 0 : index
    %1 = vector.load %arg2[%c0_1, %c0_2] : memref<64x64xbf16, #tpu.memory_space<vmem>>, vector<64x64xbf16>
    %cst = arith.constant dense<0.000000e+00> : vector<32x64xf32>
    %2 = tpu.matmul %0, %1, %cst {dimension_numbers = #tpu.dot_dimension_numbers<[1], [0], [0], [1], [0, 0, 1, 1], [], []>} : vector<32x64xbf16>, vector<64x64xbf16>, vector<32x64xf32> -> vector<32x64xf32>
    %c0_3 = arith.constant 0 : index
    %c0_4 = arith.constant 0 : index
    %3 = vector.load %arg3[%c0_3, %c0_4] : memref<1x64xf32, #tpu.memory_space<vmem>>, vector<1x64xf32>
    %4 = vector.broadcast %3 : vector<1x64xf32> to vector<32x64xf32>
    %5 = arith.addf %2, %4 : vector<32x64xf32>
    %c0_5 = arith.constant 0 : index
    %c0_6 = arith.constant 0 : index
    %6 = vector.load %arg4[%c0_5, %c0_6] : memref<32x64xf32, #tpu.memory_space<vmem>>, vector<32x64xf32>
    tpu.vector_store %arg4[%c0_5, %c0_6], %5 {strides = array<i32>} : memref<32x64xf32, #tpu.memory_space<vmem>>, vector<32x64xf32>,
    return
  }
  func.func @transform_0(%arg0: i32) -> (i32, i32) {
    %c0_i32 = arith.constant 0 : i32
    %c0_i32_0 = arith.constant 0 : i32
    return %arg0, %c0_i32 : i32, i32
  }
  func.func @transform_1(%arg0: i32) -> (i32, i32) {
    %c0_i32 = arith.constant 0 : i32
    %c0_i32_0 = arith.constant 0 : i32
    %c0_i32_1 = arith.constant 0 : i32
    return %c0_i32, %c0_i32_0 : i32, i32
  }
  func.func @transform_2(%arg0: i32) -> (i32, i32) {
    %c0_i32 = arith.constant 0 : i32
    %c0_i32_0 = arith.constant 0 : i32
    %c0_i32_1 = arith.constant 0 : i32
    return %c0_i32, %c0_i32_0 : i32, i32
  }
  func.func @transform_3(%arg0: i32) -> (i32, i32) {
    %c0_i32 = arith.constant 0 : i32
    %c0_i32_0 = arith.constant 0 : i32
    return %arg0, %c0_i32 : i32, i32
  }
}

module attributes {stable_mosaic.version = 11 : i64} {
  func.func @_conv_kernel(%arg0: i32, %arg1: memref<32x64xbf16, #tpu.memory_space<vmem>>, %arg2: memref<64x32xbf16, #tpu.memory_space<vmem>>, %arg3: memref<1x32xf32, #tpu.memory_space<vmem>>, %arg4: memref<32x32xf32, #tpu.memory_space<vmem>>) attributes {dimension_semantics = [#tpu.dimension_semantics<parallel>], iteration_bounds = array<i64: 1>, scalar_prefetch = 0 : i64, scratch_operands = 0 : i64, tpu.core_type = #tpu.core_type<tc>, window_params = [{transform_indices = @transform_0, window_bounds = array<i64: 32, 64>}, {pipeline_mode = #tpu.pipeline_mode<synchronous>, transform_indices = @transform_1, window_bounds = array<i64: 64, 32>}, {pipeline_mode = #tpu.pipeline_mode<synchronous>, transform_indices = @transform_2, window_bounds = array<i64: 1, 32>}, {transform_indices = @transform_3, window_bounds = array<i64: 32, 32>}]} {
    %c0 = arith.constant 0 : index
    %c0_0 = arith.constant 0 : index
    %0 = vector.load %arg1[%c0, %c0_0] : memref<32x64xbf16, #tpu.memory_space<vmem>>, vector<32x64xbf16>
    %c0_1 = arith.constant 0 : index
    %c0_2 = arith.constant 0 : index
    %1 = vector.load %arg2[%c0_1, %c0_2] : memref<64x32xbf16, #tpu.memory_space<vmem>>, vector<64x32xbf16>
    %cst = arith.constant dense<0.000000e+00> : vector<32x32xf32>
    %2 = tpu.matmul %0, %1, %cst {dimension_numbers = #tpu.dot_dimension_numbers<[1], [0], [0], [1], [0, 0, 1, 1], [], []>} : vector<32x64xbf16>, vector<64x32xbf16>, vector<32x32xf32> -> vector<32x32xf32>
    %c0_3 = arith.constant 0 : index
    %c0_4 = arith.constant 0 : index
    %3 = vector.load %arg3[%c0_3, %c0_4] : memref<1x32xf32, #tpu.memory_space<vmem>>, vector<1x32xf32>
    %4 = vector.broadcast %3 : vector<1x32xf32> to vector<32x32xf32>
    %5 = arith.addf %2, %4 : vector<32x32xf32>
    %c0_5 = arith.constant 0 : index
    %c0_6 = arith.constant 0 : index
    %6 = vector.load %arg4[%c0_5, %c0_6] : memref<32x32xf32, #tpu.memory_space<vmem>>, vector<32x32xf32>
    tpu.vector_store %arg4[%c0_5, %c0_6], %5 {strides = array<i32>} : memref<32x32xf32, #tpu.memory_space<vmem>>, vector<32x32xf32>,
    return
  }
  func.func @transform_0(%arg0: i32) -> (i32, i32) {
    %c0_i32 = arith.constant 0 : i32
    %c0_i32_0 = arith.constant 0 : i32
    return %arg0, %c0_i32 : i32, i32
  }
  func.func @transform_1(%arg0: i32) -> (i32, i32) {
    %c0_i32 = arith.constant 0 : i32
    %c0_i32_0 = arith.constant 0 : i32
    %c0_i32_1 = arith.constant 0 : i32
    return %c0_i32, %c0_i32_0 : i32, i32
  }
  func.func @transform_2(%arg0: i32) -> (i32, i32) {
    %c0_i32 = arith.constant 0 : i32
    %c0_i32_0 = arith.constant 0 : i32
    %c0_i32_1 = arith.constant 0 : i32
    return %c0_i32, %c0_i32_0 : i32, i32
  }
  func.func @transform_3(%arg0: i32) -> (i32, i32) {
    %c0_i32 = arith.constant 0 : i32
    %c0_i32_0 = arith.constant 0 : i32
    return %arg0, %c0_i32 : i32, i32
  }
}

module attributes {stable_mosaic.version = 11 : i64} {
  func.func @_conv_kernel(%arg0: i32, %arg1: memref<128x64xbf16, #tpu.memory_space<vmem>>, %arg2: memref<64x32xbf16, #tpu.memory_space<vmem>>, %arg3: memref<1x32xf32, #tpu.memory_space<vmem>>, %arg4: memref<128x32xf32, #tpu.memory_space<vmem>>) attributes {dimension_semantics = [#tpu.dimension_semantics<parallel>], iteration_bounds = array<i64: 1>, scalar_prefetch = 0 : i64, scratch_operands = 0 : i64, tpu.core_type = #tpu.core_type<tc>, window_params = [{transform_indices = @transform_0, window_bounds = array<i64: 128, 64>}, {pipeline_mode = #tpu.pipeline_mode<synchronous>, transform_indices = @transform_1, window_bounds = array<i64: 64, 32>}, {pipeline_mode = #tpu.pipeline_mode<synchronous>, transform_indices = @transform_2, window_bounds = array<i64: 1, 32>}, {transform_indices = @transform_3, window_bounds = array<i64: 128, 32>}]} {
    %c0 = arith.constant 0 : index
    %c0_0 = arith.constant 0 : index
    %0 = vector.load %arg1[%c0, %c0_0] : memref<128x64xbf16, #tpu.memory_space<vmem>>, vector<128x64xbf16>
    %c0_1 = arith.constant 0 : index
    %c0_2 = arith.constant 0 : index
    %1 = vector.load %arg2[%c0_1, %c0_2] : memref<64x32xbf16, #tpu.memory_space<vmem>>, vector<64x32xbf16>
    %cst = arith.constant dense<0.000000e+00> : vector<128x32xf32>
    %2 = tpu.matmul %0, %1, %cst {dimension_numbers = #tpu.dot_dimension_numbers<[1], [0], [0], [1], [0, 0, 1, 1], [], []>} : vector<128x64xbf16>, vector<64x32xbf16>, vector<128x32xf32> -> vector<128x32xf32>
    %c0_3 = arith.constant 0 : index
    %c0_4 = arith.constant 0 : index
    %3 = vector.load %arg3[%c0_3, %c0_4] : memref<1x32xf32, #tpu.memory_space<vmem>>, vector<1x32xf32>
    %4 = vector.broadcast %3 : vector<1x32xf32> to vector<128x32xf32>
    %5 = arith.addf %2, %4 : vector<128x32xf32>
    %c0_5 = arith.constant 0 : index
    %c0_6 = arith.constant 0 : index
    %6 = vector.load %arg4[%c0_5, %c0_6] : memref<128x32xf32, #tpu.memory_space<vmem>>, vector<128x32xf32>
    tpu.vector_store %arg4[%c0_5, %c0_6], %5 {strides = array<i32>} : memref<128x32xf32, #tpu.memory_space<vmem>>, vector<128x32xf32>,
    return
  }
  func.func @transform_0(%arg0: i32) -> (i32, i32) {
    %c0_i32 = arith.constant 0 : i32
    %c0_i32_0 = arith.constant 0 : i32
    return %arg0, %c0_i32 : i32, i32
  }
  func.func @transform_1(%arg0: i32) -> (i32, i32) {
    %c0_i32 = arith.constant 0 : i32
    %c0_i32_0 = arith.constant 0 : i32
    %c0_i32_1 = arith.constant 0 : i32
    return %c0_i32, %c0_i32_0 : i32, i32
  }
  func.func @transform_2(%arg0: i32) -> (i32, i32) {
    %c0_i32 = arith.constant 0 : i32
    %c0_i32_0 = arith.constant 0 : i32
    %c0_i32_1 = arith.constant 0 : i32
    return %c0_i32, %c0_i32_0 : i32, i32
  }
  func.func @transform_3(%arg0: i32) -> (i32, i32) {
    %c0_i32 = arith.constant 0 : i32
    %c0_i32_0 = arith.constant 0 : i32
    return %arg0, %c0_i32 : i32, i32
  }
}

module attributes {stable_mosaic.version = 11 : i64} {
  func.func @_conv_kernel(%arg0: i32, %arg1: memref<128x32xbf16, #tpu.memory_space<vmem>>, %arg2: memref<32x16xbf16, #tpu.memory_space<vmem>>, %arg3: memref<1x16xf32, #tpu.memory_space<vmem>>, %arg4: memref<128x16xf32, #tpu.memory_space<vmem>>) attributes {dimension_semantics = [#tpu.dimension_semantics<parallel>], iteration_bounds = array<i64: 1>, scalar_prefetch = 0 : i64, scratch_operands = 0 : i64, tpu.core_type = #tpu.core_type<tc>, window_params = [{transform_indices = @transform_0, window_bounds = array<i64: 128, 32>}, {pipeline_mode = #tpu.pipeline_mode<synchronous>, transform_indices = @transform_1, window_bounds = array<i64: 32, 16>}, {pipeline_mode = #tpu.pipeline_mode<synchronous>, transform_indices = @transform_2, window_bounds = array<i64: 1, 16>}, {transform_indices = @transform_3, window_bounds = array<i64: 128, 16>}]} {
    %c0 = arith.constant 0 : index
    %c0_0 = arith.constant 0 : index
    %0 = vector.load %arg1[%c0, %c0_0] : memref<128x32xbf16, #tpu.memory_space<vmem>>, vector<128x32xbf16>
    %c0_1 = arith.constant 0 : index
    %c0_2 = arith.constant 0 : index
    %1 = vector.load %arg2[%c0_1, %c0_2] : memref<32x16xbf16, #tpu.memory_space<vmem>>, vector<32x16xbf16>
    %cst = arith.constant dense<0.000000e+00> : vector<128x16xf32>
    %2 = tpu.matmul %0, %1, %cst {dimension_numbers = #tpu.dot_dimension_numbers<[1], [0], [0], [1], [0, 0, 1, 1], [], []>} : vector<128x32xbf16>, vector<32x16xbf16>, vector<128x16xf32> -> vector<128x16xf32>
    %c0_3 = arith.constant 0 : index
    %c0_4 = arith.constant 0 : index
    %3 = vector.load %arg3[%c0_3, %c0_4] : memref<1x16xf32, #tpu.memory_space<vmem>>, vector<1x16xf32>
    %4 = vector.broadcast %3 : vector<1x16xf32> to vector<128x16xf32>
    %5 = arith.addf %2, %4 : vector<128x16xf32>
    %c0_5 = arith.constant 0 : index
    %c0_6 = arith.constant 0 : index
    %6 = vector.load %arg4[%c0_5, %c0_6] : memref<128x16xf32, #tpu.memory_space<vmem>>, vector<128x16xf32>
    tpu.vector_store %arg4[%c0_5, %c0_6], %5 {strides = array<i32>} : memref<128x16xf32, #tpu.memory_space<vmem>>, vector<128x16xf32>,
    return
  }
  func.func @transform_0(%arg0: i32) -> (i32, i32) {
    %c0_i32 = arith.constant 0 : i32
    %c0_i32_0 = arith.constant 0 : i32
    return %arg0, %c0_i32 : i32, i32
  }
  func.func @transform_1(%arg0: i32) -> (i32, i32) {
    %c0_i32 = arith.constant 0 : i32
    %c0_i32_0 = arith.constant 0 : i32
    %c0_i32_1 = arith.constant 0 : i32
    return %c0_i32, %c0_i32_0 : i32, i32
  }
  func.func @transform_2(%arg0: i32) -> (i32, i32) {
    %c0_i32 = arith.constant 0 : i32
    %c0_i32_0 = arith.constant 0 : i32
    %c0_i32_1 = arith.constant 0 : i32
    return %c0_i32, %c0_i32_0 : i32, i32
  }
  func.func @transform_3(%arg0: i32) -> (i32, i32) {
    %c0_i32 = arith.constant 0 : i32
    %c0_i32_0 = arith.constant 0 : i32
    return %arg0, %c0_i32 : i32, i32
  }
}

module attributes {stable_mosaic.version = 11 : i64} {
  func.func @_conv_kernel(%arg0: i32, %arg1: memref<512x288xbf16, #tpu.memory_space<vmem>>, %arg2: memref<288x16xbf16, #tpu.memory_space<vmem>>, %arg3: memref<1x16xf32, #tpu.memory_space<vmem>>, %arg4: memref<1x16xf32, #tpu.memory_space<vmem>>, %arg5: memref<1x1xf32, #tpu.memory_space<vmem>>, %arg6: memref<512x1xf32, #tpu.memory_space<vmem>>) attributes {dimension_semantics = [#tpu.dimension_semantics<parallel>], iteration_bounds = array<i64: 1>, scalar_prefetch = 0 : i64, scratch_operands = 0 : i64, tpu.core_type = #tpu.core_type<tc>, window_params = [{transform_indices = @transform_0, window_bounds = array<i64: 512, 288>}, {pipeline_mode = #tpu.pipeline_mode<synchronous>, transform_indices = @transform_1, window_bounds = array<i64: 288, 16>}, {pipeline_mode = #tpu.pipeline_mode<synchronous>, transform_indices = @transform_2, window_bounds = array<i64: 1, 16>}, {pipeline_mode = #tpu.pipeline_mode<synchronous>, transform_indices = @transform_3, window_bounds = array<i64: 1, 16>}, {pipeline_mode = #tpu.pipeline_mode<synchronous>, transform_indices = @transform_4, window_bounds = array<i64: 1, 1>}, {transform_indices = @transform_5, window_bounds = array<i64: 512, 1>}]} {
    %c0 = arith.constant 0 : index
    %c0_0 = arith.constant 0 : index
    %0 = vector.load %arg1[%c0, %c0_0] : memref<512x288xbf16, #tpu.memory_space<vmem>>, vector<512x288xbf16>
    %c0_1 = arith.constant 0 : index
    %c0_2 = arith.constant 0 : index
    %1 = vector.load %arg2[%c0_1, %c0_2] : memref<288x16xbf16, #tpu.memory_space<vmem>>, vector<288x16xbf16>
    %cst = arith.constant dense<0.000000e+00> : vector<512x16xf32>
    %2 = tpu.matmul %0, %1, %cst {dimension_numbers = #tpu.dot_dimension_numbers<[1], [0], [0], [1], [0, 0, 1, 1], [], []>} : vector<512x288xbf16>, vector<288x16xbf16>, vector<512x16xf32> -> vector<512x16xf32>
    %c0_3 = arith.constant 0 : index
    %c0_4 = arith.constant 0 : index
    %3 = vector.load %arg3[%c0_3, %c0_4] : memref<1x16xf32, #tpu.memory_space<vmem>>, vector<1x16xf32>
    %4 = vector.broadcast %3 : vector<1x16xf32> to vector<512x16xf32>
    %5 = arith.addf %2, %4 : vector<512x16xf32>
    %cst_5 = arith.constant 0.000000e+00 : f32
    %6 = vector.broadcast %cst_5 : f32 to vector<512x16xf32>
    %7 = arith.cmpf oge, %5, %6 : vector<512x16xf32>
    %cst_6 = arith.constant 0.00999999977 : f32
    %8 = vector.broadcast %cst_6 : f32 to vector<512x16xf32>
    %9 = arith.mulf %8, %5 : vector<512x16xf32>
    %10 = arith.select %7, %5, %9 : vector<512x16xi1>, vector<512x16xf32>
    %c0_7 = arith.constant 0 : index
    %c0_8 = arith.constant 0 : index
    %11 = vector.load %arg4[%c0_7, %c0_8] : memref<1x16xf32, #tpu.memory_space<vmem>>, vector<1x16xf32>
    %12 = vector.broadcast %11 : vector<1x16xf32> to vector<512x16xf32>
    %13 = arith.mulf %10, %12 : vector<512x16xf32>
    %cst_9 = arith.constant dense<0.000000e+00> : vector<512xf32>
    %14 = vector.multi_reduction <add>, %13, %cst_9 [1] : vector<512x16xf32> to vector<512xf32>
    %15 = vector.shape_cast %14 : vector<512xf32> to vector<512x1xf32>
    %c0_10 = arith.constant 0 : index
    %c0_11 = arith.constant 0 : index
    %16 = vector.load %arg5[%c0_10, %c0_11] : memref<1x1xf32, #tpu.memory_space<vmem>>, vector<1x1xf32>
    %17 = vector.broadcast %16 : vector<1x1xf32> to vector<512x1xf32>
    %18 = arith.addf %15, %17 : vector<512x1xf32>
    %19 = arith.negf %18 : vector<512x1xf32>
    %20 = math.exp %19 : vector<512x1xf32>
    %cst_12 = arith.constant 1.000000e+00 : f32
    %21 = vector.broadcast %cst_12 : f32 to vector<512x1xf32>
    %22 = arith.addf %21, %20 : vector<512x1xf32>
    %23 = arith.divf %21, %22 : vector<512x1xf32>
    %c0_13 = arith.constant 0 : index
    %c0_14 = arith.constant 0 : index
    %24 = vector.load %arg6[%c0_13, %c0_14] : memref<512x1xf32, #tpu.memory_space<vmem>>, vector<512x1xf32>
    tpu.vector_store %arg6[%c0_13, %c0_14], %23 {strides = array<i32>} : memref<512x1xf32, #tpu.memory_space<vmem>>, vector<512x1xf32>,
    return
  }
  func.func @transform_0(%arg0: i32) -> (i32, i32) {
    %c0_i32 = arith.constant 0 : i32
    %c0_i32_0 = arith.constant 0 : i32
    return %arg0, %c0_i32 : i32, i32
  }
  func.func @transform_1(%arg0: i32) -> (i32, i32) {
    %c0_i32 = arith.constant 0 : i32
    %c0_i32_0 = arith.constant 0 : i32
    %c0_i32_1 = arith.constant 0 : i32
    return %c0_i32, %c0_i32_0 : i32, i32
  }
  func.func @transform_2(%arg0: i32) -> (i32, i32) {
    %c0_i32 = arith.constant 0 : i32
    %c0_i32_0 = arith.constant 0 : i32
    %c0_i32_1 = arith.constant 0 : i32
    return %c0_i32, %c0_i32_0 : i32, i32
  }
  func.func @transform_3(%arg0: i32) -> (i32, i32) {
    %c0_i32 = arith.constant 0 : i32
    %c0_i32_0 = arith.constant 0 : i32
    %c0_i32_1 = arith.constant 0 : i32
    return %c0_i32, %c0_i32_0 : i32, i32
  }
  func.func @transform_4(%arg0: i32) -> (i32, i32) {
    %c0_i32 = arith.constant 0 : i32
    %c0_i32_0 = arith.constant 0 : i32
    %c0_i32_1 = arith.constant 0 : i32
    return %c0_i32, %c0_i32_0 : i32, i32
  }
  func.func @transform_5(%arg0: i32) -> (i32, i32) {
    %c0_i32 = arith.constant 0 : i32
    %c0_i32_0 = arith.constant 0 : i32
    return %arg0, %c0_i32 : i32, i32
  }
}

</mosaic_0001>

<bundles_post_ra>
// kernel: resatomsegnet_s2_forward.23
= control target key start
LH: loop header
LB: loop body
LE: loop exit
PB: predicated region body
PF: predicated region fallthrough
CT: control target
= control target key end

     0   :  { %vm83_vm0 = vcmask 130048   ;;  %vm157_vm1 = vcmask 261120   ;;  %s357_s1 = inlined_call_operand.vmem [shape: bf16[16,32], index: 1, kind: input, shape index: {}]   ;;  %s358_s0 = inlined_call_operand.vmem [shape: bf16[128,16], index: 0, kind: input, shape index: {}]   ;;  %s359_s2 = inlined_call_operand.vmem [shape: f32[1,32], index: 2, kind: input, shape index: {}]   ;;  %s360_s3 = inlined_call_operand.vmem [shape: f32[128,32], index: 3, kind: output, shape index: {}]  }
   0x1   :  { %v230_v0 = vld [vmem:[%s357_s1] sm:$0xff]  ;;  %v224_v2 = vld [vmem:[%s358_s0 + $0x10] sm:$0xff]  ;;  %v223_v5 = vld [vmem:[%s358_s0 + $0x8] sm:$0xff] }
   0x2   :  { %v222_v1 = vld [vmem:[%s358_s0] sm:$0xff]  ;;  %115 = vmatpush.bf16.msra.mxu0 %v230_v0  ;;  %231 = vmatpush.bf16.msra.mxu1 %v230_v0  ;;  %v228_v4 = vld [vmem:[%s358_s0 + $0x30] sm:$0xff]  ;;  %v225_v6 = vld [vmem:[%s358_s0 + $0x18] sm:$0xff] }
   0x3   :  { %v226_v3 = vld [vmem:[%s358_s0 + $0x20] sm:$0xff]  ;;  %232 = vmatpush.bf16.msra.mxu2 %v230_v0  ;;  %233 = vmatpush.bf16.msra.mxu3 %v230_v0  ;;  %v227_v7 = vld [vmem:[%s358_s0 + $0x28] sm:$0xff]  ;;  %v229_v8 = vld [vmem:[%s358_s0 + $0x38] sm:$0xff] }
   0x4   :  { %v234_v9 = vld [vmem:[%s359_s2] ss:$0 sm:$0xff] }
   0x5   :  { %214 = vmatmul.msk.bf16.vlgmr.msra.gmra.mxu0 %vm83_vm0, %v222_v1  ;;  %216 = vmatmul.msk.bf16.vlgmr.msra.gmra.mxu1 %vm83_vm0, %v224_v2 }
   0x6   :  { %218 = vmatmul.msk.bf16.vlgmr.msra.gmra.mxu2 %vm83_vm0, %v226_v3  ;;  %220 = vmatmul.msk.bf16.vlgmr.msra.gmra.mxu3 %vm83_vm0, %v228_v4 }
  0x15   :  { %215 = vmatmul.msk.bf16.gmra.mxu0 %vm83_vm0, %v223_v5  ;;  %217 = vmatmul.msk.bf16.gmra.mxu1 %vm83_vm0, %v225_v6 }
  0x16   :  { %219 = vmatmul.msk.bf16.gmra.mxu2 %vm83_vm0, %v227_v7  ;;  %221 = vmatmul.msk.bf16.gmra.mxu3 %vm83_vm0, %v229_v8 }
  0x82   :  { %v117_v10 = vpop.f32.mrf.mxu0  ;;  %v127_v11 = vpop.f32.mrf.mxu1 }
  0x83   :  { %v118_v12 = vadd.f32 %v234_v9, %v117_v10  ;;  %v128_v13 = vadd.f32 %v234_v9, %v127_v11 }
  0x85   :  { %158 = vst.msk [vmem:[%s360_s3] sm:$0xff] %vm157_vm1, %v118_v12 }
  0x86   :  { %162 = vst.msk [vmem:[%s360_s3 + $0x20] sm:$0xff] %vm157_vm1, %v128_v13 }
  0x89   :  { %v137_v14 = vpop.f32.mrf.mxu2  ;;  %v147_v15 = vpop.f32.mrf.mxu3 }
  0x8a   :  { %v138_v16 = vadd.f32 %v234_v9, %v137_v14  ;;  %v148_v17 = vadd.f32 %v234_v9, %v147_v15  ;;  %v119_v18 = vpop.f32.mrf.mxu0  ;;  %v129_v19 = vpop.f32.mrf.mxu1 }
  0x8b   :  { %v120_v20 = vadd.f32 %v234_v9, %v119_v18  ;;  %v130_v21 = vadd.f32 %v234_v9, %v129_v19 }
  0x8c   :  { %166 = vst.msk [vmem:[%s360_s3 + $0x40] sm:$0xff] %vm157_vm1, %v138_v16 }
  0x8d   :  { %170 = vst.msk [vmem:[%s360_s3 + $0x60] sm:$0xff] %vm157_vm1, %v148_v17 }
  0x8e   :  { %159 = vst.msk [vmem:[%s360_s3 + $0x8] sm:$0xff] %vm157_vm1, %v120_v20 }
  0x8f   :  { %163 = vst.msk [vmem:[%s360_s3 + $0x28] sm:$0xff] %vm157_vm1, %v130_v21 }
  0x91   :  { %v139_v22 = vpop.f32.mrf.mxu2  ;;  %v149_v23 = vpop.f32.mrf.mxu3 }
  0x92   :  { %v140_v24 = vadd.f32 %v234_v9, %v139_v22  ;;  %v150_v25 = vadd.f32 %v234_v9, %v149_v23  ;;  %v122_v26 = vpop.f32.mrf.mxu0  ;;  %v132_v27 = vpop.f32.mrf.mxu1 }
  0x93   :  { %v123_v28 = vadd.f32 %v234_v9, %v122_v26  ;;  %v133_v29 = vadd.f32 %v234_v9, %v132_v27 }
  0x94   :  { %167 = vst.msk [vmem:[%s360_s3 + $0x48] sm:$0xff] %vm157_vm1, %v140_v24 }
  0x95   :  { %171 = vst.msk [vmem:[%s360_s3 + $0x68] sm:$0xff] %vm157_vm1, %v150_v25 }
  0x96   :  { %160 = vst.msk [vmem:[%s360_s3 + $0x10] sm:$0xff] %vm157_vm1, %v123_v28 }
  0x97   :  { %164 = vst.msk [vmem:[%s360_s3 + $0x30] sm:$0xff] %vm157_vm1, %v133_v29 }
  0x99   :  { %v142_v30 = vpop.f32.mrf.mxu2  ;;  %v152_v31 = vpop.f32.mrf.mxu3 }
  0x9a   :  { %v143_v32 = vadd.f32 %v234_v9, %v142_v30  ;;  %v153_v33 = vadd.f32 %v234_v9, %v152_v31  ;;  %v124_v34 = vpop.f32.mrf.mxu0  ;;  %v134_v35 = vpop.f32.mrf.mxu1 }
  0x9b   :  { %v125_v36 = vadd.f32 %v234_v9, %v124_v34  ;;  %v135_v37 = vadd.f32 %v234_v9, %v134_v35 }
  0x9c   :  { %168 = vst.msk [vmem:[%s360_s3 + $0x50] sm:$0xff] %vm157_vm1, %v143_v32 }
  0x9d   :  { %172 = vst.msk [vmem:[%s360_s3 + $0x70] sm:$0xff] %vm157_vm1, %v153_v33 }
  0x9e   :  { %161 = vst.msk [vmem:[%s360_s3 + $0x18] sm:$0xff] %vm157_vm1, %v125_v36 }
  0x9f   :  { %165 = vst.msk [vmem:[%s360_s3 + $0x38] sm:$0xff] %vm157_vm1, %v135_v37 }
  0xa1   :  { %v144_v38 = vpop.f32.mrf.mxu2  ;;  %v154_v39 = vpop.f32.mrf.mxu3 }
  0xa2   :  { %v145_v40 = vadd.f32 %v234_v9, %v144_v38  ;;  %v155_v41 = vadd.f32 %v234_v9, %v154_v39 }
  0xa4   :  { %169 = vst.msk [vmem:[%s360_s3 + $0x58] sm:$0xff] %vm157_vm1, %v145_v40 }
  0xa5   :  { %173 = vst.msk [vmem:[%s360_s3 + $0x78] sm:$0xff] %vm157_vm1, %v155_v41 }

// kernel: resatomsegnet_s2_forward.22
= control target key start
LH: loop header
LB: loop body
LE: loop exit
PB: predicated region body
PF: predicated region fallthrough
CT: control target
= control target key end

     0   :  { %vm347_vm0 = vcmask 1043456   ;;  %vm348_vm1 = vcmask 1044480   ;;  %v986_v2 = vmov 65535   ;;  %vm250_vm2 = vcmask 72704   ;;  %s1466_s1 = inlined_call_operand.vmem [shape: bf16[9,16], index: 1, kind: input, shape index: {}]   ;;  %s1467_s0 = inlined_call_operand.vmem [shape: bf16[512,9], index: 0, kind: input, shape index: {}]   ;;  %s1468_s2 = inlined_call_operand.vmem [shape: f32[1,16], index: 2, kind: input, shape index: {}]   ;;  %s1469_s3 = inlined_call_operand.vmem [shape: f32[512,16], index: 3, kind: output, shape index: {}]  }
   0x1   :  { %v914_v0 = vld [vmem:[%s1466_s1] sm:$0xf]  ;;  %v980_v1 = vld [vmem:[%s1466_s1] sm:$0x10]  ;;  %v349_v3 = vsel %vm347_vm0, 4294967295, %v986_v2  ;;  %v949_v11 = vld [vmem:[%s1467_s0 + $0x8] sm:$0xff] }
   0x2   :  { %v915_v4 = vor.u32 %v980_v1, %v914_v0  ;;  %v350_v5 = vsel %vm348_vm1, %v349_v3, 0  ;;  %v948_v7 = vld [vmem:[%s1467_s0] sm:$0xff]  ;;  %v957_v12 = vld [vmem:[%s1467_s0 + $0x48] sm:$0xff]  ;;  %v950_v15 = vld [vmem:[%s1467_s0 + $0x10] sm:$0xff]  ;;  %vm715_vm3 = vcmask 130048  }
   0x3   :  { %v956_v8 = vld [vmem:[%s1467_s0 + $0x40] sm:$0xff]  ;;  %v965_v13 = vld [vmem:[%s1467_s0 + $0x88] sm:$0xff]  ;;  %v958_v16 = vld [vmem:[%s1467_s0 + $0x50] sm:$0xff] }
   0x4   :  { %v352_v6 = vand.u32 %v915_v4, %v350_v5  ;;  %v964_v9 = vld [vmem:[%s1467_s0 + $0x80] sm:$0xff]  ;;  %v973_v14 = vld [vmem:[%s1467_s0 + $0xc8] sm:$0xff]  ;;  %v966_v17 = vld [vmem:[%s1467_s0 + $0x90] sm:$0xff] }
   0x5   :  { %v972_v10 = vld [vmem:[%s1467_s0 + $0xc0] sm:$0xff]  ;;  %v974_v18 = vld [vmem:[%s1467_s0 + $0xd0] sm:$0xff]  ;;  %v951_v19 = vld [vmem:[%s1467_s0 + $0x18] sm:$0xff] }
   0x6   :  { %361 = vmatpush.bf16.msra.mxu0 %v352_v6  ;;  %981 = vmatpush.bf16.msra.mxu1 %v352_v6  ;;  %v959_v20 = vld [vmem:[%s1467_s0 + $0x58] sm:$0xff]  ;;  %v952_v23 = vld [vmem:[%s1467_s0 + $0x20] sm:$0xff]  ;;  %v953_v27 = vld [vmem:[%s1467_s0 + $0x28] sm:$0xff] }
   0x7   :  { %982 = vmatpush.bf16.msra.mxu2 %v352_v6  ;;  %983 = vmatpush.bf16.msra.mxu3 %v352_v6  ;;  %v967_v21 = vld [vmem:[%s1467_s0 + $0x98] sm:$0xff]  ;;  %v960_v24 = vld [vmem:[%s1467_s0 + $0x60] sm:$0xff]  ;;  %v961_v28 = vld [vmem:[%s1467_s0 + $0x68] sm:$0xff] }
   0x8   :  { %v975_v22 = vld [vmem:[%s1467_s0 + $0xd8] sm:$0xff]  ;;  %v968_v25 = vld [vmem:[%s1467_s0 + $0xa0] sm:$0xff]  ;;  %v969_v29 = vld [vmem:[%s1467_s0 + $0xa8] sm:$0xff] }
   0x9   :  { %916 = vmatmul.msk.bf16.vlgmr.msra.gmra.mxu0 %vm250_vm2, %v948_v7  ;;  %924 = vmatmul.msk.bf16.vlgmr.msra.gmra.mxu1 %vm250_vm2, %v956_v8  ;;  %v976_v26 = vld [vmem:[%s1467_s0 + $0xe0] sm:$0xff]  ;;  %v977_v30 = vld [vmem:[%s1467_s0 + $0xe8] sm:$0xff]  ;;  %v954_v31 = vld [vmem:[%s1467_s0 + $0x30] sm:$0xff] }
   0xa   :  { %932 = vmatmul.msk.bf16.vlgmr.msra.gmra.mxu2 %vm250_vm2, %v964_v9  ;;  %940 = vmatmul.msk.bf16.vlgmr.msra.gmra.mxu3 %vm250_vm2, %v972_v10  ;;  %v962_v32 = vld [vmem:[%s1467_s0 + $0x70] sm:$0xff]  ;;  %v955_v35 = vld [vmem:[%s1467_s0 + $0x38] sm:$0xff]  ;;  %v1144_v39 = vld [vmem:[%s1468_s2] ss:$0 sm:$0xff] }
   0xb   :  { %v970_v33 = vld [vmem:[%s1467_s0 + $0xb0] sm:$0xff]  ;;  %v963_v36 = vld [vmem:[%s1467_s0 + $0x78] sm:$0xff] }
   0xc   :  { %v978_v34 = vld [vmem:[%s1467_s0 + $0xf0] sm:$0xff]  ;;  %v971_v37 = vld [vmem:[%s1467_s0 + $0xb8] sm:$0xff] }
   0xd   :  { %v979_v38 = vld [vmem:[%s1467_s0 + $0xf8] sm:$0xff] }
  0x19   :  { %917 = vmatmul.msk.bf16.gmra.mxu0 %vm250_vm2, %v949_v11  ;;  %925 = vmatmul.msk.bf16.gmra.mxu1 %vm250_vm2, %v957_v12 }
  0x1a   :  { %933 = vmatmul.msk.bf16.gmra.mxu2 %vm250_vm2, %v965_v13  ;;  %941 = vmatmul.msk.bf16.gmra.mxu3 %vm250_vm2, %v973_v14 }
  0x29   :  { %918 = vmatmul.msk.bf16.gmra.mxu0 %vm250_vm2, %v950_v15  ;;  %926 = vmatmul.msk.bf16.gmra.mxu1 %vm250_vm2, %v958_v16 }
  0x2a   :  { %934 = vmatmul.msk.bf16.gmra.mxu2 %vm250_vm2, %v966_v17  ;;  %942 = vmatmul.msk.bf16.gmra.mxu3 %vm250_vm2, %v974_v18 }
  0x39   :  { %919 = vmatmul.msk.bf16.gmra.mxu0 %vm250_vm2, %v951_v19  ;;  %927 = vmatmul.msk.bf16.gmra.mxu1 %vm250_vm2, %v959_v20 }
  0x3a   :  { %935 = vmatmul.msk.bf16.gmra.mxu2 %vm250_vm2, %v967_v21  ;;  %943 = vmatmul.msk.bf16.gmra.mxu3 %vm250_vm2, %v975_v22 }
  0x49   :  { %920 = vmatmul.msk.bf16.gmra.mxu0 %vm250_vm2, %v952_v23  ;;  %928 = vmatmul.msk.bf16.gmra.mxu1 %vm250_vm2, %v960_v24 }
  0x4a   :  { %936 = vmatmul.msk.bf16.gmra.mxu2 %vm250_vm2, %v968_v25  ;;  %944 = vmatmul.msk.bf16.gmra.mxu3 %vm250_vm2, %v976_v26 }
  0x59   :  { %921 = vmatmul.msk.bf16.gmra.mxu0 %vm250_vm2, %v953_v27  ;;  %929 = vmatmul.msk.bf16.gmra.mxu1 %vm250_vm2, %v961_v28 }
  0x5a   :  { %937 = vmatmul.msk.bf16.gmra.mxu2 %vm250_vm2, %v969_v29  ;;  %945 = vmatmul.msk.bf16.gmra.mxu3 %vm250_vm2, %v977_v30 }
  0x69   :  { %922 = vmatmul.msk.bf16.gmra.mxu0 %vm250_vm2, %v954_v31  ;;  %930 = vmatmul.msk.bf16.gmra.mxu1 %vm250_vm2, %v962_v32 }
  0x6a   :  { %938 = vmatmul.msk.bf16.gmra.mxu2 %vm250_vm2, %v970_v33  ;;  %946 = vmatmul.msk.bf16.gmra.mxu3 %vm250_vm2, %v978_v34 }
  0x79   :  { %923 = vmatmul.msk.bf16.gmra.mxu0 %vm250_vm2, %v955_v35  ;;  %931 = vmatmul.msk.bf16.gmra.mxu1 %vm250_vm2, %v963_v36 }
  0x7a   :  { %939 = vmatmul.msk.bf16.gmra.mxu2 %vm250_vm2, %v971_v37  ;;  %947 = vmatmul.msk.bf16.gmra.mxu3 %vm250_vm2, %v979_v38 }
  0x86   :  { %v363_v40 = vpop.f32.mrf.mxu0  ;;  %v403_v41 = vpop.f32.mrf.mxu1 }
  0x87   :  { %v364_v42 = vadd.f32 %v1144_v39, %v363_v40  ;;  %v404_v43 = vadd.f32 %v1144_v39, %v403_v41 }
  0x89   :  { %vm523_vm4 = vcmp.ge.f32.partialorder %v364_v42, 0.0  ;;  %v587_v44 = vmul.f32 0.01, %v364_v42  ;;  %vm539_vm5 = vcmp.ge.f32.partialorder %v404_v43, 0.0  ;;  %v603_v45 = vmul.f32 0.01, %v404_v43 }
  0x8b   :  { %v651_v46 = vsel %vm523_vm4, %v364_v42, %v587_v44  ;;  %v667_v47 = vsel %vm539_vm5, %v404_v43, %v603_v45 }
  0x8c   :  { %716 = vst.msk [vmem:[%s1469_s3] sm:$0xff] %vm715_vm3, %v651_v46 }
  0x8d   :  { %732 = vst.msk [vmem:[%s1469_s3 + $0x80] sm:$0xff] %vm715_vm3, %v667_v47  ;;  %v443_v48 = vpop.f32.mrf.mxu2  ;;  %v483_v49 = vpop.f32.mrf.mxu3 }
  0x8e   :  { %v444_v50 = vadd.f32 %v1144_v39, %v443_v48  ;;  %v484_v51 = vadd.f32 %v1144_v39, %v483_v49  ;;  %v365_v52 = vpop.f32.mrf.mxu0  ;;  %v405_v53 = vpop.f32.mrf.mxu1 }
  0x8f   :  { %v366_v54 = vadd.f32 %v1144_v39, %v365_v52  ;;  %v406_v55 = vadd.f32 %v1144_v39, %v405_v53 }
  0x90   :  { %vm555_vm6 = vcmp.ge.f32.partialorder %v444_v50, 0.0  ;;  %v619_v56 = vmul.f32 0.01, %v444_v50  ;;  %vm571_vm7 = vcmp.ge.f32.partialorder %v484_v51, 0.0  ;;  %v635_v57 = vmul.f32 0.01, %v484_v51 }
  0x91   :  { %vm524_vm8 = vcmp.ge.f32.partialorder %v366_v54, 0.0  ;;  %v588_v58 = vmul.f32 0.01, %v366_v54  ;;  %vm540_vm9 = vcmp.ge.f32.partialorder %v406_v55, 0.0  ;;  %v604_v59 = vmul.f32 0.01, %v406_v55 }
  0x92   :  { %v683_v60 = vsel %vm555_vm6, %v444_v50, %v619_v56  ;;  %v699_v61 = vsel %vm571_vm7, %v484_v51, %v635_v57 }
  0x93   :  { %748 = vst.msk [vmem:[%s1469_s3 + $0x100] sm:$0xff] %vm715_vm3, %v683_v60  ;;  %v652_v62 = vsel %vm524_vm8, %v366_v54, %v588_v58  ;;  %v668_v63 = vsel %vm540_vm9, %v406_v55, %v604_v59 }
  0x94   :  { %764 = vst.msk [vmem:[%s1469_s3 + $0x180] sm:$0xff] %vm715_vm3, %v699_v61 }
  0x95   :  { %717 = vst.msk [vmem:[%s1469_s3 + $0x8] sm:$0xff] %vm715_vm3, %v652_v62  ;;  %v445_v0 = vpop.f32.mrf.mxu2  ;;  %v485_v1 = vpop.f32.mrf.mxu3 }
  0x96   :  { %733 = vst.msk [vmem:[%s1469_s3 + $0x88] sm:$0xff] %vm715_vm3, %v668_v63  ;;  %v446_v2 = vadd.f32 %v1144_v39, %v445_v0  ;;  %v486_v3 = vadd.f32 %v1144_v39, %v485_v1  ;;  %v368_v4 = vpop.f32.mrf.mxu0  ;;  %v408_v5 = vpop.f32.mrf.mxu1 }
  0x97   :  { %v369_v6 = vadd.f32 %v1144_v39, %v368_v4  ;;  %v409_v7 = vadd.f32 %v1144_v39, %v408_v5 }
  0x98   :  { %vm556_vm10 = vcmp.ge.f32.partialorder %v446_v2, 0.0  ;;  %v620_v8 = vmul.f32 0.01, %v446_v2  ;;  %vm572_vm11 = vcmp.ge.f32.partialorder %v486_v3, 0.0  ;;  %v636_v9 = vmul.f32 0.01, %v486_v3 }
  0x99   :  { %vm525_vm12 = vcmp.ge.f32.partialorder %v369_v6, 0.0  ;;  %v589_v10 = vmul.f32 0.01, %v369_v6  ;;  %vm541_vm13 = vcmp.ge.f32.partialorder %v409_v7, 0.0  ;;  %v605_v11 = vmul.f32 0.01, %v409_v7 }
  0x9a   :  { %v684_v12 = vsel %vm556_vm10, %v446_v2, %v620_v8  ;;  %v700_v13 = vsel %vm572_vm11, %v486_v3, %v636_v9 }
  0x9b   :  { %749 = vst.msk [vmem:[%s1469_s3 + $0x108] sm:$0xff] %vm715_vm3, %v684_v12  ;;  %v653_v14 = vsel %vm525_vm12, %v369_v6, %v589_v10  ;;  %v669_v15 = vsel %vm541_vm13, %v409_v7, %v605_v11 }
  0x9c   :  { %765 = vst.msk [vmem:[%s1469_s3 + $0x188] sm:$0xff] %vm715_vm3, %v700_v13 }
  0x9d   :  { %718 = vst.msk [vmem:[%s1469_s3 + $0x10] sm:$0xff] %vm715_vm3, %v653_v14  ;;  %v448_v16 = vpop.f32.mrf.mxu2  ;;  %v488_v17 = vpop.f32.mrf.mxu3 }
  0x9e   :  { %734 = vst.msk [vmem:[%s1469_s3 + $0x90] sm:$0xff] %vm715_vm3, %v669_v15  ;;  %v449_v18 = vadd.f32 %v1144_v39, %v448_v16  ;;  %v489_v19 = vadd.f32 %v1144_v39, %v488_v17  ;;  %v370_v20 = vpop.f32.mrf.mxu0  ;;  %v410_v21 = vpop.f32.mrf.mxu1 }
  0x9f   :  { %v371_v22 = vadd.f32 %v1144_v39, %v370_v20  ;;  %v411_v23 = vadd.f32 %v1144_v39, %v410_v21 }
  0xa0   :  { %vm557_vm14 = vcmp.ge.f32.partialorder %v449_v18, 0.0  ;;  %v621_v24 = vmul.f32 0.01, %v449_v18  ;;  %vm573_vm15 = vcmp.ge.f32.partialorder %v489_v19, 0.0  ;;  %v637_v25 = vmul.f32 0.01, %v489_v19 }
  0xa1   :  { %vm526_vm0 = vcmp.ge.f32.partialorder %v371_v22, 0.0  ;;  %v590_v26 = vmul.f32 0.01, %v371_v22  ;;  %vm542_vm1 = vcmp.ge.f32.partialorder %v411_v23, 0.0  ;;  %v606_v27 = vmul.f32 0.01, %v411_v23 }
  0xa2   :  { %v685_v28 = vsel %vm557_vm14, %v449_v18, %v621_v24  ;;  %v701_v29 = vsel %vm573_vm15, %v489_v19, %v637_v25 }
  0xa3   :  { %750 = vst.msk [vmem:[%s1469_s3 + $0x110] sm:$0xff] %vm715_vm3, %v685_v28  ;;  %v654_v30 = vsel %vm526_vm0, %v371_v22, %v590_v26  ;;  %v670_v31 = vsel %vm542_vm1, %v411_v23, %v606_v27 }
  0xa4   :  { %766 = vst.msk [vmem:[%s1469_s3 + $0x190] sm:$0xff] %vm715_vm3, %v701_v29 }
  0xa5   :  { %719 = vst.msk [vmem:[%s1469_s3 + $0x18] sm:$0xff] %vm715_vm3, %v654_v30  ;;  %v450_v32 = vpop.f32.mrf.mxu2  ;;  %v490_v33 = vpop.f32.mrf.mxu3 }
  0xa6   :  { %735 = vst.msk [vmem:[%s1469_s3 + $0x98] sm:$0xff] %vm715_vm3, %v670_v31  ;;  %v451_v34 = vadd.f32 %v1144_v39, %v450_v32  ;;  %v491_v35 = vadd.f32 %v1144_v39, %v490_v33  ;;  %v373_v36 = vpop.f32.mrf.mxu0  ;;  %v413_v37 = vpop.f32.mrf.mxu1 }
  0xa7   :  { %v374_v38 = vadd.f32 %v1144_v39, %v373_v36  ;;  %v414_v40 = vadd.f32 %v1144_v39, %v413_v37 }
  0xa8   :  { %vm558_vm2 = vcmp.ge.f32.partialorder %v451_v34, 0.0  ;;  %v622_v41 = vmul.f32 0.01, %v451_v34  ;;  %vm574_vm4 = vcmp.ge.f32.partialorder %v491_v35, 0.0  ;;  %v638_v42 = vmul.f32 0.01, %v491_v35 }
  0xa9   :  { %vm527_vm5 = vcmp.ge.f32.partialorder %v374_v38, 0.0  ;;  %v591_v43 = vmul.f32 0.01, %v374_v38  ;;  %vm543_vm6 = vcmp.ge.f32.partialorder %v414_v40, 0.0  ;;  %v607_v44 = vmul.f32 0.01, %v414_v40 }
  0xaa   :  { %v686_v45 = vsel %vm558_vm2, %v451_v34, %v622_v41  ;;  %v702_v46 = vsel %vm574_vm4, %v491_v35, %v638_v42 }
  0xab   :  { %751 = vst.msk [vmem:[%s1469_s3 + $0x118] sm:$0xff] %vm715_vm3, %v686_v45  ;;  %v655_v47 = vsel %vm527_vm5, %v374_v38, %v591_v43  ;;  %v671_v48 = vsel %vm543_vm6, %v414_v40, %v607_v44 }
  0xac   :  { %767 = vst.msk [vmem:[%s1469_s3 + $0x198] sm:$0xff] %vm715_vm3, %v702_v46 }
  0xad   :  { %720 = vst.msk [vmem:[%s1469_s3 + $0x20] sm:$0xff] %vm715_vm3, %v655_v47  ;;  %v453_v49 = vpop.f32.mrf.mxu2  ;;  %v493_v50 = vpop.f32.mrf.mxu3 }
  0xae   :  { %736 = vst.msk [vmem:[%s1469_s3 + $0xa0] sm:$0xff] %vm715_vm3, %v671_v48  ;;  %v454_v51 = vadd.f32 %v1144_v39, %v453_v49  ;;  %v494_v52 = vadd.f32 %v1144_v39, %v493_v50  ;;  %v375_v53 = vpop.f32.mrf.mxu0  ;;  %v415_v54 = vpop.f32.mrf.mxu1 }
  0xaf   :  { %v376_v55 = vadd.f32 %v1144_v39, %v375_v53  ;;  %v416_v56 = vadd.f32 %v1144_v39, %v415_v54 }
  0xb0   :  { %vm559_vm7 = vcmp.ge.f32.partialorder %v454_v51, 0.0  ;;  %v623_v57 = vmul.f32 0.01, %v454_v51  ;;  %vm575_vm8 = vcmp.ge.f32.partialorder %v494_v52, 0.0  ;;  %v639_v58 = vmul.f32 0.01, %v494_v52 }
  0xb1   :  { %vm528_vm9 = vcmp.ge.f32.partialorder %v376_v55, 0.0  ;;  %v592_v59 = vmul.f32 0.01, %v376_v55  ;;  %vm544_vm10 = vcmp.ge.f32.partialorder %v416_v56, 0.0  ;;  %v608_v60 = vmul.f32 0.01, %v416_v56 }
  0xb2   :  { %v687_v61 = vsel %vm559_vm7, %v454_v51, %v623_v57  ;;  %v703_v62 = vsel %vm575_vm8, %v494_v52, %v639_v58 }
  0xb3   :  { %752 = vst.msk [vmem:[%s1469_s3 + $0x120] sm:$0xff] %vm715_vm3, %v687_v61  ;;  %v656_v63 = vsel %vm528_vm9, %v376_v55, %v592_v59  ;;  %v672_v0 = vsel %vm544_vm10, %v416_v56, %v608_v60 }
  0xb4   :  { %768 = vst.msk [vmem:[%s1469_s3 + $0x1a0] sm:$0xff] %vm715_vm3, %v703_v62 }
  0xb5   :  { %721 = vst.msk [vmem:[%s1469_s3 + $0x28] sm:$0xff] %vm715_vm3, %v656_v63  ;;  %v455_v1 = vpop.f32.mrf.mxu2  ;;  %v495_v2 = vpop.f32.mrf.mxu3 }
  0xb6   :  { %737 = vst.msk [vmem:[%s1469_s3 + $0xa8] sm:$0xff] %vm715_vm3, %v672_v0  ;;  %v456_v3 = vadd.f32 %v1144_v39, %v455_v1  ;;  %v496_v4 = vadd.f32 %v1144_v39, %v495_v2  ;;  %v378_v5 = vpop.f32.mrf.mxu0  ;;  %v418_v6 = vpop.f32.mrf.mxu1 }
  0xb7   :  { %v379_v7 = vadd.f32 %v1144_v39, %v378_v5  ;;  %v419_v8 = vadd.f32 %v1144_v39, %v418_v6 }
  0xb8   :  { %vm560_vm11 = vcmp.ge.f32.partialorder %v456_v3, 0.0  ;;  %v624_v9 = vmul.f32 0.01, %v456_v3  ;;  %vm576_vm12 = vcmp.ge.f32.partialorder %v496_v4, 0.0  ;;  %v640_v10 = vmul.f32 0.01, %v496_v4 }
  0xb9   :  { %vm529_vm13 = vcmp.ge.f32.partialorder %v379_v7, 0.0  ;;  %v593_v11 = vmul.f32 0.01, %v379_v7  ;;  %vm545_vm14 = vcmp.ge.f32.partialorder %v419_v8, 0.0  ;;  %v609_v12 = vmul.f32 0.01, %v419_v8 }
  0xba   :  { %v688_v13 = vsel %vm560_vm11, %v456_v3, %v624_v9  ;;  %v704_v14 = vsel %vm576_vm12, %v496_v4, %v640_v10 }
  0xbb   :  { %753 = vst.msk [vmem:[%s1469_s3 + $0x128] sm:$0xff] %vm715_vm3, %v688_v13  ;;  %v657_v15 = vsel %vm529_vm13, %v379_v7, %v593_v11  ;;  %v673_v16 = vsel %vm545_vm14, %v419_v8, %v609_v12 }
  0xbc   :  { %769 = vst.msk [vmem:[%s1469_s3 + $0x1a8] sm:$0xff] %vm715_vm3, %v704_v14 }
  0xbd   :  { %722 = vst.msk [vmem:[%s1469_s3 + $0x30] sm:$0xff] %vm715_vm3, %v657_v15  ;;  %v458_v17 = vpop.f32.mrf.mxu2  ;;  %v498_v18 = vpop.f32.mrf.mxu3 }
  0xbe   :  { %738 = vst.msk [vmem:[%s1469_s3 + $0xb0] sm:$0xff] %vm715_vm3, %v673_v16  ;;  %v459_v19 = vadd.f32 %v1144_v39, %v458_v17  ;;  %v499_v20 = vadd.f32 %v1144_v39, %v498_v18  ;;  %v380_v21 = vpop.f32.mrf.mxu0  ;;  %v420_v22 = vpop.f32.mrf.mxu1 }
  0xbf   :  { %v381_v23 = vadd.f32 %v1144_v39, %v380_v21  ;;  %v421_v24 = vadd.f32 %v1144_v39, %v420_v22 }
  0xc0   :  { %vm561_vm15 = vcmp.ge.f32.partialorder %v459_v19, 0.0  ;;  %v625_v25 = vmul.f32 0.01, %v459_v19  ;;  %vm577_vm0 = vcmp.ge.f32.partialorder %v499_v20, 0.0  ;;  %v641_v26 = vmul.f32 0.01, %v499_v20 }
  0xc1   :  { %vm530_vm1 = vcmp.ge.f32.partialorder %v381_v23, 0.0  ;;  %v594_v27 = vmul.f32 0.01, %v381_v23  ;;  %vm546_vm2 = vcmp.ge.f32.partialorder %v421_v24, 0.0  ;;  %v610_v28 = vmul.f32 0.01, %v421_v24 }
  0xc2   :  { %v689_v29 = vsel %vm561_vm15, %v459_v19, %v625_v25  ;;  %v705_v30 = vsel %vm577_vm0, %v499_v20, %v641_v26 }
  0xc3   :  { %754 = vst.msk [vmem:[%s1469_s3 + $0x130] sm:$0xff] %vm715_vm3, %v689_v29  ;;  %v658_v31 = vsel %vm530_vm1, %v381_v23, %v594_v27  ;;  %v674_v32 = vsel %vm546_vm2, %v421_v24, %v610_v28 }
  0xc4   :  { %770 = vst.msk [vmem:[%s1469_s3 + $0x1b0] sm:$0xff] %vm715_vm3, %v705_v30 }
  0xc5   :  { %723 = vst.msk [vmem:[%s1469_s3 + $0x38] sm:$0xff] %vm715_vm3, %v658_v31  ;;  %v460_v33 = vpop.f32.mrf.mxu2  ;;  %v500_v34 = vpop.f32.mrf.mxu3 }
  0xc6   :  { %739 = vst.msk [vmem:[%s1469_s3 + $0xb8] sm:$0xff] %vm715_vm3, %v674_v32  ;;  %v461_v35 = vadd.f32 %v1144_v39, %v460_v33  ;;  %v501_v36 = vadd.f32 %v1144_v39, %v500_v34  ;;  %v383_v37 = vpop.f32.mrf.mxu0  ;;  %v423_v38 = vpop.f32.mrf.mxu1 }
  0xc7   :  { %v384_v40 = vadd.f32 %v1144_v39, %v383_v37  ;;  %v424_v41 = vadd.f32 %v1144_v39, %v423_v38 }
  0xc8   :  { %vm562_vm4 = vcmp.ge.f32.partialorder %v461_v35, 0.0  ;;  %v626_v42 = vmul.f32 0.01, %v461_v35  ;;  %vm578_vm5 = vcmp.ge.f32.partialorder %v501_v36, 0.0  ;;  %v642_v43 = vmul.f32 0.01, %v501_v36 }
  0xc9   :  { %vm531_vm6 = vcmp.ge.f32.partialorder %v384_v40, 0.0  ;;  %v595_v44 = vmul.f32 0.01, %v384_v40  ;;  %vm547_vm7 = vcmp.ge.f32.partialorder %v424_v41, 0.0  ;;  %v611_v45 = vmul.f32 0.01, %v424_v41 }
  0xca   :  { %v690_v46 = vsel %vm562_vm4, %v461_v35, %v626_v42  ;;  %v706_v47 = vsel %vm578_vm5, %v501_v36, %v642_v43 }
  0xcb   :  { %755 = vst.msk [vmem:[%s1469_s3 + $0x138] sm:$0xff] %vm715_vm3, %v690_v46  ;;  %v659_v48 = vsel %vm531_vm6, %v384_v40, %v595_v44  ;;  %v675_v49 = vsel %vm547_vm7, %v424_v41, %v611_v45 }
  0xcc   :  { %771 = vst.msk [vmem:[%s1469_s3 + $0x1b8] sm:$0xff] %vm715_vm3, %v706_v47 }
  0xcd   :  { %724 = vst.msk [vmem:[%s1469_s3 + $0x40] sm:$0xff] %vm715_vm3, %v659_v48  ;;  %v463_v50 = vpop.f32.mrf.mxu2  ;;  %v503_v51 = vpop.f32.mrf.mxu3 }
  0xce   :  { %740 = vst.msk [vmem:[%s1469_s3 + $0xc0] sm:$0xff] %vm715_vm3, %v675_v49  ;;  %v464_v52 = vadd.f32 %v1144_v39, %v463_v50  ;;  %v504_v53 = vadd.f32 %v1144_v39, %v503_v51  ;;  %v385_v54 = vpop.f32.mrf.mxu0  ;;  %v425_v55 = vpop.f32.mrf.mxu1 }
  0xcf   :  { %v386_v56 = vadd.f32 %v1144_v39, %v385_v54  ;;  %v426_v57 = vadd.f32 %v1144_v39, %v425_v55 }
  0xd0   :  { %vm563_vm8 = vcmp.ge.f32.partialorder %v464_v52, 0.0  ;;  %v627_v58 = vmul.f32 0.01, %v464_v52  ;;  %vm579_vm9 = vcmp.ge.f32.partialorder %v504_v53, 0.0  ;;  %v643_v59 = vmul.f32 0.01, %v504_v53 }
  0xd1   :  { %vm532_vm10 = vcmp.ge.f32.partialorder %v386_v56, 0.0  ;;  %v596_v60 = vmul.f32 0.01, %v386_v56  ;;  %vm548_vm11 = vcmp.ge.f32.partialorder %v426_v57, 0.0  ;;  %v612_v61 = vmul.f32 0.01, %v426_v57 }
  0xd2   :  { %v691_v62 = vsel %vm563_vm8, %v464_v52, %v627_v58  ;;  %v707_v63 = vsel %vm579_vm9, %v504_v53, %v643_v59 }
  0xd3   :  { %756 = vst.msk [vmem:[%s1469_s3 + $0x140] sm:$0xff] %vm715_vm3, %v691_v62  ;;  %v660_v0 = vsel %vm532_vm10, %v386_v56, %v596_v60  ;;  %v676_v1 = vsel %vm548_vm11, %v426_v57, %v612_v61 }
  0xd4   :  { %772 = vst.msk [vmem:[%s1469_s3 + $0x1c0] sm:$0xff] %vm715_vm3, %v707_v63 }
  0xd5   :  { %725 = vst.msk [vmem:[%s1469_s3 + $0x48] sm:$0xff] %vm715_vm3, %v660_v0  ;;  %v465_v2 = vpop.f32.mrf.mxu2  ;;  %v505_v3 = vpop.f32.mrf.mxu3 }
  0xd6   :  { %741 = vst.msk [vmem:[%s1469_s3 + $0xc8] sm:$0xff] %vm715_vm3, %v676_v1  ;;  %v466_v4 = vadd.f32 %v1144_v39, %v465_v2  ;;  %v506_v5 = vadd.f32 %v1144_v39, %v505_v3  ;;  %v388_v6 = vpop.f32.mrf.mxu0  ;;  %v428_v7 = vpop.f32.mrf.mxu1 }
  0xd7   :  { %v389_v8 = vadd.f32 %v1144_v39, %v388_v6  ;;  %v429_v9 = vadd.f32 %v1144_v39, %v428_v7 }
  0xd8   :  { %vm564_vm12 = vcmp.ge.f32.partialorder %v466_v4, 0.0  ;;  %v628_v10 = vmul.f32 0.01, %v466_v4  ;;  %vm580_vm13 = vcmp.ge.f32.partialorder %v506_v5, 0.0  ;;  %v644_v11 = vmul.f32 0.01, %v506_v5 }
  0xd9   :  { %vm533_vm14 = vcmp.ge.f32.partialorder %v389_v8, 0.0  ;;  %v597_v12 = vmul.f32 0.01, %v389_v8  ;;  %vm549_vm15 = vcmp.ge.f32.partialorder %v429_v9, 0.0  ;;  %v613_v13 = vmul.f32 0.01, %v429_v9 }
  0xda   :  { %v692_v14 = vsel %vm564_vm12, %v466_v4, %v628_v10  ;;  %v708_v15 = vsel %vm580_vm13, %v506_v5, %v644_v11 }
  0xdb   :  { %757 = vst.msk [vmem:[%s1469_s3 + $0x148] sm:$0xff] %vm715_vm3, %v692_v14  ;;  %v661_v16 = vsel %vm533_vm14, %v389_v8, %v597_v12  ;;  %v677_v17 = vsel %vm549_vm15, %v429_v9, %v613_v13 }
  0xdc   :  { %773 = vst.msk [vmem:[%s1469_s3 + $0x1c8] sm:$0xff] %vm715_vm3, %v708_v15 }
  0xdd   :  { %726 = vst.msk [vmem:[%s1469_s3 + $0x50] sm:$0xff] %vm715_vm3, %v661_v16  ;;  %v468_v18 = vpop.f32.mrf.mxu2  ;;  %v508_v19 = vpop.f32.mrf.mxu3 }
  0xde   :  { %742 = vst.msk [vmem:[%s1469_s3 + $0xd0] sm:$0xff] %vm715_vm3, %v677_v17  ;;  %v469_v20 = vadd.f32 %v1144_v39, %v468_v18  ;;  %v509_v21 = vadd.f32 %v1144_v39, %v508_v19  ;;  %v390_v22 = vpop.f32.mrf.mxu0  ;;  %v430_v23 = vpop.f32.mrf.mxu1 }
  0xdf   :  { %v391_v24 = vadd.f32 %v1144_v39, %v390_v22  ;;  %v431_v25 = vadd.f32 %v1144_v39, %v430_v23 }
  0xe0   :  { %vm565_vm0 = vcmp.ge.f32.partialorder %v469_v20, 0.0  ;;  %v629_v26 = vmul.f32 0.01, %v469_v20  ;;  %vm581_vm1 = vcmp.ge.f32.partialorder %v509_v21, 0.0  ;;  %v645_v27 = vmul.f32 0.01, %v509_v21 }
  0xe1   :  { %vm534_vm2 = vcmp.ge.f32.partialorder %v391_v24, 0.0  ;;  %v598_v28 = vmul.f32 0.01, %v391_v24  ;;  %vm550_vm4 = vcmp.ge.f32.partialorder %v431_v25, 0.0  ;;  %v614_v29 = vmul.f32 0.01, %v431_v25 }
  0xe2   :  { %v693_v30 = vsel %vm565_vm0, %v469_v20, %v629_v26  ;;  %v709_v31 = vsel %vm581_vm1, %v509_v21, %v645_v27 }
  0xe3   :  { %758 = vst.msk [vmem:[%s1469_s3 + $0x150] sm:$0xff] %vm715_vm3, %v693_v30  ;;  %v662_v32 = vsel %vm534_vm2, %v391_v24, %v598_v28  ;;  %v678_v33 = vsel %vm550_vm4, %v431_v25, %v614_v29 }
  0xe4   :  { %774 = vst.msk [vmem:[%s1469_s3 + $0x1d0] sm:$0xff] %vm715_vm3, %v709_v31 }
  0xe5   :  { %727 = vst.msk [vmem:[%s1469_s3 + $0x58] sm:$0xff] %vm715_vm3, %v662_v32  ;;  %v470_v34 = vpop.f32.mrf.mxu2  ;;  %v510_v35 = vpop.f32.mrf.mxu3 }
  0xe6   :  { %743 = vst.msk [vmem:[%s1469_s3 + $0xd8] sm:$0xff] %vm715_vm3, %v678_v33  ;;  %v471_v36 = vadd.f32 %v1144_v39, %v470_v34  ;;  %v511_v37 = vadd.f32 %v1144_v39, %v510_v35  ;;  %v393_v38 = vpop.f32.mrf.mxu0  ;;  %v433_v40 = vpop.f32.mrf.mxu1 }
  0xe7   :  { %v394_v41 = vadd.f32 %v1144_v39, %v393_v38  ;;  %v434_v42 = vadd.f32 %v1144_v39, %v433_v40 }
  0xe8   :  { %vm566_vm5 = vcmp.ge.f32.partialorder %v471_v36, 0.0  ;;  %v630_v43 = vmul.f32 0.01, %v471_v36  ;;  %vm582_vm6 = vcmp.ge.f32.partialorder %v511_v37, 0.0  ;;  %v646_v44 = vmul.f32 0.01, %v511_v37 }
  0xe9   :  { %vm535_vm7 = vcmp.ge.f32.partialorder %v394_v41, 0.0  ;;  %v599_v45 = vmul.f32 0.01, %v394_v41  ;;  %vm551_vm8 = vcmp.ge.f32.partialorder %v434_v42, 0.0  ;;  %v615_v46 = vmul.f32 0.01, %v434_v42 }
  0xea   :  { %v694_v47 = vsel %vm566_vm5, %v471_v36, %v630_v43  ;;  %v710_v48 = vsel %vm582_vm6, %v511_v37, %v646_v44 }
  0xeb   :  { %759 = vst.msk [vmem:[%s1469_s3 + $0x158] sm:$0xff] %vm715_vm3, %v694_v47  ;;  %v663_v49 = vsel %vm535_vm7, %v394_v41, %v599_v45  ;;  %v679_v50 = vsel %vm551_vm8, %v434_v42, %v615_v46 }
  0xec   :  { %775 = vst.msk [vmem:[%s1469_s3 + $0x1d8] sm:$0xff] %vm715_vm3, %v710_v48 }
  0xed   :  { %728 = vst.msk [vmem:[%s1469_s3 + $0x60] sm:$0xff] %vm715_vm3, %v663_v49  ;;  %v473_v51 = vpop.f32.mrf.mxu2  ;;  %v513_v52 = vpop.f32.mrf.mxu3 }
  0xee   :  { %744 = vst.msk [vmem:[%s1469_s3 + $0xe0] sm:$0xff] %vm715_vm3, %v679_v50  ;;  %v474_v53 = vadd.f32 %v1144_v39, %v473_v51  ;;  %v514_v54 = vadd.f32 %v1144_v39, %v513_v52  ;;  %v395_v55 = vpop.f32.mrf.mxu0  ;;  %v435_v56 = vpop.f32.mrf.mxu1 }
  0xef   :  { %v396_v57 = vadd.f32 %v1144_v39, %v395_v55  ;;  %v436_v58 = vadd.f32 %v1144_v39, %v435_v56 }
  0xf0   :  { %vm567_vm9 = vcmp.ge.f32.partialorder %v474_v53, 0.0  ;;  %v631_v59 = vmul.f32 0.01, %v474_v53  ;;  %vm583_vm10 = vcmp.ge.f32.partialorder %v514_v54, 0.0  ;;  %v647_v60 = vmul.f32 0.01, %v514_v54 }
  0xf1   :  { %vm536_vm11 = vcmp.ge.f32.partialorder %v396_v57, 0.0  ;;  %v600_v61 = vmul.f32 0.01, %v396_v57  ;;  %vm552_vm12 = vcmp.ge.f32.partialorder %v436_v58, 0.0  ;;  %v616_v62 = vmul.f32 0.01, %v436_v58 }
  0xf2   :  { %v695_v63 = vsel %vm567_vm9, %v474_v53, %v631_v59  ;;  %v711_v0 = vsel %vm583_vm10, %v514_v54, %v647_v60 }
  0xf3   :  { %760 = vst.msk [vmem:[%s1469_s3 + $0x160] sm:$0xff] %vm715_vm3, %v695_v63  ;;  %v664_v1 = vsel %vm536_vm11, %v396_v57, %v600_v61  ;;  %v680_v2 = vsel %vm552_vm12, %v436_v58, %v616_v62 }
  0xf4   :  { %776 = vst.msk [vmem:[%s1469_s3 + $0x1e0] sm:$0xff] %vm715_vm3, %v711_v0 }
  0xf5   :  { %729 = vst.msk [vmem:[%s1469_s3 + $0x68] sm:$0xff] %vm715_vm3, %v664_v1  ;;  %v475_v3 = vpop.f32.mrf.mxu2  ;;  %v515_v4 = vpop.f32.mrf.mxu3 }
  0xf6   :  { %745 = vst.msk [vmem:[%s1469_s3 + $0xe8] sm:$0xff] %vm715_vm3, %v680_v2  ;;  %v476_v5 = vadd.f32 %v1144_v39, %v475_v3  ;;  %v516_v6 = vadd.f32 %v1144_v39, %v515_v4  ;;  %v398_v7 = vpop.f32.mrf.mxu0  ;;  %v438_v8 = vpop.f32.mrf.mxu1 }
  0xf7   :  { %v399_v9 = vadd.f32 %v1144_v39, %v398_v7  ;;  %v439_v10 = vadd.f32 %v1144_v39, %v438_v8 }
  0xf8   :  { %vm568_vm13 = vcmp.ge.f32.partialorder %v476_v5, 0.0  ;;  %v632_v11 = vmul.f32 0.01, %v476_v5  ;;  %vm584_vm14 = vcmp.ge.f32.partialorder %v516_v6, 0.0  ;;  %v648_v12 = vmul.f32 0.01, %v516_v6 }
  0xf9   :  { %vm537_vm15 = vcmp.ge.f32.partialorder %v399_v9, 0.0  ;;  %v601_v13 = vmul.f32 0.01, %v399_v9  ;;  %vm553_vm0 = vcmp.ge.f32.partialorder %v439_v10, 0.0  ;;  %v617_v14 = vmul.f32 0.01, %v439_v10 }
  0xfa   :  { %v696_v15 = vsel %vm568_vm13, %v476_v5, %v632_v11  ;;  %v712_v16 = vsel %vm584_vm14, %v516_v6, %v648_v12 }
  0xfb   :  { %761 = vst.msk [vmem:[%s1469_s3 + $0x168] sm:$0xff] %vm715_vm3, %v696_v15  ;;  %v665_v17 = vsel %vm537_vm15, %v399_v9, %v601_v13  ;;  %v681_v18 = vsel %vm553_vm0, %v439_v10, %v617_v14 }
  0xfc   :  { %777 = vst.msk [vmem:[%s1469_s3 + $0x1e8] sm:$0xff] %vm715_vm3, %v712_v16 }
  0xfd   :  { %730 = vst.msk [vmem:[%s1469_s3 + $0x70] sm:$0xff] %vm715_vm3, %v665_v17  ;;  %v478_v19 = vpop.f32.mrf.mxu2  ;;  %v518_v20 = vpop.f32.mrf.mxu3 }
  0xfe   :  { %746 = vst.msk [vmem:[%s1469_s3 + $0xf0] sm:$0xff] %vm715_vm3, %v681_v18  ;;  %v479_v21 = vadd.f32 %v1144_v39, %v478_v19  ;;  %v519_v22 = vadd.f32 %v1144_v39, %v518_v20  ;;  %v400_v23 = vpop.f32.mrf.mxu0  ;;  %v440_v24 = vpop.f32.mrf.mxu1 }
  0xff   :  { %v401_v25 = vadd.f32 %v1144_v39, %v400_v23  ;;  %v441_v26 = vadd.f32 %v1144_v39, %v440_v24 }
 0x100   :  { %vm569_vm1 = vcmp.ge.f32.partialorder %v479_v21, 0.0  ;;  %v633_v27 = vmul.f32 0.01, %v479_v21  ;;  %vm585_vm2 = vcmp.ge.f32.partialorder %v519_v22, 0.0  ;;  %v649_v28 = vmul.f32 0.01, %v519_v22 }
 0x101   :  { %vm538_vm4 = vcmp.ge.f32.partialorder %v401_v25, 0.0  ;;  %v602_v29 = vmul.f32 0.01, %v401_v25  ;;  %vm554_vm5 = vcmp.ge.f32.partialorder %v441_v26, 0.0  ;;  %v618_v30 = vmul.f32 0.01, %v441_v26 }
 0x102   :  { %v697_v31 = vsel %vm569_vm1, %v479_v21, %v633_v27  ;;  %v713_v32 = vsel %vm585_vm2, %v519_v22, %v649_v28 }
 0x103   :  { %762 = vst.msk [vmem:[%s1469_s3 + $0x170] sm:$0xff] %vm715_vm3, %v697_v31  ;;  %v666_v33 = vsel %vm538_vm4, %v401_v25, %v602_v29  ;;  %v682_v34 = vsel %vm554_vm5, %v441_v26, %v618_v30 }
 0x104   :  { %778 = vst.msk [vmem:[%s1469_s3 + $0x1f0] sm:$0xff] %vm715_vm3, %v713_v32 }
 0x105   :  { %731 = vst.msk [vmem:[%s1469_s3 + $0x78] sm:$0xff] %vm715_vm3, %v666_v33  ;;  %v480_v35 = vpop.f32.mrf.mxu2  ;;  %v520_v36 = vpop.f32.mrf.mxu3 }
 0x106   :  { %747 = vst.msk [vmem:[%s1469_s3 + $0xf8] sm:$0xff] %vm715_vm3, %v682_v34  ;;  %v481_v37 = vadd.f32 %v1144_v39, %v480_v35  ;;  %v521_v38 = vadd.f32 %v1144_v39, %v520_v36 }
 0x108   :  { %vm570_vm6 = vcmp.ge.f32.partialorder %v481_v37, 0.0  ;;  %v634_v40 = vmul.f32 0.01, %v481_v37  ;;  %vm586_vm7 = vcmp.ge.f32.partialorder %v521_v38, 0.0  ;;  %v650_v41 = vmul.f32 0.01, %v521_v38 }
 0x10a   :  { %v698_v42 = vsel %vm570_vm6, %v481_v37, %v634_v40  ;;  %v714_v43 = vsel %vm586_vm7, %v521_v38, %v650_v41 }
 0x10b   :  { %763 = vst.msk [vmem:[%s1469_s3 + $0x178] sm:$0xff] %vm715_vm3, %v698_v42 }
 0x10c   :  { %779 = vst.msk [vmem:[%s1469_s3 + $0x1f8] sm:$0xff] %vm715_vm3, %v714_v43 }

// kernel: resatomsegnet_s2_forward.24
= control target key start
LH: loop header
LB: loop body
LE: loop exit
PB: predicated region body
PF: predicated region fallthrough
CT: control target
= control target key end

     0   :  { %vm315_vm0 = vcmask 261120   ;;  %s1113_s1 = inlined_call_operand.vmem [shape: bf16[288,32], index: 1, kind: input, shape index: {}]   ;;  %s1114_s0 = inlined_call_operand.vmem [shape: bf16[128,288], index: 0, kind: input, shape index: {}]   ;;  %s1115_s2 = inlined_call_operand.vmem [shape: f32[1,32], index: 2, kind: input, shape index: {}]   ;;  %s1116_s3 = inlined_call_operand.vmem [shape: f32[128,32], index: 3, kind: output, shape index: {}]  }
   0x1   :  { %v762_v0 = vld [vmem:[%s1113_s1 + $0x38] sm:$0xff]  ;;  %v772_v1 = vld [vmem:[%s1113_s1 + $0x88] sm:$0xff]  ;;  %v761_v3 = vld [vmem:[%s1113_s1 + $0x30] sm:$0xff] }
   0x2   :  { %v770_v2 = vld [vmem:[%s1113_s1 + $0x78] sm:$0xff]  ;;  %340 = vmatpush.bf16.msra.mxu0 %v762_v0  ;;  %773 = vmatpush.bf16.msra.mxu3 %v762_v0  ;;  %v771_v4 = vld [vmem:[%s1113_s1 + $0x80] sm:$0xff]  ;;  %v769_v5 = vld [vmem:[%s1113_s1 + $0x70] sm:$0xff] }
   0x3   :  { %444 = vmatpush.bf16.msra.mxu2 %v772_v1  ;;  %389 = vmatpush.bf16.msra.mxu1 %v770_v2  ;;  %v565_v6 = vld [vmem:[%s1114_s0 + $0x8] sm:$0xf]  ;;  %v733_v7 = vld [vmem:[%s1114_s0 + $0x10] sm:$0xf0]  ;;  %v759_v11 = vld [vmem:[%s1113_s1 + $0x20] sm:$0xff] }
   0x4   :  { %v566_v8 = vor.u32 %v733_v7, %v565_v6  ;;  %v760_v9 = vld [vmem:[%s1113_s1 + $0x28] sm:$0xff]  ;;  %v767_v12 = vld [vmem:[%s1113_s1 + $0x60] sm:$0xff]  ;;  %v758_v13 = vld [vmem:[%s1113_s1 + $0x18] sm:$0xff] }
   0x5   :  { %v768_v10 = vld [vmem:[%s1113_s1 + $0x68] sm:$0xff]  ;;  %v766_v14 = vld [vmem:[%s1113_s1 + $0x58] sm:$0xff]  ;;  %v757_v15 = vld [vmem:[%s1113_s1 + $0x10] sm:$0xff] }
   0x6   :  { %341 = vmatpush.bf16.msra.mxu0 %v761_v3  ;;  %774 = vmatpush.bf16.msra.mxu3 %v761_v3  ;;  %v765_v16 = vld [vmem:[%s1113_s1 + $0x50] sm:$0xff]  ;;  %v577_v17 = vld [vmem:[%s1114_s0 + $0x20] sm:$0xf]  ;;  %v736_v18 = vld [vmem:[%s1114_s0 + $0x28] sm:$0xf0] }
   0x7   :  { %445 = vmatpush.bf16.msra.mxu2 %v771_v4  ;;  %390 = vmatpush.bf16.msra.mxu1 %v769_v5  ;;  %v578_v19 = vor.u32 %v736_v18, %v577_v17  ;;  %v756_v20 = vld [vmem:[%s1113_s1 + $0x8] sm:$0xff]  ;;  %v755_v22 = vld [vmem:[%s1113_s1] sm:$0xff]  ;;  %v629_v26 = vld [vmem:[%s1114_s0 + $0x90] sm:$0xf] }
   0x8   :  { %v764_v21 = vld [vmem:[%s1113_s1 + $0x48] sm:$0xff]  ;;  %v763_v23 = vld [vmem:[%s1113_s1 + $0x40] sm:$0xff]  ;;  %v750_v27 = vld [vmem:[%s1114_s0 + $0x98] sm:$0xf0] }
   0x9   :  { %v557_v24 = vld [vmem:[%s1114_s0] sm:$0xf]  ;;  %v732_v25 = vld [vmem:[%s1114_s0 + $0x8] sm:$0xf0]  ;;  %v731_v28 = vld [vmem:[%s1114_s0 + $0x4] sm:$0xf]  ;;  %v630_v31 = vor.u32 %v750_v27, %v629_v26 }
   0xa   :  { %723 = vmatmul.msk.bf16.vlgmr.msra.gmra.mxu2 %vm315_vm0, %v566_v8  ;;  %342 = vmatpush.bf16.msra.mxu0 %v760_v9  ;;  %v559_v29 = vld [vmem:[%s1114_s0 + $0xc] sm:$0xf0]  ;;  %v558_v30 = vor.u32 %v732_v25, %v557_v24  ;;  %v589_v33 = vld [vmem:[%s1114_s0 + $0x38] sm:$0xf]  ;;  %v739_v34 = vld [vmem:[%s1114_s0 + $0x40] sm:$0xf0] }
   0xb   :  { %775 = vmatpush.bf16.msra.mxu3 %v760_v9  ;;  %391 = vmatpush.bf16.msra.mxu1 %v768_v10  ;;  %v562_v32 = vor.u32 %v731_v28, %v559_v29  ;;  %v590_v35 = vor.u32 %v739_v34, %v589_v33  ;;  %v569_v36 = vld [vmem:[%s1114_s0 + $0x18] sm:$0xf]  ;;  %v735_v37 = vld [vmem:[%s1114_s0 + $0x20] sm:$0xf0]  ;;  %v641_v38 = vld [vmem:[%s1114_s0 + $0xa8] sm:$0xf] }
   0xc   :  { %v753_v39 = vld [vmem:[%s1114_s0 + $0xb0] sm:$0xf0]  ;;  %v734_v40 = vld [vmem:[%s1114_s0 + $0x1c] sm:$0xf]  ;;  %v571_v41 = vld [vmem:[%s1114_s0 + $0x24] sm:$0xf0]  ;;  %v570_v42 = vor.u32 %v735_v37, %v569_v36 }
   0xd   :  { %v642_v43 = vor.u32 %v753_v39, %v641_v38  ;;  %v574_v44 = vor.u32 %v734_v40, %v571_v41  ;;  %v601_v45 = vld [vmem:[%s1114_s0 + $0x50] sm:$0xf]  ;;  %v742_v46 = vld [vmem:[%s1114_s0 + $0x58] sm:$0xf0]  ;;  %v749_v50 = vld [vmem:[%s1114_s0 + $0x94] sm:$0xf] }
   0xe   :  { %343 = vmatpush.bf16.msra.mxu0 %v759_v11  ;;  %v602_v47 = vor.u32 %v742_v46, %v601_v45  ;;  %v581_v48 = vld [vmem:[%s1114_s0 + $0x30] sm:$0xf]  ;;  %v738_v49 = vld [vmem:[%s1114_s0 + $0x38] sm:$0xf0]  ;;  %v631_v51 = vld [vmem:[%s1114_s0 + $0x9c] sm:$0xf0] }
   0xf   :  { %776 = vmatpush.bf16.msra.mxu3 %v759_v11  ;;  %392 = vmatpush.bf16.msra.mxu1 %v767_v12  ;;  %v737_v52 = vld [vmem:[%s1114_s0 + $0x34] sm:$0xf]  ;;  %v583_v53 = vld [vmem:[%s1114_s0 + $0x3c] sm:$0xf0]  ;;  %v582_v54 = vor.u32 %v738_v49, %v581_v48  ;;  %v634_v55 = vor.u32 %v749_v50, %v631_v51  ;;  %v613_v57 = vld [vmem:[%s1114_s0 + $0x68] sm:$0xf] }
  0x10   :  { %v586_v56 = vor.u32 %v737_v52, %v583_v53  ;;  %v745_v58 = vld [vmem:[%s1114_s0 + $0x70] sm:$0xf0]  ;;  %v593_v60 = vld [vmem:[%s1114_s0 + $0x48] sm:$0xf]  ;;  %v752_v62 = vld [vmem:[%s1114_s0 + $0xac] sm:$0xf] }
  0x11   :  { %v614_v59 = vor.u32 %v745_v58, %v613_v57  ;;  %v741_v61 = vld [vmem:[%s1114_s0 + $0x50] sm:$0xf0]  ;;  %v643_v63 = vld [vmem:[%s1114_s0 + $0xb4] sm:$0xf0]  ;;  %v740_v0 = vld [vmem:[%s1114_s0 + $0x4c] sm:$0xf] }
  0x12   :  { %344 = vmatpush.bf16.msra.mxu0 %v758_v13  ;;  %v595_v1 = vld [vmem:[%s1114_s0 + $0x54] sm:$0xf0]  ;;  %v646_v3 = vor.u32 %v752_v62, %v643_v63  ;;  %v748_v6 = vld [vmem:[%s1114_s0 + $0x88] sm:$0xf0]  ;;  %v605_v8 = vld [vmem:[%s1114_s0 + $0x60] sm:$0xf] }
  0x13   :  { %777 = vmatpush.bf16.msra.mxu3 %v758_v13  ;;  %393 = vmatpush.bf16.msra.mxu1 %v766_v14  ;;  %v598_v4 = vor.u32 %v740_v0, %v595_v1  ;;  %v744_v9 = vld [vmem:[%s1114_s0 + $0x68] sm:$0xf0]  ;;  %v607_v11 = vld [vmem:[%s1114_s0 + $0x6c] sm:$0xf0]  ;;  %v617_v17 = vld [vmem:[%s1114_s0 + $0x78] sm:$0xf] }
  0x14   :  { %v747_v18 = vld [vmem:[%s1114_s0 + $0x80] sm:$0xf0]  ;;  %v754_v24 = vld [vmem:[%s1114_s0 + $0xb8] sm:$0xf0]  ;;  %v1019_v28 = vld [vmem:[%s1115_s2] ss:$0 sm:$0xff] }
  0x16   :  { %345 = vmatpush.bf16.msra.mxu0 %v757_v15 }
  0x17   :  { %778 = vmatpush.bf16.msra.mxu3 %v757_v15  ;;  %394 = vmatpush.bf16.msra.mxu1 %v765_v16  ;;  %v751_v15 = vld [vmem:[%s1114_s0 + $0xa0] sm:$0xf0] }
  0x1a   :  { %724 = vmatmul.msk.bf16.gmra.mxu2 %vm315_vm0, %v578_v19  ;;  %346 = vmatpush.bf16.msra.mxu0 %v756_v20  ;;  %v746_v19 = vld [vmem:[%s1114_s0 + $0x7c] sm:$0xf] }
  0x1b   :  { %779 = vmatpush.bf16.msra.mxu3 %v756_v20  ;;  %395 = vmatpush.bf16.msra.mxu1 %v764_v21  ;;  %v619_v20 = vld [vmem:[%s1114_s0 + $0x84] sm:$0xf0] }
  0x1e   :  { %347 = vmatpush.bf16.msra.mxu0 %v755_v22 }
  0x1f   :  { %780 = vmatpush.bf16.msra.mxu3 %v755_v22  ;;  %396 = vmatpush.bf16.msra.mxu1 %v763_v23  ;;  %v622_v22 = vor.u32 %v746_v19, %v619_v20 }
  0x21   :  { %348 = vmatmul.bf16.vlgmr.msra.gmra.mxu0 %v558_v30 }
  0x22   :  { %378 = vmatmul.bf16.vlgmr.msra.gmra.mxu3 %v630_v31  ;;  %397 = vmatmul.bf16.vlgmr.msra.gmra.mxu1 %v562_v32 }
  0x23   :  { %781 = vmatpush.bf16.msrb.mxu3 %v770_v2  ;;  %v594_v2 = vor.u32 %v741_v61, %v593_v60 }
  0x27   :  { %782 = vmatpush.bf16.msrb.mxu3 %v769_v5  ;;  %v625_v5 = vld [vmem:[%s1114_s0 + $0x80] sm:$0xf] }
  0x28   :  { %v626_v7 = vor.u32 %v748_v6, %v625_v5 }
  0x2a   :  { %725 = vmatmul.msk.bf16.gmra.mxu2 %vm315_vm0, %v590_v35 }
  0x2b   :  { %783 = vmatpush.bf16.msrb.mxu3 %v768_v10  ;;  %v743_v10 = vld [vmem:[%s1114_s0 + $0x64] sm:$0xf] }
  0x2c   :  { %v610_v13 = vor.u32 %v743_v10, %v607_v11 }
  0x2f   :  { %784 = vmatpush.bf16.msrb.mxu3 %v767_v12  ;;  %v606_v12 = vor.u32 %v744_v9, %v605_v8 }
  0x31   :  { %353 = vmatmul.bf16.gmra.mxu0 %v570_v42 }
  0x32   :  { %383 = vmatmul.bf16.gmra.mxu3 %v642_v43  ;;  %402 = vmatmul.bf16.gmra.mxu1 %v574_v44 }
  0x33   :  { %785 = vmatpush.bf16.msrb.mxu3 %v766_v14  ;;  %v637_v14 = vld [vmem:[%s1114_s0 + $0x98] sm:$0xf] }
  0x37   :  { %786 = vmatpush.bf16.msrb.mxu3 %v765_v16  ;;  %v638_v16 = vor.u32 %v751_v15, %v637_v14 }
  0x3a   :  { %726 = vmatmul.msk.bf16.gmra.mxu2 %vm315_vm0, %v602_v47 }
  0x3b   :  { %787 = vmatpush.bf16.msrb.mxu3 %v764_v21  ;;  %v618_v21 = vor.u32 %v747_v18, %v617_v17 }
  0x3f   :  { %788 = vmatpush.bf16.msrb.mxu3 %v763_v23  ;;  %v649_v23 = vld [vmem:[%s1114_s0 + $0xb0] sm:$0xf] }
  0x40   :  { %v650_v25 = vor.u32 %v754_v24, %v649_v23 }
  0x41   :  { %358 = vmatmul.bf16.gmra.mxu0 %v582_v54 }
  0x42   :  { %427 = vmatmul.bf16.vlgmr.msrb.gmra.mxu3 %v634_v55  ;;  %407 = vmatmul.bf16.gmra.mxu1 %v586_v56 }
  0x4a   :  { %727 = vmatmul.msk.bf16.gmra.mxu2 %vm315_vm0, %v614_v59 }
  0x51   :  { %363 = vmatmul.bf16.gmra.mxu0 %v594_v2 }
  0x52   :  { %432 = vmatmul.bf16.gmra.mxu3 %v646_v3  ;;  %412 = vmatmul.bf16.gmra.mxu1 %v598_v4 }
  0x5a   :  { %728 = vmatmul.msk.bf16.gmra.mxu2 %vm315_vm0, %v626_v7 }
  0x61   :  { %368 = vmatmul.bf16.gmra.mxu0 %v606_v12 }
  0x62   :  { %417 = vmatmul.bf16.gmra.mxu1 %v610_v13 }
  0x6a   :  { %729 = vmatmul.msk.bf16.gmra.mxu2 %vm315_vm0, %v638_v16 }
  0x71   :  { %373 = vmatmul.bf16.gmra.mxu0 %v618_v21 }
  0x72   :  { %422 = vmatmul.bf16.gmra.mxu1 %v622_v22 }
  0x7a   :  { %730 = vmatmul.msk.bf16.gmra.mxu2 %vm315_vm0, %v650_v25 }
  0x8d   :  { %v447_v26 = vpop.f32.mrf.mxu2 }
  0x95   :  { %v449_v27 = vpop.f32.mrf.mxu2 }
  0x9d   :  { %v452_v29 = vpop.f32.mrf.mxu2 }
  0x9e   :  { %v349_v30 = vpop.f32.mrf.mxu0 }
  0x9f   :  { %v350_v31 = vadd.f32 %v1019_v28, %v349_v30  ;;  %v398_v32 = vpop.f32.mrf.mxu1 }
  0xa1   :  { %v399_v33 = vadd.f32 %v398_v32, %v350_v31 }
  0xa3   :  { %v448_v34 = vadd.f32 %v447_v26, %v399_v33 }
  0xa5   :  { %vm487_vm1 = vcmp.ge.f32.partialorder %v448_v34, 0.0  ;;  %v503_v35 = vmul.f32 0.01, %v448_v34  ;;  %v454_v36 = vpop.f32.mrf.mxu2  ;;  %v1037_v58 = vpop.f32.mrf.mxu3 }
  0xa6   :  { %v351_v37 = vpop.f32.mrf.mxu0 }
  0xa7   :  { %v519_v38 = vsel %vm487_vm1, %v448_v34, %v503_v35  ;;  %v352_v39 = vadd.f32 %v1019_v28, %v351_v37  ;;  %v400_v40 = vpop.f32.mrf.mxu1 }
  0xa8   :  { %535 = vst.msk [vmem:[%s1116_s3] sm:$0xff] %vm315_vm0, %v519_v38 }
  0xa9   :  { %v401_v41 = vadd.f32 %v400_v40, %v352_v39 }
  0xab   :  { %v450_v42 = vadd.f32 %v449_v27, %v401_v41 }
  0xad   :  { %vm488_vm2 = vcmp.ge.f32.partialorder %v450_v42, 0.0  ;;  %v504_v43 = vmul.f32 0.01, %v450_v42  ;;  %v457_v44 = vpop.f32.mrf.mxu2  ;;  %v1044_v4 = vpop.f32.mrf.mxu3 }
  0xae   :  { %v354_v45 = vpop.f32.mrf.mxu0 }
  0xaf   :  { %v520_v46 = vsel %vm488_vm2, %v450_v42, %v504_v43  ;;  %v355_v47 = vadd.f32 %v1019_v28, %v354_v45  ;;  %v403_v48 = vpop.f32.mrf.mxu1 }
  0xb0   :  { %536 = vst.msk [vmem:[%s1116_s3 + $0x8] sm:$0xff] %vm315_vm0, %v520_v46 }
  0xb1   :  { %v404_v49 = vadd.f32 %v403_v48, %v355_v47  ;;  %v380_v47 = vadd.f32 %v1019_v28, %v1037_v58  ;;  %v382_v58 = vadd.f32 %v1019_v28, %v1044_v4 }
  0xb3   :  { %v453_v50 = vadd.f32 %v452_v29, %v404_v49 }
  0xb5   :  { %vm489_vm3 = vcmp.ge.f32.partialorder %v453_v50, 0.0  ;;  %v505_v51 = vmul.f32 0.01, %v453_v50  ;;  %v459_v52 = vpop.f32.mrf.mxu2  ;;  %v1051_v16 = vpop.f32.mrf.mxu3 }
  0xb6   :  { %v356_v53 = vpop.f32.mrf.mxu0 }
  0xb7   :  { %v521_v54 = vsel %vm489_vm3, %v453_v50, %v505_v51  ;;  %v357_v55 = vadd.f32 %v1019_v28, %v356_v53  ;;  %v405_v56 = vpop.f32.mrf.mxu1 }
  0xb8   :  { %537 = vst.msk [vmem:[%s1116_s3 + $0x10] sm:$0xff] %vm315_vm0, %v521_v54 }
  0xb9   :  { %v406_v57 = vadd.f32 %v405_v56, %v357_v55 }
  0xbb   :  { %v455_v59 = vadd.f32 %v454_v36, %v406_v57 }
  0xbd   :  { %vm490_vm4 = vcmp.ge.f32.partialorder %v455_v59, 0.0  ;;  %v506_v60 = vmul.f32 0.01, %v455_v59  ;;  %v462_v61 = vpop.f32.mrf.mxu2  ;;  %v1063_v29 = vpop.f32.mrf.mxu3 }
  0xbe   :  { %v359_v62 = vpop.f32.mrf.mxu0 }
  0xbf   :  { %v522_v63 = vsel %vm490_vm4, %v455_v59, %v506_v60  ;;  %v360_v0 = vadd.f32 %v1019_v28, %v359_v62  ;;  %v408_v1 = vpop.f32.mrf.mxu1 }
  0xc0   :  { %538 = vst.msk [vmem:[%s1116_s3 + $0x18] sm:$0xff] %vm315_vm0, %v522_v63 }
  0xc1   :  { %v409_v2 = vadd.f32 %v408_v1, %v360_v0 }
  0xc3   :  { %v458_v3 = vadd.f32 %v457_v44, %v409_v2 }
  0xc5   :  { %vm491_vm5 = vcmp.ge.f32.partialorder %v458_v3, 0.0  ;;  %v507_v5 = vmul.f32 0.01, %v458_v3  ;;  %v464_v6 = vpop.f32.mrf.mxu2  ;;  %v428_v39 = vpop.f32.mrf.mxu3 }
  0xc6   :  { %v361_v7 = vpop.f32.mrf.mxu0  ;;  %v429_v50 = vadd.f32 %v428_v39, %v380_v47 }
  0xc7   :  { %v523_v8 = vsel %vm491_vm5, %v458_v3, %v507_v5  ;;  %v362_v9 = vadd.f32 %v1019_v28, %v361_v7  ;;  %v410_v10 = vpop.f32.mrf.mxu1 }
  0xc8   :  { %539 = vst.msk [vmem:[%s1116_s3 + $0x20] sm:$0xff] %vm315_vm0, %v523_v8 }
  0xc9   :  { %v411_v11 = vadd.f32 %v410_v10, %v362_v9  ;;  %v385_v9 = vadd.f32 %v1019_v28, %v1051_v16 }
  0xcb   :  { %v460_v12 = vadd.f32 %v459_v52, %v411_v11 }
  0xcd   :  { %vm492_vm6 = vcmp.ge.f32.partialorder %v460_v12, 0.0  ;;  %v508_v13 = vmul.f32 0.01, %v460_v12  ;;  %v467_v14 = vpop.f32.mrf.mxu2  ;;  %v430_v51 = vpop.f32.mrf.mxu3 }
  0xce   :  { %v364_v15 = vpop.f32.mrf.mxu0  ;;  %v431_v0 = vadd.f32 %v430_v51, %v382_v58 }
  0xcf   :  { %v524_v17 = vsel %vm492_vm6, %v460_v12, %v508_v13  ;;  %v365_v18 = vadd.f32 %v1019_v28, %v364_v15  ;;  %v413_v19 = vpop.f32.mrf.mxu1 }
  0xd0   :  { %540 = vst.msk [vmem:[%s1116_s3 + $0x28] sm:$0xff] %vm315_vm0, %v524_v17 }
  0xd1   :  { %v414_v20 = vadd.f32 %v413_v19, %v365_v18  ;;  %v387_v19 = vadd.f32 %v1019_v28, %v1063_v29 }
  0xd3   :  { %v463_v21 = vadd.f32 %v462_v61, %v414_v20 }
  0xd5   :  { %vm493_vm7 = vcmp.ge.f32.partialorder %v463_v21, 0.0  ;;  %v509_v22 = vmul.f32 0.01, %v463_v21  ;;  %v469_v23 = vpop.f32.mrf.mxu2  ;;  %v433_v5 = vpop.f32.mrf.mxu3 }
  0xd6   :  { %v366_v24 = vpop.f32.mrf.mxu0 }
  0xd7   :  { %v525_v25 = vsel %vm493_vm7, %v463_v21, %v509_v22  ;;  %v367_v26 = vadd.f32 %v1019_v28, %v366_v24  ;;  %v415_v27 = vpop.f32.mrf.mxu1 }
  0xd8   :  { %541 = vst.msk [vmem:[%s1116_s3 + $0x30] sm:$0xff] %vm315_vm0, %v525_v25 }
  0xd9   :  { %v416_v30 = vadd.f32 %v415_v27, %v367_v26 }
  0xdb   :  { %v465_v31 = vadd.f32 %v464_v6, %v416_v30 }
  0xdd   :  { %vm494_vm8 = vcmp.ge.f32.partialorder %v465_v31, 0.0  ;;  %v510_v32 = vmul.f32 0.01, %v465_v31  ;;  %v472_v33 = vpop.f32.mrf.mxu2  ;;  %v435_v21 = vpop.f32.mrf.mxu3 }
  0xde   :  { %v369_v34 = vpop.f32.mrf.mxu0 }
  0xdf   :  { %v526_v35 = vsel %vm494_vm8, %v465_v31, %v510_v32  ;;  %v370_v36 = vadd.f32 %v1019_v28, %v369_v34  ;;  %v418_v37 = vpop.f32.mrf.mxu1 }
  0xe0   :  { %542 = vst.msk [vmem:[%s1116_s3 + $0x38] sm:$0xff] %vm315_vm0, %v526_v35 }
  0xe1   :  { %v419_v38 = vadd.f32 %v418_v37, %v370_v36 }
  0xe3   :  { %v468_v40 = vadd.f32 %v467_v14, %v419_v38  ;;  %v434_v14 = vadd.f32 %v433_v5, %v385_v9 }
  0xe5   :  { %vm495_vm9 = vcmp.ge.f32.partialorder %v468_v40, 0.0  ;;  %v511_v41 = vmul.f32 0.01, %v468_v40  ;;  %v474_v42 = vpop.f32.mrf.mxu2 }
  0xe6   :  { %v371_v43 = vpop.f32.mrf.mxu0 }
  0xe7   :  { %v527_v44 = vsel %vm495_vm9, %v468_v40, %v511_v41  ;;  %v372_v45 = vadd.f32 %v1019_v28, %v371_v43  ;;  %v420_v46 = vpop.f32.mrf.mxu1 }
  0xe8   :  { %543 = vst.msk [vmem:[%s1116_s3 + $0x40] sm:$0xff] %vm315_vm0, %v527_v44 }
  0xe9   :  { %v421_v48 = vadd.f32 %v420_v46, %v372_v45 }
  0xeb   :  { %v470_v49 = vadd.f32 %v469_v23, %v421_v48  ;;  %v436_v23 = vadd.f32 %v435_v21, %v387_v19 }
  0xed   :  { %vm496_vm10 = vcmp.ge.f32.partialorder %v470_v49, 0.0  ;;  %v512_v52 = vmul.f32 0.01, %v470_v49  ;;  %v477_v53 = vpop.f32.mrf.mxu2 }
  0xee   :  { %v478_v54 = vadd.f32 %v477_v53, %v429_v50  ;;  %v374_v55 = vpop.f32.mrf.mxu0 }
  0xef   :  { %v528_v56 = vsel %vm496_vm10, %v470_v49, %v512_v52  ;;  %v375_v57 = vadd.f32 %v1019_v28, %v374_v55  ;;  %v423_v59 = vpop.f32.mrf.mxu1 }
  0xf0   :  { %544 = vst.msk [vmem:[%s1116_s3 + $0x48] sm:$0xff] %vm315_vm0, %v528_v56  ;;  %vm499_vm11 = vcmp.ge.f32.partialorder %v478_v54, 0.0  ;;  %v515_v60 = vmul.f32 0.01, %v478_v54 }
  0xf1   :  { %v424_v61 = vadd.f32 %v423_v59, %v375_v57 }
  0xf2   :  { %v531_v62 = vsel %vm499_vm11, %v478_v54, %v515_v60 }
  0xf3   :  { %547 = vst.msk [vmem:[%s1116_s3 + $0x60] sm:$0xff] %vm315_vm0, %v531_v62  ;;  %v473_v63 = vadd.f32 %v472_v33, %v424_v61 }
  0xf5   :  { %vm497_vm12 = vcmp.ge.f32.partialorder %v473_v63, 0.0  ;;  %v513_v1 = vmul.f32 0.01, %v473_v63  ;;  %v479_v2 = vpop.f32.mrf.mxu2 }
  0xf6   :  { %v480_v3 = vadd.f32 %v479_v2, %v431_v0  ;;  %v376_v4 = vpop.f32.mrf.mxu0 }
  0xf7   :  { %v529_v6 = vsel %vm497_vm12, %v473_v63, %v513_v1  ;;  %v377_v7 = vadd.f32 %v1019_v28, %v376_v4  ;;  %v425_v8 = vpop.f32.mrf.mxu1 }
  0xf8   :  { %545 = vst.msk [vmem:[%s1116_s3 + $0x50] sm:$0xff] %vm315_vm0, %v529_v6  ;;  %vm500_vm13 = vcmp.ge.f32.partialorder %v480_v3, 0.0  ;;  %v516_v10 = vmul.f32 0.01, %v480_v3 }
  0xf9   :  { %v426_v11 = vadd.f32 %v425_v8, %v377_v7 }
  0xfa   :  { %v532_v12 = vsel %vm500_vm13, %v480_v3, %v516_v10 }
  0xfb   :  { %548 = vst.msk [vmem:[%s1116_s3 + $0x68] sm:$0xff] %vm315_vm0, %v532_v12  ;;  %v475_v13 = vadd.f32 %v474_v42, %v426_v11 }
  0xfd   :  { %vm498_vm14 = vcmp.ge.f32.partialorder %v475_v13, 0.0  ;;  %v514_v15 = vmul.f32 0.01, %v475_v13  ;;  %v482_v17 = vpop.f32.mrf.mxu2 }
  0xfe   :  { %v483_v16 = vadd.f32 %v482_v17, %v434_v14 }
  0xff   :  { %v530_v18 = vsel %vm498_vm14, %v475_v13, %v514_v15 }
 0x100   :  { %546 = vst.msk [vmem:[%s1116_s3 + $0x58] sm:$0xff] %vm315_vm0, %v530_v18  ;;  %vm501_vm15 = vcmp.ge.f32.partialorder %v483_v16, 0.0  ;;  %v517_v20 = vmul.f32 0.01, %v483_v16 }
 0x102   :  { %v533_v22 = vsel %vm501_vm15, %v483_v16, %v517_v20 }
 0x103   :  { %549 = vst.msk [vmem:[%s1116_s3 + $0x70] sm:$0xff] %vm315_vm0, %v533_v22 }
 0x105   :  { %v484_v24 = vpop.f32.mrf.mxu2 }
 0x106   :  { %v485_v25 = vadd.f32 %v484_v24, %v436_v23 }
 0x108   :  { %vm502_vm1 = vcmp.ge.f32.partialorder %v485_v25, 0.0  ;;  %v518_v26 = vmul.f32 0.01, %v485_v25 }
 0x10a   :  { %v534_v28 = vsel %vm502_vm1, %v485_v25, %v518_v26 }
 0x10b   :  { %550 = vst.msk [vmem:[%s1116_s3 + $0x78] sm:$0xff] %vm315_vm0, %v534_v28 }

// kernel: resatomsegnet_s2_forward.26
= control target key start
LH: loop header
LB: loop body
LE: loop exit
PB: predicated region body
PF: predicated region fallthrough
CT: control target
= control target key end

     0   :  { %vm91_vm0 = vcmask 261120   ;;  %s375_s1 = inlined_call_operand.vmem [shape: bf16[32,32], index: 1, kind: input, shape index: {}]   ;;  %s376_s0 = inlined_call_operand.vmem [shape: bf16[128,32], index: 0, kind: input, shape index: {}]   ;;  %s377_s2 = inlined_call_operand.vmem [shape: f32[1,32], index: 2, kind: input, shape index: {}]   ;;  %s378_s3 = inlined_call_operand.vmem [shape: f32[128,32], index: 3, kind: output, shape index: {}]  }
   0x1   :  { %v242_v0 = vld [vmem:[%s375_s1 + $0x8] sm:$0xff]  ;;  %v241_v1 = vld [vmem:[%s375_s1] sm:$0xff]  ;;  %v235_v3 = vld [vmem:[%s376_s0 + $0x10] sm:$0xff] }
   0x2   :  { %122 = vmatpush.bf16.msra.mxu0 %v242_v0  ;;  %243 = vmatpush.bf16.msra.mxu1 %v242_v0  ;;  %v233_v2 = vld [vmem:[%s376_s0] sm:$0xff]  ;;  %v239_v5 = vld [vmem:[%s376_s0 + $0x30] sm:$0xff]  ;;  %v234_v6 = vld [vmem:[%s376_s0 + $0x8] sm:$0xff] }
   0x3   :  { %244 = vmatpush.bf16.msra.mxu2 %v242_v0  ;;  %245 = vmatpush.bf16.msra.mxu3 %v242_v0  ;;  %v237_v4 = vld [vmem:[%s376_s0 + $0x20] sm:$0xff]  ;;  %v236_v7 = vld [vmem:[%s376_s0 + $0x18] sm:$0xff]  ;;  %v238_v8 = vld [vmem:[%s376_s0 + $0x28] sm:$0xff] }
   0x4   :  { %v240_v9 = vld [vmem:[%s376_s0 + $0x38] sm:$0xff]  ;;  %v249_v10 = vld [vmem:[%s377_s2] ss:$0 sm:$0xff] }
   0x6   :  { %123 = vmatpush.bf16.msra.mxu0 %v241_v1  ;;  %246 = vmatpush.bf16.msra.mxu1 %v241_v1 }
   0x7   :  { %247 = vmatpush.bf16.msra.mxu2 %v241_v1  ;;  %248 = vmatpush.bf16.msra.mxu3 %v241_v1 }
   0x9   :  { %225 = vmatmul.msk.bf16.vlgmr.msra.gmra.mxu0 %vm91_vm0, %v233_v2  ;;  %227 = vmatmul.msk.bf16.vlgmr.msra.gmra.mxu1 %vm91_vm0, %v235_v3 }
   0xa   :  { %229 = vmatmul.msk.bf16.vlgmr.msra.gmra.mxu2 %vm91_vm0, %v237_v4  ;;  %231 = vmatmul.msk.bf16.vlgmr.msra.gmra.mxu3 %vm91_vm0, %v239_v5 }
  0x19   :  { %226 = vmatmul.msk.bf16.gmra.mxu0 %vm91_vm0, %v234_v6  ;;  %228 = vmatmul.msk.bf16.gmra.mxu1 %vm91_vm0, %v236_v7 }
  0x1a   :  { %230 = vmatmul.msk.bf16.gmra.mxu2 %vm91_vm0, %v238_v8  ;;  %232 = vmatmul.msk.bf16.gmra.mxu3 %vm91_vm0, %v240_v9 }
  0x86   :  { %v125_v11 = vpop.f32.mrf.mxu0  ;;  %v135_v12 = vpop.f32.mrf.mxu1 }
  0x87   :  { %v126_v13 = vadd.f32 %v249_v10, %v125_v11  ;;  %v136_v14 = vadd.f32 %v249_v10, %v135_v12 }
  0x89   :  { %165 = vst.msk [vmem:[%s378_s3] sm:$0xff] %vm91_vm0, %v126_v13 }
  0x8a   :  { %169 = vst.msk [vmem:[%s378_s3 + $0x20] sm:$0xff] %vm91_vm0, %v136_v14 }
  0x8d   :  { %v145_v15 = vpop.f32.mrf.mxu2  ;;  %v155_v16 = vpop.f32.mrf.mxu3 }
  0x8e   :  { %v146_v17 = vadd.f32 %v249_v10, %v145_v15  ;;  %v156_v18 = vadd.f32 %v249_v10, %v155_v16  ;;  %v127_v19 = vpop.f32.mrf.mxu0  ;;  %v137_v20 = vpop.f32.mrf.mxu1 }
  0x8f   :  { %v128_v21 = vadd.f32 %v249_v10, %v127_v19  ;;  %v138_v22 = vadd.f32 %v249_v10, %v137_v20 }
  0x90   :  { %173 = vst.msk [vmem:[%s378_s3 + $0x40] sm:$0xff] %vm91_vm0, %v146_v17 }
  0x91   :  { %177 = vst.msk [vmem:[%s378_s3 + $0x60] sm:$0xff] %vm91_vm0, %v156_v18 }
  0x92   :  { %166 = vst.msk [vmem:[%s378_s3 + $0x8] sm:$0xff] %vm91_vm0, %v128_v21 }
  0x93   :  { %170 = vst.msk [vmem:[%s378_s3 + $0x28] sm:$0xff] %vm91_vm0, %v138_v22 }
  0x95   :  { %v147_v23 = vpop.f32.mrf.mxu2  ;;  %v157_v24 = vpop.f32.mrf.mxu3 }
  0x96   :  { %v148_v25 = vadd.f32 %v249_v10, %v147_v23  ;;  %v158_v26 = vadd.f32 %v249_v10, %v157_v24  ;;  %v130_v27 = vpop.f32.mrf.mxu0  ;;  %v140_v28 = vpop.f32.mrf.mxu1 }
  0x97   :  { %v131_v29 = vadd.f32 %v249_v10, %v130_v27  ;;  %v141_v30 = vadd.f32 %v249_v10, %v140_v28 }
  0x98   :  { %174 = vst.msk [vmem:[%s378_s3 + $0x48] sm:$0xff] %vm91_vm0, %v148_v25 }
  0x99   :  { %178 = vst.msk [vmem:[%s378_s3 + $0x68] sm:$0xff] %vm91_vm0, %v158_v26 }
  0x9a   :  { %167 = vst.msk [vmem:[%s378_s3 + $0x10] sm:$0xff] %vm91_vm0, %v131_v29 }
  0x9b   :  { %171 = vst.msk [vmem:[%s378_s3 + $0x30] sm:$0xff] %vm91_vm0, %v141_v30 }
  0x9d   :  { %v150_v31 = vpop.f32.mrf.mxu2  ;;  %v160_v32 = vpop.f32.mrf.mxu3 }
  0x9e   :  { %v151_v33 = vadd.f32 %v249_v10, %v150_v31  ;;  %v161_v34 = vadd.f32 %v249_v10, %v160_v32  ;;  %v132_v35 = vpop.f32.mrf.mxu0  ;;  %v142_v36 = vpop.f32.mrf.mxu1 }
  0x9f   :  { %v133_v37 = vadd.f32 %v249_v10, %v132_v35  ;;  %v143_v38 = vadd.f32 %v249_v10, %v142_v36 }
  0xa0   :  { %175 = vst.msk [vmem:[%s378_s3 + $0x50] sm:$0xff] %vm91_vm0, %v151_v33 }
  0xa1   :  { %179 = vst.msk [vmem:[%s378_s3 + $0x70] sm:$0xff] %vm91_vm0, %v161_v34 }
  0xa2   :  { %168 = vst.msk [vmem:[%s378_s3 + $0x18] sm:$0xff] %vm91_vm0, %v133_v37 }
  0xa3   :  { %172 = vst.msk [vmem:[%s378_s3 + $0x38] sm:$0xff] %vm91_vm0, %v143_v38 }
  0xa5   :  { %v152_v39 = vpop.f32.mrf.mxu2  ;;  %v162_v40 = vpop.f32.mrf.mxu3 }
  0xa6   :  { %v153_v41 = vadd.f32 %v249_v10, %v152_v39  ;;  %v163_v42 = vadd.f32 %v249_v10, %v162_v40 }
  0xa8   :  { %176 = vst.msk [vmem:[%s378_s3 + $0x58] sm:$0xff] %vm91_vm0, %v153_v41 }
  0xa9   :  { %180 = vst.msk [vmem:[%s378_s3 + $0x78] sm:$0xff] %vm91_vm0, %v163_v42 }

// kernel: resatomsegnet_s2_forward.25
= control target key start
LH: loop header
LB: loop body
LE: loop exit
PB: predicated region body
PF: predicated region fallthrough
CT: control target
= control target key end

     0   :  { %vm318_vm0 = vcmask 261120   ;;  %s1201_s1 = inlined_call_operand.vmem [shape: bf16[288,32], index: 1, kind: input, shape index: {}]   ;;  %s1202_s0 = inlined_call_operand.vmem [shape: bf16[128,288], index: 0, kind: input, shape index: {}]   ;;  %s1203_s2 = inlined_call_operand.vmem [shape: f32[1,32], index: 2, kind: input, shape index: {}]   ;;  %s1204_s3 = inlined_call_operand.vmem [shape: f32[128,32], index: 3, kind: input, shape index: {}]   ;;  %s1205_s4 = inlined_call_operand.vmem [shape: f32[128,32], index: 4, kind: output, shape index: {}]  }
   0x1   :  { %v797_v0 = vld [vmem:[%s1201_s1 + $0x38] sm:$0xff]  ;;  %v807_v1 = vld [vmem:[%s1201_s1 + $0x88] sm:$0xff]  ;;  %v796_v3 = vld [vmem:[%s1201_s1 + $0x30] sm:$0xff] }
   0x2   :  { %v805_v2 = vld [vmem:[%s1201_s1 + $0x78] sm:$0xff]  ;;  %343 = vmatpush.bf16.msra.mxu0 %v797_v0  ;;  %808 = vmatpush.bf16.msra.mxu3 %v797_v0  ;;  %v806_v4 = vld [vmem:[%s1201_s1 + $0x80] sm:$0xff]  ;;  %v804_v5 = vld [vmem:[%s1201_s1 + $0x70] sm:$0xff] }
   0x3   :  { %447 = vmatpush.bf16.msra.mxu2 %v807_v1  ;;  %392 = vmatpush.bf16.msra.mxu1 %v805_v2  ;;  %v600_v6 = vld [vmem:[%s1202_s0 + $0x8] sm:$0xf]  ;;  %v768_v7 = vld [vmem:[%s1202_s0 + $0x10] sm:$0xf0]  ;;  %v794_v11 = vld [vmem:[%s1201_s1 + $0x20] sm:$0xff] }
   0x4   :  { %v601_v8 = vor.u32 %v768_v7, %v600_v6  ;;  %v795_v9 = vld [vmem:[%s1201_s1 + $0x28] sm:$0xff]  ;;  %v802_v12 = vld [vmem:[%s1201_s1 + $0x60] sm:$0xff]  ;;  %v793_v13 = vld [vmem:[%s1201_s1 + $0x18] sm:$0xff] }
   0x5   :  { %v803_v10 = vld [vmem:[%s1201_s1 + $0x68] sm:$0xff]  ;;  %v801_v14 = vld [vmem:[%s1201_s1 + $0x58] sm:$0xff]  ;;  %v792_v15 = vld [vmem:[%s1201_s1 + $0x10] sm:$0xff] }
   0x6   :  { %344 = vmatpush.bf16.msra.mxu0 %v796_v3  ;;  %809 = vmatpush.bf16.msra.mxu3 %v796_v3  ;;  %v800_v16 = vld [vmem:[%s1201_s1 + $0x50] sm:$0xff]  ;;  %v612_v17 = vld [vmem:[%s1202_s0 + $0x20] sm:$0xf]  ;;  %v771_v18 = vld [vmem:[%s1202_s0 + $0x28] sm:$0xf0] }
   0x7   :  { %448 = vmatpush.bf16.msra.mxu2 %v806_v4  ;;  %393 = vmatpush.bf16.msra.mxu1 %v804_v5  ;;  %v613_v19 = vor.u32 %v771_v18, %v612_v17  ;;  %v791_v20 = vld [vmem:[%s1201_s1 + $0x8] sm:$0xff]  ;;  %v790_v22 = vld [vmem:[%s1201_s1] sm:$0xff]  ;;  %v664_v26 = vld [vmem:[%s1202_s0 + $0x90] sm:$0xf] }
   0x8   :  { %v799_v21 = vld [vmem:[%s1201_s1 + $0x48] sm:$0xff]  ;;  %v798_v23 = vld [vmem:[%s1201_s1 + $0x40] sm:$0xff]  ;;  %v785_v27 = vld [vmem:[%s1202_s0 + $0x98] sm:$0xf0] }
   0x9   :  { %v592_v24 = vld [vmem:[%s1202_s0] sm:$0xf]  ;;  %v767_v25 = vld [vmem:[%s1202_s0 + $0x8] sm:$0xf0]  ;;  %v766_v28 = vld [vmem:[%s1202_s0 + $0x4] sm:$0xf]  ;;  %v665_v31 = vor.u32 %v785_v27, %v664_v26 }
   0xa   :  { %758 = vmatmul.msk.bf16.vlgmr.msra.gmra.mxu2 %vm318_vm0, %v601_v8  ;;  %345 = vmatpush.bf16.msra.mxu0 %v795_v9  ;;  %v594_v29 = vld [vmem:[%s1202_s0 + $0xc] sm:$0xf0]  ;;  %v593_v30 = vor.u32 %v767_v25, %v592_v24  ;;  %v624_v33 = vld [vmem:[%s1202_s0 + $0x38] sm:$0xf]  ;;  %v774_v34 = vld [vmem:[%s1202_s0 + $0x40] sm:$0xf0] }
   0xb   :  { %810 = vmatpush.bf16.msra.mxu3 %v795_v9  ;;  %394 = vmatpush.bf16.msra.mxu1 %v803_v10  ;;  %v597_v32 = vor.u32 %v766_v28, %v594_v29  ;;  %v625_v35 = vor.u32 %v774_v34, %v624_v33  ;;  %v604_v36 = vld [vmem:[%s1202_s0 + $0x18] sm:$0xf]  ;;  %v770_v37 = vld [vmem:[%s1202_s0 + $0x20] sm:$0xf0]  ;;  %v676_v38 = vld [vmem:[%s1202_s0 + $0xa8] sm:$0xf] }
   0xc   :  { %v788_v39 = vld [vmem:[%s1202_s0 + $0xb0] sm:$0xf0]  ;;  %v769_v40 = vld [vmem:[%s1202_s0 + $0x1c] sm:$0xf]  ;;  %v606_v41 = vld [vmem:[%s1202_s0 + $0x24] sm:$0xf0]  ;;  %v605_v42 = vor.u32 %v770_v37, %v604_v36 }
   0xd   :  { %v677_v43 = vor.u32 %v788_v39, %v676_v38  ;;  %v609_v44 = vor.u32 %v769_v40, %v606_v41  ;;  %v636_v45 = vld [vmem:[%s1202_s0 + $0x50] sm:$0xf]  ;;  %v777_v46 = vld [vmem:[%s1202_s0 + $0x58] sm:$0xf0]  ;;  %v784_v50 = vld [vmem:[%s1202_s0 + $0x94] sm:$0xf] }
   0xe   :  { %346 = vmatpush.bf16.msra.mxu0 %v794_v11  ;;  %v637_v47 = vor.u32 %v777_v46, %v636_v45  ;;  %v616_v48 = vld [vmem:[%s1202_s0 + $0x30] sm:$0xf]  ;;  %v773_v49 = vld [vmem:[%s1202_s0 + $0x38] sm:$0xf0]  ;;  %v666_v51 = vld [vmem:[%s1202_s0 + $0x9c] sm:$0xf0] }
   0xf   :  { %811 = vmatpush.bf16.msra.mxu3 %v794_v11  ;;  %395 = vmatpush.bf16.msra.mxu1 %v802_v12  ;;  %v772_v52 = vld [vmem:[%s1202_s0 + $0x34] sm:$0xf]  ;;  %v618_v53 = vld [vmem:[%s1202_s0 + $0x3c] sm:$0xf0]  ;;  %v617_v54 = vor.u32 %v773_v49, %v616_v48  ;;  %v669_v55 = vor.u32 %v784_v50, %v666_v51  ;;  %v648_v57 = vld [vmem:[%s1202_s0 + $0x68] sm:$0xf] }
  0x10   :  { %v621_v56 = vor.u32 %v772_v52, %v618_v53  ;;  %v780_v58 = vld [vmem:[%s1202_s0 + $0x70] sm:$0xf0]  ;;  %v628_v60 = vld [vmem:[%s1202_s0 + $0x48] sm:$0xf]  ;;  %v787_v62 = vld [vmem:[%s1202_s0 + $0xac] sm:$0xf] }
  0x11   :  { %v649_v59 = vor.u32 %v780_v58, %v648_v57  ;;  %v776_v61 = vld [vmem:[%s1202_s0 + $0x50] sm:$0xf0]  ;;  %v678_v63 = vld [vmem:[%s1202_s0 + $0xb4] sm:$0xf0]  ;;  %v775_v0 = vld [vmem:[%s1202_s0 + $0x4c] sm:$0xf] }
  0x12   :  { %347 = vmatpush.bf16.msra.mxu0 %v793_v13  ;;  %v630_v1 = vld [vmem:[%s1202_s0 + $0x54] sm:$0xf0]  ;;  %v681_v3 = vor.u32 %v787_v62, %v678_v63  ;;  %v783_v6 = vld [vmem:[%s1202_s0 + $0x88] sm:$0xf0]  ;;  %v640_v8 = vld [vmem:[%s1202_s0 + $0x60] sm:$0xf] }
  0x13   :  { %812 = vmatpush.bf16.msra.mxu3 %v793_v13  ;;  %396 = vmatpush.bf16.msra.mxu1 %v801_v14  ;;  %v633_v4 = vor.u32 %v775_v0, %v630_v1  ;;  %v779_v9 = vld [vmem:[%s1202_s0 + $0x68] sm:$0xf0]  ;;  %v642_v11 = vld [vmem:[%s1202_s0 + $0x6c] sm:$0xf0]  ;;  %v652_v17 = vld [vmem:[%s1202_s0 + $0x78] sm:$0xf] }
  0x14   :  { %v782_v18 = vld [vmem:[%s1202_s0 + $0x80] sm:$0xf0]  ;;  %v789_v24 = vld [vmem:[%s1202_s0 + $0xb8] sm:$0xf0]  ;;  %v1059_v28 = vld [vmem:[%s1203_s2] ss:$0 sm:$0xff] }
  0x15   :  { %v490_v34 = vld [vmem:[%s1204_s3] sm:$0xff]  ;;  %v493_v0 = vld [vmem:[%s1204_s3 + $0x18] sm:$0xff] }
  0x16   :  { %348 = vmatpush.bf16.msra.mxu0 %v792_v15 }
  0x17   :  { %813 = vmatpush.bf16.msra.mxu3 %v792_v15  ;;  %397 = vmatpush.bf16.msra.mxu1 %v800_v16  ;;  %v786_v15 = vld [vmem:[%s1202_s0 + $0xa0] sm:$0xf0] }
  0x1a   :  { %759 = vmatmul.msk.bf16.gmra.mxu2 %vm318_vm0, %v613_v19  ;;  %349 = vmatpush.bf16.msra.mxu0 %v791_v20  ;;  %v781_v19 = vld [vmem:[%s1202_s0 + $0x7c] sm:$0xf] }
  0x1b   :  { %814 = vmatpush.bf16.msra.mxu3 %v791_v20  ;;  %398 = vmatpush.bf16.msra.mxu1 %v799_v21  ;;  %v654_v20 = vld [vmem:[%s1202_s0 + $0x84] sm:$0xf0] }
  0x1e   :  { %350 = vmatpush.bf16.msra.mxu0 %v790_v22 }
  0x1f   :  { %815 = vmatpush.bf16.msra.mxu3 %v790_v22  ;;  %399 = vmatpush.bf16.msra.mxu1 %v798_v23  ;;  %v657_v22 = vor.u32 %v781_v19, %v654_v20 }
  0x21   :  { %351 = vmatmul.bf16.vlgmr.msra.gmra.mxu0 %v593_v30 }
  0x22   :  { %381 = vmatmul.bf16.vlgmr.msra.gmra.mxu3 %v665_v31  ;;  %400 = vmatmul.bf16.vlgmr.msra.gmra.mxu1 %v597_v32 }
  0x23   :  { %816 = vmatpush.bf16.msrb.mxu3 %v805_v2  ;;  %v629_v2 = vor.u32 %v776_v61, %v628_v60 }
  0x27   :  { %817 = vmatpush.bf16.msrb.mxu3 %v804_v5  ;;  %v660_v5 = vld [vmem:[%s1202_s0 + $0x80] sm:$0xf] }
  0x28   :  { %v661_v7 = vor.u32 %v783_v6, %v660_v5 }
  0x2a   :  { %760 = vmatmul.msk.bf16.gmra.mxu2 %vm318_vm0, %v625_v35 }
  0x2b   :  { %818 = vmatpush.bf16.msrb.mxu3 %v803_v10  ;;  %v778_v10 = vld [vmem:[%s1202_s0 + $0x64] sm:$0xf] }
  0x2c   :  { %v645_v13 = vor.u32 %v778_v10, %v642_v11  ;;  %v494_v11 = vld [vmem:[%s1204_s3 + $0x20] sm:$0xff] }
  0x2f   :  { %819 = vmatpush.bf16.msrb.mxu3 %v802_v12  ;;  %v641_v12 = vor.u32 %v779_v9, %v640_v8 }
  0x31   :  { %356 = vmatmul.bf16.gmra.mxu0 %v605_v42 }
  0x32   :  { %386 = vmatmul.bf16.gmra.mxu3 %v677_v43  ;;  %405 = vmatmul.bf16.gmra.mxu1 %v609_v44  ;;  %v491_v44 = vld [vmem:[%s1204_s3 + $0x8] sm:$0xff] }
  0x33   :  { %820 = vmatpush.bf16.msrb.mxu3 %v801_v14  ;;  %v672_v14 = vld [vmem:[%s1202_s0 + $0x98] sm:$0xf] }
  0x37   :  { %821 = vmatpush.bf16.msrb.mxu3 %v800_v16  ;;  %v673_v16 = vor.u32 %v786_v15, %v672_v14 }
  0x3a   :  { %761 = vmatmul.msk.bf16.gmra.mxu2 %vm318_vm0, %v637_v47 }
  0x3b   :  { %822 = vmatpush.bf16.msrb.mxu3 %v799_v21  ;;  %v653_v21 = vor.u32 %v782_v18, %v652_v17 }
  0x3f   :  { %823 = vmatpush.bf16.msrb.mxu3 %v798_v23  ;;  %v684_v23 = vld [vmem:[%s1202_s0 + $0xb0] sm:$0xf] }
  0x40   :  { %v685_v25 = vor.u32 %v789_v24, %v684_v23 }
  0x41   :  { %361 = vmatmul.bf16.gmra.mxu0 %v617_v54  ;;  %v492_v54 = vld [vmem:[%s1204_s3 + $0x10] sm:$0xff] }
  0x42   :  { %430 = vmatmul.bf16.vlgmr.msrb.gmra.mxu3 %v669_v55  ;;  %410 = vmatmul.bf16.gmra.mxu1 %v621_v56 }
  0x4a   :  { %762 = vmatmul.msk.bf16.gmra.mxu2 %vm318_vm0, %v649_v59 }
  0x51   :  { %366 = vmatmul.bf16.gmra.mxu0 %v629_v2 }
  0x52   :  { %435 = vmatmul.bf16.gmra.mxu3 %v681_v3  ;;  %415 = vmatmul.bf16.gmra.mxu1 %v633_v4 }
  0x5a   :  { %763 = vmatmul.msk.bf16.gmra.mxu2 %vm318_vm0, %v661_v7 }
  0x61   :  { %371 = vmatmul.bf16.gmra.mxu0 %v641_v12 }
  0x62   :  { %420 = vmatmul.bf16.gmra.mxu1 %v645_v13 }
  0x6a   :  { %764 = vmatmul.msk.bf16.gmra.mxu2 %vm318_vm0, %v673_v16 }
  0x71   :  { %376 = vmatmul.bf16.gmra.mxu0 %v653_v21 }
  0x72   :  { %425 = vmatmul.bf16.gmra.mxu1 %v657_v22  ;;  %v495_v22 = vld [vmem:[%s1204_s3 + $0x28] sm:$0xff] }
  0x7a   :  { %765 = vmatmul.msk.bf16.gmra.mxu2 %vm318_vm0, %v685_v25 }
  0x8d   :  { %v450_v26 = vpop.f32.mrf.mxu2 }
  0x95   :  { %v452_v27 = vpop.f32.mrf.mxu2 }
  0x9d   :  { %v455_v29 = vpop.f32.mrf.mxu2 }
  0x9e   :  { %v352_v30 = vpop.f32.mrf.mxu0 }
  0x9f   :  { %v353_v31 = vadd.f32 %v1059_v28, %v352_v30  ;;  %v401_v32 = vpop.f32.mrf.mxu1 }
  0xa1   :  { %v402_v33 = vadd.f32 %v401_v32, %v353_v31 }
  0xa3   :  { %v451_v35 = vadd.f32 %v450_v26, %v402_v33 }
  0xa5   :  { %v506_v36 = vadd.f32 %v490_v34, %v451_v35  ;;  %v457_v37 = vpop.f32.mrf.mxu2  ;;  %v1089_v1 = vpop.f32.mrf.mxu3  ;;  %v496_v34 = vld [vmem:[%s1204_s3 + $0x30] sm:$0xff] }
  0xa6   :  { %v354_v38 = vpop.f32.mrf.mxu0 }
  0xa7   :  { %vm522_vm1 = vcmp.ge.f32.partialorder %v506_v36, 0.0  ;;  %v538_v39 = vmul.f32 0.01, %v506_v36  ;;  %v355_v40 = vadd.f32 %v1059_v28, %v354_v38  ;;  %v403_v41 = vpop.f32.mrf.mxu1 }
  0xa9   :  { %v554_v42 = vsel %vm522_vm1, %v506_v36, %v538_v39  ;;  %v404_v43 = vadd.f32 %v403_v41, %v355_v40 }
  0xaa   :  { %570 = vst.msk [vmem:[%s1205_s4] sm:$0xff] %vm318_vm0, %v554_v42 }
  0xab   :  { %v453_v45 = vadd.f32 %v452_v27, %v404_v43 }
  0xad   :  { %v507_v46 = vadd.f32 %v491_v44, %v453_v45  ;;  %v460_v47 = vpop.f32.mrf.mxu2  ;;  %v1099_v13 = vpop.f32.mrf.mxu3  ;;  %v497_v45 = vld [vmem:[%s1204_s3 + $0x38] sm:$0xff] }
  0xae   :  { %v357_v48 = vpop.f32.mrf.mxu0 }
  0xaf   :  { %vm523_vm2 = vcmp.ge.f32.partialorder %v507_v46, 0.0  ;;  %v539_v49 = vmul.f32 0.01, %v507_v46  ;;  %v358_v50 = vadd.f32 %v1059_v28, %v357_v48  ;;  %v406_v51 = vpop.f32.mrf.mxu1 }
  0xb1   :  { %v555_v52 = vsel %vm523_vm2, %v507_v46, %v539_v49  ;;  %v407_v53 = vadd.f32 %v406_v51, %v358_v50 }
  0xb2   :  { %571 = vst.msk [vmem:[%s1205_s4 + $0x8] sm:$0xff] %vm318_vm0, %v555_v52 }
  0xb3   :  { %v456_v55 = vadd.f32 %v455_v29, %v407_v53 }
  0xb5   :  { %v508_v56 = vadd.f32 %v492_v54, %v456_v55  ;;  %v462_v57 = vpop.f32.mrf.mxu2  ;;  %v1109_v27 = vpop.f32.mrf.mxu3  ;;  %v498_v55 = vld [vmem:[%s1204_s3 + $0x40] sm:$0xff] }
  0xb6   :  { %v359_v58 = vpop.f32.mrf.mxu0 }
  0xb7   :  { %vm524_vm3 = vcmp.ge.f32.partialorder %v508_v56, 0.0  ;;  %v540_v59 = vmul.f32 0.01, %v508_v56  ;;  %v360_v60 = vadd.f32 %v1059_v28, %v359_v58  ;;  %v408_v61 = vpop.f32.mrf.mxu1 }
  0xb9   :  { %v556_v62 = vsel %vm524_vm3, %v508_v56, %v540_v59  ;;  %v409_v63 = vadd.f32 %v408_v61, %v360_v60 }
  0xba   :  { %572 = vst.msk [vmem:[%s1205_s4 + $0x10] sm:$0xff] %vm318_vm0, %v556_v62 }
  0xbb   :  { %v458_v2 = vadd.f32 %v457_v37, %v409_v63 }
  0xbd   :  { %v509_v3 = vadd.f32 %v493_v0, %v458_v2  ;;  %v465_v4 = vpop.f32.mrf.mxu2  ;;  %v1120_v42 = vpop.f32.mrf.mxu3  ;;  %v383_v0 = vadd.f32 %v1059_v28, %v1089_v1  ;;  %v502_v1 = vld [vmem:[%s1204_s3 + $0x60] sm:$0xff] }
  0xbe   :  { %v362_v5 = vpop.f32.mrf.mxu0 }
  0xbf   :  { %vm525_vm4 = vcmp.ge.f32.partialorder %v509_v3, 0.0  ;;  %v541_v6 = vmul.f32 0.01, %v509_v3  ;;  %v363_v7 = vadd.f32 %v1059_v28, %v362_v5  ;;  %v411_v8 = vpop.f32.mrf.mxu1 }
  0xc1   :  { %v557_v9 = vsel %vm525_vm4, %v509_v3, %v541_v6  ;;  %v412_v10 = vadd.f32 %v411_v8, %v363_v7 }
  0xc2   :  { %573 = vst.msk [vmem:[%s1205_s4 + $0x18] sm:$0xff] %vm318_vm0, %v557_v9 }
  0xc3   :  { %v461_v12 = vadd.f32 %v460_v47, %v412_v10 }
  0xc5   :  { %v510_v14 = vadd.f32 %v494_v11, %v461_v12  ;;  %v467_v15 = vpop.f32.mrf.mxu2  ;;  %v431_v56 = vpop.f32.mrf.mxu3 }
  0xc6   :  { %v364_v16 = vpop.f32.mrf.mxu0  ;;  %v432_v6 = vadd.f32 %v431_v56, %v383_v0 }
  0xc7   :  { %vm526_vm5 = vcmp.ge.f32.partialorder %v510_v14, 0.0  ;;  %v542_v17 = vmul.f32 0.01, %v510_v14  ;;  %v365_v18 = vadd.f32 %v1059_v28, %v364_v16  ;;  %v413_v19 = vpop.f32.mrf.mxu1  ;;  %v385_v16 = vadd.f32 %v1059_v28, %v1099_v13 }
  0xc9   :  { %v558_v20 = vsel %vm526_vm5, %v510_v14, %v542_v17  ;;  %v414_v21 = vadd.f32 %v413_v19, %v365_v18 }
  0xca   :  { %574 = vst.msk [vmem:[%s1205_s4 + $0x20] sm:$0xff] %vm318_vm0, %v558_v20 }
  0xcb   :  { %v463_v23 = vadd.f32 %v462_v57, %v414_v21  ;;  %v500_v21 = vld [vmem:[%s1204_s3 + $0x50] sm:$0xff] }
  0xcd   :  { %v511_v24 = vadd.f32 %v495_v22, %v463_v23  ;;  %v470_v25 = vpop.f32.mrf.mxu2  ;;  %v433_v7 = vpop.f32.mrf.mxu3 }
  0xce   :  { %v367_v26 = vpop.f32.mrf.mxu0  ;;  %v434_v23 = vadd.f32 %v433_v7, %v385_v16 }
  0xcf   :  { %vm527_vm6 = vcmp.ge.f32.partialorder %v511_v24, 0.0  ;;  %v543_v29 = vmul.f32 0.01, %v511_v24  ;;  %v368_v30 = vadd.f32 %v1059_v28, %v367_v26  ;;  %v416_v31 = vpop.f32.mrf.mxu1  ;;  %v503_v26 = vld [vmem:[%s1204_s3 + $0x68] sm:$0xff] }
  0xd1   :  { %v559_v32 = vsel %vm527_vm6, %v511_v24, %v543_v29  ;;  %v417_v33 = vadd.f32 %v416_v31, %v368_v30 }
  0xd2   :  { %575 = vst.msk [vmem:[%s1205_s4 + $0x28] sm:$0xff] %vm318_vm0, %v559_v32 }
  0xd3   :  { %v466_v35 = vadd.f32 %v465_v4, %v417_v33  ;;  %v499_v4 = vld [vmem:[%s1204_s3 + $0x48] sm:$0xff] }
  0xd5   :  { %v512_v36 = vadd.f32 %v496_v34, %v466_v35  ;;  %v472_v37 = vpop.f32.mrf.mxu2  ;;  %v436_v31 = vpop.f32.mrf.mxu3  ;;  %v388_v35 = vadd.f32 %v1059_v28, %v1109_v27 }
  0xd6   :  { %v369_v38 = vpop.f32.mrf.mxu0 }
  0xd7   :  { %vm528_vm7 = vcmp.ge.f32.partialorder %v512_v36, 0.0  ;;  %v544_v39 = vmul.f32 0.01, %v512_v36  ;;  %v370_v40 = vadd.f32 %v1059_v28, %v369_v38  ;;  %v418_v41 = vpop.f32.mrf.mxu1 }
  0xd9   :  { %v560_v43 = vsel %vm528_vm7, %v512_v36, %v544_v39  ;;  %v419_v44 = vadd.f32 %v418_v41, %v370_v40  ;;  %v501_v40 = vld [vmem:[%s1204_s3 + $0x58] sm:$0xff] }
  0xda   :  { %576 = vst.msk [vmem:[%s1205_s4 + $0x30] sm:$0xff] %vm318_vm0, %v560_v43  ;;  %v437_v43 = vadd.f32 %v436_v31, %v388_v35 }
  0xdb   :  { %v468_v46 = vadd.f32 %v467_v15, %v419_v44 }
  0xdd   :  { %v513_v47 = vadd.f32 %v497_v45, %v468_v46  ;;  %v475_v48 = vpop.f32.mrf.mxu2  ;;  %v504_v46 = vld [vmem:[%s1204_s3 + $0x70] sm:$0xff] }
  0xde   :  { %v372_v49 = vpop.f32.mrf.mxu0 }
  0xdf   :  { %vm529_vm8 = vcmp.ge.f32.partialorder %v513_v47, 0.0  ;;  %v545_v50 = vmul.f32 0.01, %v513_v47  ;;  %v373_v51 = vadd.f32 %v1059_v28, %v372_v49  ;;  %v421_v52 = vpop.f32.mrf.mxu1  ;;  %v390_v49 = vadd.f32 %v1059_v28, %v1120_v42 }
  0xe1   :  { %v561_v53 = vsel %vm529_vm8, %v513_v47, %v545_v50  ;;  %v422_v54 = vadd.f32 %v421_v52, %v373_v51  ;;  %v438_v51 = vpop.f32.mrf.mxu3 }
  0xe2   :  { %577 = vst.msk [vmem:[%s1205_s4 + $0x38] sm:$0xff] %vm318_vm0, %v561_v53 }
  0xe3   :  { %v471_v57 = vadd.f32 %v470_v25, %v422_v54  ;;  %v439_v54 = vadd.f32 %v438_v51, %v390_v49 }
  0xe5   :  { %v514_v58 = vadd.f32 %v498_v55, %v471_v57  ;;  %v477_v59 = vpop.f32.mrf.mxu2 }
  0xe6   :  { %v374_v60 = vpop.f32.mrf.mxu0 }
  0xe7   :  { %vm530_vm9 = vcmp.ge.f32.partialorder %v514_v58, 0.0  ;;  %v546_v61 = vmul.f32 0.01, %v514_v58  ;;  %v375_v62 = vadd.f32 %v1059_v28, %v374_v60  ;;  %v423_v63 = vpop.f32.mrf.mxu1 }
  0xe9   :  { %v562_v2 = vsel %vm530_vm9, %v514_v58, %v546_v61  ;;  %v424_v3 = vadd.f32 %v423_v63, %v375_v62 }
  0xea   :  { %578 = vst.msk [vmem:[%s1205_s4 + $0x40] sm:$0xff] %vm318_vm0, %v562_v2 }
  0xeb   :  { %v473_v5 = vadd.f32 %v472_v37, %v424_v3 }
  0xed   :  { %v515_v8 = vadd.f32 %v499_v4, %v473_v5  ;;  %v480_v9 = vpop.f32.mrf.mxu2 }
  0xee   :  { %v481_v10 = vadd.f32 %v480_v9, %v432_v6  ;;  %v377_v11 = vpop.f32.mrf.mxu0 }
  0xef   :  { %vm531_vm10 = vcmp.ge.f32.partialorder %v515_v8, 0.0  ;;  %v547_v12 = vmul.f32 0.01, %v515_v8  ;;  %v378_v14 = vadd.f32 %v1059_v28, %v377_v11  ;;  %v426_v15 = vpop.f32.mrf.mxu1 }
  0xf0   :  { %v518_v17 = vadd.f32 %v502_v1, %v481_v10 }
  0xf1   :  { %v563_v18 = vsel %vm531_vm10, %v515_v8, %v547_v12  ;;  %v427_v19 = vadd.f32 %v426_v15, %v378_v14 }
  0xf2   :  { %579 = vst.msk [vmem:[%s1205_s4 + $0x48] sm:$0xff] %vm318_vm0, %v563_v18  ;;  %vm534_vm11 = vcmp.ge.f32.partialorder %v518_v17, 0.0  ;;  %v550_v20 = vmul.f32 0.01, %v518_v17 }
  0xf3   :  { %v476_v22 = vadd.f32 %v475_v48, %v427_v19 }
  0xf4   :  { %v566_v24 = vsel %vm534_vm11, %v518_v17, %v550_v20 }
  0xf5   :  { %582 = vst.msk [vmem:[%s1205_s4 + $0x60] sm:$0xff] %vm318_vm0, %v566_v24  ;;  %v516_v13 = vadd.f32 %v500_v21, %v476_v22  ;;  %v482_v25 = vpop.f32.mrf.mxu2 }
  0xf6   :  { %v483_v29 = vadd.f32 %v482_v25, %v434_v23  ;;  %v379_v30 = vpop.f32.mrf.mxu0 }
  0xf7   :  { %vm532_vm12 = vcmp.ge.f32.partialorder %v516_v13, 0.0  ;;  %v548_v32 = vmul.f32 0.01, %v516_v13  ;;  %v380_v33 = vadd.f32 %v1059_v28, %v379_v30  ;;  %v428_v34 = vpop.f32.mrf.mxu1  ;;  %v505_v28 = vld [vmem:[%s1204_s3 + $0x78] sm:$0xff] }
  0xf8   :  { %v519_v36 = vadd.f32 %v503_v26, %v483_v29 }
  0xf9   :  { %v564_v37 = vsel %vm532_vm12, %v516_v13, %v548_v32  ;;  %v429_v38 = vadd.f32 %v428_v34, %v380_v33 }
  0xfa   :  { %580 = vst.msk [vmem:[%s1205_s4 + $0x50] sm:$0xff] %vm318_vm0, %v564_v37  ;;  %vm535_vm13 = vcmp.ge.f32.partialorder %v519_v36, 0.0  ;;  %v551_v39 = vmul.f32 0.01, %v519_v36 }
  0xfb   :  { %v478_v41 = vadd.f32 %v477_v59, %v429_v38 }
  0xfc   :  { %v567_v44 = vsel %vm535_vm13, %v519_v36, %v551_v39 }
  0xfd   :  { %583 = vst.msk [vmem:[%s1205_s4 + $0x68] sm:$0xff] %vm318_vm0, %v567_v44  ;;  %v517_v27 = vadd.f32 %v501_v40, %v478_v41  ;;  %v485_v45 = vpop.f32.mrf.mxu2 }
  0xfe   :  { %v486_v47 = vadd.f32 %v485_v45, %v437_v43 }
  0xff   :  { %vm533_vm14 = vcmp.ge.f32.partialorder %v517_v27, 0.0  ;;  %v549_v48 = vmul.f32 0.01, %v517_v27 }
 0x100   :  { %v520_v50 = vadd.f32 %v504_v46, %v486_v47 }
 0x101   :  { %v565_v52 = vsel %vm533_vm14, %v517_v27, %v549_v48 }
 0x102   :  { %581 = vst.msk [vmem:[%s1205_s4 + $0x58] sm:$0xff] %vm318_vm0, %v565_v52  ;;  %vm536_vm15 = vcmp.ge.f32.partialorder %v520_v50, 0.0  ;;  %v552_v53 = vmul.f32 0.01, %v520_v50 }
 0x104   :  { %v568_v55 = vsel %vm536_vm15, %v520_v50, %v552_v53 }
 0x105   :  { %584 = vst.msk [vmem:[%s1205_s4 + $0x70] sm:$0xff] %vm318_vm0, %v568_v55  ;;  %v487_v56 = vpop.f32.mrf.mxu2 }
 0x106   :  { %v488_v42 = vadd.f32 %v487_v56, %v439_v54 }
 0x108   :  { %v521_v57 = vadd.f32 %v505_v28, %v488_v42 }
 0x10a   :  { %vm537_vm1 = vcmp.ge.f32.partialorder %v521_v57, 0.0  ;;  %v553_v58 = vmul.f32 0.01, %v521_v57 }
 0x10c   :  { %v569_v59 = vsel %vm537_vm1, %v521_v57, %v553_v58 }
 0x10d   :  { %585 = vst.msk [vmem:[%s1205_s4 + $0x78] sm:$0xff] %vm318_vm0, %v569_v59 }

// kernel: resatomsegnet_s2_forward.29
= control target key start
LH: loop header
LB: loop body
LE: loop exit
PB: predicated region body
PF: predicated region fallthrough
CT: control target
= control target key end

     0   :  { %vm49_vm0 = vcmask 261120   ;;  %vm75_vm1 = vcmask 523264   ;;  %s156_s1 = inlined_call_operand.vmem [shape: bf16[32,64], index: 1, kind: input, shape index: {}]   ;;  %s157_s2 = inlined_call_operand.vmem [shape: f32[1,64], index: 2, kind: input, shape index: {}]   ;;  %s158_s0 = inlined_call_operand.vmem [shape: bf16[32,32], index: 0, kind: input, shape index: {}]   ;;  %s159_s3 = inlined_call_operand.vmem [shape: f32[32,64], index: 3, kind: output, shape index: {}]  }
   0x1   :  { %v105_v0 = vld [vmem:[%s156_s1 + $0x8] sm:$0xff]  ;;  %v104_v1 = vld [vmem:[%s156_s1] sm:$0xff] }
   0x2   :  { %62 = vmatpush.bf16.msra.mxu0 %v105_v0  ;;  %106 = vmatpush.bf16.msra.mxu1 %v105_v0  ;;  %v102_v2 = vld [vmem:[%s158_s0] sm:$0xff]  ;;  %v103_v3 = vld [vmem:[%s158_s0 + $0x8] sm:$0xff] }
   0x3   :  { %v108_v4 = vld [vmem:[%s157_s2] ss:$0 sm:$0xff] }
   0x6   :  { %63 = vmatpush.bf16.msra.mxu0 %v104_v1  ;;  %107 = vmatpush.bf16.msra.mxu1 %v104_v1 }
   0x9   :  { %100 = vmatmul.msk.bf16.vlgmr.msra.gmra.mxu0 %vm49_vm0, %v102_v2  ;;  %101 = vmatmul.msk.bf16.vlgmr.msra.gmra.mxu1 %vm49_vm0, %v103_v3 }
  0x86   :  { %v65_v5 = vpop.f32.mrf.mxu0  ;;  %v70_v6 = vpop.f32.mrf.mxu1 }
  0x87   :  { %v66_v7 = vadd.f32 %v108_v4, %v65_v5  ;;  %v71_v8 = vadd.f32 %v108_v4, %v70_v6 }
  0x89   :  { %76 = vst.msk [vmem:[%s159_s3] sm:$0xff] %vm75_vm1, %v66_v7 }
  0x8a   :  { %78 = vst.msk [vmem:[%s159_s3 + $0x10] sm:$0xff] %vm75_vm1, %v71_v8 }
  0x8e   :  { %v67_v9 = vpop.f32.mrf.mxu0  ;;  %v72_v10 = vpop.f32.mrf.mxu1 }
  0x8f   :  { %v68_v11 = vadd.f32 %v108_v4, %v67_v9  ;;  %v73_v12 = vadd.f32 %v108_v4, %v72_v10 }
  0x91   :  { %77 = vst.msk [vmem:[%s159_s3 + $0x8] sm:$0xff] %vm75_vm1, %v68_v11 }
  0x92   :  { %79 = vst.msk [vmem:[%s159_s3 + $0x18] sm:$0xff] %vm75_vm1, %v73_v12 }

// kernel: resatomsegnet_s2_forward.32
= control target key start
LH: loop header
LB: loop body
LE: loop exit
PB: predicated region body
PF: predicated region fallthrough
CT: control target
= control target key end

     0   :  { %vm65_vm0 = vcmask 523264   ;;  %s195_s1 = inlined_call_operand.vmem [shape: bf16[64,64], index: 1, kind: input, shape index: {}]   ;;  %s196_s2 = inlined_call_operand.vmem [shape: f32[1,64], index: 2, kind: input, shape index: {}]   ;;  %s197_s0 = inlined_call_operand.vmem [shape: bf16[32,64], index: 0, kind: input, shape index: {}]   ;;  %s198_s3 = inlined_call_operand.vmem [shape: f32[32,64], index: 3, kind: output, shape index: {}]  }
   0x1   :  { %v130_v0 = vld [vmem:[%s195_s1 + $0x18] sm:$0xff]  ;;  %v129_v1 = vld [vmem:[%s195_s1 + $0x10] sm:$0xff]  ;;  %v128_v2 = vld [vmem:[%s195_s1 + $0x8] sm:$0xff] }
   0x2   :  { %76 = vmatpush.bf16.msra.mxu0 %v130_v0  ;;  %131 = vmatpush.bf16.msra.mxu1 %v130_v0  ;;  %v127_v3 = vld [vmem:[%s195_s1] sm:$0xff]  ;;  %v126_v5 = vld [vmem:[%s197_s0 + $0x8] sm:$0xff] }
   0x3   :  { %v125_v4 = vld [vmem:[%s197_s0] sm:$0xff] }
   0x4   :  { %v135_v6 = vld [vmem:[%s196_s2] ss:$0 sm:$0xff] }
   0x6   :  { %77 = vmatpush.bf16.msra.mxu0 %v129_v1  ;;  %132 = vmatpush.bf16.msra.mxu1 %v129_v1 }
   0xa   :  { %78 = vmatpush.bf16.msra.mxu0 %v128_v2  ;;  %133 = vmatpush.bf16.msra.mxu1 %v128_v2 }
   0xe   :  { %79 = vmatpush.bf16.msra.mxu0 %v127_v3  ;;  %134 = vmatpush.bf16.msra.mxu1 %v127_v3 }
  0x11   :  { %123 = vmatmul.msk.bf16.vlgmr.msra.gmra.mxu0 %vm65_vm0, %v125_v4  ;;  %124 = vmatmul.msk.bf16.vlgmr.msra.gmra.mxu1 %vm65_vm0, %v126_v5 }
  0x8e   :  { %v81_v7 = vpop.f32.mrf.mxu0  ;;  %v86_v8 = vpop.f32.mrf.mxu1 }
  0x8f   :  { %v82_v9 = vadd.f32 %v135_v6, %v81_v7  ;;  %v87_v10 = vadd.f32 %v135_v6, %v86_v8 }
  0x91   :  { %91 = vst.msk [vmem:[%s198_s3] sm:$0xff] %vm65_vm0, %v82_v9 }
  0x92   :  { %93 = vst.msk [vmem:[%s198_s3 + $0x10] sm:$0xff] %vm65_vm0, %v87_v10 }
  0x96   :  { %v83_v11 = vpop.f32.mrf.mxu0  ;;  %v88_v12 = vpop.f32.mrf.mxu1 }
  0x97   :  { %v84_v13 = vadd.f32 %v135_v6, %v83_v11  ;;  %v89_v14 = vadd.f32 %v135_v6, %v88_v12 }
  0x99   :  { %92 = vst.msk [vmem:[%s198_s3 + $0x8] sm:$0xff] %vm65_vm0, %v84_v13 }
  0x9a   :  { %94 = vst.msk [vmem:[%s198_s3 + $0x18] sm:$0xff] %vm65_vm0, %v89_v14 }

// kernel: resatomsegnet_s2_forward.31
= control target key start
LH: loop header
LB: loop body
LE: loop exit
PB: predicated region body
PF: predicated region fallthrough
CT: control target
= control target key end

     0   :  { %vm372_vm0 = vcmask 523264   ;;  %s965_s1 = inlined_call_operand.vmem [shape: bf16[576,64], index: 1, kind: input, shape index: {}]   ;;  %s966_s2 = inlined_call_operand.vmem [shape: f32[1,64], index: 2, kind: input, shape index: {}]   ;;  %s967_s0 = inlined_call_operand.vmem [shape: bf16[32,576], index: 0, kind: input, shape index: {}]   ;;  %s968_s3 = inlined_call_operand.vmem [shape: f32[32,64], index: 3, kind: input, shape index: {}]   ;;  %s969_s4 = inlined_call_operand.vmem [shape: f32[32,64], index: 4, kind: output, shape index: {}]  }
   0x1   :  { %v705_v0 = vld [vmem:[%s965_s1 + $0x38] sm:$0xff]  ;;  %v704_v4 = vld [vmem:[%s965_s1 + $0x30] sm:$0xff]  ;;  %v703_v8 = vld [vmem:[%s965_s1 + $0x28] sm:$0xff] }
   0x2   :  { %v713_v1 = vld [vmem:[%s965_s1 + $0x78] sm:$0xff]  ;;  %379 = vmatpush.bf16.msra.mxu0 %v705_v0  ;;  %v712_v5 = vld [vmem:[%s965_s1 + $0x70] sm:$0xff]  ;;  %v711_v9 = vld [vmem:[%s965_s1 + $0x68] sm:$0xff] }
   0x3   :  { %v721_v2 = vld [vmem:[%s965_s1 + $0xb8] sm:$0xff]  ;;  %398 = vmatpush.bf16.msra.mxu1 %v713_v1  ;;  %v720_v6 = vld [vmem:[%s965_s1 + $0xb0] sm:$0xff]  ;;  %v719_v10 = vld [vmem:[%s965_s1 + $0xa8] sm:$0xff] }
   0x4   :  { %v729_v3 = vld [vmem:[%s965_s1 + $0xf8] sm:$0xff]  ;;  %417 = vmatpush.bf16.msra.mxu2 %v721_v2  ;;  %v728_v7 = vld [vmem:[%s965_s1 + $0xf0] sm:$0xff]  ;;  %v727_v11 = vld [vmem:[%s965_s1 + $0xe8] sm:$0xff] }
   0x5   :  { %436 = vmatpush.bf16.msra.mxu3 %v729_v3  ;;  %v702_v12 = vld [vmem:[%s965_s1 + $0x20] sm:$0xff]  ;;  %v701_v16 = vld [vmem:[%s965_s1 + $0x18] sm:$0xff]  ;;  %v700_v20 = vld [vmem:[%s965_s1 + $0x10] sm:$0xff] }
   0x6   :  { %380 = vmatpush.bf16.msra.mxu0 %v704_v4  ;;  %v710_v13 = vld [vmem:[%s965_s1 + $0x60] sm:$0xff]  ;;  %v709_v17 = vld [vmem:[%s965_s1 + $0x58] sm:$0xff]  ;;  %v708_v21 = vld [vmem:[%s965_s1 + $0x50] sm:$0xff] }
   0x7   :  { %399 = vmatpush.bf16.msra.mxu1 %v712_v5  ;;  %v718_v14 = vld [vmem:[%s965_s1 + $0xa0] sm:$0xff]  ;;  %v717_v18 = vld [vmem:[%s965_s1 + $0x98] sm:$0xff]  ;;  %v716_v22 = vld [vmem:[%s965_s1 + $0x90] sm:$0xff] }
   0x8   :  { %418 = vmatpush.bf16.msra.mxu2 %v720_v6  ;;  %v726_v15 = vld [vmem:[%s965_s1 + $0xe0] sm:$0xff]  ;;  %v725_v19 = vld [vmem:[%s965_s1 + $0xd8] sm:$0xff]  ;;  %v724_v23 = vld [vmem:[%s965_s1 + $0xd0] sm:$0xff] }
   0x9   :  { %437 = vmatpush.bf16.msra.mxu3 %v728_v7  ;;  %v699_v24 = vld [vmem:[%s965_s1 + $0x8] sm:$0xff]  ;;  %v698_v28 = vld [vmem:[%s965_s1] sm:$0xff]  ;;  %v690_v33 = vld [vmem:[%s967_s0 + $0x10] sm:$0xf0] }
   0xa   :  { %381 = vmatpush.bf16.msra.mxu0 %v703_v8  ;;  %v707_v25 = vld [vmem:[%s965_s1 + $0x48] sm:$0xff]  ;;  %v706_v29 = vld [vmem:[%s965_s1 + $0x40] sm:$0xff]  ;;  %v506_v35 = vld [vmem:[%s967_s0 + $0x14] sm:$0xf0] }
   0xb   :  { %400 = vmatpush.bf16.msra.mxu1 %v711_v9  ;;  %v715_v26 = vld [vmem:[%s965_s1 + $0x88] sm:$0xff]  ;;  %v714_v30 = vld [vmem:[%s965_s1 + $0x80] sm:$0xff]  ;;  %v691_v37 = vld [vmem:[%s967_s0 + $0x18] sm:$0xf0] }
   0xc   :  { %419 = vmatpush.bf16.msra.mxu2 %v719_v10  ;;  %v723_v27 = vld [vmem:[%s965_s1 + $0xc8] sm:$0xff]  ;;  %v722_v31 = vld [vmem:[%s965_s1 + $0xc0] sm:$0xff]  ;;  %v733_v40 = vld [vmem:[%s965_s1 + $0x118] sm:$0xff] }
   0xd   :  { %438 = vmatpush.bf16.msra.mxu3 %v727_v11  ;;  %v504_v32 = vld [vmem:[%s967_s0] sm:$0xf]  ;;  %v688_v34 = vld [vmem:[%s967_s0 + $0x4] sm:$0xf]  ;;  %v512_v36 = vld [vmem:[%s967_s0 + $0x8] sm:$0xf] }
   0xe   :  { %382 = vmatpush.bf16.msra.mxu0 %v702_v12  ;;  %v689_v38 = vld [vmem:[%s967_s0 + $0xc] sm:$0xf]  ;;  %v514_v39 = vld [vmem:[%s967_s0 + $0x1c] sm:$0xf0]  ;;  %v505_v41 = vor.u32 %v690_v33, %v504_v32  ;;  %v509_v42 = vor.u32 %v688_v34, %v506_v35  ;;  %v513_v43 = vor.u32 %v691_v37, %v512_v36  ;;  %v732_v45 = vld [vmem:[%s965_s1 + $0x110] sm:$0xff] }
   0xf   :  { %401 = vmatpush.bf16.msra.mxu1 %v710_v13  ;;  %v517_v44 = vor.u32 %v689_v38, %v514_v39  ;;  %v731_v46 = vld [vmem:[%s965_s1 + $0x108] sm:$0xff]  ;;  %v730_v47 = vld [vmem:[%s965_s1 + $0x100] sm:$0xff]  ;;  %v695_v49 = vld [vmem:[%s967_s0 + $0x38] sm:$0xf0] }
  0x10   :  { %420 = vmatpush.bf16.msra.mxu2 %v718_v14  ;;  %v524_v48 = vld [vmem:[%s967_s0 + $0x28] sm:$0xf]  ;;  %v693_v50 = vld [vmem:[%s967_s0 + $0x2c] sm:$0xf]  ;;  %v526_v51 = vld [vmem:[%s967_s0 + $0x3c] sm:$0xf0] }
  0x11   :  { %439 = vmatpush.bf16.msra.mxu3 %v726_v15  ;;  %v532_v52 = vld [vmem:[%s967_s0 + $0x30] sm:$0xf]  ;;  %v696_v53 = vld [vmem:[%s967_s0 + $0x40] sm:$0xf0]  ;;  %v694_v54 = vld [vmem:[%s967_s0 + $0x34] sm:$0xf]  ;;  %v525_v56 = vor.u32 %v695_v49, %v524_v48  ;;  %v529_v57 = vor.u32 %v693_v50, %v526_v51 }
  0x12   :  { %383 = vmatpush.bf16.msra.mxu0 %v701_v16  ;;  %v534_v55 = vld [vmem:[%s967_s0 + $0x44] sm:$0xf0]  ;;  %v533_v58 = vor.u32 %v696_v53, %v532_v52  ;;  %v520_v60 = vld [vmem:[%s967_s0 + $0x10] sm:$0xf]  ;;  %v692_v61 = vld [vmem:[%s967_s0 + $0x20] sm:$0xf0] }
  0x13   :  { %402 = vmatpush.bf16.msra.mxu1 %v709_v17  ;;  %v537_v59 = vor.u32 %v694_v54, %v534_v55  ;;  %v540_v62 = vld [vmem:[%s967_s0 + $0x38] sm:$0xf]  ;;  %v697_v63 = vld [vmem:[%s967_s0 + $0x48] sm:$0xf0]  ;;  %v521_v0 = vor.u32 %v692_v61, %v520_v60  ;;  %v738_v11 = vld [vmem:[%s966_s2] ss:$0 sm:$0xff] }
  0x14   :  { %421 = vmatpush.bf16.msra.mxu2 %v717_v18  ;;  %v541_v1 = vor.u32 %v697_v63, %v540_v62  ;;  %v475_v48 = vld [vmem:[%s968_s3 + $0x8] sm:$0xff]  ;;  %v477_v50 = vld [vmem:[%s968_s3 + $0x18] sm:$0xff] }
  0x15   :  { %440 = vmatpush.bf16.msra.mxu3 %v725_v19 }
  0x16   :  { %384 = vmatpush.bf16.msra.mxu0 %v700_v20 }
  0x17   :  { %403 = vmatpush.bf16.msra.mxu1 %v708_v21 }
  0x18   :  { %422 = vmatpush.bf16.msra.mxu2 %v716_v22 }
  0x19   :  { %441 = vmatpush.bf16.msra.mxu3 %v724_v23 }
  0x1a   :  { %385 = vmatpush.bf16.msra.mxu0 %v699_v24 }
  0x1b   :  { %404 = vmatpush.bf16.msra.mxu1 %v707_v25 }
  0x1c   :  { %423 = vmatpush.bf16.msra.mxu2 %v715_v26 }
  0x1d   :  { %442 = vmatpush.bf16.msra.mxu3 %v723_v27 }
  0x1e   :  { %386 = vmatpush.bf16.msra.mxu0 %v698_v28 }
  0x1f   :  { %405 = vmatpush.bf16.msra.mxu1 %v706_v29  ;;  %v474_v29 = vld [vmem:[%s968_s3] sm:$0xff] }
  0x20   :  { %424 = vmatpush.bf16.msra.mxu2 %v714_v30 }
  0x21   :  { %443 = vmatpush.bf16.msra.mxu3 %v722_v31  ;;  %387 = vmatmul.bf16.vlgmr.msra.gmra.mxu0 %v505_v41  ;;  %v476_v31 = vld [vmem:[%s968_s3 + $0x10] sm:$0xff] }
  0x22   :  { %459 = vmatpush.bf16.msrb.mxu0 %v733_v40  ;;  %406 = vmatmul.bf16.vlgmr.msra.gmra.mxu1 %v509_v42 }
  0x23   :  { %734 = vmatpush.bf16.msrb.mxu1 %v733_v40  ;;  %425 = vmatmul.bf16.vlgmr.msra.gmra.mxu2 %v513_v43 }
  0x24   :  { %444 = vmatmul.bf16.vlgmr.msra.gmra.mxu3 %v517_v44 }
  0x26   :  { %460 = vmatpush.bf16.msrb.mxu0 %v732_v45 }
  0x27   :  { %735 = vmatpush.bf16.msrb.mxu1 %v732_v45 }
  0x2a   :  { %461 = vmatpush.bf16.msrb.mxu0 %v731_v46 }
  0x2b   :  { %736 = vmatpush.bf16.msrb.mxu1 %v731_v46 }
  0x2e   :  { %462 = vmatpush.bf16.msrb.mxu0 %v730_v47 }
  0x2f   :  { %737 = vmatpush.bf16.msrb.mxu1 %v730_v47 }
  0x31   :  { %392 = vmatmul.bf16.gmra.mxu0 %v525_v56 }
  0x32   :  { %411 = vmatmul.bf16.gmra.mxu1 %v529_v57 }
  0x33   :  { %430 = vmatmul.bf16.gmra.mxu2 %v533_v58 }
  0x34   :  { %449 = vmatmul.bf16.gmra.mxu3 %v537_v59 }
  0x41   :  { %686 = vmatmul.msk.bf16.vlgmr.msrb.gmra.mxu0 %vm372_vm0, %v521_v0 }
  0x42   :  { %687 = vmatmul.msk.bf16.vlgmr.msrb.gmra.mxu1 %vm372_vm0, %v541_v1 }
  0x9e   :  { %v388_v2 = vpop.f32.mrf.mxu0 }
  0x9f   :  { %v407_v3 = vpop.f32.mrf.mxu1  ;;  %v389_v13 = vadd.f32 %v738_v11, %v388_v2 }
  0xa1   :  { %v408_v18 = vadd.f32 %v407_v3, %v389_v13 }
  0xa6   :  { %v426_v4 = vpop.f32.mrf.mxu2  ;;  %v390_v6 = vpop.f32.mrf.mxu0 }
  0xa7   :  { %v445_v5 = vpop.f32.mrf.mxu3  ;;  %v409_v7 = vpop.f32.mrf.mxu1  ;;  %v427_v20 = vadd.f32 %v426_v4, %v408_v18  ;;  %v391_v23 = vadd.f32 %v738_v11, %v390_v6 }
  0xa9   :  { %v446_v25 = vadd.f32 %v445_v5, %v427_v20  ;;  %v410_v32 = vadd.f32 %v409_v7, %v391_v23 }
  0xae   :  { %v428_v8 = vpop.f32.mrf.mxu2  ;;  %v393_v9 = vpop.f32.mrf.mxu0 }
  0xaf   :  { %v412_v10 = vpop.f32.mrf.mxu1  ;;  %v447_v12 = vpop.f32.mrf.mxu3  ;;  %v394_v14 = vadd.f32 %v738_v11, %v393_v9  ;;  %v429_v36 = vadd.f32 %v428_v8, %v410_v32 }
  0xb1   :  { %v413_v19 = vadd.f32 %v412_v10, %v394_v14  ;;  %v448_v43 = vadd.f32 %v447_v12, %v429_v36 }
  0xb6   :  { %v431_v15 = vpop.f32.mrf.mxu2  ;;  %v395_v16 = vpop.f32.mrf.mxu0 }
  0xb7   :  { %v414_v17 = vpop.f32.mrf.mxu1  ;;  %v432_v21 = vadd.f32 %v431_v15, %v413_v19  ;;  %v450_v22 = vpop.f32.mrf.mxu3  ;;  %v396_v24 = vadd.f32 %v738_v11, %v395_v16 }
  0xb9   :  { %v451_v26 = vadd.f32 %v450_v22, %v432_v21  ;;  %v415_v33 = vadd.f32 %v414_v17, %v396_v24 }
  0xbe   :  { %v433_v27 = vpop.f32.mrf.mxu2  ;;  %v464_v28 = vpop.f32.mrf.mxu0 }
  0xbf   :  { %v469_v30 = vpop.f32.mrf.mxu1  ;;  %v465_v34 = vadd.f32 %v464_v28, %v446_v25  ;;  %v434_v37 = vadd.f32 %v433_v27, %v415_v33  ;;  %v452_v42 = vpop.f32.mrf.mxu3 }
  0xc0   :  { %v470_v35 = vadd.f32 %v469_v30, %v451_v26 }
  0xc1   :  { %v478_v38 = vadd.f32 %v474_v29, %v465_v34  ;;  %v453_v44 = vadd.f32 %v452_v42, %v434_v37 }
  0xc2   :  { %v480_v39 = vadd.f32 %v476_v31, %v470_v35 }
  0xc3   :  { %vm482_vm1 = vcmp.ge.f32.partialorder %v478_v38, 0.0  ;;  %v486_v40 = vmul.f32 0.01, %v478_v38 }
  0xc4   :  { %vm484_vm2 = vcmp.ge.f32.partialorder %v480_v39, 0.0  ;;  %v488_v41 = vmul.f32 0.01, %v480_v39 }
  0xc5   :  { %v490_v45 = vsel %vm482_vm1, %v478_v38, %v486_v40 }
  0xc6   :  { %v492_v46 = vsel %vm484_vm2, %v480_v39, %v488_v41  ;;  %494 = vst.msk [vmem:[%s969_s4] sm:$0xff] %vm372_vm0, %v490_v45  ;;  %v466_v47 = vpop.f32.mrf.mxu0 }
  0xc7   :  { %v471_v49 = vpop.f32.mrf.mxu1  ;;  %496 = vst.msk [vmem:[%s969_s4 + $0x10] sm:$0xff] %vm372_vm0, %v492_v46  ;;  %v467_v51 = vadd.f32 %v466_v47, %v448_v43 }
  0xc8   :  { %v472_v52 = vadd.f32 %v471_v49, %v453_v44 }
  0xc9   :  { %v479_v53 = vadd.f32 %v475_v48, %v467_v51 }
  0xca   :  { %v481_v54 = vadd.f32 %v477_v50, %v472_v52 }
  0xcb   :  { %vm483_vm3 = vcmp.ge.f32.partialorder %v479_v53, 0.0  ;;  %v487_v55 = vmul.f32 0.01, %v479_v53 }
  0xcc   :  { %vm485_vm4 = vcmp.ge.f32.partialorder %v481_v54, 0.0  ;;  %v489_v56 = vmul.f32 0.01, %v481_v54 }
  0xcd   :  { %v491_v57 = vsel %vm483_vm3, %v479_v53, %v487_v55 }
  0xce   :  { %v493_v58 = vsel %vm485_vm4, %v481_v54, %v489_v56  ;;  %495 = vst.msk [vmem:[%s969_s4 + $0x8] sm:$0xff] %vm372_vm0, %v491_v57 }
  0xcf   :  { %497 = vst.msk [vmem:[%s969_s4 + $0x18] sm:$0xff] %vm372_vm0, %v493_v58 }

// kernel: resatomsegnet_s2_forward.30
= control target key start
LH: loop header
LB: loop body
LE: loop exit
PB: predicated region body
PF: predicated region fallthrough
CT: control target
= control target key end

     0   :  { %vm369_vm0 = vcmask 523264   ;;  %s937_s1 = inlined_call_operand.vmem [shape: bf16[576,64], index: 1, kind: input, shape index: {}]   ;;  %s938_s2 = inlined_call_operand.vmem [shape: f32[1,64], index: 2, kind: input, shape index: {}]   ;;  %s939_s0 = inlined_call_operand.vmem [shape: bf16[32,576], index: 0, kind: input, shape index: {}]   ;;  %s940_s3 = inlined_call_operand.vmem [shape: f32[32,64], index: 3, kind: output, shape index: {}]  }
   0x1   :  { %v694_v0 = vld [vmem:[%s937_s1 + $0x38] sm:$0xff]  ;;  %v693_v4 = vld [vmem:[%s937_s1 + $0x30] sm:$0xff]  ;;  %v692_v8 = vld [vmem:[%s937_s1 + $0x28] sm:$0xff] }
   0x2   :  { %v702_v1 = vld [vmem:[%s937_s1 + $0x78] sm:$0xff]  ;;  %376 = vmatpush.bf16.msra.mxu0 %v694_v0  ;;  %v701_v5 = vld [vmem:[%s937_s1 + $0x70] sm:$0xff]  ;;  %v700_v9 = vld [vmem:[%s937_s1 + $0x68] sm:$0xff] }
   0x3   :  { %v710_v2 = vld [vmem:[%s937_s1 + $0xb8] sm:$0xff]  ;;  %395 = vmatpush.bf16.msra.mxu1 %v702_v1  ;;  %v709_v6 = vld [vmem:[%s937_s1 + $0xb0] sm:$0xff]  ;;  %v708_v10 = vld [vmem:[%s937_s1 + $0xa8] sm:$0xff] }
   0x4   :  { %v718_v3 = vld [vmem:[%s937_s1 + $0xf8] sm:$0xff]  ;;  %414 = vmatpush.bf16.msra.mxu2 %v710_v2  ;;  %v717_v7 = vld [vmem:[%s937_s1 + $0xf0] sm:$0xff]  ;;  %v716_v11 = vld [vmem:[%s937_s1 + $0xe8] sm:$0xff] }
   0x5   :  { %433 = vmatpush.bf16.msra.mxu3 %v718_v3  ;;  %v691_v12 = vld [vmem:[%s937_s1 + $0x20] sm:$0xff]  ;;  %v690_v16 = vld [vmem:[%s937_s1 + $0x18] sm:$0xff]  ;;  %v689_v20 = vld [vmem:[%s937_s1 + $0x10] sm:$0xff] }
   0x6   :  { %377 = vmatpush.bf16.msra.mxu0 %v693_v4  ;;  %v699_v13 = vld [vmem:[%s937_s1 + $0x60] sm:$0xff]  ;;  %v698_v17 = vld [vmem:[%s937_s1 + $0x58] sm:$0xff]  ;;  %v697_v21 = vld [vmem:[%s937_s1 + $0x50] sm:$0xff] }
   0x7   :  { %396 = vmatpush.bf16.msra.mxu1 %v701_v5  ;;  %v707_v14 = vld [vmem:[%s937_s1 + $0xa0] sm:$0xff]  ;;  %v706_v18 = vld [vmem:[%s937_s1 + $0x98] sm:$0xff]  ;;  %v705_v22 = vld [vmem:[%s937_s1 + $0x90] sm:$0xff] }
   0x8   :  { %415 = vmatpush.bf16.msra.mxu2 %v709_v6  ;;  %v715_v15 = vld [vmem:[%s937_s1 + $0xe0] sm:$0xff]  ;;  %v714_v19 = vld [vmem:[%s937_s1 + $0xd8] sm:$0xff]  ;;  %v713_v23 = vld [vmem:[%s937_s1 + $0xd0] sm:$0xff] }
   0x9   :  { %434 = vmatpush.bf16.msra.mxu3 %v717_v7  ;;  %v688_v24 = vld [vmem:[%s937_s1 + $0x8] sm:$0xff]  ;;  %v687_v28 = vld [vmem:[%s937_s1] sm:$0xff]  ;;  %v679_v33 = vld [vmem:[%s939_s0 + $0x10] sm:$0xf0] }
   0xa   :  { %378 = vmatpush.bf16.msra.mxu0 %v692_v8  ;;  %v696_v25 = vld [vmem:[%s937_s1 + $0x48] sm:$0xff]  ;;  %v695_v29 = vld [vmem:[%s937_s1 + $0x40] sm:$0xff]  ;;  %v495_v35 = vld [vmem:[%s939_s0 + $0x14] sm:$0xf0] }
   0xb   :  { %397 = vmatpush.bf16.msra.mxu1 %v700_v9  ;;  %v704_v26 = vld [vmem:[%s937_s1 + $0x88] sm:$0xff]  ;;  %v703_v30 = vld [vmem:[%s937_s1 + $0x80] sm:$0xff]  ;;  %v680_v37 = vld [vmem:[%s939_s0 + $0x18] sm:$0xf0] }
   0xc   :  { %416 = vmatpush.bf16.msra.mxu2 %v708_v10  ;;  %v712_v27 = vld [vmem:[%s937_s1 + $0xc8] sm:$0xff]  ;;  %v711_v31 = vld [vmem:[%s937_s1 + $0xc0] sm:$0xff]  ;;  %v722_v40 = vld [vmem:[%s937_s1 + $0x118] sm:$0xff] }
   0xd   :  { %435 = vmatpush.bf16.msra.mxu3 %v716_v11  ;;  %v493_v32 = vld [vmem:[%s939_s0] sm:$0xf]  ;;  %v677_v34 = vld [vmem:[%s939_s0 + $0x4] sm:$0xf]  ;;  %v501_v36 = vld [vmem:[%s939_s0 + $0x8] sm:$0xf] }
   0xe   :  { %379 = vmatpush.bf16.msra.mxu0 %v691_v12  ;;  %v678_v38 = vld [vmem:[%s939_s0 + $0xc] sm:$0xf]  ;;  %v503_v39 = vld [vmem:[%s939_s0 + $0x1c] sm:$0xf0]  ;;  %v494_v41 = vor.u32 %v679_v33, %v493_v32  ;;  %v498_v42 = vor.u32 %v677_v34, %v495_v35  ;;  %v502_v43 = vor.u32 %v680_v37, %v501_v36  ;;  %v721_v45 = vld [vmem:[%s937_s1 + $0x110] sm:$0xff] }
   0xf   :  { %398 = vmatpush.bf16.msra.mxu1 %v699_v13  ;;  %v506_v44 = vor.u32 %v678_v38, %v503_v39  ;;  %v720_v46 = vld [vmem:[%s937_s1 + $0x108] sm:$0xff]  ;;  %v719_v47 = vld [vmem:[%s937_s1 + $0x100] sm:$0xff]  ;;  %v684_v49 = vld [vmem:[%s939_s0 + $0x38] sm:$0xf0] }
  0x10   :  { %417 = vmatpush.bf16.msra.mxu2 %v707_v14  ;;  %v513_v48 = vld [vmem:[%s939_s0 + $0x28] sm:$0xf]  ;;  %v682_v50 = vld [vmem:[%s939_s0 + $0x2c] sm:$0xf]  ;;  %v515_v51 = vld [vmem:[%s939_s0 + $0x3c] sm:$0xf0] }
  0x11   :  { %436 = vmatpush.bf16.msra.mxu3 %v715_v15  ;;  %v521_v52 = vld [vmem:[%s939_s0 + $0x30] sm:$0xf]  ;;  %v685_v53 = vld [vmem:[%s939_s0 + $0x40] sm:$0xf0]  ;;  %v683_v54 = vld [vmem:[%s939_s0 + $0x34] sm:$0xf]  ;;  %v514_v56 = vor.u32 %v684_v49, %v513_v48  ;;  %v518_v57 = vor.u32 %v682_v50, %v515_v51 }
  0x12   :  { %380 = vmatpush.bf16.msra.mxu0 %v690_v16  ;;  %v523_v55 = vld [vmem:[%s939_s0 + $0x44] sm:$0xf0]  ;;  %v522_v58 = vor.u32 %v685_v53, %v521_v52  ;;  %v509_v60 = vld [vmem:[%s939_s0 + $0x10] sm:$0xf]  ;;  %v681_v61 = vld [vmem:[%s939_s0 + $0x20] sm:$0xf0] }
  0x13   :  { %399 = vmatpush.bf16.msra.mxu1 %v698_v17  ;;  %v526_v59 = vor.u32 %v683_v54, %v523_v55  ;;  %v529_v62 = vld [vmem:[%s939_s0 + $0x38] sm:$0xf]  ;;  %v686_v63 = vld [vmem:[%s939_s0 + $0x48] sm:$0xf0]  ;;  %v510_v0 = vor.u32 %v681_v61, %v509_v60  ;;  %v727_v11 = vld [vmem:[%s938_s2] ss:$0 sm:$0xff] }
  0x14   :  { %418 = vmatpush.bf16.msra.mxu2 %v706_v18  ;;  %v530_v1 = vor.u32 %v686_v63, %v529_v62 }
  0x15   :  { %437 = vmatpush.bf16.msra.mxu3 %v714_v19 }
  0x16   :  { %381 = vmatpush.bf16.msra.mxu0 %v689_v20 }
  0x17   :  { %400 = vmatpush.bf16.msra.mxu1 %v697_v21 }
  0x18   :  { %419 = vmatpush.bf16.msra.mxu2 %v705_v22 }
  0x19   :  { %438 = vmatpush.bf16.msra.mxu3 %v713_v23 }
  0x1a   :  { %382 = vmatpush.bf16.msra.mxu0 %v688_v24 }
  0x1b   :  { %401 = vmatpush.bf16.msra.mxu1 %v696_v25 }
  0x1c   :  { %420 = vmatpush.bf16.msra.mxu2 %v704_v26 }
  0x1d   :  { %439 = vmatpush.bf16.msra.mxu3 %v712_v27 }
  0x1e   :  { %383 = vmatpush.bf16.msra.mxu0 %v687_v28 }
  0x1f   :  { %402 = vmatpush.bf16.msra.mxu1 %v695_v29 }
  0x20   :  { %421 = vmatpush.bf16.msra.mxu2 %v703_v30 }
  0x21   :  { %440 = vmatpush.bf16.msra.mxu3 %v711_v31  ;;  %384 = vmatmul.bf16.vlgmr.msra.gmra.mxu0 %v494_v41 }
  0x22   :  { %456 = vmatpush.bf16.msrb.mxu0 %v722_v40  ;;  %403 = vmatmul.bf16.vlgmr.msra.gmra.mxu1 %v498_v42 }
  0x23   :  { %723 = vmatpush.bf16.msrb.mxu1 %v722_v40  ;;  %422 = vmatmul.bf16.vlgmr.msra.gmra.mxu2 %v502_v43 }
  0x24   :  { %441 = vmatmul.bf16.vlgmr.msra.gmra.mxu3 %v506_v44 }
  0x26   :  { %457 = vmatpush.bf16.msrb.mxu0 %v721_v45 }
  0x27   :  { %724 = vmatpush.bf16.msrb.mxu1 %v721_v45 }
  0x2a   :  { %458 = vmatpush.bf16.msrb.mxu0 %v720_v46 }
  0x2b   :  { %725 = vmatpush.bf16.msrb.mxu1 %v720_v46 }
  0x2e   :  { %459 = vmatpush.bf16.msrb.mxu0 %v719_v47 }
  0x2f   :  { %726 = vmatpush.bf16.msrb.mxu1 %v719_v47 }
  0x31   :  { %389 = vmatmul.bf16.gmra.mxu0 %v514_v56 }
  0x32   :  { %408 = vmatmul.bf16.gmra.mxu1 %v518_v57 }
  0x33   :  { %427 = vmatmul.bf16.gmra.mxu2 %v522_v58 }
  0x34   :  { %446 = vmatmul.bf16.gmra.mxu3 %v526_v59 }
  0x41   :  { %675 = vmatmul.msk.bf16.vlgmr.msrb.gmra.mxu0 %vm369_vm0, %v510_v0 }
  0x42   :  { %676 = vmatmul.msk.bf16.vlgmr.msrb.gmra.mxu1 %vm369_vm0, %v530_v1 }
  0x9e   :  { %v385_v2 = vpop.f32.mrf.mxu0 }
  0x9f   :  { %v404_v3 = vpop.f32.mrf.mxu1  ;;  %v386_v13 = vadd.f32 %v727_v11, %v385_v2 }
  0xa1   :  { %v405_v18 = vadd.f32 %v404_v3, %v386_v13 }
  0xa6   :  { %v423_v4 = vpop.f32.mrf.mxu2  ;;  %v387_v6 = vpop.f32.mrf.mxu0 }
  0xa7   :  { %v442_v5 = vpop.f32.mrf.mxu3  ;;  %v406_v7 = vpop.f32.mrf.mxu1  ;;  %v424_v20 = vadd.f32 %v423_v4, %v405_v18  ;;  %v388_v22 = vadd.f32 %v727_v11, %v387_v6 }
  0xa9   :  { %v443_v25 = vadd.f32 %v442_v5, %v424_v20  ;;  %v407_v28 = vadd.f32 %v406_v7, %v388_v22 }
  0xae   :  { %v425_v8 = vpop.f32.mrf.mxu2  ;;  %v390_v9 = vpop.f32.mrf.mxu0 }
  0xaf   :  { %v409_v10 = vpop.f32.mrf.mxu1  ;;  %v444_v12 = vpop.f32.mrf.mxu3  ;;  %v391_v14 = vadd.f32 %v727_v11, %v390_v9  ;;  %v426_v34 = vadd.f32 %v425_v8, %v407_v28 }
  0xb1   :  { %v410_v19 = vadd.f32 %v409_v10, %v391_v14  ;;  %v445_v41 = vadd.f32 %v444_v12, %v426_v34 }
  0xb6   :  { %v428_v15 = vpop.f32.mrf.mxu2  ;;  %v392_v16 = vpop.f32.mrf.mxu0 }
  0xb7   :  { %v411_v17 = vpop.f32.mrf.mxu1  ;;  %v429_v21 = vadd.f32 %v428_v15, %v410_v19  ;;  %v447_v23 = vpop.f32.mrf.mxu3  ;;  %v393_v24 = vadd.f32 %v727_v11, %v392_v16 }
  0xb9   :  { %v448_v26 = vadd.f32 %v447_v23, %v429_v21  ;;  %v412_v29 = vadd.f32 %v411_v17, %v393_v24 }
  0xbe   :  { %v430_v27 = vpop.f32.mrf.mxu2  ;;  %v461_v30 = vpop.f32.mrf.mxu0 }
  0xbf   :  { %v466_v31 = vpop.f32.mrf.mxu1  ;;  %v462_v32 = vadd.f32 %v461_v30, %v443_v25  ;;  %v431_v35 = vadd.f32 %v430_v27, %v412_v29  ;;  %v449_v40 = vpop.f32.mrf.mxu3 }
  0xc0   :  { %v467_v33 = vadd.f32 %v466_v31, %v448_v26 }
  0xc1   :  { %vm471_vm1 = vcmp.ge.f32.partialorder %v462_v32, 0.0  ;;  %v475_v36 = vmul.f32 0.01, %v462_v32  ;;  %v450_v42 = vadd.f32 %v449_v40, %v431_v35 }
  0xc2   :  { %vm473_vm2 = vcmp.ge.f32.partialorder %v467_v33, 0.0  ;;  %v477_v37 = vmul.f32 0.01, %v467_v33 }
  0xc3   :  { %v479_v38 = vsel %vm471_vm1, %v462_v32, %v475_v36 }
  0xc4   :  { %v481_v39 = vsel %vm473_vm2, %v467_v33, %v477_v37  ;;  %483 = vst.msk [vmem:[%s940_s3] sm:$0xff] %vm369_vm0, %v479_v38 }
  0xc5   :  { %485 = vst.msk [vmem:[%s940_s3 + $0x10] sm:$0xff] %vm369_vm0, %v481_v39 }
  0xc6   :  { %v463_v43 = vpop.f32.mrf.mxu0 }
  0xc7   :  { %v468_v44 = vpop.f32.mrf.mxu1  ;;  %v464_v45 = vadd.f32 %v463_v43, %v445_v41 }
  0xc8   :  { %v469_v46 = vadd.f32 %v468_v44, %v450_v42 }
  0xc9   :  { %vm472_vm3 = vcmp.ge.f32.partialorder %v464_v45, 0.0  ;;  %v476_v47 = vmul.f32 0.01, %v464_v45 }
  0xca   :  { %vm474_vm4 = vcmp.ge.f32.partialorder %v469_v46, 0.0  ;;  %v478_v48 = vmul.f32 0.01, %v469_v46 }
  0xcb   :  { %v480_v49 = vsel %vm472_vm3, %v464_v45, %v476_v47 }
  0xcc   :  { %v482_v50 = vsel %vm474_vm4, %v469_v46, %v478_v48  ;;  %484 = vst.msk [vmem:[%s940_s3 + $0x8] sm:$0xff] %vm369_vm0, %v480_v49 }
  0xcd   :  { %486 = vst.msk [vmem:[%s940_s3 + $0x18] sm:$0xff] %vm369_vm0, %v482_v50 }

// kernel: resatomsegnet_s2_forward.35
= control target key start
LH: loop header
LB: loop body
LE: loop exit
PB: predicated region body
PF: predicated region fallthrough
CT: control target
= control target key end

     0   :  { %vm65_vm0 = vcmask 523264   ;;  %vm91_vm1 = vcmask 261120   ;;  %s190_s1 = inlined_call_operand.vmem [shape: bf16[64,32], index: 1, kind: input, shape index: {}]   ;;  %s191_s2 = inlined_call_operand.vmem [shape: f32[1,32], index: 2, kind: input, shape index: {}]   ;;  %s192_s0 = inlined_call_operand.vmem [shape: bf16[32,64], index: 0, kind: input, shape index: {}]   ;;  %s193_s3 = inlined_call_operand.vmem [shape: f32[32,32], index: 3, kind: output, shape index: {}]  }
   0x1   :  { %v131_v0 = vld [vmem:[%s190_s1 + $0x18] sm:$0xff]  ;;  %v130_v1 = vld [vmem:[%s190_s1 + $0x10] sm:$0xff]  ;;  %v129_v2 = vld [vmem:[%s190_s1 + $0x8] sm:$0xff] }
   0x2   :  { %76 = vmatpush.bf16.msra.mxu0 %v131_v0  ;;  %132 = vmatpush.bf16.msra.mxu1 %v131_v0  ;;  %v128_v3 = vld [vmem:[%s190_s1] sm:$0xff]  ;;  %v127_v5 = vld [vmem:[%s192_s0 + $0x8] sm:$0xff] }
   0x3   :  { %v126_v4 = vld [vmem:[%s192_s0] sm:$0xff] }
   0x4   :  { %v136_v6 = vld [vmem:[%s191_s2] ss:$0 sm:$0xff] }
   0x6   :  { %77 = vmatpush.bf16.msra.mxu0 %v130_v1  ;;  %133 = vmatpush.bf16.msra.mxu1 %v130_v1 }
   0xa   :  { %78 = vmatpush.bf16.msra.mxu0 %v129_v2  ;;  %134 = vmatpush.bf16.msra.mxu1 %v129_v2 }
   0xe   :  { %79 = vmatpush.bf16.msra.mxu0 %v128_v3  ;;  %135 = vmatpush.bf16.msra.mxu1 %v128_v3 }
  0x11   :  { %124 = vmatmul.msk.bf16.vlgmr.msra.gmra.mxu0 %vm65_vm0, %v126_v4  ;;  %125 = vmatmul.msk.bf16.vlgmr.msra.gmra.mxu1 %vm65_vm0, %v127_v5 }
  0x8e   :  { %v81_v7 = vpop.f32.mrf.mxu0  ;;  %v86_v8 = vpop.f32.mrf.mxu1 }
  0x8f   :  { %v82_v9 = vadd.f32 %v136_v6, %v81_v7  ;;  %v87_v10 = vadd.f32 %v136_v6, %v86_v8 }
  0x91   :  { %92 = vst.msk [vmem:[%s193_s3] sm:$0xff] %vm91_vm1, %v82_v9 }
  0x92   :  { %94 = vst.msk [vmem:[%s193_s3 + $0x10] sm:$0xff] %vm91_vm1, %v87_v10 }
  0x96   :  { %v83_v11 = vpop.f32.mrf.mxu0  ;;  %v88_v12 = vpop.f32.mrf.mxu1 }
  0x97   :  { %v84_v13 = vadd.f32 %v136_v6, %v83_v11  ;;  %v89_v14 = vadd.f32 %v136_v6, %v88_v12 }
  0x99   :  { %93 = vst.msk [vmem:[%s193_s3 + $0x8] sm:$0xff] %vm91_vm1, %v84_v13 }
  0x9a   :  { %95 = vst.msk [vmem:[%s193_s3 + $0x18] sm:$0xff] %vm91_vm1, %v89_v14 }

// kernel: resatomsegnet_s2_forward.36
= control target key start
LH: loop header
LB: loop body
LE: loop exit
PB: predicated region body
PF: predicated region fallthrough
CT: control target
= control target key end

     0   :  { %vm107_vm0 = vcmask 523264   ;;  %vm181_vm1 = vcmask 261120   ;;  %s414_s1 = inlined_call_operand.vmem [shape: bf16[64,32], index: 1, kind: input, shape index: {}]   ;;  %s415_s2 = inlined_call_operand.vmem [shape: f32[1,32], index: 2, kind: input, shape index: {}]   ;;  %s416_s0 = inlined_call_operand.vmem [shape: bf16[128,64], index: 0, kind: input, shape index: {}]   ;;  %s417_s3 = inlined_call_operand.vmem [shape: f32[128,32], index: 3, kind: output, shape index: {}]  }
   0x1   :  { %v269_v0 = vld [vmem:[%s414_s1 + $0x18] sm:$0xff]  ;;  %v268_v1 = vld [vmem:[%s414_s1 + $0x10] sm:$0xff]  ;;  %v267_v2 = vld [vmem:[%s414_s1 + $0x8] sm:$0xff] }
   0x2   :  { %136 = vmatpush.bf16.msra.mxu0 %v269_v0  ;;  %270 = vmatpush.bf16.msra.mxu1 %v269_v0  ;;  %v266_v3 = vld [vmem:[%s414_s1] sm:$0xff]  ;;  %v260_v5 = vld [vmem:[%s416_s0 + $0x10] sm:$0xff]  ;;  %v259_v8 = vld [vmem:[%s416_s0 + $0x8] sm:$0xff] }
   0x3   :  { %271 = vmatpush.bf16.msra.mxu2 %v269_v0  ;;  %272 = vmatpush.bf16.msra.mxu3 %v269_v0  ;;  %v258_v4 = vld [vmem:[%s416_s0] sm:$0xff]  ;;  %v264_v7 = vld [vmem:[%s416_s0 + $0x30] sm:$0xff]  ;;  %v261_v9 = vld [vmem:[%s416_s0 + $0x18] sm:$0xff] }
   0x4   :  { %v262_v6 = vld [vmem:[%s416_s0 + $0x20] sm:$0xff]  ;;  %v263_v10 = vld [vmem:[%s416_s0 + $0x28] sm:$0xff]  ;;  %v265_v11 = vld [vmem:[%s416_s0 + $0x38] sm:$0xff] }
   0x5   :  { %v282_v12 = vld [vmem:[%s415_s2] ss:$0 sm:$0xff] }
   0x6   :  { %137 = vmatpush.bf16.msra.mxu0 %v268_v1  ;;  %273 = vmatpush.bf16.msra.mxu1 %v268_v1 }
   0x7   :  { %274 = vmatpush.bf16.msra.mxu2 %v268_v1  ;;  %275 = vmatpush.bf16.msra.mxu3 %v268_v1 }
   0xa   :  { %138 = vmatpush.bf16.msra.mxu0 %v267_v2  ;;  %276 = vmatpush.bf16.msra.mxu1 %v267_v2 }
   0xb   :  { %277 = vmatpush.bf16.msra.mxu2 %v267_v2  ;;  %278 = vmatpush.bf16.msra.mxu3 %v267_v2 }
   0xe   :  { %139 = vmatpush.bf16.msra.mxu0 %v266_v3  ;;  %279 = vmatpush.bf16.msra.mxu1 %v266_v3 }
   0xf   :  { %280 = vmatpush.bf16.msra.mxu2 %v266_v3  ;;  %281 = vmatpush.bf16.msra.mxu3 %v266_v3 }
  0x11   :  { %250 = vmatmul.msk.bf16.vlgmr.msra.gmra.mxu0 %vm107_vm0, %v258_v4  ;;  %252 = vmatmul.msk.bf16.vlgmr.msra.gmra.mxu1 %vm107_vm0, %v260_v5 }
  0x12   :  { %254 = vmatmul.msk.bf16.vlgmr.msra.gmra.mxu2 %vm107_vm0, %v262_v6  ;;  %256 = vmatmul.msk.bf16.vlgmr.msra.gmra.mxu3 %vm107_vm0, %v264_v7 }
  0x21   :  { %251 = vmatmul.msk.bf16.gmra.mxu0 %vm107_vm0, %v259_v8  ;;  %253 = vmatmul.msk.bf16.gmra.mxu1 %vm107_vm0, %v261_v9 }
  0x22   :  { %255 = vmatmul.msk.bf16.gmra.mxu2 %vm107_vm0, %v263_v10  ;;  %257 = vmatmul.msk.bf16.gmra.mxu3 %vm107_vm0, %v265_v11 }
  0x8e   :  { %v141_v13 = vpop.f32.mrf.mxu0  ;;  %v151_v14 = vpop.f32.mrf.mxu1 }
  0x8f   :  { %v142_v15 = vadd.f32 %v282_v12, %v141_v13  ;;  %v152_v16 = vadd.f32 %v282_v12, %v151_v14 }
  0x91   :  { %182 = vst.msk [vmem:[%s417_s3] sm:$0xff] %vm181_vm1, %v142_v15 }
  0x92   :  { %186 = vst.msk [vmem:[%s417_s3 + $0x20] sm:$0xff] %vm181_vm1, %v152_v16 }
  0x95   :  { %v161_v17 = vpop.f32.mrf.mxu2  ;;  %v171_v18 = vpop.f32.mrf.mxu3 }
  0x96   :  { %v162_v19 = vadd.f32 %v282_v12, %v161_v17  ;;  %v172_v20 = vadd.f32 %v282_v12, %v171_v18  ;;  %v143_v21 = vpop.f32.mrf.mxu0  ;;  %v153_v22 = vpop.f32.mrf.mxu1 }
  0x97   :  { %v144_v23 = vadd.f32 %v282_v12, %v143_v21  ;;  %v154_v24 = vadd.f32 %v282_v12, %v153_v22 }
  0x98   :  { %190 = vst.msk [vmem:[%s417_s3 + $0x40] sm:$0xff] %vm181_vm1, %v162_v19 }
  0x99   :  { %194 = vst.msk [vmem:[%s417_s3 + $0x60] sm:$0xff] %vm181_vm1, %v172_v20 }
  0x9a   :  { %183 = vst.msk [vmem:[%s417_s3 + $0x8] sm:$0xff] %vm181_vm1, %v144_v23 }
  0x9b   :  { %187 = vst.msk [vmem:[%s417_s3 + $0x28] sm:$0xff] %vm181_vm1, %v154_v24 }
  0x9d   :  { %v163_v25 = vpop.f32.mrf.mxu2  ;;  %v173_v26 = vpop.f32.mrf.mxu3 }
  0x9e   :  { %v164_v27 = vadd.f32 %v282_v12, %v163_v25  ;;  %v174_v28 = vadd.f32 %v282_v12, %v173_v26  ;;  %v146_v29 = vpop.f32.mrf.mxu0  ;;  %v156_v30 = vpop.f32.mrf.mxu1 }
  0x9f   :  { %v147_v31 = vadd.f32 %v282_v12, %v146_v29  ;;  %v157_v32 = vadd.f32 %v282_v12, %v156_v30 }
  0xa0   :  { %191 = vst.msk [vmem:[%s417_s3 + $0x48] sm:$0xff] %vm181_vm1, %v164_v27 }
  0xa1   :  { %195 = vst.msk [vmem:[%s417_s3 + $0x68] sm:$0xff] %vm181_vm1, %v174_v28 }
  0xa2   :  { %184 = vst.msk [vmem:[%s417_s3 + $0x10] sm:$0xff] %vm181_vm1, %v147_v31 }
  0xa3   :  { %188 = vst.msk [vmem:[%s417_s3 + $0x30] sm:$0xff] %vm181_vm1, %v157_v32 }
  0xa5   :  { %v166_v33 = vpop.f32.mrf.mxu2  ;;  %v176_v34 = vpop.f32.mrf.mxu3 }
  0xa6   :  { %v167_v35 = vadd.f32 %v282_v12, %v166_v33  ;;  %v177_v36 = vadd.f32 %v282_v12, %v176_v34  ;;  %v148_v37 = vpop.f32.mrf.mxu0  ;;  %v158_v38 = vpop.f32.mrf.mxu1 }
  0xa7   :  { %v149_v39 = vadd.f32 %v282_v12, %v148_v37  ;;  %v159_v40 = vadd.f32 %v282_v12, %v158_v38 }
  0xa8   :  { %192 = vst.msk [vmem:[%s417_s3 + $0x50] sm:$0xff] %vm181_vm1, %v167_v35 }
  0xa9   :  { %196 = vst.msk [vmem:[%s417_s3 + $0x70] sm:$0xff] %vm181_vm1, %v177_v36 }
  0xaa   :  { %185 = vst.msk [vmem:[%s417_s3 + $0x18] sm:$0xff] %vm181_vm1, %v149_v39 }
  0xab   :  { %189 = vst.msk [vmem:[%s417_s3 + $0x38] sm:$0xff] %vm181_vm1, %v159_v40 }
  0xad   :  { %v168_v41 = vpop.f32.mrf.mxu2  ;;  %v178_v42 = vpop.f32.mrf.mxu3 }
  0xae   :  { %v169_v43 = vadd.f32 %v282_v12, %v168_v41  ;;  %v179_v44 = vadd.f32 %v282_v12, %v178_v42 }
  0xb0   :  { %193 = vst.msk [vmem:[%s417_s3 + $0x58] sm:$0xff] %vm181_vm1, %v169_v43 }
  0xb1   :  { %197 = vst.msk [vmem:[%s417_s3 + $0x78] sm:$0xff] %vm181_vm1, %v179_v44 }

// kernel: resatomsegnet_s2_forward.42
= control target key start
LH: loop header
LB: loop body
LE: loop exit
PB: predicated region body
PF: predicated region fallthrough
CT: control target
= control target key end

     0   :  { %vm91_vm0 = vcmask 261120   ;;  %vm165_vm1 = vcmask 130048   ;;  %s376_s1 = inlined_call_operand.vmem [shape: bf16[32,16], index: 1, kind: input, shape index: {}]   ;;  %s377_s0 = inlined_call_operand.vmem [shape: bf16[128,32], index: 0, kind: input, shape index: {}]   ;;  %s378_s2 = inlined_call_operand.vmem [shape: f32[1,16], index: 2, kind: input, shape index: {}]   ;;  %s379_s3 = inlined_call_operand.vmem [shape: f32[128,16], index: 3, kind: output, shape index: {}]  }
   0x1   :  { %v243_v0 = vld [vmem:[%s376_s1 + $0x8] sm:$0xff]  ;;  %v242_v1 = vld [vmem:[%s376_s1] sm:$0xff]  ;;  %v236_v3 = vld [vmem:[%s377_s0 + $0x10] sm:$0xff] }
   0x2   :  { %122 = vmatpush.bf16.msra.mxu0 %v243_v0  ;;  %244 = vmatpush.bf16.msra.mxu1 %v243_v0  ;;  %v234_v2 = vld [vmem:[%s377_s0] sm:$0xff]  ;;  %v240_v5 = vld [vmem:[%s377_s0 + $0x30] sm:$0xff]  ;;  %v235_v6 = vld [vmem:[%s377_s0 + $0x8] sm:$0xff] }
   0x3   :  { %245 = vmatpush.bf16.msra.mxu2 %v243_v0  ;;  %246 = vmatpush.bf16.msra.mxu3 %v243_v0  ;;  %v238_v4 = vld [vmem:[%s377_s0 + $0x20] sm:$0xff]  ;;  %v237_v7 = vld [vmem:[%s377_s0 + $0x18] sm:$0xff]  ;;  %v239_v8 = vld [vmem:[%s377_s0 + $0x28] sm:$0xff] }
   0x4   :  { %v241_v9 = vld [vmem:[%s377_s0 + $0x38] sm:$0xff]  ;;  %v250_v10 = vld [vmem:[%s378_s2] ss:$0 sm:$0xff] }
   0x6   :  { %123 = vmatpush.bf16.msra.mxu0 %v242_v1  ;;  %247 = vmatpush.bf16.msra.mxu1 %v242_v1 }
   0x7   :  { %248 = vmatpush.bf16.msra.mxu2 %v242_v1  ;;  %249 = vmatpush.bf16.msra.mxu3 %v242_v1 }
   0x9   :  { %226 = vmatmul.msk.bf16.vlgmr.msra.gmra.mxu0 %vm91_vm0, %v234_v2  ;;  %228 = vmatmul.msk.bf16.vlgmr.msra.gmra.mxu1 %vm91_vm0, %v236_v3 }
   0xa   :  { %230 = vmatmul.msk.bf16.vlgmr.msra.gmra.mxu2 %vm91_vm0, %v238_v4  ;;  %232 = vmatmul.msk.bf16.vlgmr.msra.gmra.mxu3 %vm91_vm0, %v240_v5 }
  0x19   :  { %227 = vmatmul.msk.bf16.gmra.mxu0 %vm91_vm0, %v235_v6  ;;  %229 = vmatmul.msk.bf16.gmra.mxu1 %vm91_vm0, %v237_v7 }
  0x1a   :  { %231 = vmatmul.msk.bf16.gmra.mxu2 %vm91_vm0, %v239_v8  ;;  %233 = vmatmul.msk.bf16.gmra.mxu3 %vm91_vm0, %v241_v9 }
  0x86   :  { %v125_v11 = vpop.f32.mrf.mxu0  ;;  %v135_v12 = vpop.f32.mrf.mxu1 }
  0x87   :  { %v126_v13 = vadd.f32 %v250_v10, %v125_v11  ;;  %v136_v14 = vadd.f32 %v250_v10, %v135_v12 }
  0x89   :  { %166 = vst.msk [vmem:[%s379_s3] sm:$0xff] %vm165_vm1, %v126_v13 }
  0x8a   :  { %170 = vst.msk [vmem:[%s379_s3 + $0x20] sm:$0xff] %vm165_vm1, %v136_v14 }
  0x8d   :  { %v145_v15 = vpop.f32.mrf.mxu2  ;;  %v155_v16 = vpop.f32.mrf.mxu3 }
  0x8e   :  { %v146_v17 = vadd.f32 %v250_v10, %v145_v15  ;;  %v156_v18 = vadd.f32 %v250_v10, %v155_v16  ;;  %v127_v19 = vpop.f32.mrf.mxu0  ;;  %v137_v20 = vpop.f32.mrf.mxu1 }
  0x8f   :  { %v128_v21 = vadd.f32 %v250_v10, %v127_v19  ;;  %v138_v22 = vadd.f32 %v250_v10, %v137_v20 }
  0x90   :  { %174 = vst.msk [vmem:[%s379_s3 + $0x40] sm:$0xff] %vm165_vm1, %v146_v17 }
  0x91   :  { %178 = vst.msk [vmem:[%s379_s3 + $0x60] sm:$0xff] %vm165_vm1, %v156_v18 }
  0x92   :  { %167 = vst.msk [vmem:[%s379_s3 + $0x8] sm:$0xff] %vm165_vm1, %v128_v21 }
  0x93   :  { %171 = vst.msk [vmem:[%s379_s3 + $0x28] sm:$0xff] %vm165_vm1, %v138_v22 }
  0x95   :  { %v147_v23 = vpop.f32.mrf.mxu2  ;;  %v157_v24 = vpop.f32.mrf.mxu3 }
  0x96   :  { %v148_v25 = vadd.f32 %v250_v10, %v147_v23  ;;  %v158_v26 = vadd.f32 %v250_v10, %v157_v24  ;;  %v130_v27 = vpop.f32.mrf.mxu0  ;;  %v140_v28 = vpop.f32.mrf.mxu1 }
  0x97   :  { %v131_v29 = vadd.f32 %v250_v10, %v130_v27  ;;  %v141_v30 = vadd.f32 %v250_v10, %v140_v28 }
  0x98   :  { %175 = vst.msk [vmem:[%s379_s3 + $0x48] sm:$0xff] %vm165_vm1, %v148_v25 }
  0x99   :  { %179 = vst.msk [vmem:[%s379_s3 + $0x68] sm:$0xff] %vm165_vm1, %v158_v26 }
  0x9a   :  { %168 = vst.msk [vmem:[%s379_s3 + $0x10] sm:$0xff] %vm165_vm1, %v131_v29 }
  0x9b   :  { %172 = vst.msk [vmem:[%s379_s3 + $0x30] sm:$0xff] %vm165_vm1, %v141_v30 }
  0x9d   :  { %v150_v31 = vpop.f32.mrf.mxu2  ;;  %v160_v32 = vpop.f32.mrf.mxu3 }
  0x9e   :  { %v151_v33 = vadd.f32 %v250_v10, %v150_v31  ;;  %v161_v34 = vadd.f32 %v250_v10, %v160_v32  ;;  %v132_v35 = vpop.f32.mrf.mxu0  ;;  %v142_v36 = vpop.f32.mrf.mxu1 }
  0x9f   :  { %v133_v37 = vadd.f32 %v250_v10, %v132_v35  ;;  %v143_v38 = vadd.f32 %v250_v10, %v142_v36 }
  0xa0   :  { %176 = vst.msk [vmem:[%s379_s3 + $0x50] sm:$0xff] %vm165_vm1, %v151_v33 }
  0xa1   :  { %180 = vst.msk [vmem:[%s379_s3 + $0x70] sm:$0xff] %vm165_vm1, %v161_v34 }
  0xa2   :  { %169 = vst.msk [vmem:[%s379_s3 + $0x18] sm:$0xff] %vm165_vm1, %v133_v37 }
  0xa3   :  { %173 = vst.msk [vmem:[%s379_s3 + $0x38] sm:$0xff] %vm165_vm1, %v143_v38 }
  0xa5   :  { %v152_v39 = vpop.f32.mrf.mxu2  ;;  %v162_v40 = vpop.f32.mrf.mxu3 }
  0xa6   :  { %v153_v41 = vadd.f32 %v250_v10, %v152_v39  ;;  %v163_v42 = vadd.f32 %v250_v10, %v162_v40 }
  0xa8   :  { %177 = vst.msk [vmem:[%s379_s3 + $0x58] sm:$0xff] %vm165_vm1, %v153_v41 }
  0xa9   :  { %181 = vst.msk [vmem:[%s379_s3 + $0x78] sm:$0xff] %vm165_vm1, %v163_v42 }

// kernel: resatomsegnet_s2_forward.43
= control target key start
LH: loop header
LB: loop body
LE: loop exit
PB: predicated region body
PF: predicated region fallthrough
CT: control target
= control target key end

     0   :  { %vm779_vm0 = vcmask 261120   ;;  %vm1643_vm2 = vcmask 130048   ;;  %s6198_s1 = inlined_call_operand.vmem [shape: bf16[288,16], index: 1, kind: input, shape index: {}]   ;;  %s6199_s0 = inlined_call_operand.vmem [shape: bf16[512,288], index: 0, kind: input, shape index: {}]   ;;  %s6200_s2 = inlined_call_operand.vmem [shape: f32[1,16], index: 2, kind: input, shape index: {}]   ;;  %s6201_s3 = inlined_call_operand.vmem [shape: f32[1,16], index: 3, kind: input, shape index: {}]   ;;  %s6202_s4 = inlined_call_operand.<no memory space> [shape: f32[1,1], index: 4, kind: input, shape index: {}]   ;;  %s6203_s5 = inlined_call_operand.vmem [shape: f32[512,1], index: 5, kind: output, shape index: {}]  }
   0x1   :  { %v3844_v0 = vld [vmem:[%s6198_s1 + $0x38] sm:$0xff]  ;;  %v4180_v2 = vld [vmem:[%s6198_s1 + $0x88] sm:$0xff]  ;;  %v3843_v3 = vld [vmem:[%s6198_s1 + $0x30] sm:$0xff] }
   0x2   :  { %v3852_v1 = vld [vmem:[%s6198_s1 + $0x78] sm:$0xff]  ;;  %876 = vmatpush.bf16.msra.mxu0 %v3844_v0  ;;  %3855 = vmatpush.bf16.msra.mxu3 %v3844_v0  ;;  %v3851_v4 = vld [vmem:[%s6198_s1 + $0x70] sm:$0xff]  ;;  %v4192_v5 = vld [vmem:[%s6198_s1 + $0x80] sm:$0xff] }
   0x3   :  { %1045 = vmatpush.bf16.msra.mxu1 %v3852_v1  ;;  %1220 = vmatpush.bf16.msra.mxu2 %v4180_v2  ;;  %v3199_v6 = vld [vmem:[%s6199_s0 + $0x8] sm:$0xf]  ;;  %v3743_v7 = vld [vmem:[%s6199_s0 + $0x10] sm:$0xf0]  ;;  %v3841_v11 = vld [vmem:[%s6198_s1 + $0x20] sm:$0xff] }
   0x4   :  { %v3200_v8 = vor.u32 %v3743_v7, %v3199_v6  ;;  %v3842_v9 = vld [vmem:[%s6198_s1 + $0x28] sm:$0xff]  ;;  %v3849_v12 = vld [vmem:[%s6198_s1 + $0x60] sm:$0xff]  ;;  %v3840_v13 = vld [vmem:[%s6198_s1 + $0x18] sm:$0xff] }
   0x5   :  { %v3850_v10 = vld [vmem:[%s6198_s1 + $0x68] sm:$0xff]  ;;  %v3848_v14 = vld [vmem:[%s6198_s1 + $0x58] sm:$0xff]  ;;  %v3839_v15 = vld [vmem:[%s6198_s1 + $0x10] sm:$0xff] }
   0x6   :  { %877 = vmatpush.bf16.msra.mxu0 %v3843_v3  ;;  %3856 = vmatpush.bf16.msra.mxu3 %v3843_v3  ;;  %v3847_v16 = vld [vmem:[%s6198_s1 + $0x50] sm:$0xff]  ;;  %v3211_v17 = vld [vmem:[%s6199_s0 + $0x20] sm:$0xf]  ;;  %v3746_v18 = vld [vmem:[%s6199_s0 + $0x28] sm:$0xf0] }
   0x7   :  { %1046 = vmatpush.bf16.msra.mxu1 %v3851_v4  ;;  %1221 = vmatpush.bf16.msra.mxu2 %v4192_v5  ;;  %v3212_v19 = vor.u32 %v3746_v18, %v3211_v17  ;;  %v3838_v20 = vld [vmem:[%s6198_s1 + $0x8] sm:$0xff]  ;;  %v3837_v22 = vld [vmem:[%s6198_s1] sm:$0xff]  ;;  %v3193_v29 = vld [vmem:[%s6199_s0 + $0xc] sm:$0xf0] }
   0x8   :  { %v3846_v21 = vld [vmem:[%s6198_s1 + $0x48] sm:$0xff]  ;;  %v3845_v23 = vld [vmem:[%s6198_s1 + $0x40] sm:$0xff]  ;;  %v3223_v33 = vld [vmem:[%s6199_s0 + $0x38] sm:$0xf] }
   0x9   :  { %v3191_v24 = vld [vmem:[%s6199_s0] sm:$0xf]  ;;  %v3742_v25 = vld [vmem:[%s6199_s0 + $0x8] sm:$0xf0]  ;;  %v3741_v28 = vld [vmem:[%s6199_s0 + $0x4] sm:$0xf] }
   0xa   :  { %3645 = vmatmul.msk.bf16.vlgmr.msra.gmra.mxu2 %vm779_vm0, %v3200_v8  ;;  %878 = vmatpush.bf16.msra.mxu0 %v3842_v9  ;;  %v3479_v26 = vld [vmem:[%s6199_s0 + $0x240] sm:$0xf]  ;;  %v3814_v27 = vld [vmem:[%s6199_s0 + $0x248] sm:$0xf0]  ;;  %v3192_v30 = vor.u32 %v3742_v25, %v3191_v24  ;;  %v3196_v32 = vor.u32 %v3741_v28, %v3193_v29  ;;  %v3749_v34 = vld [vmem:[%s6199_s0 + $0x40] sm:$0xf0] }
   0xb   :  { %3857 = vmatpush.bf16.msra.mxu3 %v3842_v9  ;;  %1047 = vmatpush.bf16.msra.mxu1 %v3850_v10  ;;  %v3480_v31 = vor.u32 %v3814_v27, %v3479_v26  ;;  %v3224_v35 = vor.u32 %v3749_v34, %v3223_v33  ;;  %v3203_v36 = vld [vmem:[%s6199_s0 + $0x18] sm:$0xf]  ;;  %v3745_v37 = vld [vmem:[%s6199_s0 + $0x20] sm:$0xf0]  ;;  %v3744_v40 = vld [vmem:[%s6199_s0 + $0x1c] sm:$0xf] }
   0xc   :  { %v3491_v38 = vld [vmem:[%s6199_s0 + $0x258] sm:$0xf]  ;;  %v3817_v39 = vld [vmem:[%s6199_s0 + $0x260] sm:$0xf0]  ;;  %v3205_v41 = vld [vmem:[%s6199_s0 + $0x24] sm:$0xf0]  ;;  %v3204_v42 = vor.u32 %v3745_v37, %v3203_v36 }
   0xd   :  { %v3492_v43 = vor.u32 %v3817_v39, %v3491_v38  ;;  %v3208_v44 = vor.u32 %v3744_v40, %v3205_v41  ;;  %v3235_v45 = vld [vmem:[%s6199_s0 + $0x50] sm:$0xf]  ;;  %v3752_v46 = vld [vmem:[%s6199_s0 + $0x58] sm:$0xf0]  ;;  %v3747_v52 = vld [vmem:[%s6199_s0 + $0x34] sm:$0xf] }
   0xe   :  { %879 = vmatpush.bf16.msra.mxu0 %v3841_v11  ;;  %v3236_v47 = vor.u32 %v3752_v46, %v3235_v45  ;;  %v3215_v48 = vld [vmem:[%s6199_s0 + $0x30] sm:$0xf]  ;;  %v3748_v49 = vld [vmem:[%s6199_s0 + $0x38] sm:$0xf0]  ;;  %v3217_v53 = vld [vmem:[%s6199_s0 + $0x3c] sm:$0xf0] }
   0xf   :  { %3858 = vmatpush.bf16.msra.mxu3 %v3841_v11  ;;  %1048 = vmatpush.bf16.msra.mxu1 %v3849_v12  ;;  %v3503_v50 = vld [vmem:[%s6199_s0 + $0x270] sm:$0xf]  ;;  %v3820_v51 = vld [vmem:[%s6199_s0 + $0x278] sm:$0xf0]  ;;  %v3216_v54 = vor.u32 %v3748_v49, %v3215_v48  ;;  %v3220_v56 = vor.u32 %v3747_v52, %v3217_v53  ;;  %v3247_v57 = vld [vmem:[%s6199_s0 + $0x68] sm:$0xf] }
  0x10   :  { %v3504_v55 = vor.u32 %v3820_v51, %v3503_v50  ;;  %v3755_v58 = vld [vmem:[%s6199_s0 + $0x70] sm:$0xf0]  ;;  %v3227_v60 = vld [vmem:[%s6199_s0 + $0x48] sm:$0xf]  ;;  %v3750_v0 = vld [vmem:[%s6199_s0 + $0x4c] sm:$0xf] }
  0x11   :  { %v3248_v59 = vor.u32 %v3755_v58, %v3247_v57  ;;  %v3751_v61 = vld [vmem:[%s6199_s0 + $0x50] sm:$0xf0]  ;;  %v3515_v62 = vld [vmem:[%s6199_s0 + $0x288] sm:$0xf]  ;;  %v3758_v6 = vld [vmem:[%s6199_s0 + $0x88] sm:$0xf0] }
  0x12   :  { %880 = vmatpush.bf16.msra.mxu0 %v3840_v13  ;;  %v3823_v63 = vld [vmem:[%s6199_s0 + $0x290] sm:$0xf0]  ;;  %v3239_v8 = vld [vmem:[%s6199_s0 + $0x60] sm:$0xf]  ;;  %v3754_v9 = vld [vmem:[%s6199_s0 + $0x68] sm:$0xf0] }
  0x13   :  { %3859 = vmatpush.bf16.msra.mxu3 %v3840_v13  ;;  %1049 = vmatpush.bf16.msra.mxu1 %v3848_v14  ;;  %v3516_v3 = vor.u32 %v3823_v63, %v3515_v62  ;;  %v3826_v11 = vld [vmem:[%s6199_s0 + $0x2a8] sm:$0xf0]  ;;  %v3241_v13 = vld [vmem:[%s6199_s0 + $0x6c] sm:$0xf0]  ;;  %v3271_v17 = vld [vmem:[%s6199_s0 + $0x98] sm:$0xf] }
  0x14   :  { %v3761_v18 = vld [vmem:[%s6199_s0 + $0xa0] sm:$0xf0]  ;;  %v3756_v24 = vld [vmem:[%s6199_s0 + $0x7c] sm:$0xf]  ;;  %v3253_v25 = vld [vmem:[%s6199_s0 + $0x84] sm:$0xf0] }
  0x15   :  { %v3256_v28 = vor.u32 %v3756_v24, %v3253_v25  ;;  %v3283_v29 = vld [vmem:[%s6199_s0 + $0xb0] sm:$0xf]  ;;  %v3760_v33 = vld [vmem:[%s6199_s0 + $0x98] sm:$0xf0]  ;;  %v3759_v36 = vld [vmem:[%s6199_s0 + $0x94] sm:$0xf] }
  0x16   :  { %881 = vmatpush.bf16.msra.mxu0 %v3839_v15  ;;  %v3551_v34 = vld [vmem:[%s6199_s0 + $0x2d0] sm:$0xf]  ;;  %v3265_v37 = vld [vmem:[%s6199_s0 + $0x9c] sm:$0xf0]  ;;  %v3295_v41 = vld [vmem:[%s6199_s0 + $0xc8] sm:$0xf] }
  0x17   :  { %3860 = vmatpush.bf16.msra.mxu3 %v3839_v15  ;;  %1050 = vmatpush.bf16.msra.mxu1 %v3847_v16  ;;  %v3268_v40 = vor.u32 %v3759_v36, %v3265_v37  ;;  %v3763_v45 = vld [vmem:[%s6199_s0 + $0xb0] sm:$0xf0]  ;;  %v3563_v46 = vld [vmem:[%s6199_s0 + $0x2e8] sm:$0xf]  ;;  %v3762_v48 = vld [vmem:[%s6199_s0 + $0xac] sm:$0xf] }
  0x18   :  { %v3277_v49 = vld [vmem:[%s6199_s0 + $0xb4] sm:$0xf0]  ;;  %v4449_v58 = vld [vmem:[%s6200_s2] ss:$0 sm:$0xff]  ;;  %v3289_v62 = vld [vmem:[%s6199_s0 + $0xcc] sm:$0xf0] }
  0x19   :  { %v3280_v53 = vor.u32 %v3762_v48, %v3277_v49  ;;  %v3813_v63 = vld [vmem:[%s6199_s0 + $0x244] sm:$0xf] }
  0x1a   :  { %3646 = vmatmul.msk.bf16.gmra.mxu2 %vm779_vm0, %v3212_v19  ;;  %882 = vmatpush.bf16.msra.mxu0 %v3838_v20  ;;  %v3272_v19 = vor.u32 %v3761_v18, %v3271_v17  ;;  %v3769_v25 = vld [vmem:[%s6199_s0 + $0xe0] sm:$0xf0] }
  0x1b   :  { %3861 = vmatpush.bf16.msra.mxu3 %v3838_v20  ;;  %1051 = vmatpush.bf16.msra.mxu1 %v3846_v21  ;;  %v3251_v20 = vld [vmem:[%s6199_s0 + $0x78] sm:$0xf] }
  0x1e   :  { %883 = vmatpush.bf16.msra.mxu0 %v3837_v22 }
  0x1f   :  { %3862 = vmatpush.bf16.msra.mxu3 %v3837_v22  ;;  %1052 = vmatpush.bf16.msra.mxu1 %v3845_v23  ;;  %v3539_v22 = vld [vmem:[%s6199_s0 + $0x2b8] sm:$0xf] }
  0x21   :  { %884 = vmatmul.bf16.vlgmr.msra.gmra.mxu0 %v3192_v30  ;;  %v3764_v30 = vld [vmem:[%s6199_s0 + $0xb8] sm:$0xf0] }
  0x22   :  { %1004 = vmatmul.bf16.vlgmr.msra.gmra.mxu3 %v3480_v31  ;;  %1053 = vmatmul.bf16.vlgmr.msra.gmra.mxu1 %v3196_v32  ;;  %v3284_v31 = vor.u32 %v3764_v30, %v3283_v29  ;;  %v3263_v32 = vld [vmem:[%s6199_s0 + $0x90] sm:$0xf]  ;;  %v3816_v29 = vld [vmem:[%s6199_s0 + $0x25c] sm:$0xf]  ;;  %v3493_v30 = vld [vmem:[%s6199_s0 + $0x264] sm:$0xf0] }
  0x23   :  { %3863 = vmatpush.bf16.msrb.mxu3 %v3852_v1  ;;  %v3229_v1 = vld [vmem:[%s6199_s0 + $0x54] sm:$0xf0]  ;;  %v3264_v38 = vor.u32 %v3760_v33, %v3263_v32  ;;  %v3496_v37 = vor.u32 %v3816_v29, %v3493_v30  ;;  %v3323_v30 = vld [vmem:[%s6199_s0 + $0x108] sm:$0xf] }
  0x27   :  { %3864 = vmatpush.bf16.msrb.mxu3 %v3851_v4  ;;  %v3232_v4 = vor.u32 %v3750_v0, %v3229_v1  ;;  %v3481_v0 = vld [vmem:[%s6199_s0 + $0x24c] sm:$0xf0] }
  0x2a   :  { %3647 = vmatmul.msk.bf16.gmra.mxu2 %vm779_vm0, %v3224_v35  ;;  %v3832_v35 = vld [vmem:[%s6199_s0 + $0x2d8] sm:$0xf0] }
  0x2b   :  { %3865 = vmatpush.bf16.msrb.mxu3 %v3850_v10  ;;  %v3527_v10 = vld [vmem:[%s6199_s0 + $0x2a0] sm:$0xf]  ;;  %v3552_v39 = vor.u32 %v3832_v35, %v3551_v34 }
  0x2c   :  { %v3528_v15 = vor.u32 %v3826_v11, %v3527_v10  ;;  %v3319_v10 = vld [vmem:[%s6199_s0 + $0xf8] sm:$0xf]  ;;  %v3773_v11 = vld [vmem:[%s6199_s0 + $0x100] sm:$0xf0] }
  0x2d   :  { %v3320_v17 = vor.u32 %v3773_v11, %v3319_v10 }
  0x2f   :  { %3866 = vmatpush.bf16.msrb.mxu3 %v3849_v12  ;;  %v3753_v12 = vld [vmem:[%s6199_s0 + $0x64] sm:$0xf] }
  0x31   :  { %889 = vmatmul.bf16.gmra.mxu0 %v3204_v42  ;;  %v3767_v42 = vld [vmem:[%s6199_s0 + $0xd0] sm:$0xf0] }
  0x32   :  { %1009 = vmatmul.bf16.gmra.mxu3 %v3492_v43  ;;  %1058 = vmatmul.bf16.gmra.mxu1 %v3208_v44  ;;  %v3296_v43 = vor.u32 %v3767_v42, %v3295_v41  ;;  %v3275_v44 = vld [vmem:[%s6199_s0 + $0xa8] sm:$0xf] }
  0x33   :  { %3867 = vmatpush.bf16.msrb.mxu3 %v3848_v14  ;;  %v3240_v14 = vor.u32 %v3754_v9, %v3239_v8  ;;  %v3276_v51 = vor.u32 %v3763_v45, %v3275_v44  ;;  %v3331_v45 = vld [vmem:[%s6199_s0 + $0x110] sm:$0xf] }
  0x37   :  { %3868 = vmatpush.bf16.msrb.mxu3 %v3847_v16  ;;  %v3244_v16 = vor.u32 %v3753_v12, %v3241_v13  ;;  %v4480_v12 = vld [vmem:[%s6201_s3] ss:$0 sm:$0xff] }
  0x3a   :  { %3648 = vmatmul.msk.bf16.gmra.mxu2 %vm779_vm0, %v3236_v47  ;;  %v3835_v47 = vld [vmem:[%s6199_s0 + $0x2f0] sm:$0xf0] }
  0x3b   :  { %3869 = vmatpush.bf16.msrb.mxu3 %v3846_v21  ;;  %v3757_v21 = vld [vmem:[%s6199_s0 + $0x80] sm:$0xf0]  ;;  %v3564_v52 = vor.u32 %v3835_v47, %v3563_v46  ;;  %v3776_v46 = vld [vmem:[%s6199_s0 + $0x118] sm:$0xf0] }
  0x3c   :  { %v3252_v26 = vor.u32 %v3757_v21, %v3251_v20 }
  0x3f   :  { %3870 = vmatpush.bf16.msrb.mxu3 %v3845_v23  ;;  %v3829_v23 = vld [vmem:[%s6199_s0 + $0x2c0] sm:$0xf0] }
  0x40   :  { %v3540_v27 = vor.u32 %v3829_v23, %v3539_v22  ;;  %v3299_v23 = vld [vmem:[%s6199_s0 + $0xd8] sm:$0xf] }
  0x41   :  { %894 = vmatmul.bf16.gmra.mxu0 %v3216_v54  ;;  %v3307_v54 = vld [vmem:[%s6199_s0 + $0xe0] sm:$0xf]  ;;  %v3300_v33 = vor.u32 %v3769_v25, %v3299_v23 }
  0x42   :  { %1014 = vmatmul.bf16.gmra.mxu3 %v3504_v55  ;;  %1063 = vmatmul.bf16.gmra.mxu1 %v3220_v56  ;;  %v3770_v55 = vld [vmem:[%s6199_s0 + $0xe8] sm:$0xf0] }
  0x43   :  { %3871 = vmatpush.bf16.msra.mxu3 %v4180_v2  ;;  %v3228_v2 = vor.u32 %v3751_v61, %v3227_v60  ;;  %v3308_v57 = vor.u32 %v3770_v55, %v3307_v54  ;;  %v3766_v60 = vld [vmem:[%s6199_s0 + $0xc8] sm:$0xf0]  ;;  %v3765_v61 = vld [vmem:[%s6199_s0 + $0xc4] sm:$0xf] }
  0x47   :  { %3872 = vmatpush.bf16.msra.mxu3 %v4192_v5  ;;  %v3259_v5 = vld [vmem:[%s6199_s0 + $0x80] sm:$0xf] }
  0x48   :  { %v3260_v7 = vor.u32 %v3758_v6, %v3259_v5  ;;  %v3484_v5 = vor.u32 %v3813_v63, %v3481_v0  ;;  %v3313_v63 = vld [vmem:[%s6199_s0 + $0xfc] sm:$0xf0]  ;;  %v3819_v0 = vld [vmem:[%s6199_s0 + $0x274] sm:$0xf] }
  0x4a   :  { %3649 = vmatmul.msk.bf16.gmra.mxu2 %vm779_vm0, %v3248_v59  ;;  %v3287_v59 = vld [vmem:[%s6199_s0 + $0xc0] sm:$0xf] }
  0x51   :  { %899 = vmatmul.bf16.gmra.mxu0 %v3228_v2  ;;  %v3288_v2 = vor.u32 %v3766_v60, %v3287_v59  ;;  %v3772_v60 = vld [vmem:[%s6199_s0 + $0xf8] sm:$0xf0] }
  0x52   :  { %1019 = vmatmul.bf16.gmra.mxu3 %v3516_v3  ;;  %1068 = vmatmul.bf16.gmra.mxu1 %v3232_v4  ;;  %v3292_v4 = vor.u32 %v3765_v61, %v3289_v62  ;;  %v3771_v61 = vld [vmem:[%s6199_s0 + $0xf4] sm:$0xf] }
  0x5a   :  { %3650 = vmatmul.msk.bf16.gmra.mxu2 %vm779_vm0, %v3260_v7 }
  0x61   :  { %904 = vmatmul.bf16.gmra.mxu0 %v3240_v14 }
  0x62   :  { %1024 = vmatmul.bf16.gmra.mxu3 %v3528_v15  ;;  %1073 = vmatmul.bf16.gmra.mxu1 %v3244_v16 }
  0x6a   :  { %3651 = vmatmul.msk.bf16.gmra.mxu2 %vm779_vm0, %v3272_v19 }
  0x71   :  { %909 = vmatmul.bf16.gmra.mxu0 %v3252_v26  ;;  %v3768_v26 = vld [vmem:[%s6199_s0 + $0xdc] sm:$0xf] }
  0x72   :  { %1029 = vmatmul.bf16.gmra.mxu3 %v3540_v27  ;;  %1078 = vmatmul.bf16.gmra.mxu1 %v3256_v28  ;;  %v3301_v28 = vld [vmem:[%s6199_s0 + $0xe4] sm:$0xf0] }
  0x73   :  { %v3304_v36 = vor.u32 %v3768_v26, %v3301_v28 }
  0x7a   :  { %3652 = vmatmul.msk.bf16.gmra.mxu2 %vm779_vm0, %v3284_v31 }
  0x81   :  { %914 = vmatmul.bf16.gmra.mxu0 %v3264_v38 }
  0x82   :  { %1034 = vmatmul.bf16.gmra.mxu3 %v3552_v39  ;;  %1083 = vmatmul.bf16.gmra.mxu1 %v3268_v40 }
  0x8a   :  { %3653 = vmatmul.msk.bf16.gmra.mxu2 %vm779_vm0, %v3296_v43 }
  0x8d   :  { %v1223_v50 = vpop.f32.mrf.mxu2 }
  0x91   :  { %919 = vmatmul.bf16.gmra.mxu0 %v3276_v51  ;;  %v3332_v51 = vor.u32 %v3776_v46, %v3331_v45 }
  0x92   :  { %1039 = vmatmul.bf16.gmra.mxu3 %v3564_v52  ;;  %1088 = vmatmul.bf16.gmra.mxu1 %v3280_v53 }
  0x95   :  { %v1225_v56 = vpop.f32.mrf.mxu2 }
  0x9a   :  { %3654 = vmatmul.msk.bf16.gmra.mxu2 %vm779_vm0, %v3308_v57  ;;  %v3311_v57 = vld [vmem:[%s6199_s0 + $0xf0] sm:$0xf] }
  0x9d   :  { %v1228_v1 = vpop.f32.mrf.mxu2 }
  0x9e   :  { %v885_v3 = vpop.f32.mrf.mxu0 }
  0x9f   :  { %v886_v6 = vadd.f32 %v4449_v58, %v885_v3  ;;  %v1054_v7 = vpop.f32.mrf.mxu1 }
  0xa1   :  { %v1055_v8 = vadd.f32 %v1054_v7, %v886_v6  ;;  %924 = vmatmul.bf16.gmra.mxu0 %v3288_v2  ;;  %v3316_v7 = vor.u32 %v3771_v61, %v3313_v63 }
  0xa2   :  { %1093 = vmatmul.bf16.gmra.mxu1 %v3292_v4  ;;  %1173 = vmatmul.bf16.vlgmr.msrb.gmra.mxu3 %v3484_v5  ;;  %v3312_v4 = vor.u32 %v3772_v60, %v3311_v57 }
  0xa3   :  { %v1224_v9 = vadd.f32 %v1223_v50, %v1055_v8 }
  0xa5   :  { %v1447_v13 = vmul.f32 0.01, %v1224_v9  ;;  %v4482_v14 = vpop.f32.mrf.mxu3  ;;  %v1230_v15 = vpop.f32.mrf.mxu2  ;;  %vm1383_vm1 = vcmp.ge.f32.partialorder %v1224_v9, 0.0 }
  0xa6   :  { %v887_v16 = vpop.f32.mrf.mxu0 }
  0xa7   :  { %v888_v18 = vadd.f32 %v4449_v58, %v887_v16  ;;  %v1056_v19 = vpop.f32.mrf.mxu1  ;;  %v1511_v20 = vsel %vm1383_vm1, %v1224_v9, %v1447_v13 }
  0xa8   :  { %v1579_v21 = vmul.f32 %v4480_v12, %v1511_v20 }
  0xa9   :  { %v1057_v22 = vadd.f32 %v1056_v19, %v888_v18  ;;  %v3343_v18 = vld [vmem:[%s6199_s0 + $0x128] sm:$0xf]  ;;  %v3779_v19 = vld [vmem:[%s6199_s0 + $0x130] sm:$0xf0] }
  0xaa   :  { %3655 = vmatmul.msk.bf16.gmra.mxu2 %vm779_vm0, %v3320_v17  ;;  %v1644_v24 = vsel %vm1643_vm2, %v1579_v21, 0.0 }
  0xab   :  { %v1226_v27 = vadd.f32 %v1225_v56, %v1057_v22  ;;  %1645 = vadd.xlane.f32.xlu0 %v1644_v24  ;;  %v3344_v24 = vor.u32 %v3779_v19, %v3343_v18 }
  0xad   :  { %v4506_v31 = vpop.f32.mrf.mxu3  ;;  %v1233_v32 = vpop.f32.mrf.mxu2  ;;  %vm1384_vm3 = vcmp.ge.f32.partialorder %v1226_v27, 0.0  ;;  %v1448_v34 = vmul.f32 0.01, %v1226_v27 }
  0xae   :  { %v890_v35 = vpop.f32.mrf.mxu0 }
  0xaf   :  { %v891_v38 = vadd.f32 %v4449_v58, %v890_v35  ;;  %v1059_v39 = vpop.f32.mrf.mxu1  ;;  %v1512_v40 = vsel %vm1384_vm3, %v1226_v27, %v1448_v34  ;;  %v3774_v34 = vld [vmem:[%s6199_s0 + $0x10c] sm:$0xf] }
  0xb0   :  { %v1580_v41 = vmul.f32 %v4480_v12, %v1512_v40 }
  0xb1   :  { %v1060_v42 = vadd.f32 %v1059_v39, %v891_v38  ;;  %929 = vmatmul.bf16.gmra.mxu0 %v3300_v33  ;;  %v3775_v33 = vld [vmem:[%s6199_s0 + $0x110] sm:$0xf0]  ;;  %v3517_v38 = vld [vmem:[%s6199_s0 + $0x294] sm:$0xf0] }
  0xb2   :  { %1098 = vmatmul.bf16.gmra.mxu1 %v3304_v36  ;;  %1178 = vmatmul.bf16.gmra.mxu3 %v3496_v37  ;;  %v1647_v43 = vsel %vm1643_vm2, %v1580_v41, 0.0  ;;  %v3325_v36 = vld [vmem:[%s6199_s0 + $0x114] sm:$0xf0]  ;;  %v3822_v37 = vld [vmem:[%s6199_s0 + $0x28c] sm:$0xf]  ;;  %v3324_v41 = vor.u32 %v3775_v33, %v3323_v30 }
  0xb3   :  { %v1229_v44 = vadd.f32 %v1228_v1, %v1060_v42  ;;  %1648 = vadd.xlane.f32.xlu0 %v1647_v43  ;;  %v3505_v1 = vld [vmem:[%s6199_s0 + $0x27c] sm:$0xf0]  ;;  %v3520_v45 = vor.u32 %v3822_v37, %v3517_v38  ;;  %v3785_v30 = vld [vmem:[%s6199_s0 + $0x160] sm:$0xf0] }
  0xb4   :  { %v3508_v8 = vor.u32 %v3819_v0, %v3505_v1 }
  0xb5   :  { %v1449_v47 = vmul.f32 0.01, %v1229_v44  ;;  %v4517_v48 = vpop.f32.mrf.mxu3  ;;  %v1235_v49 = vpop.f32.mrf.mxu2  ;;  %vm1385_vm4 = vcmp.ge.f32.partialorder %v1229_v44, 0.0 }
  0xb6   :  { %v892_v50 = vpop.f32.mrf.mxu0 }
  0xb7   :  { %v893_v52 = vadd.f32 %v4449_v58, %v892_v50  ;;  %v1061_v53 = vpop.f32.mrf.mxu1  ;;  %v1513_v54 = vsel %vm1385_vm4, %v1229_v44, %v1449_v47  ;;  %v3328_v44 = vor.u32 %v3774_v34, %v3325_v36 }
  0xb8   :  { %v1581_v55 = vmul.f32 %v4480_v12, %v1513_v54  ;;  %v3355_v54 = vld [vmem:[%s6199_s0 + $0x140] sm:$0xf] }
  0xb9   :  { %v1062_v56 = vadd.f32 %v1061_v53, %v893_v52 }
  0xba   :  { %3656 = vmatmul.msk.bf16.gmra.mxu2 %vm779_vm0, %v3332_v51  ;;  %v1650_v59 = vsel %vm1643_vm2, %v1581_v55, 0.0  ;;  %v3782_v55 = vld [vmem:[%s6199_s0 + $0x148] sm:$0xf0] }
  0xbb   :  { %v1231_v62 = vadd.f32 %v1230_v15, %v1062_v56  ;;  %1651 = vadd.xlane.f32.xlu1 %v1650_v59  ;;  %v3356_v61 = vor.u32 %v3782_v55, %v3355_v54 }
  0xbd   :  { %v4541_v2 = vpop.f32.mrf.mxu3  ;;  %v1238_v3 = vpop.f32.mrf.mxu2  ;;  %vm1386_vm5 = vcmp.ge.f32.partialorder %v1231_v62, 0.0  ;;  %v1450_v5 = vmul.f32 0.01, %v1231_v62 }
  0xbe   :  { %v895_v6 = vpop.f32.mrf.mxu0 }
  0xbf   :  { %v896_v9 = vadd.f32 %v4449_v58, %v895_v6  ;;  %v1064_v10 = vpop.f32.mrf.mxu1  ;;  %v1514_v11 = vsel %vm1386_vm5, %v1231_v62, %v1450_v5  ;;  %v3778_v6 = vld [vmem:[%s6199_s0 + $0x128] sm:$0xf0] }
  0xc0   :  { %v1582_v13 = vmul.f32 %v4480_v12, %v1514_v11  ;;  %v3529_v11 = vld [vmem:[%s6199_s0 + $0x2ac] sm:$0xf0] }
  0xc1   :  { %v1065_v15 = vadd.f32 %v1064_v10, %v896_v9  ;;  %934 = vmatmul.bf16.gmra.mxu0 %v3312_v4  ;;  %v3335_v4 = vld [vmem:[%s6199_s0 + $0x120] sm:$0xf]  ;;  %v3337_v9 = vld [vmem:[%s6199_s0 + $0x12c] sm:$0xf0]  ;;  %v3825_v10 = vld [vmem:[%s6199_s0 + $0x2a4] sm:$0xf] }
  0xc2   :  { %1103 = vmatmul.bf16.gmra.mxu1 %v3316_v7  ;;  %1183 = vmatmul.bf16.gmra.mxu3 %v3508_v8  ;;  %v1653_v16 = vsel %vm1643_vm2, %v1582_v13, 0.0  ;;  %v3777_v7 = vld [vmem:[%s6199_s0 + $0x124] sm:$0xf] }
  0xc3   :  { %v1234_v17 = vadd.f32 %v1233_v32, %v1065_v15  ;;  %1654 = vadd.xlane.f32.xlu1 %v1653_v16  ;;  %v3336_v16 = vor.u32 %v3778_v6, %v3335_v4  ;;  %v3340_v19 = vor.u32 %v3777_v7, %v3337_v9  ;;  %v3788_v6 = vld [vmem:[%s6199_s0 + $0x178] sm:$0xf0] }
  0xc5   :  { %v1451_v20 = vmul.f32 0.01, %v1234_v17  ;;  %v4552_v21 = vpop.f32.mrf.mxu3  ;;  %v1240_v22 = vpop.f32.mrf.mxu2  ;;  %vm1387_vm6 = vcmp.ge.f32.partialorder %v1234_v17, 0.0 }
  0xc6   :  { %v897_v23 = vpop.f32.mrf.mxu0 }
  0xc7   :  { %v898_v25 = vadd.f32 %v4449_v58, %v897_v23  ;;  %v1066_v26 = vpop.f32.mrf.mxu1  ;;  %v1515_v27 = vsel %vm1387_vm6, %v1234_v17, %v1451_v20  ;;  %v3532_v20 = vor.u32 %v3825_v10, %v3529_v11 }
  0xc8   :  { %v1583_v28 = vmul.f32 %v4480_v12, %v1515_v27 }
  0xc9   :  { %v1067_v29 = vadd.f32 %v1066_v26, %v898_v25 }
  0xca   :  { %3657 = vmatmul.msk.bf16.gmra.mxu2 %vm779_vm0, %v3344_v24  ;;  %v1656_v32 = vsel %vm1643_vm2, %v1583_v28, 0.0 }
  0xcb   :  { %v1236_v35 = vadd.f32 %v1235_v49, %v1067_v29  ;;  %1657 = vadd.xlane.f32.xlu2 %v1656_v32  ;;  %v3367_v29 = vld [vmem:[%s6199_s0 + $0x158] sm:$0xf] }
  0xcc   :  { %v3368_v36 = vor.u32 %v3785_v30, %v3367_v29  ;;  %v3553_v29 = vld [vmem:[%s6199_s0 + $0x2dc] sm:$0xf0] }
  0xcd   :  { %v4576_v39 = vpop.f32.mrf.mxu3  ;;  %v1243_v40 = vpop.f32.mrf.mxu2  ;;  %vm1388_vm7 = vcmp.ge.f32.partialorder %v1236_v35, 0.0  ;;  %v1452_v42 = vmul.f32 0.01, %v1236_v35 }
  0xce   :  { %v900_v43 = vpop.f32.mrf.mxu0 }
  0xcf   :  { %v901_v46 = vadd.f32 %v4449_v58, %v900_v43  ;;  %v1069_v47 = vpop.f32.mrf.mxu1  ;;  %v1516_v49 = vsel %vm1388_vm7, %v1236_v35, %v1452_v42  ;;  %v3347_v43 = vld [vmem:[%s6199_s0 + $0x138] sm:$0xf] }
  0xd0   :  { %v1584_v50 = vmul.f32 %v4480_v12, %v1516_v49  ;;  %v3349_v49 = vld [vmem:[%s6199_s0 + $0x144] sm:$0xf0] }
  0xd1   :  { %v1070_v51 = vadd.f32 %v1069_v47, %v901_v46  ;;  %939 = vmatmul.bf16.gmra.mxu0 %v3324_v41  ;;  %v3780_v46 = vld [vmem:[%s6199_s0 + $0x13c] sm:$0xf] }
  0xd2   :  { %1108 = vmatmul.bf16.gmra.mxu1 %v3328_v44  ;;  %1188 = vmatmul.bf16.gmra.mxu3 %v3520_v45  ;;  %v1659_v52 = vsel %vm1643_vm2, %v1584_v50, 0.0  ;;  %v3781_v45 = vld [vmem:[%s6199_s0 + $0x140] sm:$0xf0]  ;;  %v3828_v50 = vld [vmem:[%s6199_s0 + $0x2bc] sm:$0xf] }
  0xd3   :  { %v1239_v53 = vadd.f32 %v1238_v3, %v1070_v51  ;;  %1660 = vadd.xlane.f32.xlu2 %v1659_v52  ;;  %v3541_v51 = vld [vmem:[%s6199_s0 + $0x2c4] sm:$0xf0]  ;;  %v3348_v54 = vor.u32 %v3781_v45, %v3347_v43 }
  0xd5   :  { %v1453_v56 = vmul.f32 0.01, %v1239_v53  ;;  %v4587_v57 = vpop.f32.mrf.mxu3  ;;  %v1245_v59 = vpop.f32.mrf.mxu2  ;;  %vm1389_vm8 = vcmp.ge.f32.partialorder %v1239_v53, 0.0 }
  0xd6   :  { %v902_v60 = vpop.f32.mrf.mxu0 }
  0xd7   :  { %v903_v62 = vadd.f32 %v4449_v58, %v902_v60  ;;  %v1071_v63 = vpop.f32.mrf.mxu1  ;;  %v1517_v0 = vsel %vm1389_vm8, %v1239_v53, %v1453_v56  ;;  %v3544_v60 = vor.u32 %v3828_v50, %v3541_v51 }
  0xd8   :  { %v1585_v1 = vmul.f32 %v4480_v12, %v1517_v0 }
  0xd9   :  { %v1072_v3 = vadd.f32 %v1071_v63, %v903_v62 }
  0xda   :  { %3658 = vmatmul.msk.bf16.gmra.mxu2 %vm779_vm0, %v3356_v61  ;;  %v1662_v5 = vsel %vm1643_vm2, %v1585_v1, 0.0 }
  0xdb   :  { %v1241_v8 = vadd.f32 %v1240_v22, %v1072_v3  ;;  %1663 = vadd.xlane.f32.xlu0 %v1662_v5  ;;  %v3379_v5 = vld [vmem:[%s6199_s0 + $0x170] sm:$0xf] }
  0xdc   :  { %v3380_v11 = vor.u32 %v3788_v6, %v3379_v5  ;;  %v3373_v5 = vld [vmem:[%s6199_s0 + $0x174] sm:$0xf0]  ;;  %v3834_v6 = vld [vmem:[%s6199_s0 + $0x2ec] sm:$0xf] }
  0xdd   :  { %v4611_v13 = vpop.f32.mrf.mxu3  ;;  %v1248_v15 = vpop.f32.mrf.mxu2  ;;  %vm1390_vm9 = vcmp.ge.f32.partialorder %v1241_v8, 0.0  ;;  %v1454_v17 = vmul.f32 0.01, %v1241_v8 }
  0xde   :  { %v905_v18 = vpop.f32.mrf.mxu0 }
  0xdf   :  { %v906_v22 = vadd.f32 %v4449_v58, %v905_v18  ;;  %v1074_v23 = vpop.f32.mrf.mxu1  ;;  %v1518_v24 = vsel %vm1390_vm9, %v1241_v8, %v1454_v17  ;;  %vm3120_vm9 = vcmask 7168  }
  0xe0   :  { %v1586_v25 = vmul.f32 %v4480_v12, %v1518_v24  ;;  %v3784_v24 = vld [vmem:[%s6199_s0 + $0x158] sm:$0xf0] }
  0xe1   :  { %v1075_v26 = vadd.f32 %v1074_v23, %v906_v22  ;;  %944 = vmatmul.bf16.gmra.mxu0 %v3336_v16  ;;  %v3359_v22 = vld [vmem:[%s6199_s0 + $0x150] sm:$0xf] }
  0xe2   :  { %1113 = vmatmul.bf16.gmra.mxu1 %v3340_v19  ;;  %1193 = vmatmul.bf16.gmra.mxu3 %v3532_v20  ;;  %v1665_v27 = vsel %vm1643_vm2, %v1586_v25, 0.0  ;;  %v3783_v25 = vld [vmem:[%s6199_s0 + $0x154] sm:$0xf] }
  0xe3   :  { %v1244_v28 = vadd.f32 %v1243_v40, %v1075_v26  ;;  %1666 = vadd.xlane.f32.xlu1 %v1665_v27  ;;  %v3361_v27 = vld [vmem:[%s6199_s0 + $0x15c] sm:$0xf0] }
  0xe5   :  { %v1455_v32 = vmul.f32 0.01, %v1244_v28  ;;  %v4622_v33 = vpop.f32.mrf.mxu3  ;;  %v1250_v34 = vpop.f32.mrf.mxu2  ;;  %vm1391_vm10 = vcmp.ge.f32.partialorder %v1244_v28, 0.0 }
  0xe6   :  { %v907_v35 = vpop.f32.mrf.mxu0 }
  0xe7   :  { %v908_v37 = vadd.f32 %v4449_v58, %v907_v35  ;;  %v1076_v38 = vpop.f32.mrf.mxu1  ;;  %v1519_v40 = vsel %vm1391_vm10, %v1244_v28, %v1455_v32  ;;  %v3831_v28 = vld [vmem:[%s6199_s0 + $0x2d4] sm:$0xf]  ;;  %v3360_v35 = vor.u32 %v3784_v24, %v3359_v22 }
  0xe8   :  { %v1587_v41 = vmul.f32 %v4480_v12, %v1519_v40 }
  0xe9   :  { %v1077_v42 = vadd.f32 %v1076_v38, %v908_v37  ;;  %v3364_v37 = vor.u32 %v3783_v25, %v3361_v27  ;;  %v3556_v38 = vor.u32 %v3831_v28, %v3553_v29  ;;  %v3403_v27 = vld [vmem:[%s6199_s0 + $0x1a0] sm:$0xf]  ;;  %v3794_v28 = vld [vmem:[%s6199_s0 + $0x1a8] sm:$0xf0] }
  0xea   :  { %3659 = vmatmul.msk.bf16.gmra.mxu2 %vm779_vm0, %v3368_v36  ;;  %v1668_v44 = vsel %vm1643_vm2, %v1587_v41, 0.0 }
  0xeb   :  { %v1246_v47 = vadd.f32 %v1245_v59, %v1077_v42  ;;  %1669 = vadd.xlane.f32.xlu2 %v1668_v44  ;;  %v3352_v59 = vor.u32 %v3780_v46, %v3349_v49  ;;  %v3791_v49 = vld [vmem:[%s6199_s0 + $0x190] sm:$0xf0] }
  0xed   :  { %v4646_v52 = vpop.f32.mrf.mxu3  ;;  %v1253_v53 = vpop.f32.mrf.mxu2  ;;  %vm1392_vm11 = vcmp.ge.f32.partialorder %v1246_v47, 0.0  ;;  %v1456_v55 = vmul.f32 0.01, %v1246_v47 }
  0xee   :  { %v910_v56 = vpop.f32.mrf.mxu0 }
  0xef   :  { %v911_v61 = vadd.f32 %v4449_v58, %v910_v56  ;;  %v1079_v62 = vpop.f32.mrf.mxu1  ;;  %v1520_v63 = vsel %vm1392_vm11, %v1246_v47, %v1456_v55  ;;  %v3391_v47 = vld [vmem:[%s6199_s0 + $0x188] sm:$0xf] }
  0xf0   :  { %v1588_v0 = vmul.f32 %v4480_v12, %v1520_v63  ;;  %v3392_v56 = vor.u32 %v3791_v49, %v3391_v47  ;;  %v3371_v63 = vld [vmem:[%s6199_s0 + $0x168] sm:$0xf]  ;;  %v3789_v47 = vld [vmem:[%s6199_s0 + $0x184] sm:$0xf] }
  0xf1   :  { %v1080_v1 = vadd.f32 %v1079_v62, %v911_v61  ;;  %949 = vmatmul.bf16.gmra.mxu0 %v3348_v54 }
  0xf2   :  { %1118 = vmatmul.bf16.gmra.mxu1 %v3352_v59  ;;  %1198 = vmatmul.bf16.gmra.mxu3 %v3544_v60  ;;  %v1671_v3 = vsel %vm1643_vm2, %v1588_v0, 0.0 }
  0xf3   :  { %v1249_v4 = vadd.f32 %v1248_v15, %v1080_v1  ;;  %1672 = vadd.xlane.f32.xlu0 %v1671_v3  ;;  %v10_v15 = vstv %s6202_s4  ;;  %v3787_v1 = vld [vmem:[%s6199_s0 + $0x170] sm:$0xf0]  ;;  %v3786_v3 = vld [vmem:[%s6199_s0 + $0x16c] sm:$0xf] }
  0xf4   :  { %11 = vst [vmem:[#allocation2] sm:$0x1] %v10_v15  ;;  %v3372_v15 = vor.u32 %v3787_v1, %v3371_v63 }
  0xf5   :  { %v1457_v7 = vmul.f32 0.01, %v1249_v4  ;;  %v4657_v8 = vpop.f32.mrf.mxu3  ;;  %v1255_v9 = vpop.f32.mrf.mxu2  ;;  %vm1393_vm12 = vcmp.ge.f32.partialorder %v1249_v4, 0.0 }
  0xf6   :  { %v912_v10 = vpop.f32.mrf.mxu0 }
  0xf7   :  { %v913_v16 = vadd.f32 %v4449_v58, %v912_v10  ;;  %v1081_v17 = vpop.f32.mrf.mxu1  ;;  %v1521_v18 = vsel %vm1393_vm12, %v1249_v4, %v1457_v7  ;;  %v3565_v7 = vld [vmem:[%s6199_s0 + $0x2f4] sm:$0xf0] }
  0xf8   :  { %v1589_v19 = vmul.f32 %v4480_v12, %v1521_v18  ;;  %v3568_v18 = vor.u32 %v3834_v6, %v3565_v7 }
  0xf9   :  { %v1082_v20 = vadd.f32 %v1081_v17, %v913_v16  ;;  %v3376_v17 = vor.u32 %v3786_v3, %v3373_v5 }
  0xfa   :  { %3660 = vmatmul.msk.bf16.gmra.mxu2 %vm779_vm0, %v3380_v11  ;;  %v1674_v23 = vsel %vm1643_vm2, %v1589_v19, 0.0 }
  0xfb   :  { %v1251_v26 = vadd.f32 %v1250_v34, %v1082_v20  ;;  %1675 = vadd.xlane.f32.xlu1 %v1674_v23 }
  0xfd   :  { %v4684_v30 = vpop.f32.mrf.mxu3  ;;  %v1258_v32 = vpop.f32.mrf.mxu2  ;;  %vm1394_vm13 = vcmp.ge.f32.partialorder %v1251_v26, 0.0  ;;  %v1458_v36 = vmul.f32 0.01, %v1251_v26 }
  0xfe   :  { %v915_v34 = vpop.f32.mrf.mxu0 }
  0xff   :  { %v916_v40 = vadd.f32 %v4449_v58, %v915_v34  ;;  %v1084_v41 = vpop.f32.mrf.mxu1  ;;  %v1522_v42 = vsel %vm1394_vm13, %v1251_v26, %v1458_v36 }
 0x100   :  { %v1590_v43 = vmul.f32 %v4480_v12, %v1522_v42 }
 0x101   :  { %v1085_v44 = vadd.f32 %v1084_v41, %v916_v40  ;;  %954 = vmatmul.bf16.gmra.mxu0 %v3360_v35 }
 0x102   :  { %1123 = vmatmul.bf16.gmra.mxu1 %v3364_v37  ;;  %1203 = vmatmul.bf16.gmra.mxu3 %v3556_v38  ;;  %v1677_v45 = vsel %vm1643_vm2, %v1590_v43, 0.0  ;;  %v3404_v37 = vor.u32 %v3794_v28, %v3403_v27  ;;  %v4736_v43 = vld [vmem:[#allocation2] ss:$0 sm:$0xff] }
 0x103   :  { %v1254_v46 = vadd.f32 %v1253_v53, %v1085_v44  ;;  %1678 = vadd.xlane.f32.xlu2 %v1677_v45  ;;  %v3383_v44 = vld [vmem:[%s6199_s0 + $0x180] sm:$0xf] }
 0x105   :  { %v1459_v50 = vmul.f32 0.01, %v1254_v46  ;;  %v4695_v51 = vpop.f32.mrf.mxu3  ;;  %v1260_v54 = vpop.f32.mrf.mxu2  ;;  %vm1395_vm14 = vcmp.ge.f32.partialorder %v1254_v46, 0.0 }
 0x106   :  { %v917_v55 = vpop.f32.mrf.mxu0 }
 0x107   :  { %v918_v59 = vadd.f32 %v4449_v58, %v917_v55  ;;  %v1086_v60 = vpop.f32.mrf.mxu1  ;;  %v1523_v53 = vsel %vm1395_vm14, %v1254_v46, %v1459_v50  ;;  %v3790_v46 = vld [vmem:[%s6199_s0 + $0x188] sm:$0xf0]  ;;  %v3385_v50 = vld [vmem:[%s6199_s0 + $0x18c] sm:$0xf0]  ;;  %v3511_v55 = vld [vmem:[%s6199_s0 + $0x278] sm:$0xf] }
 0x108   :  { %v1591_v61 = vmul.f32 %v4480_v12, %v1523_v53  ;;  %v3384_v53 = vor.u32 %v3790_v46, %v3383_v44  ;;  %v3388_v63 = vor.u32 %v3789_v47, %v3385_v50  ;;  %v3793_v44 = vld [vmem:[%s6199_s0 + $0x1a0] sm:$0xf0]  ;;  %v3397_v47 = vld [vmem:[%s6199_s0 + $0x1a4] sm:$0xf0]  ;;  %v3824_v50 = vld [vmem:[%s6199_s0 + $0x298] sm:$0xf0] }
 0x109   :  { %v1087_v62 = vadd.f32 %v1086_v60, %v918_v59 }
 0x10a   :  { %3661 = vmatmul.msk.bf16.gmra.mxu2 %vm779_vm0, %v3392_v56  ;;  %v1680_v0 = vsel %vm1643_vm2, %v1591_v61, 0.0  ;;  %v3821_v56 = vld [vmem:[%s6199_s0 + $0x280] sm:$0xf0] }
 0x10b   :  { %v1256_v4 = vadd.f32 %v1255_v9, %v1087_v62  ;;  %1681 = vadd.xlane.f32.xlu0 %v1680_v0  ;;  %v3512_v0 = vor.u32 %v3821_v56, %v3511_v55  ;;  %v1008_v55 = vadd.f32 %v4449_v58, %v4506_v31 }
 0x10d   :  { %v4719_v10 = vpop.f32.mrf.mxu3  ;;  %v1263_v11 = vpop.f32.mrf.mxu2  ;;  %vm1396_vm15 = vcmp.ge.f32.partialorder %v1256_v4, 0.0  ;;  %v1460_v16 = vmul.f32 0.01, %v1256_v4 }
 0x10e   :  { %v920_v9 = vpop.f32.mrf.mxu0 }
 0x10f   :  { %v921_v19 = vadd.f32 %v4449_v58, %v920_v9  ;;  %v1089_v20 = vpop.f32.mrf.mxu1  ;;  %v1524_v22 = vsel %vm1396_vm15, %v1256_v4, %v1460_v16 }
 0x110   :  { %v1592_v23 = vmul.f32 %v4480_v12, %v1524_v22 }
 0x111   :  { %v1090_v24 = vadd.f32 %v1089_v20, %v921_v19  ;;  %959 = vmatmul.bf16.gmra.mxu0 %v3372_v15  ;;  %v1006_v19 = vadd.f32 %v4449_v58, %v4482_v14 }
 0x112   :  { %1128 = vmatmul.bf16.gmra.mxu1 %v3376_v17  ;;  %1208 = vmatmul.bf16.gmra.mxu3 %v3568_v18  ;;  %v1683_v25 = vsel %vm1643_vm2, %v1592_v23, 0.0  ;;  %v3415_v17 = vld [vmem:[%s6199_s0 + $0x1b8] sm:$0xf]  ;;  %v3797_v18 = vld [vmem:[%s6199_s0 + $0x1c0] sm:$0xf0] }
 0x113   :  { %v1259_v26 = vadd.f32 %v1258_v32, %v1090_v24  ;;  %1684 = vadd.xlane.f32.xlu1 %v1683_v25 }
 0x115   :  { %v1461_v29 = vmul.f32 0.01, %v1259_v26  ;;  %v4730_v35 = vpop.f32.mrf.mxu3  ;;  %v4732_v36 = vpop.f32.mrf.mxu2  ;;  %vm1397_vm1 = vcmp.ge.f32.partialorder %v1259_v26, 0.0 }
 0x116   :  { %v922_v34 = vpop.f32.mrf.mxu0 }
 0x117   :  { %v923_v38 = vadd.f32 %v4449_v58, %v922_v34  ;;  %v1091_v32 = vpop.f32.mrf.mxu1  ;;  %v1525_v40 = vsel %vm1397_vm1, %v1259_v26, %v1461_v29  ;;  %v3416_v26 = vor.u32 %v3797_v18, %v3415_v17 }
 0x118   :  { %v1593_v41 = vmul.f32 %v4480_v12, %v1525_v40  ;;  %v3395_v40 = vld [vmem:[%s6199_s0 + $0x198] sm:$0xf] }
 0x119   :  { %v1092_v42 = vadd.f32 %v1091_v32, %v923_v38 }
 0x11a   :  { %3662 = vmatmul.msk.bf16.gmra.mxu2 %vm779_vm0, %v3404_v37  ;;  %v1686_v45 = vsel %vm1643_vm2, %v1593_v41, 0.0 }
 0x11b   :  { %v1261_v49 = vadd.f32 %v1260_v54, %v1092_v42  ;;  %1687 = vadd.xlane.f32.xlu2 %v1686_v45  ;;  %v3792_v45 = vld [vmem:[%s6199_s0 + $0x19c] sm:$0xf] }
 0x11d   :  { %v4758_v59 = vpop.f32.mrf.mxu3  ;;  %v4760_v60 = vpop.f32.mrf.mxu2  ;;  %vm1398_vm3 = vcmp.ge.f32.partialorder %v1261_v49, 0.0  ;;  %v1462_v54 = vmul.f32 0.01, %v1261_v49 }
 0x11e   :  { %v925_v61 = vpop.f32.mrf.mxu0  ;;  %v1646_v62 = vpop.xlane.xlu0 %1645 }
 0x11f   :  { %v926_v1 = vadd.f32 %v4449_v58, %v925_v61  ;;  %v1094_v3 = vpop.f32.mrf.mxu1  ;;  %v1840_v4 = vadd.f32 %v4736_v43, %v1646_v62  ;;  %v1526_v5 = vsel %vm1398_vm3, %v1261_v49, %v1462_v54  ;;  %v3523_v49 = vld [vmem:[%s6199_s0 + $0x290] sm:$0xf] }
 0x120   :  { %v1594_v6 = vmul.f32 %v4480_v12, %v1526_v5 }
 0x121   :  { %v1095_v7 = vadd.f32 %v1094_v3, %v926_v1  ;;  %v3677_v15 = vmul.f32 -1.442695, %v1840_v4  ;;  %964 = vmatmul.bf16.gmra.mxu0 %v3384_v53  ;;  %v3396_v53 = vor.u32 %v3793_v44, %v3395_v40  ;;  %v3524_v1 = vor.u32 %v3824_v50, %v3523_v49  ;;  %v3407_v49 = vld [vmem:[%s6199_s0 + $0x1b0] sm:$0xf]  ;;  %v3796_v50 = vld [vmem:[%s6199_s0 + $0x1b8] sm:$0xf0] }
 0x122   :  { %1133 = vmatmul.bf16.gmra.mxu1 %v3388_v63  ;;  %3671 = vmatmul.msk.bf16.vlgmr.msra.gmra.mxu3 %vm779_vm0, %v3512_v0  ;;  %v1689_v16 = vsel %vm1643_vm2, %v1594_v6, 0.0  ;;  %v3400_v0 = vor.u32 %v3792_v45, %v3397_v47 }
 0x123   :  { %v1264_v9 = vadd.f32 %v1263_v11, %v1095_v7  ;;  %3876 = vpow2.f32 %v3677_v15  ;;  %1690 = vadd.xlane.f32.xlu0 %v1689_v16 }
 0x125   :  { %v1463_v20 = vmul.f32 0.01, %v1264_v9  ;;  %v1174_v22 = vpop.f32.mrf.mxu3  ;;  %v4775_v23 = vpop.f32.mrf.mxu2  ;;  %vm1399_vm4 = vcmp.ge.f32.partialorder %v1264_v9, 0.0 }
 0x126   :  { %v4777_v24 = vadd.f32 %v1174_v22, %v1006_v19  ;;  %v927_v11 = vpop.f32.mrf.mxu0  ;;  %v1649_v25 = vpop.xlane.xlu0 %1648  ;;  %v3427_v19 = vld [vmem:[%s6199_s0 + $0x1d0] sm:$0xf] }
 0x127   :  { %v928_v27 = vadd.f32 %v4449_v58, %v927_v11  ;;  %v1096_v28 = vpop.f32.mrf.mxu1  ;;  %v1841_v29 = vadd.f32 %v4736_v43, %v1649_v25  ;;  %v1527_v34 = vsel %vm1399_vm4, %v1264_v9, %v1463_v20  ;;  %v3800_v20 = vld [vmem:[%s6199_s0 + $0x1d8] sm:$0xf0]  ;;  %v1011_v25 = vadd.f32 %v4449_v58, %v4517_v48 }
 0x128   :  { %v1595_v37 = vmul.f32 %v4480_v12, %v1527_v34  ;;  %v3428_v34 = vor.u32 %v3800_v20, %v3427_v19 }
 0x129   :  { %v3877_v38 = vpop.eup %3876  ;;  %v1097_v14 = vadd.f32 %v1096_v28, %v928_v27  ;;  %v3678_v32 = vmul.f32 -1.442695, %v1841_v29 }
 0x12a   :  { %v4785_v41 = vadd.f32 1.0, %v3877_v38  ;;  %3663 = vmatmul.msk.bf16.gmra.mxu2 %vm779_vm0, %v3416_v26  ;;  %v1692_v42 = vsel %vm1643_vm2, %v1595_v37, 0.0 }
 0x12b   :  { %v1266_v46 = vadd.f32 %v4732_v36, %v1097_v14  ;;  %3878 = vpow2.f32 %v3678_v32  ;;  %1693 = vadd.xlane.f32.xlu1 %v1692_v42 }
 0x12c   :  { %3880 = vrcp.f32 %v4785_v41  ;;  %v2169_v37 = vand.u32 2147483647, %v4785_v41  ;;  %v2171_v38 = vand.u32 2147483648, %v4785_v41  ;;  %vm2165_vm8 = vweird.f32 %v4785_v41 }
 0x12d   :  { %v1176_v36 = vpop.f32.mrf.mxu3  ;;  %v4808_v56 = vpop.f32.mrf.mxu2  ;;  %vm1400_vm5 = vcmp.ge.f32.partialorder %v1266_v46, 0.0  ;;  %v1464_v54 = vmul.f32 0.01, %v1266_v46 }
 0x12e   :  { %v4810_v61 = vadd.f32 %v1176_v36, %v1008_v55  ;;  %v930_v62 = vpop.f32.mrf.mxu0  ;;  %v1652_v63 = vpop.xlane.xlu1 %1651  ;;  %v3795_v55 = vld [vmem:[%s6199_s0 + $0x1b4] sm:$0xf]  ;;  %vm2170_vm11 = vcmp.eq.f32.partialorder %v2169_v37, 8.507059e+37 }
 0x12f   :  { %v931_v3 = vadd.f32 %v4449_v58, %v930_v62  ;;  %v1099_v4 = vpop.f32.mrf.mxu1  ;;  %v1842_v5 = vadd.f32 %v4736_v43, %v1652_v63  ;;  %v1528_v31 = vsel %vm1400_vm5, %v1266_v46, %v1464_v54  ;;  %v1013_v46 = vadd.f32 %v4449_v58, %v4541_v2  ;;  %v3409_v62 = vld [vmem:[%s6199_s0 + $0x1bc] sm:$0xf0]  ;;  %v3535_v63 = vld [vmem:[%s6199_s0 + $0x2a8] sm:$0xf] }
 0x130   :  { %v1596_v6 = vmul.f32 %v4480_v12, %v1528_v31 }
 0x131   :  { %v3879_v7 = vpop.eup %3878  ;;  %v1100_v15 = vadd.f32 %v1099_v4, %v931_v3  ;;  %v3679_v16 = vmul.f32 -1.442695, %v1842_v5  ;;  %969 = vmatmul.bf16.gmra.mxu0 %v3396_v53  ;;  %v3827_v4 = vld [vmem:[%s6199_s0 + $0x2b0] sm:$0xf0] }
 0x132   :  { %v3881_v9 = vpop.eup %3880  ;;  %v4815_v17 = vadd.f32 1.0, %v3879_v7  ;;  %1138 = vmatmul.bf16.gmra.mxu1 %v3400_v0  ;;  %3672 = vmatmul.msk.bf16.gmra.mxu3 %vm779_vm0, %v3524_v1  ;;  %v1695_v18 = vsel %vm1643_vm2, %v1596_v6, 0.0  ;;  %v2172_v1 = vor.u32 1.1754944e-38, %v2171_v38  ;;  %v3536_v20 = vor.u32 %v3827_v4, %v3535_v63 }
 0x133   :  { %v2161_v22 = vmul.f32 %v3881_v9, %v4785_v41  ;;  %v1269_v11 = vadd.f32 %v4760_v60, %v1100_v15  ;;  %3882 = vpow2.f32 %v3679_v16  ;;  %1696 = vadd.xlane.f32.xlu2 %v1695_v18  ;;  %vm2166_vm7 = vweird.f32 %v3881_v9 }
 0x134   :  { %3884 = vrcp.f32 %v4815_v17  ;;  %vm2167_vm10 = vmor %vm2165_vm8, %vm2166_vm7  ;;  %v3408_v15 = vor.u32 %v3796_v50, %v3407_v49  ;;  %v3412_v16 = vor.u32 %v3795_v55, %v3409_v62  ;;  %vm2180_vm14 = vweird.f32 %v4815_v17 }
 0x135   :  { %v2162_v26 = vsub.f32 1.0, %v2161_v22  ;;  %v1465_v27 = vmul.f32 0.01, %v1269_v11  ;;  %v1179_v28 = vpop.f32.mrf.mxu3  ;;  %v4830_v29 = vpop.f32.mrf.mxu2  ;;  %vm1401_vm6 = vcmp.ge.f32.partialorder %v1269_v11, 0.0  ;;  %v2186_v22 = vand.u32 2147483648, %v4815_v17 }
 0x136   :  { %v4834_v60 = vadd.f32 %v1179_v28, %v1011_v25  ;;  %v932_v14 = vpop.f32.mrf.mxu0  ;;  %v1655_v32 = vpop.xlane.xlu1 %1654 }
 0x137   :  { %v2163_v40 = vmul.f32 %v3881_v9, %v2162_v26  ;;  %v933_v48 = vadd.f32 %v4449_v58, %v932_v14  ;;  %v1101_v42 = vpop.f32.mrf.mxu1  ;;  %v1843_v44 = vadd.f32 %v4736_v43, %v1655_v32  ;;  %v1529_v45 = vsel %vm1401_vm6, %v1269_v11, %v1465_v27 }
 0x138   :  { %v1597_v47 = vmul.f32 %v4480_v12, %v1529_v45  ;;  %v1016_v45 = vadd.f32 %v4449_v58, %v4552_v21 }
 0x139   :  { %v3883_v36 = vpop.eup %3882  ;;  %v2164_v53 = vadd.f32 %v3881_v9, %v2163_v40  ;;  %v1102_v54 = vadd.f32 %v1101_v42, %v933_v48  ;;  %v3680_v2 = vmul.f32 -1.442695, %v1843_v44 }
 0x13a   :  { %v3885_v0 = vpop.eup %3884  ;;  %v4858_v3 = vadd.f32 1.0, %v3883_v36  ;;  %3664 = vmatmul.msk.bf16.gmra.mxu2 %vm779_vm0, %v3428_v34  ;;  %v1698_v41 = vsel %vm1643_vm2, %v1597_v47, 0.0  ;;  %v3803_v47 = vld [vmem:[%s6199_s0 + $0x1f0] sm:$0xf0] }
 0x13b   :  { %v2168_v5 = vsel %vm2167_vm10, %v3881_v9, %v2164_v53  ;;  %v2176_v31 = vmul.f32 %v3885_v0, %v4815_v17  ;;  %v1271_v6 = vadd.f32 %v4775_v23, %v1102_v54  ;;  %1699 = vadd.xlane.f32.xlu0 %v1698_v41  ;;  %v2184_v23 = vand.u32 2147483647, %v4815_v17  ;;  %v3439_v17 = vld [vmem:[%s6199_s0 + $0x1e8] sm:$0xf] }
 0x13c   :  { %v2173_v7 = vsel %vm2170_vm11, %v2172_v1, %v2168_v5  ;;  %3886 = vrcp.f32 %v4858_v3  ;;  %vm2181_vm13 = vweird.f32 %v3885_v0  ;;  %v3440_v63 = vor.u32 %v3803_v47, %v3439_v17 }
 0x13d   :  { %3121 = vst.msk [vmem:[%s6203_s5] sm:$0xff] %vm3120_vm9, %v2173_v7  ;;  %v2177_v18 = vsub.f32 1.0, %v2176_v31  ;;  %3888 = vpow2.f32 %v3680_v2  ;;  %v1181_v19 = vpop.f32.mrf.mxu3  ;;  %v4872_v9 = vpop.f32.mrf.mxu2  ;;  %vm1402_vm12 = vcmp.ge.f32.partialorder %v1271_v6, 0.0  ;;  %v1466_v27 = vmul.f32 0.01, %v1271_v6  ;;  %vm2182_vm15 = vmor %vm2180_vm14, %vm2181_vm13 }
 0x13e   :  { %v4876_v11 = vadd.f32 %v1181_v19, %v1013_v46  ;;  %v935_v25 = vpop.f32.mrf.mxu0  ;;  %v1658_v26 = vpop.xlane.xlu2 %1657  ;;  %v2187_v46 = vor.u32 1.1754944e-38, %v2186_v22  ;;  %vm2185_vm1 = vcmp.eq.f32.partialorder %v2184_v23, 8.507059e+37  ;;  %v4915_v31 = vld [vmem:[%s6200_s2] ss:$0 sm:$0xff]  ;;  %vm2195_vm5 = vweird.f32 %v4858_v3 }
 0x13f   :  { %v2178_v28 = vmul.f32 %v3885_v0, %v2177_v18  ;;  %v936_v34 = vadd.f32 %v4449_v58, %v935_v25  ;;  %v1104_v37 = vpop.f32.mrf.mxu1  ;;  %v1844_v38 = vadd.f32 %v4736_v43, %v1658_v26  ;;  %v1530_v14 = vsel %vm1402_vm12, %v1271_v6, %v1466_v27  ;;  %v4924_v23 = vld [vmem:[%s6201_s3] ss:$0 sm:$0xff]  ;;  %v3419_v25 = vld [vmem:[%s6199_s0 + $0x1c8] sm:$0xf] }
 0x140   :  { %v1598_v42 = vmul.f32 %v4480_v12, %v1530_v14 }
 0x141   :  { %v2179_v32 = vadd.f32 %v3885_v0, %v2178_v28  ;;  %v1105_v40 = vadd.f32 %v1104_v37, %v936_v34  ;;  %v3681_v48 = vmul.f32 -1.442695, %v1844_v38  ;;  %974 = vmatmul.bf16.gmra.mxu0 %v3408_v15  ;;  %v3798_v28 = vld [vmem:[%s6199_s0 + $0x1cc] sm:$0xf]  ;;  %v3421_v34 = vld [vmem:[%s6199_s0 + $0x1d4] sm:$0xf0] }
 0x142   :  { %v4882_v44 = vpop.eup %3886  ;;  %1143 = vmatmul.bf16.gmra.mxu1 %v3412_v16  ;;  %3673 = vmatmul.msk.bf16.gmra.mxu3 %vm779_vm0, %v3536_v20  ;;  %v1701_v36 = vsel %vm1643_vm2, %v1598_v42, 0.0  ;;  %v1018_v42 = vadd.f32 %v4915_v31, %v4576_v39 }
 0x143   :  { %v3889_v49 = vpop.eup %3888  ;;  %v2183_v12 = vsel %vm2182_vm15, %v3885_v0, %v2179_v32  ;;  %v2191_v50 = vmul.f32 %v4882_v44, %v4858_v3  ;;  %v1274_v58 = vadd.f32 %v4808_v56, %v1105_v40  ;;  %3890 = vpow2.f32 %v3681_v48  ;;  %1702 = vadd.xlane.f32.xlu1 %v1701_v36  ;;  %v3547_v32 = vld [vmem:[%s6199_s0 + $0x2c0] sm:$0xf]  ;;  %v3830_v40 = vld [vmem:[%s6199_s0 + $0x2c8] sm:$0xf0] }
 0x144   :  { %v2188_v21 = vsel %vm2185_vm1, %v2187_v46, %v2183_v12  ;;  %v4896_v55 = vadd.f32 1.0, %v3889_v49  ;;  %vm2196_vm4 = vweird.f32 %v4882_v44  ;;  %v2199_v56 = vand.u32 2147483647, %v4858_v3 }
 0x145   :  { %3122 = vst.msk [vmem:[%s6203_s5 + $0x8] sm:$0xff] %vm3120_vm9, %v2188_v21  ;;  %v2192_v53 = vsub.f32 1.0, %v2191_v50  ;;  %v1467_v54 = vmul.f32 0.01, %v1274_v58  ;;  %v1184_v2 = vpop.f32.mrf.mxu3  ;;  %v4903_v62 = vpop.f32.mrf.mxu2  ;;  %vm1403_vm3 = vcmp.ge.f32.partialorder %v1274_v58, 0.0  ;;  %v2201_v0 = vand.u32 2147483648, %v4858_v3  ;;  %vm2197_vm6 = vmor %vm2195_vm5, %vm2196_vm4 }
 0x146   :  { %3892 = vrcp.f32 %v4896_v55  ;;  %v937_v1 = vpop.f32.mrf.mxu0  ;;  %v1661_v41 = vpop.xlane.xlu2 %1660  ;;  %v4910_v5 = vadd.f32 %v1184_v2, %v1016_v45  ;;  %v3799_v3 = vld [vmem:[%s6199_s0 + $0x1d0] sm:$0xf0]  ;;  %vm2200_vm7 = vcmp.eq.f32.partialorder %v2199_v56, 8.507059e+37  ;;  %v3424_v50 = vor.u32 %v3798_v28, %v3421_v34 }
 0x147   :  { %v2193_v4 = vmul.f32 %v4882_v44, %v2192_v53  ;;  %v938_v6 = vadd.f32 %v4915_v31, %v937_v1  ;;  %v1106_v7 = vpop.f32.mrf.mxu1  ;;  %v1845_v15 = vadd.f32 %v4736_v43, %v1661_v41  ;;  %v1531_v16 = vsel %vm1403_vm3, %v1274_v58, %v1467_v54 }
 0x148   :  { %v1599_v22 = vmul.f32 %v4924_v23, %v1531_v16  ;;  %v2202_v27 = vor.u32 1.1754944e-38, %v2201_v0  ;;  %v3420_v47 = vor.u32 %v3799_v3, %v3419_v25  ;;  %v3548_v58 = vor.u32 %v3830_v40, %v3547_v32 }
 0x149   :  { %v2194_v18 = vadd.f32 %v4882_v44, %v2193_v4  ;;  %v1107_v19 = vadd.f32 %v1106_v7, %v938_v6  ;;  %v3682_v20 = vmul.f32 -1.442695, %v1845_v15  ;;  %v3891_v26 = vpop.eup %3890  ;;  %v2216_v56 = vand.u32 2147483648, %v4896_v55 }
 0x14a   :  { %3665 = vmatmul.msk.bf16.gmra.mxu2 %vm779_vm0, %v3440_v63  ;;  %v4943_v38 = vadd.f32 1.0, %v3891_v26  ;;  %v2214_v63 = vand.u32 2147483647, %v4896_v55  ;;  %v1021_v7 = vadd.f32 %v4915_v31, %v4587_v57  ;;  %vm2210_vm11 = vweird.f32 %v4896_v55 }
 0x14b   :  { %v2198_v37 = vsel %vm2197_vm6, %v4882_v44, %v2194_v18  ;;  %v1276_v14 = vadd.f32 %v4830_v29, %v1107_v19  ;;  %3894 = vpow2.f32 %v3682_v20  ;;  %v1704_v44 = vsel %vm1643_vm2, %v1599_v22, 0.0  ;;  %v3451_v18 = vld [vmem:[%s6199_s0 + $0x200] sm:$0xf]  ;;  %v3806_v19 = vld [vmem:[%s6199_s0 + $0x208] sm:$0xf0] }
 0x14c   :  { %v3893_v48 = vpop.eup %3892  ;;  %v2203_v45 = vsel %vm2200_vm7, %v2202_v27, %v2198_v37  ;;  %3896 = vrcp.f32 %v4943_v38  ;;  %1705 = vadd.xlane.f32.xlu2 %v1704_v44  ;;  %v4985_v25 = vadd.f32 %v4915_v31, %v4611_v13  ;;  %v2217_v3 = vor.u32 1.1754944e-38, %v2216_v56  ;;  %v4993_v27 = vld [vmem:[%s6199_s0 + $0x1e0] sm:$0xf]  ;;  %v3559_v56 = vld [vmem:[%s6199_s0 + $0x2d8] sm:$0xf] }
 0x14d   :  { %3123 = vst.msk [vmem:[%s6203_s5 + $0x10] sm:$0xff] %vm3120_vm9, %v2203_v45  ;;  %v2206_v29 = vmul.f32 %v3893_v48, %v4896_v55  ;;  %v1186_v46 = vpop.f32.mrf.mxu3  ;;  %v4961_v17 = vpop.f32.mrf.mxu2  ;;  %vm1404_vm8 = vcmp.ge.f32.partialorder %v1276_v14, 0.0  ;;  %v1468_v2 = vmul.f32 0.01, %v1276_v14  ;;  %vm2211_vm10 = vweird.f32 %v3893_v48 }
 0x14e   :  { %v4963_v49 = vadd.f32 %v1186_v46, %v1018_v42  ;;  %v940_v39 = vpop.f32.mrf.mxu0  ;;  %v1664_v12 = vpop.xlane.xlu0 %1663  ;;  %vm2212_vm12 = vmor %vm2210_vm11, %vm2211_vm10  ;;  %vm2215_vm13 = vcmp.eq.f32.partialorder %v2214_v63, 8.507059e+37  ;;  %v3452_v37 = vor.u32 %v3806_v19, %v3451_v18  ;;  %v2231_v46 = vand.u32 2147483648, %v4943_v38 }
 0x14f   :  { %v2207_v21 = vsub.f32 1.0, %v2206_v29  ;;  %v941_v36 = vadd.f32 %v4915_v31, %v940_v39  ;;  %v1109_v53 = vpop.f32.mrf.mxu1  ;;  %v1846_v54 = vadd.f32 %v4736_v43, %v1664_v12  ;;  %v1532_v6 = vsel %vm1404_vm8, %v1276_v14, %v1468_v2  ;;  %v5008_v29 = vld [vmem:[%s6199_s0 + $0x1e4] sm:$0xf] }
 0x150   :  { %v1600_v16 = vmul.f32 %v4924_v23, %v1532_v6  ;;  %vm2225_vm1 = vweird.f32 %v4943_v38 }
 0x151   :  { %v3895_v0 = vpop.eup %3894  ;;  %v2208_v1 = vmul.f32 %v3893_v48, %v2207_v21  ;;  %v1110_v41 = vadd.f32 %v1109_v53, %v941_v36  ;;  %v3683_v4 = vmul.f32 -1.442695, %v1846_v54  ;;  %979 = vmatmul.bf16.gmra.mxu0 %v3420_v47  ;;  %v2229_v21 = vand.u32 2147483647, %v4943_v38 }
 0x152   :  { %v4971_v15 = vadd.f32 1.0, %v3895_v0  ;;  %1148 = vmatmul.bf16.gmra.mxu1 %v3424_v50  ;;  %3674 = vmatmul.msk.bf16.gmra.mxu3 %vm779_vm0, %v3548_v58  ;;  %v3897_v20 = vpop.eup %3896  ;;  %v1707_v40 = vsel %vm1643_vm2, %v1600_v16, 0.0  ;;  %v3833_v0 = vld [vmem:[%s6199_s0 + $0x2e0] sm:$0xf0] }
 0x153   :  { %v2209_v22 = vadd.f32 %v3893_v48, %v2208_v1  ;;  %v1279_v57 = vadd.f32 %v4872_v9, %v1110_v41  ;;  %3898 = vpow2.f32 %v3683_v4  ;;  %v2221_v26 = vmul.f32 %v3897_v20, %v4943_v38  ;;  %v4998_v9 = vld [vmem:[%s6199_s0 + $0x1e8] sm:$0xf0]  ;;  %1708 = vadd.xlane.f32.xlu0 %v1707_v40 }
 0x154   :  { %3900 = vrcp.f32 %v4971_v15  ;;  %v3432_v50 = vor.u32 %v4998_v9, %v4993_v27  ;;  %vm2226_vm14 = vweird.f32 %v3897_v20  ;;  %vm2230_vm4 = vcmp.eq.f32.partialorder %v2229_v21, 8.507059e+37 }
 0x155   :  { %v2213_v55 = vsel %vm2212_vm12, %v3893_v48, %v2209_v22  ;;  %v1469_v13 = vmul.f32 0.01, %v1279_v57  ;;  %v1189_v28 = vpop.f32.mrf.mxu3  ;;  %v5000_v34 = vpop.f32.mrf.mxu2  ;;  %v2222_v32 = vsub.f32 1.0, %v2221_v26  ;;  %v5013_v48 = vld [vmem:[%s6199_s0 + $0x1ec] sm:$0xf0]  ;;  %vm1405_vm15 = vcmp.ge.f32.partialorder %v1279_v57, 0.0  ;;  %vm2227_vm3 = vmor %vm2225_vm1, %vm2226_vm14 }
 0x156   :  { %v2218_v14 = vsel %vm2215_vm13, %v2217_v3, %v2213_v55  ;;  %v5003_v42 = vadd.f32 %v1189_v28, %v1021_v7  ;;  %v942_v45 = vpop.f32.mrf.mxu0  ;;  %v1667_v44 = vpop.xlane.xlu1 %1666  ;;  %v3436_v63 = vor.u32 %v5008_v29, %v5013_v48  ;;  %v2232_v7 = vor.u32 1.1754944e-38, %v2231_v46 }
 0x157   :  { %3124 = vst.msk [vmem:[%s6203_s5 + $0x18] sm:$0xff] %vm3120_vm9, %v2218_v14  ;;  %v943_v47 = vadd.f32 %v4915_v31, %v942_v45  ;;  %v1111_v39 = vpop.f32.mrf.mxu1  ;;  %v1847_v12 = vadd.f32 %v4736_v43, %v1667_v44  ;;  %v2223_v58 = vmul.f32 %v3897_v20, %v2222_v32  ;;  %v1533_v2 = vsel %vm1405_vm15, %v1279_v57, %v1469_v13 }
 0x158   :  { %v1601_v6 = vmul.f32 %v4924_v23, %v1533_v2  ;;  %v3560_v22 = vor.u32 %v3833_v0, %v3559_v56  ;;  %v2244_v3 = vand.u32 2147483647, %v4971_v15  ;;  %vm2240_vm7 = vweird.f32 %v4971_v15 }
 0x159   :  { %v3899_v36 = vpop.eup %3898  ;;  %v1112_v53 = vadd.f32 %v1111_v39, %v943_v47  ;;  %v3684_v54 = vmul.f32 -1.442695, %v1847_v12  ;;  %v2224_v41 = vadd.f32 %v3897_v20, %v2223_v58  ;;  %v3809_v47 = vld [vmem:[%s6199_s0 + $0x220] sm:$0xf0] }
 0x15a   :  { %v3901_v1 = vpop.eup %3900  ;;  %v5034_v4 = vadd.f32 1.0, %v3899_v36  ;;  %3666 = vmatmul.msk.bf16.gmra.mxu2 %vm779_vm0, %v3452_v37  ;;  %v1710_v26 = vsel %vm1643_vm2, %v1601_v6, 0.0  ;;  %vm2245_vm10 = vcmp.eq.f32.partialorder %v2244_v3, 8.507059e+37  ;;  %v3805_v3 = vld [vmem:[%s6199_s0 + $0x200] sm:$0xf0] }
 0x15b   :  { %v2236_v16 = vmul.f32 %v3901_v1, %v4971_v15  ;;  %v1281_v18 = vadd.f32 %v4903_v62, %v1112_v53  ;;  %3902 = vpow2.f32 %v3684_v54  ;;  %v2228_v19 = vsel %vm2227_vm3, %v3897_v20, %v2224_v41  ;;  %1711 = vadd.xlane.f32.xlu1 %v1710_v26  ;;  %v3804_v26 = vld [vmem:[%s6199_s0 + $0x1fc] sm:$0xf] }
 0x15c   :  { %3904 = vrcp.f32 %v5034_v4  ;;  %v2233_v38 = vsel %vm2230_vm4, %v2232_v7, %v2228_v19  ;;  %v2246_v62 = vand.u32 2147483648, %v4971_v15  ;;  %vm2241_vm6 = vweird.f32 %v3901_v1 }
 0x15d   :  { %v2237_v57 = vsub.f32 1.0, %v2236_v16  ;;  %v1191_v27 = vpop.f32.mrf.mxu3  ;;  %v5044_v9 = vpop.f32.mrf.mxu2  ;;  %3125 = vst.msk [vmem:[%s6203_s5 + $0x20] sm:$0xff] %vm3120_vm9, %v2233_v38  ;;  %vm1406_vm5 = vcmp.ge.f32.partialorder %v1281_v18, 0.0  ;;  %v1470_v28 = vmul.f32 0.01, %v1281_v18  ;;  %vm2242_vm8 = vmor %vm2240_vm7, %vm2241_vm6  ;;  %v1026_v53 = vadd.f32 %v4915_v31, %v4622_v33 }
 0x15e   :  { %v5052_v20 = vadd.f32 %v1191_v27, %v4985_v25  ;;  %v945_v55 = vpop.f32.mrf.mxu0  ;;  %v1670_v13 = vpop.xlane.xlu2 %1669  ;;  %v3463_v25 = vld [vmem:[%s6199_s0 + $0x218] sm:$0xf]  ;;  %v2247_v12 = vor.u32 1.1754944e-38, %v2246_v62  ;;  %v2259_v56 = vand.u32 2147483647, %v5034_v4  ;;  %vm2255_vm13 = vweird.f32 %v5034_v4 }
 0x15f   :  { %v2238_v37 = vmul.f32 %v3901_v1, %v2237_v57  ;;  %v946_v14 = vadd.f32 %v4915_v31, %v945_v55  ;;  %v1114_v32 = vpop.f32.mrf.mxu1  ;;  %v1848_v40 = vadd.f32 %v4736_v43, %v1670_v13  ;;  %v1534_v45 = vsel %vm1406_vm5, %v1281_v18, %v1470_v28  ;;  %v3443_v18 = vld [vmem:[%s6199_s0 + $0x1f8] sm:$0xf]  ;;  %v3445_v27 = vld [vmem:[%s6199_s0 + $0x204] sm:$0xf0] }
 0x160   :  { %v1602_v15 = vmul.f32 %v4924_v23, %v1534_v45  ;;  %v3464_v2 = vor.u32 %v3809_v47, %v3463_v25  ;;  %v3444_v45 = vor.u32 %v3805_v3, %v3443_v18  ;;  %vm2260_vm15 = vcmp.eq.f32.partialorder %v2259_v56, 8.507059e+37 }
 0x161   :  { %v3903_v44 = vpop.eup %3902  ;;  %v2239_v29 = vadd.f32 %v3901_v1, %v2238_v37  ;;  %v1115_v48 = vadd.f32 %v1114_v32, %v946_v14  ;;  %v3685_v46 = vmul.f32 -1.442695, %v1848_v40  ;;  %984 = vmatmul.bf16.gmra.mxu0 %v3432_v50  ;;  %v1028_v32 = vadd.f32 %v4915_v31, %v4646_v52 }
 0x162   :  { %v3905_v39 = vpop.eup %3904  ;;  %v5063_v58 = vadd.f32 1.0, %v3903_v44  ;;  %1153 = vmatmul.bf16.gmra.mxu1 %v3436_v63  ;;  %3675 = vmatmul.msk.bf16.gmra.mxu3 %vm779_vm0, %v3560_v22  ;;  %v1713_v33 = vsel %vm1643_vm2, %v1602_v15, 0.0  ;;  %v3448_v44 = vor.u32 %v3804_v26, %v3445_v27  ;;  %v3475_v27 = vld [vmem:[%s6199_s0 + $0x230] sm:$0xf] }
 0x163   :  { %v2243_v21 = vsel %vm2242_vm8, %v3901_v1, %v2239_v29  ;;  %v2251_v50 = vmul.f32 %v3905_v39, %v5034_v4  ;;  %v1284_v36 = vadd.f32 %v4961_v17, %v1115_v48  ;;  %v2261_v17 = vand.u32 2147483648, %v5034_v4  ;;  %1714 = vadd.xlane.f32.xlu2 %v1713_v33  ;;  %v3571_v4 = vld [vmem:[%s6199_s0 + $0x2f0] sm:$0xf]  ;;  %v3836_v29 = vld [vmem:[%s6199_s0 + $0x2f8] sm:$0xf0] }
 0x164   :  { %v2248_v54 = vsel %vm2245_vm10, %v2247_v12, %v2243_v21  ;;  %3906 = vrcp.f32 %v5063_v58  ;;  %vm2256_vm12 = vweird.f32 %v3905_v39  ;;  %vm2270_vm4 = vweird.f32 %v5063_v58 }
 0x165   :  { %3126 = vst.msk [vmem:[%s6203_s5 + $0x28] sm:$0xff] %vm3120_vm9, %v2248_v54  ;;  %v2252_v63 = vsub.f32 1.0, %v2251_v50  ;;  %v1471_v0 = vmul.f32 0.01, %v1284_v36  ;;  %3908 = vpow2.f32 %v3685_v46  ;;  %v1194_v1 = vpop.f32.mrf.mxu3  ;;  %v5077_v41 = vpop.f32.mrf.mxu2  ;;  %vm1407_vm11 = vcmp.ge.f32.partialorder %v1284_v36, 0.0  ;;  %vm2257_vm14 = vmor %vm2255_vm13, %vm2256_vm12 }
 0x166   :  { %v5081_v6 = vadd.f32 %v1194_v1, %v1026_v53  ;;  %v947_v7 = vpop.f32.mrf.mxu0  ;;  %v1673_v16 = vpop.xlane.xlu0 %1672  ;;  %v2262_v40 = vor.u32 1.1754944e-38, %v2261_v17  ;;  %v3572_v53 = vor.u32 %v3836_v29, %v3571_v4  ;;  %v2276_v54 = vand.u32 2147483648, %v5063_v58 }
 0x167   :  { %v2253_v19 = vmul.f32 %v3905_v39, %v2252_v63  ;;  %v948_v22 = vadd.f32 %v4915_v31, %v947_v7  ;;  %v1116_v38 = vpop.f32.mrf.mxu1  ;;  %v1849_v57 = vadd.f32 %v4736_v43, %v1673_v16  ;;  %v1535_v62 = vsel %vm1407_vm11, %v1284_v36, %v1471_v0 }
 0x168   :  { %v1603_v37 = vmul.f32 %v4924_v23, %v1535_v62  ;;  %v3812_v62 = vld [vmem:[%s6199_s0 + $0x238] sm:$0xf0] }
 0x169   :  { %v2254_v55 = vadd.f32 %v3905_v39, %v2253_v19  ;;  %v1117_v13 = vadd.f32 %v1116_v38, %v948_v22  ;;  %v3686_v28 = vmul.f32 -1.442695, %v1849_v57  ;;  %v2277_v57 = vor.u32 1.1754944e-38, %v2276_v54  ;;  %v3455_v54 = vld [vmem:[%s6199_s0 + $0x210] sm:$0xf] }
 0x16a   :  { %v3907_v14 = vpop.eup %3906  ;;  %3667 = vmatmul.msk.bf16.gmra.mxu2 %vm779_vm0, %v3464_v2  ;;  %v1716_v15 = vsel %vm1643_vm2, %v1603_v37, 0.0  ;;  %v3476_v4 = vor.u32 %v3812_v62, %v3475_v27 }
 0x16b   :  { %v3909_v48 = vpop.eup %3908  ;;  %v2258_v46 = vsel %vm2257_vm14, %v3905_v39, %v2254_v55  ;;  %v2266_v52 = vmul.f32 %v3907_v14, %v5063_v58  ;;  %v1286_v25 = vadd.f32 %v5000_v34, %v1117_v13  ;;  %3910 = vpow2.f32 %v3686_v28  ;;  %1717 = vadd.xlane.f32.xlu0 %v1716_v15 }
 0x16c   :  { %v2263_v47 = vsel %vm2260_vm15, %v2262_v40, %v2258_v46  ;;  %v5111_v12 = vadd.f32 1.0, %v3909_v48  ;;  %vm2271_vm3 = vweird.f32 %v3907_v14  ;;  %v2274_v34 = vand.u32 2147483647, %v5063_v58 }
 0x16d   :  { %3127 = vst.msk [vmem:[%s6203_s5 + $0x30] sm:$0xff] %vm3120_vm9, %v2263_v47  ;;  %v2267_v21 = vsub.f32 1.0, %v2266_v52  ;;  %v1472_v50 = vmul.f32 0.01, %v1286_v25  ;;  %v1196_v39 = vpop.f32.mrf.mxu3  ;;  %v5118_v36 = vpop.f32.mrf.mxu2  ;;  %vm1408_vm1 = vcmp.ge.f32.partialorder %v1286_v25, 0.0  ;;  %vm2272_vm5 = vmor %vm2270_vm4, %vm2271_vm3  ;;  %v1031_v13 = vadd.f32 %v4915_v31, %v4657_v8 }
 0x16e   :  { %3912 = vrcp.f32 %v5111_v12  ;;  %v950_v2 = vpop.f32.mrf.mxu0  ;;  %v1676_v63 = vpop.xlane.xlu1 %1675  ;;  %v5123_v0 = vadd.f32 %v1196_v39, %v1028_v32  ;;  %vm2275_vm6 = vcmp.eq.f32.partialorder %v2274_v34, 8.507059e+37  ;;  %v2291_v47 = vand.u32 2147483648, %v5111_v12 }
 0x16f   :  { %v2268_v56 = vmul.f32 %v3907_v14, %v2267_v21  ;;  %v951_v1 = vadd.f32 %v4915_v31, %v950_v2  ;;  %v1119_v17 = vpop.f32.mrf.mxu1  ;;  %v1850_v33 = vadd.f32 %v4736_v43, %v1676_v63  ;;  %v1536_v7 = vsel %vm1408_vm1, %v1286_v25, %v1472_v50 }
 0x170   :  { %v1604_v22 = vmul.f32 %v4924_v23, %v1536_v7  ;;  %v2289_v25 = vand.u32 2147483647, %v5111_v12  ;;  %v1033_v2 = vadd.f32 %v4915_v31, %v4684_v30  ;;  %vm2285_vm10 = vweird.f32 %v5111_v12 }
 0x171   :  { %v2269_v16 = vadd.f32 %v3907_v14, %v2268_v56  ;;  %v1120_v18 = vadd.f32 %v1119_v17, %v951_v1  ;;  %v3687_v19 = vmul.f32 -1.442695, %v1850_v33  ;;  %989 = vmatmul.bf16.gmra.mxu0 %v3444_v45  ;;  %v3911_v38 = vpop.eup %3910  ;;  %v3807_v56 = vld [vmem:[%s6199_s0 + $0x214] sm:$0xf]  ;;  %v3457_v1 = vld [vmem:[%s6199_s0 + $0x21c] sm:$0xf0] }
 0x172   :  { %1158 = vmatmul.bf16.gmra.mxu1 %v3448_v44  ;;  %3676 = vmatmul.msk.bf16.gmra.mxu3 %vm779_vm0, %v3572_v53  ;;  %v5131_v26 = vadd.f32 1.0, %v3911_v38  ;;  %v1719_v37 = vsel %vm1643_vm2, %v1604_v22, 0.0  ;;  %vm2290_vm12 = vcmp.eq.f32.partialorder %v2289_v25, 8.507059e+37  ;;  %v3815_v25 = vld [vmem:[%s6199_s0 + $0x250] sm:$0xf0] }
 0x173   :  { %v2273_v3 = vsel %vm2272_vm5, %v3907_v14, %v2269_v16  ;;  %v1289_v58 = vadd.f32 %v5044_v9, %v1120_v18  ;;  %3914 = vpow2.f32 %v3687_v19  ;;  %1720 = vadd.xlane.f32.xlu1 %v1719_v37 }
 0x174   :  { %v3913_v55 = vpop.eup %3912  ;;  %v2278_v28 = vsel %vm2275_vm6, %v2277_v57, %v2273_v3  ;;  %3916 = vrcp.f32 %v5131_v26  ;;  %v3460_v3 = vor.u32 %v3807_v56, %v3457_v1  ;;  %vm2300_vm15 = vweird.f32 %v5131_v26 }
 0x175   :  { %3128 = vst.msk [vmem:[%s6203_s5 + $0x38] sm:$0xff] %vm3120_vm9, %v2278_v28  ;;  %v2281_v9 = vmul.f32 %v3913_v55, %v5111_v12  ;;  %v1199_v14 = vpop.f32.mrf.mxu3  ;;  %v5149_v32 = vpop.f32.mrf.mxu2  ;;  %v1473_v40 = vmul.f32 0.01, %v1289_v58  ;;  %vm1409_vm7 = vcmp.ge.f32.partialorder %v1289_v58, 0.0  ;;  %vm2286_vm8 = vweird.f32 %v3913_v55 }
 0x176   :  { %v5151_v45 = vadd.f32 %v1199_v14, %v1031_v13  ;;  %v952_v8 = vpop.f32.mrf.mxu0  ;;  %v1679_v44 = vpop.xlane.xlu2 %1678  ;;  %vm2287_vm11 = vmor %vm2285_vm10, %vm2286_vm8  ;;  %v2292_v12 = vor.u32 1.1754944e-38, %v2291_v47 }
 0x177   :  { %v2282_v29 = vsub.f32 1.0, %v2281_v9  ;;  %v953_v48 = vadd.f32 %v4915_v31, %v952_v8  ;;  %v1121_v46 = vpop.f32.mrf.mxu1  ;;  %v1851_v52 = vadd.f32 %v4736_v43, %v1679_v44  ;;  %v1537_v15 = vsel %vm1409_vm7, %v1289_v58, %v1473_v40  ;;  %v3808_v43 = vld [vmem:[%s6199_s0 + $0x218] sm:$0xf0]  ;;  %v5191_v9 = vld [vmem:[#allocation2] ss:$0 sm:$0xff] }
 0x178   :  { %v1605_v34 = vmul.f32 %v4924_v23, %v1537_v15  ;;  %v3456_v18 = vor.u32 %v3808_v43, %v3455_v54  ;;  %v2304_v8 = vand.u32 2147483647, %v5131_v26 }
 0x179   :  { %v3915_v21 = vpop.eup %3914  ;;  %v2283_v50 = vmul.f32 %v3913_v55, %v2282_v29  ;;  %v1122_v39 = vadd.f32 %v1121_v46, %v953_v48  ;;  %v3688_v53 = vmul.f32 -1.442695, %v1851_v52  ;;  %v1036_v29 = vadd.f32 %v4915_v31, %v4695_v51  ;;  %v3487_v52 = vld [vmem:[%s6199_s0 + $0x248] sm:$0xf] }
 0x17a   :  { %v5167_v63 = vadd.f32 1.0, %v3915_v21  ;;  %3668 = vmatmul.msk.bf16.gmra.mxu2 %vm779_vm0, %v3476_v4  ;;  %v3917_v17 = vpop.eup %3916  ;;  %v1722_v30 = vsel %vm1643_vm2, %v1605_v34, 0.0  ;;  %vm2305_vm3 = vcmp.eq.f32.partialorder %v2304_v8, 8.507059e+37  ;;  %v3488_v54 = vor.u32 %v3815_v25, %v3487_v52 }
 0x17b   :  { %v2284_v33 = vadd.f32 %v3913_v55, %v2283_v50  ;;  %v1291_v7 = vadd.f32 %v5077_v41, %v1122_v39  ;;  %3918 = vpow2.f32 %v3688_v53  ;;  %v2296_v16 = vmul.f32 %v3917_v17, %v5131_v26  ;;  %1723 = vadd.xlane.f32.xlu2 %v1722_v30 }
 0x17c   :  { %3920 = vrcp.f32 %v5167_v63  ;;  %vm2301_vm14 = vweird.f32 %v3917_v17  ;;  %vm2315_vm6 = vweird.f32 %v5167_v63 }
 0x17d   :  { %v2288_v19 = vsel %vm2287_vm11, %v3913_v55, %v2284_v33  ;;  %v1474_v22 = vmul.f32 0.01, %v1291_v7  ;;  %v1201_v38 = vpop.f32.mrf.mxu3  ;;  %v5181_v57 = vpop.f32.mrf.mxu2  ;;  %v2297_v58 = vsub.f32 1.0, %v2296_v16  ;;  %vm1410_vm13 = vcmp.ge.f32.partialorder %v1291_v7, 0.0  ;;  %vm2302_vm1 = vmor %vm2300_vm15, %vm2301_vm14 }
 0x17e   :  { %v2293_v41 = vsel %vm2290_vm12, %v2292_v12, %v2288_v19  ;;  %v5183_v27 = vadd.f32 %v1201_v38, %v1033_v2  ;;  %v955_v62 = vpop.f32.mrf.mxu0  ;;  %v1682_v13 = vpop.xlane.xlu0 %1681  ;;  %v2306_v55 = vand.u32 2147483648, %v5131_v26  ;;  %v2319_v2 = vand.u32 2147483647, %v5167_v63 }
 0x17f   :  { %3129 = vst.msk [vmem:[%s6203_s5 + $0x40] sm:$0xff] %vm3120_vm9, %v2293_v41  ;;  %v956_v28 = vadd.f32 %v4915_v31, %v955_v62  ;;  %v1124_v37 = vpop.f32.mrf.mxu1  ;;  %v1852_v14 = vadd.f32 %v5191_v9, %v1682_v13  ;;  %v2298_v40 = vmul.f32 %v3917_v17, %v2297_v58  ;;  %v1538_v44 = vsel %vm1410_vm13, %v1291_v7, %v1474_v22  ;;  %v3811_v41 = vld [vmem:[%s6199_s0 + $0x230] sm:$0xf0] }
 0x180   :  { %v1606_v51 = vmul.f32 %v4924_v23, %v1538_v44  ;;  %v2307_v50 = vor.u32 1.1754944e-38, %v2306_v55  ;;  %vm2320_vm8 = vcmp.eq.f32.partialorder %v2319_v2, 8.507059e+37 }
 0x181   :  { %v3919_v4 = vpop.eup %3918  ;;  %v1125_v48 = vadd.f32 %v1124_v37, %v956_v28  ;;  %v3689_v46 = vmul.f32 -1.442695, %v1852_v14  ;;  %994 = vmatmul.bf16.gmra.mxu0 %v3456_v18  ;;  %v2299_v15 = vadd.f32 %v3917_v17, %v2298_v40  ;;  %v3810_v28 = vld [vmem:[%s6199_s0 + $0x22c] sm:$0xf]  ;;  %v3469_v37 = vld [vmem:[%s6199_s0 + $0x234] sm:$0xf0]  ;;  %v1038_v40 = vadd.f32 %v4915_v31, %v4719_v10 }
 0x182   :  { %v3921_v47 = vpop.eup %3920  ;;  %v5204_v21 = vadd.f32 1.0, %v3919_v4  ;;  %1163 = vmatmul.bf16.gmra.mxu1 %v3460_v3  ;;  %v3467_v3 = vld [vmem:[%s6199_s0 + $0x228] sm:$0xf]  ;;  %v3472_v10 = vor.u32 %v3810_v28, %v3469_v37 }
 0x183   :  { %v2311_v39 = vmul.f32 %v3921_v47, %v5167_v63  ;;  %v1294_v53 = vadd.f32 %v5118_v36, %v1125_v48  ;;  %3922 = vpow2.f32 %v3689_v46  ;;  %v2303_v34 = vsel %vm2302_vm1, %v3917_v17, %v2299_v15 }
 0x184   :  { %3924 = vrcp.f32 %v5204_v21  ;;  %v2308_v43 = vsel %vm2305_vm3, %v2307_v50, %v2303_v34  ;;  %v2321_v36 = vand.u32 2147483648, %v5167_v63  ;;  %v1725_v17 = vsel %vm1643_vm2, %v1606_v51, 0.0 }
 0x185   :  { %v2312_v26 = vsub.f32 1.0, %v2311_v39  ;;  %v1475_v56 = vmul.f32 0.01, %v1294_v53  ;;  %v1204_v1 = vpop.f32.mrf.mxu3  ;;  %v5212_v33 = vpop.f32.mrf.mxu2  ;;  %3130 = vst.msk [vmem:[%s6203_s5 + $0x48] sm:$0xff] %vm3120_vm9, %v2308_v43  ;;  %vm1411_vm4 = vcmp.ge.f32.partialorder %v1294_v53, 0.0  ;;  %vm2316_vm5 = vweird.f32 %v3921_v47  ;;  %1726 = vadd.xlane.f32.xlu0 %v1725_v17 }
 0x186   :  { %v5220_v7 = vadd.f32 %v1204_v1, %v1036_v29  ;;  %v957_v30 = vpop.f32.mrf.mxu0  ;;  %v1685_v12 = vpop.xlane.xlu1 %1684  ;;  %vm2317_vm7 = vmor %vm2315_vm6, %vm2316_vm5  ;;  %v2322_v8 = vor.u32 1.1754944e-38, %v2321_v36  ;;  %v3468_v52 = vor.u32 %v3811_v41, %v3467_v3  ;;  %v2334_v15 = vand.u32 2147483647, %v5204_v21 }
 0x187   :  { %v2313_v16 = vmul.f32 %v3921_v47, %v2312_v26  ;;  %v958_v18 = vadd.f32 %v4915_v31, %v957_v30  ;;  %v1126_v19 = vpop.f32.mrf.mxu1  ;;  %v1853_v22 = vadd.f32 %v5191_v9, %v1685_v12  ;;  %v1539_v38 = vsel %vm1411_vm4, %v1294_v53, %v1475_v56 }
 0x188   :  { %v1607_v63 = vmul.f32 %v4924_v23, %v1539_v38  ;;  %vm2330_vm12 = vweird.f32 %v5204_v21  ;;  %vm2335_vm14 = vcmp.eq.f32.partialorder %v2334_v15, 8.507059e+37 }
 0x189   :  { %v3923_v58 = vpop.eup %3922  ;;  %v2314_v62 = vadd.f32 %v3921_v47, %v2313_v16  ;;  %v1127_v13 = vadd.f32 %v1126_v19, %v958_v18  ;;  %v3690_v55 = vmul.f32 -1.442695, %v1853_v22  ;;  %v1041_v18 = vadd.f32 %v4915_v31, %v4730_v35  ;;  %v3499_v22 = vld [vmem:[%s6199_s0 + $0x260] sm:$0xf] }
 0x18a   :  { %v3925_v14 = vpop.eup %3924  ;;  %v5240_v44 = vadd.f32 1.0, %v3923_v58  ;;  %3669 = vmatmul.msk.bf16.gmra.mxu2 %vm779_vm0, %v3488_v54  ;;  %v1728_v39 = vsel %vm1643_vm2, %v1607_v63, 0.0 }
 0x18b   :  { %v2318_v4 = vsel %vm2317_vm7, %v3921_v47, %v2314_v62  ;;  %v2326_v29 = vmul.f32 %v3925_v14, %v5204_v21  ;;  %v1296_v48 = vadd.f32 %v5149_v32, %v1127_v13  ;;  %v2336_v32 = vand.u32 2147483648, %v5204_v21  ;;  %1729 = vadd.xlane.f32.xlu1 %v1728_v39  ;;  %v3818_v21 = vld [vmem:[%s6199_s0 + $0x268] sm:$0xf0] }
 0x18c   :  { %v2323_v46 = vsel %vm2320_vm8, %v2322_v8, %v2318_v4  ;;  %3926 = vrcp.f32 %v5240_v44  ;;  %vm2331_vm11 = vweird.f32 %v3925_v14  ;;  %v2351_v8 = vand.u32 2147483648, %v5240_v44 }
 0x18d   :  { %3131 = vst.msk [vmem:[%s6203_s5 + $0x50] sm:$0xff] %vm3120_vm9, %v2323_v46  ;;  %v2327_v25 = vsub.f32 1.0, %v2326_v29  ;;  %v1476_v51 = vmul.f32 0.01, %v1296_v48  ;;  %3928 = vpow2.f32 %v3690_v55  ;;  %v1206_v47 = vpop.f32.mrf.mxu3  ;;  %v5252_v50 = vpop.f32.mrf.mxu2  ;;  %vm1412_vm10 = vcmp.ge.f32.partialorder %v1296_v48, 0.0  ;;  %vm2332_vm13 = vmor %vm2330_vm12, %vm2331_vm11 }
 0x18e   :  { %v5256_v53 = vadd.f32 %v1206_v47, %v1038_v40  ;;  %v960_v34 = vpop.f32.mrf.mxu0  ;;  %v1688_v54 = vpop.xlane.xlu2 %1687  ;;  %v2337_v19 = vor.u32 1.1754944e-38, %v2336_v32  ;;  %v3500_v40 = vor.u32 %v3818_v21, %v3499_v22  ;;  %vm2345_vm3 = vweird.f32 %v5240_v44 }
 0x18f   :  { %v2328_v43 = vmul.f32 %v3925_v14, %v2327_v25  ;;  %v961_v26 = vadd.f32 %v4915_v31, %v960_v34  ;;  %v1129_v2 = vpop.f32.mrf.mxu1  ;;  %v1854_v56 = vadd.f32 %v5191_v9, %v1688_v54  ;;  %v1540_v1 = vsel %vm1412_vm10, %v1296_v48, %v1476_v51 }
 0x190   :  { %v1608_v12 = vmul.f32 %v4924_v23, %v1540_v1  ;;  %v2352_v34 = vor.u32 1.1754944e-38, %v2351_v8 }
 0x191   :  { %v2329_v36 = vadd.f32 %v3925_v14, %v2328_v43  ;;  %v1130_v17 = vadd.f32 %v1129_v2, %v961_v26  ;;  %v3691_v30 = vmul.f32 -1.442695, %v1854_v56  ;;  %999 = vmatmul.bf16.gmra.mxu0 %v3468_v52  ;;  %v1043_v2 = vadd.f32 %v4915_v31, %v4758_v59 }
 0x192   :  { %v3927_v16 = vpop.eup %3926  ;;  %1168 = vmatmul.bf16.gmra.mxu1 %v3472_v10  ;;  %v1731_v13 = vsel %vm1643_vm2, %v1608_v12, 0.0 }
 0x193   :  { %v3929_v38 = vpop.eup %3928  ;;  %v2333_v3 = vsel %vm2332_vm13, %v3925_v14, %v2329_v36  ;;  %v2341_v41 = vmul.f32 %v3927_v16, %v5240_v44  ;;  %v1299_v58 = vadd.f32 %v5181_v57, %v1130_v17  ;;  %3930 = vpow2.f32 %v3691_v30  ;;  %1732 = vadd.xlane.f32.xlu2 %v1731_v13 }
 0x194   :  { %v2338_v62 = vsel %vm2335_vm14, %v2337_v19, %v2333_v3  ;;  %v5272_v35 = vadd.f32 1.0, %v3929_v38  ;;  %vm2346_vm1 = vweird.f32 %v3927_v16  ;;  %v2349_v57 = vand.u32 2147483647, %v5240_v44 }
 0x195   :  { %3132 = vst.msk [vmem:[%s6203_s5 + $0x58] sm:$0xff] %vm3120_vm9, %v2338_v62  ;;  %v2342_v55 = vsub.f32 1.0, %v2341_v41  ;;  %v1477_v28 = vmul.f32 0.01, %v1299_v58  ;;  %v1209_v37 = vpop.f32.mrf.mxu3  ;;  %v5279_v14 = vpop.f32.mrf.mxu2  ;;  %vm1413_vm15 = vcmp.ge.f32.partialorder %v1299_v58, 0.0  ;;  %vm2347_vm4 = vmor %vm2345_vm3, %vm2346_vm1 }
 0x196   :  { %3932 = vrcp.f32 %v5272_v35  ;;  %v962_v63 = vpop.f32.mrf.mxu0  ;;  %v1691_v4 = vpop.xlane.xlu0 %1690  ;;  %v5284_v48 = vadd.f32 %v1209_v37, %v1041_v18  ;;  %vm2350_vm5 = vcmp.eq.f32.partialorder %v2349_v57, 8.507059e+37  ;;  %v2364_v38 = vand.u32 2147483647, %v5272_v35 }
 0x197   :  { %v2343_v29 = vmul.f32 %v3927_v16, %v2342_v55  ;;  %v963_v46 = vadd.f32 %v4915_v31, %v962_v63  ;;  %v1131_v52 = vpop.f32.mrf.mxu1  ;;  %v1855_v10 = vadd.f32 %v5191_v9, %v1691_v4  ;;  %v1541_v25 = vsel %vm1413_vm15, %v1299_v58, %v1477_v28 }
 0x198   :  { %v1609_v32 = vmul.f32 %v4924_v23, %v1541_v25  ;;  %v2366_v3 = vand.u32 2147483648, %v5272_v35  ;;  %vm2360_vm7 = vweird.f32 %v5272_v35  ;;  %vm2365_vm10 = vcmp.eq.f32.partialorder %v2364_v38, 8.507059e+37 }
 0x199   :  { %v2344_v15 = vadd.f32 %v3927_v16, %v2343_v29  ;;  %v1132_v51 = vadd.f32 %v1131_v52, %v963_v46  ;;  %v3692_v47 = vmul.f32 -1.442695, %v1855_v10  ;;  %v3931_v39 = vpop.eup %3930 }
 0x19a   :  { %3670 = vmatmul.msk.bf16.gmra.mxu2 %vm779_vm0, %v3500_v40  ;;  %v5292_v43 = vadd.f32 1.0, %v3931_v39  ;;  %v1734_v1 = vsel %vm1643_vm2, %v1609_v32, 0.0  ;;  %v2367_v63 = vor.u32 1.1754944e-38, %v2366_v3  ;;  %v5333_v32 = vld [vmem:[%s6200_s2] ss:$0 sm:$0xff] }
 0x19b   :  { %v2348_v54 = vsel %vm2347_vm4, %v3927_v16, %v2344_v15  ;;  %v1301_v26 = vadd.f32 %v5212_v33, %v1132_v51  ;;  %3934 = vpow2.f32 %v3692_v47  ;;  %1735 = vadd.xlane.f32.xlu0 %v1734_v1 }
 0x19c   :  { %v3933_v44 = vpop.eup %3932  ;;  %v2353_v56 = vsel %vm2350_vm5, %v2352_v34, %v2348_v54  ;;  %3936 = vrcp.f32 %v5292_v43  ;;  %v2379_v47 = vand.u32 2147483647, %v5292_v43  ;;  %vm2375_vm14 = vweird.f32 %v5292_v43 }
 0x19d   :  { %3133 = vst.msk [vmem:[%s6203_s5 + $0x60] sm:$0xff] %vm3120_vm9, %v2353_v56  ;;  %v2356_v36 = vmul.f32 %v3933_v44, %v5272_v35  ;;  %v1211_v17 = vpop.f32.mrf.mxu3  ;;  %v5304_v33 = vpop.f32.mrf.mxu2  ;;  %v1478_v30 = vmul.f32 0.01, %v1301_v26  ;;  %vm1414_vm0 = vcmp.ge.f32.partialorder %v1301_v26, 0.0  ;;  %vm2361_vm6 = vweird.f32 %v3933_v44 }
 0x19e   :  { %v5306_v12 = vadd.f32 %v1211_v17, %v1043_v2  ;;  %v965_v59 = vpop.f32.mrf.mxu0  ;;  %v1694_v16 = vpop.xlane.xlu1 %1693  ;;  %vm2362_vm8 = vmor %vm2360_vm7, %vm2361_vm6  ;;  %v2381_v35 = vand.u32 2147483648, %v5292_v43  ;;  %vm2380_vm1 = vcmp.eq.f32.partialorder %v2379_v47, 8.507059e+37 }
 0x19f   :  { %v2357_v18 = vsub.f32 1.0, %v2356_v36  ;;  %v966_v19 = vadd.f32 %v4915_v31, %v965_v59  ;;  %v1134_v22 = vpop.f32.mrf.mxu1  ;;  %v1856_v21 = vadd.f32 %v5191_v9, %v1694_v16  ;;  %v1542_v41 = vsel %vm1414_vm0, %v1301_v26, %v1478_v30  ;;  %v5343_v16 = vld [vmem:[%s6201_s3] ss:$0 sm:$0xff] }
 0x1a0   :  { %v1610_v28 = vmul.f32 %v4924_v23, %v1542_v41  ;;  %v2382_v30 = vor.u32 1.1754944e-38, %v2381_v35 }
 0x1a1   :  { %v3935_v58 = vpop.eup %3934  ;;  %v2358_v62 = vmul.f32 %v3933_v44, %v2357_v18  ;;  %v1135_v13 = vadd.f32 %v1134_v22, %v966_v19  ;;  %v3693_v55 = vmul.f32 -1.442695, %v1856_v21 }
 0x1a2   :  { %v5314_v37 = vadd.f32 1.0, %v3935_v58  ;;  %v3937_v31 = vpop.eup %3936  ;;  %v1737_v8 = vsel %vm1643_vm2, %v1610_v28, 0.0 }
 0x1a3   :  { %v2359_v40 = vadd.f32 %v3933_v44, %v2358_v62  ;;  %v1304_v57 = vadd.f32 %v5252_v50, %v1135_v13  ;;  %3938 = vpow2.f32 %v3693_v55  ;;  %v2371_v4 = vmul.f32 %v3937_v31, %v5292_v43  ;;  %1738 = vadd.xlane.f32.xlu1 %v1737_v8 }
 0x1a4   :  { %3940 = vrcp.f32 %v5314_v37  ;;  %vm2376_vm12 = vweird.f32 %v3937_v31  ;;  %vm2390_vm3 = vweird.f32 %v5314_v37  ;;  %v2394_v41 = vand.u32 2147483647, %v5314_v37 }
 0x1a5   :  { %v2363_v23 = vsel %vm2362_vm8, %v3933_v44, %v2359_v40  ;;  %v1479_v29 = vmul.f32 0.01, %v1304_v57  ;;  %v5322_v46 = vpop.f32.mrf.mxu2  ;;  %v1353_v52 = vpop.f32.mrf.mxu3  ;;  %v2372_v10 = vsub.f32 1.0, %v2371_v4  ;;  %vm1415_vm11 = vcmp.ge.f32.partialorder %v1304_v57, 0.0  ;;  %vm2377_vm15 = vmor %vm2375_vm14, %vm2376_vm12 }
 0x1a6   :  { %v2368_v50 = vsel %vm2365_vm10, %v2367_v63, %v2363_v23  ;;  %v1354_v25 = vadd.f32 %v1353_v52, %v4910_v5  ;;  %v967_v15 = vpop.f32.mrf.mxu0  ;;  %v1697_v51 = vpop.xlane.xlu2 %1696  ;;  %vm2395_vm7 = vcmp.eq.f32.partialorder %v2394_v41, 8.507059e+37 }
 0x1a7   :  { %3134 = vst.msk [vmem:[%s6203_s5 + $0x68] sm:$0xff] %vm3120_vm9, %v2368_v50  ;;  %v968_v39 = vadd.f32 %v5333_v32, %v967_v15  ;;  %v1136_v34 = vpop.f32.mrf.mxu1  ;;  %v1857_v5 = vadd.f32 %v5191_v9, %v1697_v51  ;;  %v2373_v54 = vmul.f32 %v3937_v31, %v2372_v10  ;;  %v1543_v44 = vsel %vm1415_vm11, %v1304_v57, %v1479_v29 }
 0x1a8   :  { %vm1435_vm13 = vcmp.ge.f32.partialorder %v1354_v25, 0.0  ;;  %v1499_v26 = vmul.f32 0.01, %v1354_v25  ;;  %v1611_v18 = vmul.f32 %v5343_v16, %v1543_v44 }
 0x1a9   :  { %v3939_v2 = vpop.eup %3938  ;;  %v1137_v56 = vadd.f32 %v1136_v34, %v968_v39  ;;  %v3694_v1 = vmul.f32 -1.442695, %v1857_v5  ;;  %v2374_v17 = vadd.f32 %v3937_v31, %v2373_v54 }
 0x1aa   :  { %v3941_v36 = vpop.eup %3940  ;;  %v5338_v59 = vadd.f32 1.0, %v3939_v2  ;;  %v1563_v22 = vsel %vm1435_vm13, %v1354_v25, %v1499_v26  ;;  %v1740_v55 = vsel %vm1643_vm2, %v1611_v18, 0.0 }
 0x1ab   :  { %v2386_v19 = vmul.f32 %v3941_v36, %v5314_v37  ;;  %v1306_v43 = vadd.f32 %v5279_v14, %v1137_v56  ;;  %3942 = vpow2.f32 %v3694_v1  ;;  %v2378_v21 = vsel %vm2377_vm15, %v3937_v31, %v2374_v17  ;;  %1741 = vadd.xlane.f32.xlu2 %v1740_v55 }
 0x1ac   :  { %3944 = vrcp.f32 %v5338_v59  ;;  %v2383_v38 = vsel %vm2380_vm1, %v2382_v30, %v2378_v21  ;;  %v2396_v14 = vand.u32 2147483648, %v5314_v37  ;;  %v1631_v31 = vmul.f32 %v5343_v16, %v1563_v22 }
 0x1ad   :  { %v2387_v3 = vsub.f32 1.0, %v2386_v19  ;;  %v1480_v58 = vmul.f32 0.01, %v1306_v43  ;;  %v5353_v62 = vpop.f32.mrf.mxu2  ;;  %v1355_v13 = vpop.f32.mrf.mxu3  ;;  %3135 = vst.msk [vmem:[%s6203_s5 + $0x70] sm:$0xff] %vm3120_vm9, %v2383_v38  ;;  %vm2391_vm4 = vweird.f32 %v3941_v36  ;;  %vm1416_vm0 = vcmp.ge.f32.partialorder %v1306_v43, 0.0 }
 0x1ae   :  { %v1356_v28 = vadd.f32 %v1355_v13, %v4963_v49  ;;  %v970_v40 = vpop.f32.mrf.mxu0  ;;  %v1700_v57 = vpop.xlane.xlu0 %1699  ;;  %v1800_v29 = vsel %vm1643_vm2, %v1631_v31, 0.0  ;;  %vm2392_vm6 = vmor %vm2390_vm3, %vm2391_vm4  ;;  %v2397_v51 = vor.u32 1.1754944e-38, %v2396_v14  ;;  %vm2405_vm8 = vweird.f32 %v5338_v59 }
 0x1af   :  { %v2388_v8 = vmul.f32 %v3941_v36, %v2387_v3  ;;  %v971_v63 = vadd.f32 %v5333_v32, %v970_v40  ;;  %v1139_v4 = vpop.f32.mrf.mxu1  ;;  %v1858_v23 = vadd.f32 %v5191_v9, %v1700_v57  ;;  %1801 = vadd.xlane.f32.xlu1 %v1800_v29  ;;  %v1544_v25 = vsel %vm1416_vm0, %v1306_v43, %v1480_v58 }
 0x1b0   :  { %vm1436_vm5 = vcmp.ge.f32.partialorder %v1356_v28, 0.0  ;;  %v1500_v35 = vmul.f32 0.01, %v1356_v28  ;;  %v1612_v39 = vmul.f32 %v5343_v16, %v1544_v25  ;;  %v2409_v2 = vand.u32 2147483647, %v5338_v59 }
 0x1b1   :  { %v3943_v52 = vpop.eup %3942  ;;  %v2389_v50 = vadd.f32 %v3941_v36, %v2388_v8  ;;  %v1140_v49 = vadd.f32 %v1139_v4, %v971_v63  ;;  %v3695_v10 = vmul.f32 -1.442695, %v1858_v23 }
 0x1b2   :  { %v3945_v15 = vpop.eup %3944  ;;  %v5369_v47 = vadd.f32 1.0, %v3943_v52  ;;  %v1564_v26 = vsel %vm1436_vm5, %v1356_v28, %v1500_v35  ;;  %v1743_v17 = vsel %vm1643_vm2, %v1612_v39, 0.0  ;;  %vm2410_vm14 = vcmp.eq.f32.partialorder %v2409_v2, 8.507059e+37 }
 0x1b3   :  { %v2393_v34 = vsel %vm2392_vm6, %v3941_v36, %v2389_v50  ;;  %v2401_v5 = vmul.f32 %v3945_v15, %v5338_v59  ;;  %v1309_v54 = vadd.f32 %v5304_v33, %v1140_v49  ;;  %v2411_v36 = vand.u32 2147483648, %v5338_v59  ;;  %1744 = vadd.xlane.f32.xlu0 %v1743_v17 }
 0x1b4   :  { %v2398_v44 = vsel %vm2395_vm7, %v2397_v51, %v2393_v34  ;;  %3946 = vrcp.f32 %v5369_v47  ;;  %v1632_v18 = vmul.f32 %v5343_v16, %v1564_v26  ;;  %vm2406_vm10 = vweird.f32 %v3945_v15 }
 0x1b5   :  { %3136 = vst.msk [vmem:[%s6203_s5 + $0x78] sm:$0xff] %vm3120_vm9, %v2398_v44  ;;  %v2402_v37 = vsub.f32 1.0, %v2401_v5  ;;  %v1481_v56 = vmul.f32 0.01, %v1309_v54  ;;  %3948 = vpow2.f32 %v3695_v10  ;;  %v5382_v1 = vpop.f32.mrf.mxu2  ;;  %v1358_v33 = vpop.f32.mrf.mxu3  ;;  %vm1417_vm11 = vcmp.ge.f32.partialorder %v1309_v54, 0.0  ;;  %vm2407_vm13 = vmor %vm2405_vm8, %vm2406_vm10 }
 0x1b6   :  { %v1359_v30 = vadd.f32 %v1358_v33, %v5003_v42  ;;  %v972_v19 = vpop.f32.mrf.mxu0  ;;  %v1803_v3 = vsel %vm1643_vm2, %v1632_v18, 0.0  ;;  %v1703_v41 = vpop.xlane.xlu1 %1702  ;;  %v2412_v31 = vor.u32 1.1754944e-38, %v2411_v36  ;;  %vm2420_vm3 = vweird.f32 %v5369_v47 }
 0x1b7   :  { %v2403_v43 = vmul.f32 %v3945_v15, %v2402_v37  ;;  %v973_v22 = vadd.f32 %v5333_v32, %v972_v19  ;;  %v1141_v21 = vpop.f32.mrf.mxu1  ;;  %v1545_v58 = vsel %vm1417_vm11, %v1309_v54, %v1481_v56  ;;  %1804 = vadd.xlane.f32.xlu2 %v1803_v3  ;;  %v1859_v42 = vadd.f32 %v5191_v9, %v1703_v41 }
 0x1b8   :  { %vm1437_vm12 = vcmp.ge.f32.partialorder %v1359_v30, 0.0  ;;  %v1501_v38 = vmul.f32 0.01, %v1359_v30  ;;  %v1613_v55 = vmul.f32 %v5343_v16, %v1545_v58 }
 0x1b9   :  { %v2404_v13 = vadd.f32 %v3945_v15, %v2403_v43  ;;  %v1142_v14 = vadd.f32 %v1141_v21, %v973_v22  ;;  %v3696_v29 = vmul.f32 -1.442695, %v1859_v42 }
 0x1ba   :  { %v3947_v28 = vpop.eup %3946  ;;  %v1565_v40 = vsel %vm1437_vm12, %v1359_v30, %v1501_v38  ;;  %v1746_v52 = vsel %vm1643_vm2, %v1613_v55, 0.0 }
 0x1bb   :  { %v3949_v57 = vpop.eup %3948  ;;  %v2408_v8 = vsel %vm2407_vm13, %v3945_v15, %v2404_v13  ;;  %v2416_v63 = vmul.f32 %v3947_v28, %v5369_v47  ;;  %v1311_v4 = vadd.f32 %v5322_v46, %v1142_v14  ;;  %1747 = vadd.xlane.f32.xlu1 %v1746_v52  ;;  %v1633_v25 = vmul.f32 %v5343_v16, %v1565_v40 }
 0x1bc   :  { %v2413_v23 = vsel %vm2410_vm14, %v2412_v31, %v2408_v8  ;;  %v5397_v35 = vadd.f32 1.0, %v3949_v57  ;;  %vm2421_vm1 = vweird.f32 %v3947_v28  ;;  %v2424_v46 = vand.u32 2147483647, %v5369_v47 }
 0x1bd   :  { %3137 = vst.msk [vmem:[%s6203_s5 + $0x80] sm:$0xff] %vm3120_vm9, %v2413_v23  ;;  %v2417_v59 = vsub.f32 1.0, %v2416_v63  ;;  %v1482_v50 = vmul.f32 0.01, %v1311_v4  ;;  %v5404_v49 = vpop.f32.mrf.mxu2  ;;  %v1360_v10 = vpop.f32.mrf.mxu3  ;;  %vm1418_vm15 = vcmp.ge.f32.partialorder %v1311_v4, 0.0  ;;  %v2426_v15 = vand.u32 2147483648, %v5369_v47  ;;  %vm2422_vm5 = vmor %vm2420_vm3, %vm2421_vm1 }
 0x1be   :  { %3950 = vrcp.f32 %v5397_v35  ;;  %v975_v51 = vpop.f32.mrf.mxu0  ;;  %v1361_v34 = vadd.f32 %v1360_v10, %v5052_v20  ;;  %v1806_v5 = vsel %vm1643_vm2, %v1633_v25, 0.0  ;;  %vm2425_vm0 = vcmp.eq.f32.partialorder %v2424_v46, 8.507059e+37 }
 0x1bf   :  { %v2418_v39 = vmul.f32 %v3947_v28, %v2417_v59  ;;  %3952 = vpow2.f32 %v3696_v29  ;;  %v1144_v54 = vpop.f32.mrf.mxu1  ;;  %1807 = vadd.xlane.f32.xlu0 %v1806_v5  ;;  %v976_v26 = vadd.f32 %v5333_v32, %v975_v51  ;;  %v1706_v44 = vpop.xlane.xlu2 %1705  ;;  %v1546_v37 = vsel %vm1418_vm15, %v1311_v4, %v1482_v50 }
 0x1c0   :  { %vm1438_vm4 = vcmp.ge.f32.partialorder %v1361_v34, 0.0  ;;  %v1502_v56 = vmul.f32 0.01, %v1361_v34  ;;  %v1860_v33 = vadd.f32 %v5191_v9, %v1706_v44  ;;  %v2427_v36 = vor.u32 1.1754944e-38, %v2426_v15 }
 0x1c1   :  { %v2419_v2 = vadd.f32 %v3947_v28, %v2418_v39  ;;  %v1145_v17 = vadd.f32 %v1144_v54, %v976_v26  ;;  %v1614_v20 = vmul.f32 %v5343_v16, %v1546_v37  ;;  %v2439_v8 = vand.u32 2147483647, %v5397_v35 }
 0x1c2   :  { %v3697_v18 = vmul.f32 -1.442695, %v1860_v33  ;;  %v1566_v47 = vsel %vm1438_vm4, %v1361_v34, %v1502_v56  ;;  %v2441_v63 = vand.u32 2147483648, %v5397_v35  ;;  %vm2435_vm8 = vweird.f32 %v5397_v35 }
 0x1c3   :  { %v2423_v30 = vsel %vm2422_vm5, %v3947_v28, %v2419_v2  ;;  %v1314_v22 = vadd.f32 %v5353_v62, %v1145_v17  ;;  %v1749_v21 = vsel %vm1643_vm2, %v1614_v20, 0.0  ;;  %v1634_v38 = vmul.f32 %v5343_v16, %v1566_v47 }
 0x1c4   :  { %v3951_v19 = vpop.eup %3950  ;;  %v2428_v43 = vsel %vm2425_vm0, %v2427_v36, %v2423_v30  ;;  %3954 = vpow2.f32 %v3697_v18  ;;  %1750 = vadd.xlane.f32.xlu2 %v1749_v21  ;;  %vm2440_vm12 = vcmp.eq.f32.partialorder %v2439_v8, 8.507059e+37  ;;  %v2442_v15 = vor.u32 1.1754944e-38, %v2441_v63 }
 0x1c5   :  { %v3953_v3 = vpop.eup %3952  ;;  %3138 = vst.msk [vmem:[%s6203_s5 + $0x88] sm:$0xff] %vm3120_vm9, %v2428_v43  ;;  %v2431_v41 = vmul.f32 %v3951_v19, %v5397_v35  ;;  %v5425_v58 = vpop.f32.mrf.mxu2  ;;  %v1483_v62 = vmul.f32 0.01, %v1314_v22  ;;  %v1809_v55 = vsel %vm1643_vm2, %v1634_v38, 0.0  ;;  %vm1419_vm6 = vcmp.ge.f32.partialorder %v1314_v22, 0.0 }
 0x1c6   :  { %v1363_v13 = vpop.f32.mrf.mxu3  ;;  %v5427_v14 = vadd.f32 1.0, %v3953_v3  ;;  %v977_v28 = vpop.f32.mrf.mxu0  ;;  %1810 = vadd.xlane.f32.xlu1 %v1809_v55  ;;  %vm2436_vm7 = vweird.f32 %v3951_v19 }
 0x1c7   :  { %v1364_v42 = vadd.f32 %v1363_v13, %v5081_v6  ;;  %v2432_v31 = vsub.f32 1.0, %v2431_v41  ;;  %v978_v40 = vadd.f32 %v5333_v32, %v977_v28  ;;  %v1146_v57 = vpop.f32.mrf.mxu1  ;;  %v1709_v6 = vpop.xlane.xlu0 %1708  ;;  %v1547_v52 = vsel %vm1419_vm6, %v1314_v22, %v1483_v62  ;;  %vm2437_vm11 = vmor %vm2435_vm8, %vm2436_vm7 }
 0x1c8   :  { %3956 = vrcp.f32 %v5427_v14  ;;  %v1861_v25 = vadd.f32 %v5191_v9, %v1709_v6  ;;  %v1615_v46 = vmul.f32 %v5343_v16, %v1547_v52  ;;  %v2454_v36 = vand.u32 2147483647, %v5427_v14 }
 0x1c9   :  { %v2433_v4 = vmul.f32 %v3951_v19, %v2432_v31  ;;  %v1503_v23 = vmul.f32 0.01, %v1364_v42  ;;  %v1147_v29 = vadd.f32 %v1146_v57, %v978_v40  ;;  %vm1439_vm10 = vcmp.ge.f32.partialorder %v1364_v42, 0.0 }
 0x1ca   :  { %v3955_v59 = vpop.eup %3954  ;;  %v3698_v34 = vmul.f32 -1.442695, %v1861_v25  ;;  %v1752_v35 = vsel %vm1643_vm2, %v1615_v46, 0.0  ;;  %vm2450_vm13 = vweird.f32 %v5427_v14  ;;  %v2456_v47 = vand.u32 2147483648, %v5427_v14 }
 0x1cb   :  { %v2434_v50 = vadd.f32 %v3951_v19, %v2433_v4  ;;  %v1316_v10 = vadd.f32 %v5382_v1, %v1147_v29  ;;  %v5439_v51 = vadd.f32 1.0, %v3955_v59  ;;  %v1567_v26 = vsel %vm1439_vm10, %v1364_v42, %v1503_v23  ;;  %1753 = vadd.xlane.f32.xlu0 %v1752_v35 }
 0x1cc   :  { %v1635_v20 = vmul.f32 %v5343_v16, %v1567_v26  ;;  %vm5459_vm3 = vcmp.eq.f32.partialorder %v2454_v36, 8.507059e+37  ;;  %v2457_v40 = vor.u32 1.1754944e-38, %v2456_v47 }
 0x1cd   :  { %v2438_v39 = vsel %vm2437_vm11, %v3951_v19, %v2434_v50  ;;  %v5442_v5 = vpop.f32.mrf.mxu2  ;;  %3958 = vrcp.f32 %v5439_v51  ;;  %v1484_v56 = vmul.f32 0.01, %v1316_v10  ;;  %vm1420_vm14 = vcmp.ge.f32.partialorder %v1316_v10, 0.0 }
 0x1ce   :  { %v1365_v54 = vpop.f32.mrf.mxu3  ;;  %v3957_v44 = vpop.eup %3956  ;;  %v2443_v1 = vsel %vm2440_vm12, %v2442_v15, %v2438_v39  ;;  %3960 = vpow2.f32 %v3698_v34  ;;  %v1812_v22 = vsel %vm1643_vm2, %v1635_v20, 0.0  ;;  %v2471_v15 = vand.u32 2147483648, %v5439_v51 }
 0x1cf   :  { %v980_v37 = vpop.f32.mrf.mxu0  ;;  %3139 = vst.msk [vmem:[%s6203_s5 + $0x90] sm:$0xff] %vm3120_vm9, %v2443_v1  ;;  %v2446_v2 = vmul.f32 %v3957_v44, %v5427_v14  ;;  %v1149_v33 = vpop.f32.mrf.mxu1  ;;  %v1366_v17 = vadd.f32 %v1365_v54, %v5123_v0  ;;  %vm2451_vm1 = vweird.f32 %v3957_v44  ;;  %1813 = vadd.xlane.f32.xlu2 %v1812_v22  ;;  %v1548_v3 = vsel %vm1420_vm14, %v1316_v10, %v1484_v56 }
 0x1d0   :  { %v981_v30 = vadd.f32 %v5333_v32, %v980_v37  ;;  %v1712_v19 = vpop.xlane.xlu1 %1711  ;;  %v1616_v42 = vmul.f32 %v5343_v16, %v1548_v3  ;;  %vm2452_vm4 = vmor %vm2450_vm13, %vm2451_vm1  ;;  %v2469_v14 = vand.u32 2147483647, %v5439_v51  ;;  %vm2465_vm7 = vweird.f32 %v5439_v51 }
 0x1d1   :  { %v2447_v18 = vsub.f32 1.0, %v2446_v2  ;;  %vm1440_vm15 = vcmp.ge.f32.partialorder %v1366_v17, 0.0  ;;  %v1504_v43 = vmul.f32 0.01, %v1366_v17  ;;  %v1862_v0 = vadd.f32 %v5191_v9, %v1712_v19 }
 0x1d2   :  { %v1150_v21 = vadd.f32 %v1149_v33, %v981_v30  ;;  %v2472_v37 = vor.u32 1.1754944e-38, %v2471_v15  ;;  %vm2470_vm10 = vcmp.eq.f32.partialorder %v2469_v14, 8.507059e+37 }
 0x1d3   :  { %v2448_v38 = vmul.f32 %v3957_v44, %v2447_v18  ;;  %v3959_v41 = vpop.eup %3958  ;;  %v1568_v55 = vsel %vm1440_vm15, %v1366_v17, %v1504_v43  ;;  %v3699_v8 = vmul.f32 -1.442695, %v1862_v0 }
 0x1d4   :  { %v1319_v62 = vadd.f32 %v5404_v49, %v1150_v21  ;;  %v3961_v28 = vpop.eup %3960  ;;  %v2461_v57 = vmul.f32 %v3959_v41, %v5439_v51  ;;  %v1755_v49 = vsel %vm1643_vm2, %v1616_v42, 0.0  ;;  %v1636_v10 = vmul.f32 %v5343_v16, %v1568_v55 }
 0x1d5   :  { %v2449_v31 = vadd.f32 %v3957_v44, %v2448_v38  ;;  %v5466_v63 = vpop.f32.mrf.mxu2  ;;  %v5471_v23 = vadd.f32 1.0, %v3961_v28  ;;  %3962 = vpow2.f32 %v3699_v8  ;;  %1756 = vadd.xlane.f32.xlu1 %v1755_v49  ;;  %vm2466_vm5 = vweird.f32 %v3959_v41 }
 0x1d6   :  { %v1368_v4 = vpop.f32.mrf.mxu3  ;;  %v1485_v29 = vmul.f32 0.01, %v1319_v62  ;;  %v2462_v50 = vsub.f32 1.0, %v2461_v57  ;;  %v1815_v34 = vsel %vm1643_vm2, %v1636_v10, 0.0  ;;  %v1715_v54 = vpop.xlane.xlu2 %1714  ;;  %vm1421_vm6 = vcmp.ge.f32.partialorder %v1319_v62, 0.0  ;;  %vm2467_vm8 = vmor %vm2465_vm7, %vm2466_vm5 }
 0x1d7   :  { %v1369_v6 = vadd.f32 %v1368_v4, %v5151_v45  ;;  %v982_v52 = vpop.f32.mrf.mxu0  ;;  %v2453_v59 = vsel %vm2452_vm4, %v3957_v44, %v2449_v31  ;;  %v1151_v25 = vpop.f32.mrf.mxu1  ;;  %3964 = vrcp.f32 %v5471_v23  ;;  %1816 = vadd.xlane.f32.xlu0 %v1815_v34  ;;  %v1863_v44 = vadd.f32 %v5191_v9, %v1715_v54 }
 0x1d8   :  { %v2458_v46 = vsel %vm5459_vm3, %v2457_v40, %v2453_v59  ;;  %v2463_v45 = vmul.f32 %v3959_v41, %v2462_v50  ;;  %v983_v35 = vadd.f32 %v5333_v32, %v982_v52  ;;  %v1549_v1 = vsel %vm1421_vm6, %v1319_v62, %v1485_v29 }
 0x1d9   :  { %3140 = vst.msk [vmem:[%s6203_s5 + $0x98] sm:$0xff] %vm3120_vm9, %v2458_v46  ;;  %vm1441_vm0 = vcmp.ge.f32.partialorder %v1369_v6, 0.0  ;;  %v1505_v39 = vmul.f32 0.01, %v1369_v6  ;;  %v1617_v56 = vmul.f32 %v5343_v16, %v1549_v1  ;;  %v3700_v20 = vmul.f32 -1.442695, %v1863_v44 }
 0x1da   :  { %v2464_v26 = vadd.f32 %v3959_v41, %v2463_v45  ;;  %v1152_v2 = vadd.f32 %v1151_v25, %v983_v35  ;;  %v2486_v13 = vand.u32 2147483648, %v5471_v23  ;;  %v2484_v28 = vand.u32 2147483647, %v5471_v23 }
 0x1db   :  { %v1569_v33 = vsel %vm1441_vm0, %v1369_v6, %v1505_v39  ;;  %v3963_v36 = vpop.eup %3962  ;;  %v1758_v21 = vsel %vm1643_vm2, %v1617_v56, 0.0  ;;  %3966 = vpow2.f32 %v3700_v20  ;;  %vm2480_vm14 = vweird.f32 %v5471_v23 }
 0x1dc   :  { %v2468_v17 = vsel %vm2467_vm8, %v3959_v41, %v2464_v26  ;;  %v1637_v47 = vmul.f32 %v5343_v16, %v1569_v33  ;;  %v5493_v43 = vadd.f32 1.0, %v3963_v36  ;;  %v1321_v22 = vadd.f32 %v5425_v58, %v1152_v2  ;;  %1759 = vadd.xlane.f32.xlu2 %v1758_v21 }
 0x1dd   :  { %v5490_v30 = vpop.f32.mrf.mxu2  ;;  %v3965_v51 = vpop.eup %3964  ;;  %v2473_v19 = vsel %vm2470_vm10, %v2472_v37, %v2468_v17  ;;  %v2487_v59 = vor.u32 1.1754944e-38, %v2486_v13  ;;  %vm2485_vm1 = vcmp.eq.f32.partialorder %v2484_v28, 8.507059e+37  ;;  %v5530_v17 = vld [vmem:[#allocation2] ss:$0 sm:$0xff] }
 0x1de   :  { %v1370_v18 = vpop.f32.mrf.mxu3  ;;  %3141 = vst.msk [vmem:[%s6203_s5 + $0xa0] sm:$0xff] %vm3120_vm9, %v2473_v19  ;;  %v2476_v0 = vmul.f32 %v3965_v51, %v5471_v23  ;;  %3968 = vrcp.f32 %v5493_v43  ;;  %v1718_v58 = vpop.xlane.xlu0 %1717  ;;  %v1486_v42 = vmul.f32 0.01, %v1321_v22  ;;  %vm2481_vm12 = vweird.f32 %v3965_v51 }
 0x1df   :  { %v985_v38 = vpop.f32.mrf.mxu0  ;;  %v1371_v3 = vadd.f32 %v1370_v18, %v5183_v27  ;;  %v1154_v41 = vpop.f32.mrf.mxu1  ;;  %v1818_v31 = vsel %vm1643_vm2, %v1637_v47, 0.0  ;;  %v1864_v27 = vadd.f32 %v5191_v9, %v1718_v58  ;;  %vm1422_vm13 = vcmp.ge.f32.partialorder %v1321_v22, 0.0  ;;  %vm2482_vm15 = vmor %vm2480_vm14, %vm2481_vm12 }
 0x1e0   :  { %v2477_v62 = vsub.f32 1.0, %v2476_v0  ;;  %v986_v40 = vadd.f32 %v5333_v32, %v985_v38  ;;  %1819 = vadd.xlane.f32.xlu1 %v1818_v31  ;;  %v1550_v29 = vsel %vm1422_vm13, %v1321_v22, %v1486_v42  ;;  %v2499_v44 = vand.u32 2147483647, %v5493_v43 }
 0x1e1   :  { %vm1442_vm11 = vcmp.ge.f32.partialorder %v1371_v3, 0.0  ;;  %v1506_v55 = vmul.f32 0.01, %v1371_v3  ;;  %v3967_v6 = vpop.eup %3966  ;;  %v3701_v50 = vmul.f32 -1.442695, %v1864_v27  ;;  %v1618_v10 = vmul.f32 %v5343_v16, %v1550_v29 }
 0x1e2   :  { %v2478_v57 = vmul.f32 %v3965_v51, %v2477_v62  ;;  %v1155_v4 = vadd.f32 %v1154_v41, %v986_v40  ;;  %v5515_v9 = vadd.f32 1.0, %v3967_v6  ;;  %v2501_v2 = vand.u32 2147483648, %v5493_v43 }
 0x1e3   :  { %v1570_v8 = vsel %vm1442_vm11, %v1371_v3, %v1506_v55  ;;  %3970 = vpow2.f32 %v3701_v50  ;;  %v1761_v37 = vsel %vm1643_vm2, %v1618_v10, 0.0  ;;  %vm2495_vm0 = vweird.f32 %v5493_v43 }
 0x1e4   :  { %v1638_v49 = vmul.f32 %v5343_v16, %v1570_v8  ;;  %v2479_v52 = vadd.f32 %v3965_v51, %v2478_v57  ;;  %v3969_v14 = vpop.eup %3968  ;;  %v1324_v23 = vadd.f32 %v5442_v5, %v1155_v4  ;;  %3972 = vrcp.f32 %v5515_v9  ;;  %1762 = vadd.xlane.f32.xlu0 %v1761_v37 }
 0x1e5   :  { %v5512_v25 = vpop.f32.mrf.mxu2  ;;  %v2491_v35 = vmul.f32 %v3969_v14, %v5493_v43  ;;  %vm2496_vm4 = vweird.f32 %v3969_v14  ;;  %v2502_v41 = vor.u32 1.1754944e-38, %v2501_v2  ;;  %vm2500_vm7 = vcmp.eq.f32.partialorder %v2499_v44, 8.507059e+37 }
 0x1e6   :  { %v1373_v46 = vpop.f32.mrf.mxu3  ;;  %v1821_v45 = vsel %vm1643_vm2, %v1638_v49, 0.0  ;;  %v2483_v34 = vsel %vm2482_vm15, %v3965_v51, %v2479_v52  ;;  %v1721_v1 = vpop.xlane.xlu1 %1720  ;;  %v1487_v5 = vmul.f32 0.01, %v1324_v23  ;;  %vm1423_vm5 = vcmp.ge.f32.partialorder %v1324_v23, 0.0  ;;  %vm2497_vm6 = vmor %vm2495_vm0, %vm2496_vm4 }
 0x1e7   :  { %v1374_v15 = vadd.f32 %v1373_v46, %v5220_v7  ;;  %v987_v39 = vpop.f32.mrf.mxu0  ;;  %1822 = vadd.xlane.f32.xlu2 %v1821_v45  ;;  %v1156_v54 = vpop.f32.mrf.mxu1  ;;  %v2488_v26 = vsel %vm2485_vm1, %v2487_v59, %v2483_v34  ;;  %v2492_v7 = vsub.f32 1.0, %v2491_v35  ;;  %v1865_v20 = vadd.f32 %v5530_v17, %v1721_v1 }
 0x1e8   :  { %3142 = vst.msk [vmem:[%s6203_s5 + $0xa8] sm:$0xff] %vm3120_vm9, %v2488_v26  ;;  %v988_v33 = vadd.f32 %v5333_v32, %v987_v39  ;;  %v1551_v47 = vsel %vm1423_vm5, %v1324_v23, %v1487_v5  ;;  %v2514_v8 = vand.u32 2147483647, %v5515_v9  ;;  %v2516_v4 = vand.u32 2147483648, %v5515_v9 }
 0x1e9   :  { %vm1443_vm3 = vcmp.ge.f32.partialorder %v1374_v15, 0.0  ;;  %v1507_v56 = vmul.f32 0.01, %v1374_v15  ;;  %v2493_v36 = vmul.f32 %v3969_v14, %v2492_v7  ;;  %v3971_v19 = vpop.eup %3970  ;;  %v3702_v21 = vmul.f32 -1.442695, %v1865_v20 }
 0x1ea   :  { %v1157_v18 = vadd.f32 %v1156_v54, %v988_v33  ;;  %v1619_v38 = vmul.f32 %v5343_v16, %v1551_v47  ;;  %v3973_v3 = vpop.eup %3972  ;;  %v5537_v13 = vadd.f32 1.0, %v3971_v19  ;;  %vm2510_vm10 = vweird.f32 %v5515_v9 }
 0x1eb   :  { %v1571_v51 = vsel %vm1443_vm3, %v1374_v15, %v1507_v56  ;;  %v2494_v22 = vadd.f32 %v3969_v14, %v2493_v36  ;;  %v2506_v28 = vmul.f32 %v3973_v3, %v5515_v9  ;;  %3974 = vpow2.f32 %v3702_v21 }
 0x1ec   :  { %v1326_v58 = vadd.f32 %v5466_v63, %v1157_v18  ;;  %v1639_v62 = vmul.f32 %v5343_v16, %v1571_v51  ;;  %3976 = vrcp.f32 %v5537_v13  ;;  %v1764_v27 = vsel %vm1643_vm2, %v1619_v38, 0.0 }
 0x1ed   :  { %v5535_v0 = vpop.f32.mrf.mxu2  ;;  %v2498_v55 = vsel %vm2497_vm6, %v3969_v14, %v2494_v22  ;;  %v2507_v57 = vsub.f32 1.0, %v2506_v28  ;;  %1765 = vadd.xlane.f32.xlu1 %v1764_v27  ;;  %vm2511_vm8 = vweird.f32 %v3973_v3  ;;  %v2517_v45 = vor.u32 1.1754944e-38, %v2516_v4 }
 0x1ee   :  { %v2503_v31 = vsel %vm2500_vm7, %v2502_v41, %v2498_v55  ;;  %v1724_v40 = vpop.xlane.xlu2 %1723  ;;  %v1488_v63 = vmul.f32 0.01, %v1326_v58  ;;  %v1824_v29 = vsel %vm1643_vm2, %v1639_v62, 0.0  ;;  %vm1424_vm11 = vcmp.ge.f32.partialorder %v1326_v58, 0.0  ;;  %vm2512_vm12 = vmor %vm2510_vm10, %vm2511_vm8  ;;  %v1375_v36 = vpop.f32.mrf.mxu3 }
 0x1ef   :  { %v990_v42 = vpop.f32.mrf.mxu0  ;;  %v1159_v43 = vpop.f32.mrf.mxu1  ;;  %3143 = vst.msk [vmem:[%s6203_s5 + $0xb0] sm:$0xff] %vm3120_vm9, %v2503_v31  ;;  %v2508_v49 = vmul.f32 %v3973_v3, %v2507_v57  ;;  %1825 = vadd.xlane.f32.xlu0 %v1824_v29  ;;  %v1866_v52 = vadd.f32 %v5530_v17, %v1724_v40  ;;  %vm2515_vm13 = vcmp.eq.f32.partialorder %v2514_v8, 8.507059e+37  ;;  %v2529_v37 = vand.u32 2147483647, %v5537_v13 }
 0x1f0   :  { %v991_v6 = vadd.f32 %v5333_v32, %v990_v42  ;;  %v1552_v14 = vsel %vm1424_vm11, %v1326_v58, %v1488_v63  ;;  %v2531_v2 = vand.u32 2147483648, %v5537_v13  ;;  %vm2525_vm15 = vweird.f32 %v5537_v13 }
 0x1f1   :  { %v3975_v59 = vpop.eup %3974  ;;  %v2509_v50 = vadd.f32 %v3973_v3, %v2508_v49  ;;  %v3703_v46 = vmul.f32 -1.442695, %v1866_v52  ;;  %v1620_v34 = vmul.f32 %v5343_v16, %v1552_v14  ;;  %v1376_v41 = vadd.f32 %v1375_v36, %v5256_v53 }
 0x1f2   :  { %v1160_v10 = vadd.f32 %v1159_v43, %v991_v6  ;;  %v3977_v15 = vpop.eup %3976  ;;  %v5556_v39 = vadd.f32 1.0, %v3975_v59  ;;  %vm2530_vm4 = vcmp.eq.f32.partialorder %v2529_v37, 8.507059e+37 }
 0x1f3   :  { %v2513_v54 = vsel %vm2512_vm12, %v3973_v3, %v2509_v50  ;;  %v2521_v9 = vmul.f32 %v3977_v15, %v5537_v13  ;;  %v1767_v56 = vsel %vm1643_vm2, %v1620_v34, 0.0  ;;  %vm2526_vm14 = vweird.f32 %v3977_v15 }
 0x1f4   :  { %v1329_v26 = vadd.f32 %v5490_v30, %v1160_v10  ;;  %v2518_v1 = vsel %vm2515_vm13, %v2517_v45, %v2513_v54  ;;  %3978 = vrcp.f32 %v5556_v39  ;;  %1768 = vadd.xlane.f32.xlu2 %v1767_v56  ;;  %vm2527_vm3 = vmor %vm2525_vm15, %vm2526_vm14  ;;  %v2532_v3 = vor.u32 1.1754944e-38, %v2531_v2 }
 0x1f5   :  { %v5554_v23 = vpop.f32.mrf.mxu2  ;;  %3144 = vst.msk [vmem:[%s6203_s5 + $0xb8] sm:$0xff] %vm3120_vm9, %v2518_v1  ;;  %v2522_v7 = vsub.f32 1.0, %v2521_v9  ;;  %3980 = vpow2.f32 %v3703_v46  ;;  %v2544_v8 = vand.u32 2147483647, %v5556_v39  ;;  %vm2540_vm0 = vweird.f32 %v5556_v39 }
 0x1f6   :  { %v1489_v5 = vmul.f32 0.01, %v1329_v26  ;;  %vm1425_vm1 = vcmp.ge.f32.partialorder %v1329_v26, 0.0  ;;  %vm1444_vm6 = vcmp.ge.f32.partialorder %v1376_v41, 0.0  ;;  %v1508_v45 = vmul.f32 0.01, %v1376_v41  ;;  %v1378_v2 = vpop.f32.mrf.mxu3 }
 0x1f7   :  { %v992_v35 = vpop.f32.mrf.mxu0  ;;  %v1161_v44 = vpop.f32.mrf.mxu1  ;;  %v2523_v30 = vmul.f32 %v3977_v15, %v2522_v7  ;;  %vm2545_vm10 = vcmp.eq.f32.partialorder %v2544_v8, 8.507059e+37 }
 0x1f8   :  { %v1727_v33 = vpop.xlane.xlu0 %1726  ;;  %v993_v20 = vadd.f32 %v5333_v32, %v992_v35  ;;  %v1553_v22 = vsel %vm1425_vm1, %v1329_v26, %v1489_v5 }
 0x1f9   :  { %v1867_v18 = vadd.f32 %v5530_v17, %v1727_v33  ;;  %v2524_v47 = vadd.f32 %v3977_v15, %v2523_v30  ;;  %v1621_v58 = vmul.f32 %v5343_v16, %v1553_v22 }
 0x1fa   :  { %v1162_v51 = vadd.f32 %v1161_v44, %v993_v20  ;;  %v3979_v38 = vpop.eup %3978  ;;  %v1572_v20 = vsel %vm1444_vm6, %v1376_v41, %v1508_v45 }
 0x1fb   :  { %v3704_v19 = vmul.f32 -1.442695, %v1867_v18  ;;  %v3981_v42 = vpop.eup %3980  ;;  %v2528_v55 = vsel %vm2527_vm3, %v3977_v15, %v2524_v47  ;;  %v2536_v13 = vmul.f32 %v3979_v38, %v5556_v39  ;;  %v1770_v57 = vsel %vm1643_vm2, %v1621_v58, 0.0 }
 0x1fc   :  { %v1331_v28 = vadd.f32 %v5512_v25, %v1162_v51  ;;  %v2533_v31 = vsel %vm2530_vm4, %v2532_v3, %v2528_v55  ;;  %v5578_v40 = vadd.f32 1.0, %v3981_v42  ;;  %1771 = vadd.xlane.f32.xlu0 %v1770_v57  ;;  %v2546_v25 = vand.u32 2147483648, %v5556_v39 }
 0x1fd   :  { %v5572_v21 = vpop.f32.mrf.mxu2  ;;  %3982 = vpow2.f32 %v3704_v19  ;;  %3145 = vst.msk [vmem:[%s6203_s5 + $0xc0] sm:$0xff] %vm3120_vm9, %v2533_v31  ;;  %v2537_v53 = vsub.f32 1.0, %v2536_v13  ;;  %vm2541_vm5 = vweird.f32 %v3979_v38  ;;  %v5609_v47 = vadd.f32 %v1378_v2, %v5284_v48 }
 0x1fe   :  { %v1490_v63 = vmul.f32 0.01, %v1331_v28  ;;  %3984 = vrcp.f32 %v5578_v40  ;;  %v1730_v4 = vpop.xlane.xlu1 %1729  ;;  %vm1426_vm7 = vcmp.ge.f32.partialorder %v1331_v28, 0.0  ;;  %vm2542_vm8 = vmor %vm2540_vm0, %vm2541_vm5  ;;  %v2547_v15 = vor.u32 1.1754944e-38, %v2546_v25 }
 0x1ff   :  { %v995_v62 = vpop.f32.mrf.mxu0  ;;  %v1164_v43 = vpop.f32.mrf.mxu1  ;;  %v2538_v29 = vmul.f32 %v3979_v38, %v2537_v53  ;;  %v1868_v6 = vadd.f32 %v5530_v17, %v1730_v4  ;;  %v2561_v18 = vand.u32 2147483648, %v5578_v40  ;;  %v2559_v3 = vand.u32 2147483647, %v5578_v40 }
 0x200   :  { %v996_v27 = vadd.f32 %v5333_v32, %v995_v62  ;;  %v1554_v10 = vsel %vm1426_vm7, %v1331_v28, %v1490_v63  ;;  %vm2555_vm13 = vweird.f32 %v5578_v40 }
 0x201   :  { %v2539_v52 = vadd.f32 %v3979_v38, %v2538_v29  ;;  %v3705_v50 = vmul.f32 -1.442695, %v1868_v6  ;;  %v1622_v34 = vmul.f32 %v5343_v16, %v1554_v10  ;;  %v2562_v31 = vor.u32 1.1754944e-38, %v2561_v18 }
 0x202   :  { %v1165_v49 = vadd.f32 %v1164_v43, %v996_v27  ;;  %vm2560_vm1 = vcmp.eq.f32.partialorder %v2559_v3, 8.507059e+37  ;;  %v5624_v27 = vmul.f32 %v5343_v16, %v1572_v20 }
 0x203   :  { %v3983_v14 = vpop.eup %3982  ;;  %v2543_v54 = vsel %vm2542_vm8, %v3979_v38, %v2539_v52  ;;  %3986 = vpow2.f32 %v3705_v50  ;;  %v1773_v1 = vsel %vm1643_vm2, %v1622_v34, 0.0  ;;  %v5636_v50 = vld [vmem:[%s6201_s3] ss:$0 sm:$0xff] }
 0x204   :  { %v1334_v59 = vadd.f32 %v5535_v0, %v1165_v49  ;;  %v5595_v9 = vadd.f32 1.0, %v3983_v14  ;;  %v3985_v44 = vpop.eup %3984  ;;  %v2548_v0 = vsel %vm2545_vm10, %v2547_v15, %v2543_v54  ;;  %1774 = vadd.xlane.f32.xlu1 %v1773_v1 }
 0x205   :  { %v5592_v46 = vpop.f32.mrf.mxu2  ;;  %3146 = vst.msk [vmem:[%s6203_s5 + $0xc8] sm:$0xff] %vm3120_vm9, %v2548_v0  ;;  %v2551_v37 = vmul.f32 %v3985_v44, %v5578_v40  ;;  %vm2556_vm12 = vweird.f32 %v3985_v44 }
 0x206   :  { %v1491_v39 = vmul.f32 0.01, %v1334_v59  ;;  %v1733_v5 = vpop.xlane.xlu2 %1732  ;;  %vm1427_vm11 = vcmp.ge.f32.partialorder %v1334_v59, 0.0  ;;  %3988 = vrcp.f32 %v5595_v9  ;;  %vm2557_vm14 = vmor %vm2555_vm13, %vm2556_vm12  ;;  %v2576_v29 = vand.u32 2147483648, %v5595_v9 }
 0x207   :  { %v997_v35 = vpop.f32.mrf.mxu0  ;;  %v1166_v26 = vpop.f32.mrf.mxu1  ;;  %v1869_v33 = vadd.f32 %v5530_v17, %v1733_v5  ;;  %v2552_v30 = vsub.f32 1.0, %v2551_v37  ;;  %vm2570_vm5 = vweird.f32 %v5595_v9 }
 0x208   :  { %v998_v7 = vadd.f32 %v5333_v32, %v997_v35  ;;  %v1555_v36 = vsel %vm1427_vm11, %v1334_v59, %v1491_v39 }
 0x209   :  { %v3706_v19 = vmul.f32 -1.442695, %v1869_v33  ;;  %v3987_v22 = vpop.eup %3986  ;;  %v2553_v38 = vmul.f32 %v3985_v44, %v2552_v30  ;;  %v1623_v58 = vmul.f32 %v5343_v16, %v1555_v36  ;;  %v4139_v36 = vld [vmem:[%s6200_s2] ss:$0 sm:$0xff] }
 0x20a   :  { %v1167_v56 = vadd.f32 %v1166_v26, %v998_v7  ;;  %v5615_v42 = vadd.f32 1.0, %v3987_v22 }
 0x20b   :  { %3990 = vpow2.f32 %v3706_v19  ;;  %v2554_v13 = vadd.f32 %v3985_v44, %v2553_v38  ;;  %v1776_v28 = vsel %vm1643_vm2, %v1623_v58, 0.0 }
 0x20c   :  { %v1336_v51 = vadd.f32 %v5554_v23, %v1167_v56  ;;  %v3989_v55 = vpop.eup %3988  ;;  %3992 = vrcp.f32 %v5615_v42  ;;  %1777 = vadd.xlane.f32.xlu2 %v1776_v28  ;;  %v2589_v14 = vand.u32 2147483647, %v5615_v42  ;;  %v2591_v5 = vand.u32 2147483648, %v5615_v42 }
 0x20d   :  { %v1343_v62 = vpop.f32.mrf.mxu2  ;;  %v2566_v57 = vmul.f32 %v3989_v55, %v5595_v9  ;;  %v2558_v53 = vsel %vm2557_vm14, %v3985_v44, %v2554_v13  ;;  %vm2571_vm4 = vweird.f32 %v3989_v55  ;;  %v2577_v44 = vor.u32 1.1754944e-38, %v2576_v29 }
 0x20e   :  { %v1344_v41 = vadd.f32 %v1343_v62, %v4777_v24  ;;  %v1492_v23 = vmul.f32 0.01, %v1336_v51  ;;  %v1736_v40 = vpop.xlane.xlu0 %1735  ;;  %vm1428_vm15 = vcmp.ge.f32.partialorder %v1336_v51, 0.0  ;;  %v2574_v24 = vand.u32 2147483647, %v5595_v9  ;;  %vm2572_vm0 = vmor %vm2570_vm5, %vm2571_vm4 }
 0x20f   :  { %v1000_v48 = vpop.f32.mrf.mxu0  ;;  %v1169_v63 = vpop.f32.mrf.mxu1  ;;  %v2563_v8 = vsel %vm2560_vm1, %v2562_v31, %v2558_v53  ;;  %v2567_v25 = vsub.f32 1.0, %v2566_v57  ;;  %v1870_v49 = vadd.f32 %v5530_v17, %v1736_v40  ;;  %vm2585_vm7 = vweird.f32 %v5615_v42 }
 0x210   :  { %v1001_v43 = vadd.f32 %v5333_v32, %v1000_v48  ;;  %v1495_v32 = vmul.f32 0.01, %v1344_v41  ;;  %3147 = vst.msk [vmem:[%s6203_s5 + $0xd0] sm:$0xff] %vm3120_vm9, %v2563_v8  ;;  %vm1431_vm3 = vcmp.ge.f32.partialorder %v1344_v41, 0.0  ;;  %v1556_v6 = vsel %vm1428_vm15, %v1336_v51, %v1492_v23 }
 0x211   :  { %v3991_v52 = vpop.eup %3990  ;;  %v2568_v59 = vmul.f32 %v3989_v55, %v2567_v25  ;;  %v1624_v10 = vmul.f32 %v5636_v50, %v1556_v6  ;;  %v3707_v45 = vmul.f32 -1.442695, %v1870_v49  ;;  %vm2575_vm6 = vcmp.eq.f32.partialorder %v2574_v24, 8.507059e+37 }
 0x212   :  { %v1170_v4 = vadd.f32 %v1169_v63, %v1001_v43  ;;  %v5641_v15 = vadd.f32 1.0, %v3991_v52  ;;  %v3993_v35 = vpop.eup %3992  ;;  %v1559_v26 = vsel %vm1431_vm3, %v1344_v41, %v1495_v32  ;;  %vm5655_vm8 = vcmp.eq.f32.partialorder %v2589_v14, 8.507059e+37  ;;  %v1380_v32 = vpop.f32.mrf.mxu3 }
 0x213   :  { %v2569_v54 = vadd.f32 %v3989_v55, %v2568_v59  ;;  %v1779_v39 = vsel %vm1643_vm2, %v1624_v10, 0.0  ;;  %v2581_v0 = vmul.f32 %v3993_v35, %v5615_v42  ;;  %vm2586_vm10 = vweird.f32 %v3993_v35 }
 0x214   :  { %v1339_v16 = vadd.f32 %v5572_v21, %v1170_v4  ;;  %3994 = vrcp.f32 %v5641_v15  ;;  %1780 = vadd.xlane.f32.xlu0 %v1779_v39  ;;  %v2592_v22 = vor.u32 1.1754944e-38, %v2591_v5  ;;  %v2606_v48 = vand.u32 2147483648, %v5641_v15  ;;  %vm2587_vm13 = vmor %vm2585_vm7, %vm2586_vm10 }
 0x215   :  { %v1345_v34 = vpop.f32.mrf.mxu2  ;;  %v2573_v7 = vsel %vm2572_vm0, %v3989_v55, %v2569_v54  ;;  %3996 = vpow2.f32 %v3707_v45  ;;  %v2582_v56 = vsub.f32 1.0, %v2581_v0  ;;  %vm1445_vm15 = vcmp.ge.f32.partialorder %v5609_v47, 0.0 }
 0x216   :  { %v1346_v21 = vadd.f32 %v1345_v34, %v4810_v61  ;;  %v1739_v1 = vpop.xlane.xlu1 %1738  ;;  %v1493_v37 = vmul.f32 0.01, %v1339_v16  ;;  %v2578_v2 = vsel %vm2575_vm6, %v2577_v44, %v2573_v7  ;;  %v1627_v61 = vmul.f32 %v5636_v50, %v1559_v26 }
 0x217   :  { %v1002_v9 = vpop.f32.mrf.mxu0  ;;  %3148 = vst.msk [vmem:[%s6203_s5 + $0xd8] sm:$0xff] %vm3120_vm9, %v2578_v2  ;;  %v1871_v18 = vadd.f32 %v5530_v17, %v1739_v1  ;;  %v2583_v51 = vmul.f32 %v3993_v35, %v2582_v56  ;;  %v1171_v19 = vpop.f32.mrf.mxu1  ;;  %vm1429_vm12 = vcmp.ge.f32.partialorder %v1339_v16, 0.0  ;;  %v2604_v4 = vand.u32 2147483647, %v5641_v15 }
 0x218   :  { %v1496_v30 = vmul.f32 0.01, %v1346_v21  ;;  %v1003_v20 = vadd.f32 %v4139_v36, %v1002_v9  ;;  %vm1432_vm11 = vcmp.ge.f32.partialorder %v1346_v21, 0.0  ;;  %v1557_v58 = vsel %vm1429_vm12, %v1339_v16, %v1493_v37 }
 0x219   :  { %v3708_v3 = vmul.f32 -1.442695, %v1871_v18  ;;  %v2584_v41 = vadd.f32 %v3993_v35, %v2583_v51  ;;  %v1625_v55 = vmul.f32 %v5636_v50, %v1557_v58  ;;  %v1788_v13 = vsel %vm1643_vm2, %v1627_v61, 0.0 }
 0x21a   :  { %v1172_v38 = vadd.f32 %v1171_v19, %v1003_v20  ;;  %v3995_v62 = vpop.eup %3994  ;;  %v1560_v57 = vsel %vm1432_vm11, %v1346_v21, %v1496_v30  ;;  %v1381_v14 = vadd.f32 %v1380_v32, %v5306_v12  ;;  %vm2600_vm4 = vweird.f32 %v5641_v15 }
 0x21b   :  { %v3997_v28 = vpop.eup %3996  ;;  %v2596_v43 = vmul.f32 %v3995_v62, %v5641_v15  ;;  %3998 = vpow2.f32 %v3708_v3  ;;  %v2588_v40 = vsel %vm2587_vm13, %v3993_v35, %v2584_v41  ;;  %v1782_v24 = vsel %vm1643_vm2, %v1625_v55, 0.0 }
 0x21c   :  { %v1341_v31 = vadd.f32 %v5592_v46, %v1172_v38  ;;  %v5672_v53 = vadd.f32 1.0, %v3997_v28  ;;  %1789 = vadd.xlane.f32.xlu0 %v1788_v13  ;;  %v2593_v8 = vsel %vm5655_vm8, %v2592_v22, %v2588_v40  ;;  %1783 = vadd.xlane.f32.xlu1 %v1782_v24  ;;  %v1509_v46 = vmul.f32 0.01, %v5609_v47 }
 0x21d   :  { %v1348_v23 = vpop.f32.mrf.mxu2  ;;  %v2597_v42 = vsub.f32 1.0, %v2596_v43  ;;  %3149 = vst.msk [vmem:[%s6203_s5 + $0xe0] sm:$0xff] %vm3120_vm9, %v2593_v8  ;;  %vm2601_vm1 = vweird.f32 %v3995_v62  ;;  %v1628_v16 = vmul.f32 %v5636_v50, %v1560_v57  ;;  %v2607_v34 = vor.u32 1.1754944e-38, %v2606_v48 }
 0x21e   :  { %v1349_v63 = vadd.f32 %v1348_v23, %v4834_v60  ;;  %v1494_v25 = vmul.f32 0.01, %v1341_v31  ;;  %vm1430_vm14 = vcmp.ge.f32.partialorder %v1341_v31, 0.0  ;;  %4000 = vrcp.f32 %v5672_v53  ;;  %v1742_v49 = vpop.xlane.xlu2 %1741  ;;  %vm2602_vm5 = vmor %vm2600_vm4, %vm2601_vm1 }
 0x21f   :  { %v2598_v60 = vmul.f32 %v3995_v62, %v2597_v42  ;;  %v1872_v52 = vadd.f32 %v5530_v17, %v1742_v49  ;;  %vm2605_vm0 = vcmp.eq.f32.partialorder %v2604_v4, 8.507059e+37  ;;  %v1791_v7 = vsel %vm1643_vm2, %v1628_v16, 0.0 }
 0x220   :  { %v1497_v29 = vmul.f32 0.01, %v1349_v63  ;;  %v1558_v6 = vsel %vm1430_vm14, %v1341_v31, %v1494_v25  ;;  %vm1433_vm3 = vcmp.ge.f32.partialorder %v1349_v63, 0.0  ;;  %v1573_v5 = vsel %vm1445_vm15, %v5609_v47, %v1509_v46 }
 0x221   :  { %v1626_v59 = vmul.f32 %v5636_v50, %v1558_v6  ;;  %v3999_v10 = vpop.eup %3998  ;;  %v2599_v45 = vadd.f32 %v3995_v62, %v2598_v60  ;;  %v3709_v39 = vmul.f32 -1.442695, %v1872_v52  ;;  %v1510_v37 = vmul.f32 0.01, %v1381_v14 }
 0x222   :  { %v1802_v35 = vpop.xlane.xlu1 %1801  ;;  %v5691_v54 = vadd.f32 1.0, %v3999_v10  ;;  %v1561_v12 = vsel %vm1433_vm3, %v1349_v63, %v1497_v29  ;;  %vm1446_vm7 = vcmp.ge.f32.partialorder %v1381_v14, 0.0  ;;  %v1827_v47 = vsel %vm1643_vm2, %v5624_v27, 0.0 }
 0x223   :  { %v1892_v21 = vadd.f32 %v5530_v17, %v1802_v35  ;;  %v1785_v26 = vsel %vm1643_vm2, %v1626_v59, 0.0  ;;  %v2603_v0 = vsel %vm2602_vm5, %v3995_v62, %v2599_v45  ;;  %v1629_v61 = vmul.f32 %v5636_v50, %v1561_v12 }
 0x224   :  { %1786 = vadd.xlane.f32.xlu2 %v1785_v26  ;;  %v4001_v1 = vpop.eup %4000  ;;  %v2608_v15 = vsel %vm2605_vm0, %v2607_v34, %v2603_v0  ;;  %4002 = vrcp.f32 %v5691_v54  ;;  %1792 = vadd.xlane.f32.xlu1 %v1791_v7  ;;  %v1641_v36 = vmul.f32 %v5636_v50, %v1573_v5  ;;  %v2621_v20 = vand.u32 2147483648, %v5672_v53 }
 0x225   :  { %v1350_v44 = vpop.f32.mrf.mxu2  ;;  %3150 = vst.msk [vmem:[%s6203_s5 + $0xe8] sm:$0xff] %vm3120_vm9, %v2608_v15  ;;  %4004 = vpow2.f32 %v3709_v39  ;;  %v3729_v2 = vmul.f32 -1.442695, %v1892_v21  ;;  %vm2616_vm8 = vweird.f32 %v4001_v1  ;;  %v2619_v22 = vand.u32 2147483647, %v5672_v53 }
 0x226   :  { %v1351_v9 = vadd.f32 %v1350_v44, %v4876_v11  ;;  %v2611_v11 = vmul.f32 %v4001_v1, %v5672_v53  ;;  %v1745_v30 = vpop.xlane.xlu0 %1744  ;;  %v1794_v27 = vsel %vm1643_vm2, %v1629_v61, 0.0  ;;  %v1574_v48 = vsel %vm1446_vm7, %v1381_v14, %v1510_v37 }
 0x227   :  { %4006 = vpow2.f32 %v3729_v2  ;;  %v1873_v18 = vadd.f32 %v5530_v17, %v1745_v30  ;;  %vm2615_vm10 = vweird.f32 %v5672_v53  ;;  %v2622_v43 = vor.u32 1.1754944e-38, %v2621_v20 }
 0x228   :  { %vm1434_vm6 = vcmp.ge.f32.partialorder %v1351_v9, 0.0  ;;  %v1498_v56 = vmul.f32 0.01, %v1351_v9  ;;  %v2612_v33 = vsub.f32 1.0, %v2611_v11  ;;  %vm2617_vm11 = vmor %vm2615_vm10, %vm2616_vm8  ;;  %vm2620_vm12 = vcmp.eq.f32.partialorder %v2619_v22, 8.507059e+37 }
 0x229   :  { %v3710_v62 = vmul.f32 -1.442695, %v1873_v18  ;;  %v1642_v53 = vmul.f32 %v5636_v50, %v1574_v48  ;;  %v2634_v25 = vand.u32 2147483647, %v5691_v54  ;;  %v2636_v46 = vand.u32 2147483648, %v5691_v54 }
 0x22a   :  { %v1562_v51 = vsel %vm1434_vm6, %v1351_v9, %v1498_v56  ;;  %v2613_v19 = vmul.f32 %v4001_v1, %v2612_v33  ;;  %v1805_v38 = vpop.xlane.xlu2 %1804  ;;  %v4003_v58 = vpop.eup %4002  ;;  %vm2630_vm14 = vweird.f32 %v5691_v54  ;;  %v1830_v16 = vsel %vm1643_vm2, %v1641_v36, 0.0 }
 0x22b   :  { %v1630_v3 = vmul.f32 %v5636_v50, %v1562_v51  ;;  %v1893_v41 = vadd.f32 %v5530_v17, %v1805_v38  ;;  %v4005_v55 = vpop.eup %4004  ;;  %v2626_v23 = vmul.f32 %v4003_v58, %v5691_v54  ;;  %4008 = vpow2.f32 %v3710_v62 }
 0x22c   :  { %v2614_v13 = vadd.f32 %v4001_v1, %v2613_v19  ;;  %1795 = vadd.xlane.f32.xlu2 %v1794_v27  ;;  %v5722_v31 = vadd.f32 1.0, %v4005_v55  ;;  %1828 = vadd.xlane.f32.xlu1 %v1827_v47  ;;  %vm2631_vm13 = vweird.f32 %v4003_v58  ;;  %v2637_v6 = vor.u32 1.1754944e-38, %v2636_v46 }
 0x22d   :  { %v1797_v28 = vsel %vm1643_vm2, %v1630_v3, 0.0  ;;  %v3730_v57 = vmul.f32 -1.442695, %v1893_v41  ;;  %v2627_v24 = vsub.f32 1.0, %v2626_v23  ;;  %v4007_v8 = vpop.eup %4006  ;;  %vm2632_vm15 = vmor %vm2630_vm14, %vm2631_vm13  ;;  %vm2635_vm1 = vcmp.eq.f32.partialorder %v2634_v25, 8.507059e+37 }
 0x22e   :  { %1798 = vadd.xlane.f32.xlu0 %v1797_v28  ;;  %v2618_v40 = vsel %vm2617_vm11, %v4001_v1, %v2614_v13  ;;  %v1748_v63 = vpop.xlane.xlu1 %1747  ;;  %4010 = vrcp.f32 %v5722_v31  ;;  %v5732_v4 = vadd.f32 1.0, %v4007_v8  ;;  %v1833_v45 = vsel %vm1643_vm2, %v1642_v53, 0.0 }
 0x22f   :  { %v2623_v42 = vsel %vm2620_vm12, %v2622_v43, %v2618_v40  ;;  %v2628_v32 = vmul.f32 %v4003_v58, %v2627_v24  ;;  %4012 = vpow2.f32 %v3730_v57  ;;  %v1874_v50 = vadd.f32 %v5530_v17, %v1748_v63 }
 0x230   :  { %3151 = vst.msk [vmem:[%s6203_s5 + $0xf0] sm:$0xff] %vm3120_vm9, %v2623_v42  ;;  %4014 = vrcp.f32 %v5732_v4  ;;  %v2649_v26 = vand.u32 2147483647, %v5722_v31  ;;  %v2651_v44 = vand.u32 2147483648, %v5722_v31  ;;  %vm2645_vm2 = vweird.f32 %v5722_v31 }
 0x231   :  { %v2629_v29 = vadd.f32 %v4003_v58, %v2628_v32  ;;  %v4009_v49 = vpop.eup %4008  ;;  %v3711_v52 = vmul.f32 -1.442695, %v1874_v50  ;;  %v2949_v5 = vand.u32 2147483647, %v5732_v4  ;;  %v2951_v2 = vand.u32 2147483648, %v5732_v4 }
 0x232   :  { %v1808_v60 = vpop.xlane.xlu0 %1807  ;;  %v5739_v14 = vadd.f32 1.0, %v4009_v49  ;;  %vm5758_vm4 = vcmp.eq.f32.partialorder %v2649_v26, 8.507059e+37  ;;  %v2652_v33 = vor.u32 1.1754944e-38, %v2651_v44  ;;  %vm2945_vm0 = vweird.f32 %v5732_v4 }
 0x233   :  { %v1894_v59 = vadd.f32 %v5530_v17, %v1808_v60  ;;  %v2633_v10 = vsel %vm2632_vm15, %v4003_v58, %v2629_v29  ;;  %4016 = vpow2.f32 %v3711_v52  ;;  %vm5769_vm7 = vcmp.eq.f32.partialorder %v2949_v5, 8.507059e+37 }
 0x234   :  { %1831 = vadd.xlane.f32.xlu2 %v1830_v16  ;;  %v4011_v34 = vpop.eup %4010  ;;  %v2638_v35 = vsel %vm2635_vm1, %v2637_v6, %v2633_v10  ;;  %4018 = vrcp.f32 %v5739_v14  ;;  %v2952_v58 = vor.u32 1.1754944e-38, %v2951_v2  ;;  %v2664_v48 = vand.u32 2147483647, %v5739_v14 }
 0x235   :  { %v4013_v54 = vpop.eup %4012  ;;  %3152 = vst.msk [vmem:[%s6203_s5 + $0xf8] sm:$0xff] %vm3120_vm9, %v2638_v35  ;;  %v2641_v39 = vmul.f32 %v4011_v34, %v5722_v31  ;;  %v3731_v9 = vmul.f32 -1.442695, %v1894_v59  ;;  %vm2646_vm3 = vweird.f32 %v4011_v34  ;;  %v2666_v23 = vand.u32 2147483648, %v5739_v14 }
 0x236   :  { %1834 = vadd.xlane.f32.xlu0 %v1833_v45  ;;  %v5750_v0 = vadd.f32 1.0, %v4013_v54  ;;  %v4015_v12 = vpop.eup %4014  ;;  %vm2647_vm5 = vmor %vm2645_vm2, %vm2646_vm3  ;;  %vm2660_vm11 = vweird.f32 %v5739_v14  ;;  %vm2665_vm12 = vcmp.eq.f32.partialorder %v2664_v48, 8.507059e+37 }
 0x237   :  { %v1751_v21 = vpop.xlane.xlu2 %1750  ;;  %v2642_v1 = vsub.f32 1.0, %v2641_v39  ;;  %v2941_v7 = vmul.f32 %v4015_v12, %v5732_v4  ;;  %vm2946_vm6 = vweird.f32 %v4015_v12  ;;  %v2667_v32 = vor.u32 1.1754944e-38, %v2666_v23 }
 0x238   :  { %v1875_v15 = vadd.f32 %v5530_v17, %v1751_v21  ;;  %4020 = vrcp.f32 %v5750_v0  ;;  %vm2947_vm8 = vmor %vm2945_vm0, %vm2946_vm6  ;;  %v2964_v4 = vand.u32 2147483647, %v5750_v0  ;;  %v2966_v50 = vand.u32 2147483648, %v5750_v0 }
 0x239   :  { %v1811_v37 = vpop.xlane.xlu1 %1810  ;;  %v2643_v11 = vmul.f32 %v4011_v34, %v2642_v1  ;;  %v4017_v56 = vpop.eup %4016  ;;  %v2942_v30 = vsub.f32 1.0, %v2941_v7  ;;  %4022 = vpow2.f32 %v3731_v9  ;;  %vm2960_vm15 = vweird.f32 %v5750_v0 }
 0x23a   :  { %v4019_v47 = vpop.eup %4018  ;;  %v5762_v20 = vadd.f32 1.0, %v4017_v56  ;;  %v3712_v18 = vmul.f32 -1.442695, %v1875_v15  ;;  %v1895_v51 = vadd.f32 %v5530_v17, %v1811_v37  ;;  %vm2965_vm2 = vcmp.eq.f32.partialorder %v2964_v4, 8.507059e+37  ;;  %v5849_v4 = vld [vmem:[#allocation2] ss:$0 sm:$0xff] }
 0x23b   :  { %v2644_v36 = vadd.f32 %v4011_v34, %v2643_v11  ;;  %v2943_v19 = vmul.f32 %v4015_v12, %v2942_v30  ;;  %v2656_v22 = vmul.f32 %v4019_v47, %v5739_v14  ;;  %vm2661_vm10 = vweird.f32 %v4019_v47 }
 0x23c   :  { %4024 = vrcp.f32 %v5762_v20  ;;  %v3732_v28 = vmul.f32 -1.442695, %v1895_v51  ;;  %vm2662_vm13 = vmor %vm2660_vm11, %vm2661_vm10  ;;  %v2967_v35 = vor.u32 1.1754944e-38, %v2966_v50  ;;  %v2679_v54 = vand.u32 2147483647, %v5762_v20 }
 0x23d   :  { %v2648_v38 = vsel %vm2647_vm5, %v4011_v34, %v2644_v36  ;;  %v2944_v41 = vadd.f32 %v4015_v12, %v2943_v19  ;;  %v2657_v27 = vsub.f32 1.0, %v2656_v22  ;;  %4026 = vpow2.f32 %v3712_v18 }
 0x23e   :  { %v2653_v62 = vsel %vm5758_vm4, %v2652_v33, %v2648_v38  ;;  %v1754_v55 = vpop.xlane.xlu0 %1753  ;;  %v4021_v13 = vpop.eup %4020  ;;  %4028 = vpow2.f32 %v3732_v28  ;;  %v2681_v39 = vand.u32 2147483648, %v5762_v20  ;;  %vm2675_vm4 = vweird.f32 %v5762_v20 }
 0x23f   :  { %3153 = vst.msk [vmem:[%s6203_s5 + $0x100] sm:$0xff] %vm3120_vm9, %v2653_v62  ;;  %v1876_v43 = vadd.f32 %v5530_v17, %v1754_v55  ;;  %v4023_v31 = vpop.eup %4022  ;;  %v2948_v57 = vsel %vm2947_vm8, %v4015_v12, %v2944_v41  ;;  %v2658_v40 = vmul.f32 %v4019_v47, %v2657_v27  ;;  %v2956_v24 = vmul.f32 %v4021_v13, %v5750_v0 }
 0x240   :  { %v2953_v63 = vsel %vm5769_vm7, %v2952_v58, %v2948_v57  ;;  %v5787_v53 = vadd.f32 1.0, %v4023_v31  ;;  %vm2961_vm14 = vweird.f32 %v4021_v13  ;;  %v2682_v37 = vor.u32 1.1754944e-38, %v2681_v39 }
 0x241   :  { %3173 = vst.msk [vmem:[%s6203_s5 + $0x1a0] sm:$0xff] %vm3120_vm9, %v2953_v63  ;;  %v2659_v8 = vadd.f32 %v4019_v47, %v2658_v40  ;;  %v2957_v42 = vsub.f32 1.0, %v2956_v24  ;;  %v3713_v25 = vmul.f32 -1.442695, %v1876_v43  ;;  %vm2962_vm1 = vmor %vm2960_vm15, %vm2961_vm14  ;;  %vm2680_vm0 = vcmp.eq.f32.partialorder %v2679_v54, 8.507059e+37 }
 0x242   :  { %v4025_v46 = vpop.eup %4024  ;;  %4030 = vrcp.f32 %v5787_v53  ;;  %v1814_v60 = vpop.xlane.xlu2 %1813  ;;  %v2979_v11 = vand.u32 2147483647, %v5787_v53  ;;  %v2981_v2 = vand.u32 2147483648, %v5787_v53  ;;  %vm2975_vm6 = vweird.f32 %v5787_v53 }
 0x243   :  { %v2663_v29 = vsel %vm2662_vm13, %v4019_v47, %v2659_v8  ;;  %v2958_v49 = vmul.f32 %v4021_v13, %v2957_v42  ;;  %v2671_v6 = vmul.f32 %v4025_v46, %v5762_v20  ;;  %v4027_v52 = vpop.eup %4026  ;;  %4032 = vpow2.f32 %v3713_v25 }
 0x244   :  { %v2668_v59 = vsel %vm2665_vm12, %v2667_v32, %v2663_v29  ;;  %v5802_v14 = vadd.f32 1.0, %v4027_v52  ;;  %v1896_v45 = vadd.f32 %v5530_v17, %v1814_v60  ;;  %v4029_v34 = vpop.eup %4028  ;;  %vm2676_vm3 = vweird.f32 %v4025_v46 }
 0x245   :  { %3154 = vst.msk [vmem:[%s6203_s5 + $0x108] sm:$0xff] %vm3120_vm9, %v2668_v59  ;;  %v2959_v16 = vadd.f32 %v4021_v13, %v2958_v49  ;;  %v2672_v10 = vsub.f32 1.0, %v2671_v6  ;;  %v5808_v9 = vadd.f32 1.0, %v4029_v34  ;;  %vm2677_vm5 = vmor %vm2675_vm4, %vm2676_vm3  ;;  %vm5828_vm8 = vcmp.eq.f32.partialorder %v2979_v11, 8.507059e+37 }
 0x246   :  { %4034 = vrcp.f32 %v5802_v14  ;;  %v3733_v15 = vmul.f32 -1.442695, %v1896_v45  ;;  %v2982_v22 = vor.u32 1.1754944e-38, %v2981_v2  ;;  %vm2690_vm10 = vweird.f32 %v5802_v14 }
 0x247   :  { %v2963_v21 = vsel %vm2962_vm1, %v4021_v13, %v2959_v16  ;;  %v2673_v26 = vmul.f32 %v4025_v46, %v2672_v10  ;;  %4036 = vrcp.f32 %v5808_v9  ;;  %v2694_v62 = vand.u32 2147483647, %v5802_v14 }
 0x248   :  { %v4031_v44 = vpop.eup %4030  ;;  %v2968_v0 = vsel %vm2965_vm2, %v2967_v35, %v2963_v21  ;;  %v1757_v7 = vpop.xlane.xlu1 %1756  ;;  %4038 = vpow2.f32 %v3733_v15  ;;  %v2696_v55 = vand.u32 2147483648, %v5802_v14  ;;  %v2994_v31 = vand.u32 2147483647, %v5808_v9 }
 0x249   :  { %3174 = vst.msk [vmem:[%s6203_s5 + $0x1a8] sm:$0xff] %vm3120_vm9, %v2968_v0  ;;  %v2674_v12 = vadd.f32 %v4025_v46, %v2673_v26  ;;  %v2971_v1 = vmul.f32 %v4031_v44, %v5787_v53  ;;  %v4033_v5 = vpop.eup %4032  ;;  %v1877_v36 = vadd.f32 %v5530_v17, %v1757_v7  ;;  %vm2976_vm7 = vweird.f32 %v4031_v44 }
 0x24a   :  { %v1817_v56 = vpop.xlane.xlu0 %1816  ;;  %v5819_v47 = vadd.f32 1.0, %v4033_v5  ;;  %vm2977_vm11 = vmor %vm2975_vm6, %vm2976_vm7  ;;  %v2996_v57 = vand.u32 2147483648, %v5808_v9  ;;  %vm2695_vm13 = vcmp.eq.f32.partialorder %v2694_v62, 8.507059e+37  ;;  %v2697_v32 = vor.u32 1.1754944e-38, %v2696_v55 }
 0x24b   :  { %v2678_v61 = vsel %vm2677_vm5, %v4025_v46, %v2674_v12  ;;  %v2972_v33 = vsub.f32 1.0, %v2971_v1  ;;  %v1897_v51 = vadd.f32 %v5530_v17, %v1817_v56  ;;  %v3714_v41 = vmul.f32 -1.442695, %v1877_v36 }
 0x24c   :  { %v2683_v30 = vsel %vm2680_vm0, %v2682_v37, %v2678_v61  ;;  %v4035_v20 = vpop.eup %4034  ;;  %4040 = vrcp.f32 %v5819_v47  ;;  %vm2990_vm1 = vweird.f32 %v5808_v9  ;;  %vm5857_vm2 = vcmp.eq.f32.partialorder %v2994_v31, 8.507059e+37 }
 0x24d   :  { %3155 = vst.msk [vmem:[%s6203_s5 + $0x110] sm:$0xff] %vm3120_vm9, %v2683_v30  ;;  %v2973_v18 = vmul.f32 %v4031_v44, %v2972_v33  ;;  %v2686_v38 = vmul.f32 %v4035_v20, %v5802_v14  ;;  %v4037_v27 = vpop.eup %4036  ;;  %v3734_v13 = vmul.f32 -1.442695, %v1897_v51  ;;  %vm2691_vm12 = vweird.f32 %v4035_v20 }
 0x24e   :  { %v2986_v43 = vmul.f32 %v4037_v27, %v5808_v9  ;;  %v4039_v40 = vpop.eup %4038  ;;  %4042 = vpow2.f32 %v3714_v41  ;;  %vm2692_vm14 = vmor %vm2690_vm10, %vm2691_vm12  ;;  %vm2991_vm15 = vweird.f32 %v4037_v27  ;;  %v2997_v52 = vor.u32 1.1754944e-38, %v2996_v57 }
 0x24f   :  { %v1760_v3 = vpop.xlane.xlu2 %1759  ;;  %v2974_v58 = vadd.f32 %v4031_v44, %v2973_v18  ;;  %v2687_v48 = vsub.f32 1.0, %v2686_v38  ;;  %v5847_v8 = vadd.f32 1.0, %v4039_v40  ;;  %4044 = vpow2.f32 %v3734_v13  ;;  %vm2992_vm3 = vmor %vm2990_vm1, %vm2991_vm15 }
 0x250   :  { %v1878_v23 = vadd.f32 %v5530_v17, %v1760_v3  ;;  %v2987_v17 = vsub.f32 1.0, %v2986_v43  ;;  %v2709_v45 = vand.u32 2147483647, %v5819_v47  ;;  %v2711_v34 = vand.u32 2147483648, %v5819_v47 }
 0x251   :  { %v2978_v28 = vsel %vm2977_vm11, %v4031_v44, %v2974_v58  ;;  %v2688_v63 = vmul.f32 %v4035_v20, %v2687_v48  ;;  %4046 = vrcp.f32 %v5847_v8  ;;  %vm2705_vm5 = vweird.f32 %v5819_v47 }
 0x252   :  { %v2983_v24 = vsel %vm5828_vm8, %v2982_v22, %v2978_v28  ;;  %v3715_v42 = vmul.f32 -1.442695, %v1878_v23  ;;  %v4041_v25 = vpop.eup %4040  ;;  %v2988_v60 = vmul.f32 %v4037_v27, %v2987_v17  ;;  %v2712_v15 = vor.u32 1.1754944e-38, %v2711_v34 }
 0x253   :  { %v1820_v53 = vpop.xlane.xlu1 %1819  ;;  %3175 = vst.msk [vmem:[%s6203_s5 + $0x1b0] sm:$0xff] %vm3120_vm9, %v2983_v24  ;;  %v2689_v46 = vadd.f32 %v4035_v20, %v2688_v63  ;;  %v2701_v29 = vmul.f32 %v4041_v25, %v5819_v47  ;;  %vm2706_vm4 = vweird.f32 %v4041_v25  ;;  %v3009_v5 = vand.u32 2147483647, %v5847_v8 }
 0x254   :  { %v1898_v50 = vadd.f32 %v5849_v4, %v1820_v53  ;;  %v2989_v16 = vadd.f32 %v4037_v27, %v2988_v60  ;;  %4048 = vpow2.f32 %v3715_v42  ;;  %v4043_v14 = vpop.eup %4042  ;;  %vm2707_vm0 = vmor %vm2705_vm5, %vm2706_vm4  ;;  %vm2710_vm6 = vcmp.eq.f32.partialorder %v2709_v45, 8.507059e+37 }
 0x255   :  { %v2693_v49 = vsel %vm2692_vm14, %v4035_v20, %v2689_v46  ;;  %v2702_v10 = vsub.f32 1.0, %v2701_v29  ;;  %v4045_v54 = vpop.eup %4044  ;;  %v5867_v26 = vadd.f32 1.0, %v4043_v14  ;;  %v3011_v56 = vand.u32 2147483648, %v5847_v8 }
 0x256   :  { %v2698_v59 = vsel %vm2695_vm13, %v2697_v32, %v2693_v49  ;;  %v3735_v35 = vmul.f32 -1.442695, %v1898_v50  ;;  %v2993_v39 = vsel %vm2992_vm3, %v4037_v27, %v2989_v16  ;;  %v5871_v0 = vadd.f32 1.0, %v4045_v54 }
 0x257   :  { %3156 = vst.msk [vmem:[%s6203_s5 + $0x118] sm:$0xff] %vm3120_vm9, %v2698_v59  ;;  %v2703_v21 = vmul.f32 %v4041_v25, %v2702_v10  ;;  %v2998_v44 = vsel %vm5857_vm2, %v2997_v52, %v2993_v39  ;;  %v4047_v9 = vpop.eup %4046  ;;  %v1763_v1 = vpop.xlane.xlu0 %1762  ;;  %v2724_v47 = vand.u32 2147483647, %v5867_v26  ;;  %vm3005_vm7 = vweird.f32 %v5847_v8 }
 0x258   :  { %4050 = vpow2.f32 %v3735_v35  ;;  %3176 = vst.msk [vmem:[%s6203_s5 + $0x1b8] sm:$0xff] %vm3120_vm9, %v2998_v44  ;;  %v3001_v7 = vmul.f32 %v4047_v9, %v5847_v8  ;;  %v1879_v30 = vadd.f32 %v5849_v4, %v1763_v1  ;;  %vm3006_vm8 = vweird.f32 %v4047_v9 }
 0x259   :  { %v2704_v12 = vadd.f32 %v4041_v25, %v2703_v21  ;;  %4052 = vrcp.f32 %v5867_v26  ;;  %vm5893_vm10 = vcmp.eq.f32.partialorder %v3009_v5, 8.507059e+37  ;;  %v3012_v38 = vor.u32 1.1754944e-38, %v3011_v56  ;;  %vm3007_vm12 = vmor %vm3005_vm7, %vm3006_vm8 }
 0x25a   :  { %4054 = vrcp.f32 %v5871_v0  ;;  %v1823_v37 = vpop.xlane.xlu2 %1822  ;;  %v4049_v11 = vpop.eup %4048  ;;  %v3002_v33 = vsub.f32 1.0, %v3001_v7  ;;  %vm2720_vm11 = vweird.f32 %v5867_v26  ;;  %v2726_v3 = vand.u32 2147483648, %v5867_v26 }
 0x25b   :  { %v2708_v2 = vsel %vm2707_vm0, %v4041_v25, %v2704_v12  ;;  %v5889_v36 = vadd.f32 1.0, %v4049_v11  ;;  %v1899_v20 = vadd.f32 %v5849_v4, %v1823_v37  ;;  %v3716_v48 = vmul.f32 -1.442695, %v1879_v30 }
 0x25c   :  { %v2713_v61 = vsel %vm2710_vm6, %v2712_v15, %v2708_v2  ;;  %v3003_v51 = vmul.f32 %v4047_v9, %v3002_v33  ;;  %vm5903_vm13 = vcmp.eq.f32.partialorder %v2724_v47, 8.507059e+37  ;;  %vm3020_vm14 = vweird.f32 %v5871_v0 }
 0x25d   :  { %3157 = vst.msk [vmem:[%s6203_s5 + $0x120] sm:$0xff] %vm3120_vm9, %v2713_v61  ;;  %4056 = vrcp.f32 %v5889_v36  ;;  %v3736_v23 = vmul.f32 -1.442695, %v1899_v20  ;;  %v3024_v40 = vand.u32 2147483647, %v5871_v0  ;;  %v3026_v53 = vand.u32 2147483648, %v5871_v0 }
 0x25e   :  { %v4051_v18 = vpop.eup %4050  ;;  %v3004_v62 = vadd.f32 %v4047_v9, %v3003_v51  ;;  %v2727_v46 = vor.u32 1.1754944e-38, %v2726_v3  ;;  %v2741_v59 = vand.u32 2147483648, %v5889_v36  ;;  %v2739_v34 = vand.u32 2147483647, %v5889_v36 }
 0x25f   :  { %v4053_v22 = vpop.eup %4052  ;;  %v5901_v27 = vadd.f32 1.0, %v4051_v18  ;;  %vm5920_vm2 = vcmp.eq.f32.partialorder %v3024_v40, 8.507059e+37  ;;  %v3027_v52 = vor.u32 1.1754944e-38, %v3026_v53  ;;  %vm2735_vm0 = vweird.f32 %v5889_v36 }
 0x260   :  { %v4055_v58 = vpop.eup %4054  ;;  %v2716_v41 = vmul.f32 %v4053_v22, %v5867_v26  ;;  %v1766_v28 = vpop.xlane.xlu1 %1765  ;;  %v3008_v31 = vsel %vm3007_vm12, %v4047_v9, %v3004_v62  ;;  %vm2721_vm15 = vweird.f32 %v4053_v22  ;;  %v2742_v1 = vor.u32 1.1754944e-38, %v2741_v59 }
 0x261   :  { %v3016_v13 = vmul.f32 %v4055_v58, %v5871_v0  ;;  %4058 = vrcp.f32 %v5901_v27  ;;  %v3013_v24 = vsel %vm5893_vm10, %v3012_v38, %v3008_v31  ;;  %v1880_v8 = vadd.f32 %v5849_v4, %v1766_v28  ;;  %vm2722_vm3 = vmor %vm2720_vm11, %vm2721_vm15 }
 0x262   :  { %v1826_v43 = vpop.xlane.xlu0 %1825  ;;  %v2717_v57 = vsub.f32 1.0, %v2716_v41  ;;  %3177 = vst.msk [vmem:[%s6203_s5 + $0x1c0] sm:$0xff] %vm3120_vm9, %v3013_v24  ;;  %4060 = vpow2.f32 %v3716_v48  ;;  %vm3021_vm1 = vweird.f32 %v4055_v58  ;;  %v3041_v37 = vand.u32 2147483648, %v5901_v27 }
 0x263   :  { %v3017_v63 = vsub.f32 1.0, %v3016_v13  ;;  %v1900_v42 = vadd.f32 %v5849_v4, %v1826_v43  ;;  %v4057_v25 = vpop.eup %4056  ;;  %4062 = vpow2.f32 %v3736_v23  ;;  %v3717_v49 = vmul.f32 -1.442695, %v1880_v8  ;;  %vm3022_vm4 = vmor %vm3020_vm14, %vm3021_vm1 }
 0x264   :  { %v2718_v17 = vmul.f32 %v4053_v22, %v2717_v57  ;;  %v2731_v29 = vmul.f32 %v4057_v25, %v5889_v36  ;;  %vm2736_vm5 = vweird.f32 %v4057_v25  ;;  %v3039_v61 = vand.u32 2147483647, %v5901_v27 }
 0x265   :  { %v3018_v32 = vmul.f32 %v4055_v58, %v3017_v63  ;;  %v3737_v16 = vmul.f32 -1.442695, %v1900_v42  ;;  %4064 = vpow2.f32 %v3717_v49  ;;  %vm2737_vm6 = vmor %vm2735_vm0, %vm2736_vm5  ;;  %vm2740_vm8 = vcmp.eq.f32.partialorder %v2739_v34, 8.507059e+37 }
 0x266   :  { %v2719_v50 = vadd.f32 %v4053_v22, %v2718_v17  ;;  %v2732_v45 = vsub.f32 1.0, %v2731_v29  ;;  %vm3035_vm10 = vweird.f32 %v5901_v27  ;;  %v3042_v51 = vor.u32 1.1754944e-38, %v3041_v37 }
 0x267   :  { %v3019_v6 = vadd.f32 %v4055_v58, %v3018_v32  ;;  %v4059_v10 = vpop.eup %4058  ;;  %v1769_v35 = vpop.xlane.xlu2 %1768  ;;  %4066 = vpow2.f32 %v3737_v16  ;;  %vm3040_vm12 = vcmp.eq.f32.partialorder %v3039_v61, 8.507059e+37 }
 0x268   :  { %v2723_v14 = vsel %vm2722_vm3, %v4053_v22, %v2719_v50  ;;  %v3031_v21 = vmul.f32 %v4059_v10, %v5901_v27  ;;  %v4061_v26 = vpop.eup %4060  ;;  %v2733_v0 = vmul.f32 %v4057_v25, %v2732_v45  ;;  %v1881_v9 = vadd.f32 %v5849_v4, %v1769_v35 }
 0x269   :  { %v2728_v54 = vsel %vm5903_vm13, %v2727_v46, %v2723_v14  ;;  %v3023_v39 = vsel %vm3022_vm4, %v4055_v58, %v3019_v6  ;;  %v4063_v12 = vpop.eup %4062  ;;  %v5947_v7 = vadd.f32 1.0, %v4061_v26  ;;  %vm3036_vm7 = vweird.f32 %v4059_v10 }
 0x26a   :  { %3158 = vst.msk [vmem:[%s6203_s5 + $0x128] sm:$0xff] %vm3120_vm9, %v2728_v54  ;;  %v3028_v44 = vsel %vm5920_vm2, %v3027_v52, %v3023_v39  ;;  %v3032_v15 = vsub.f32 1.0, %v3031_v21  ;;  %v2734_v5 = vadd.f32 %v4057_v25, %v2733_v0  ;;  %v5950_v11 = vadd.f32 1.0, %v4063_v12  ;;  %vm3037_vm11 = vmor %vm3035_vm10, %vm3036_vm7 }
 0x26b   :  { %3178 = vst.msk [vmem:[%s6203_s5 + $0x1c8] sm:$0xff] %vm3120_vm9, %v3028_v44  ;;  %v3718_v2 = vmul.f32 -1.442695, %v1881_v9  ;;  %4068 = vrcp.f32 %v5947_v7  ;;  %v4065_v33 = vpop.eup %4064  ;;  %v2754_v58 = vand.u32 2147483647, %v5947_v7  ;;  %v2756_v27 = vand.u32 2147483648, %v5947_v7 }
 0x26c   :  { %v3033_v56 = vmul.f32 %v4059_v10, %v3032_v15  ;;  %v2738_v30 = vsel %vm2737_vm6, %v4057_v25, %v2734_v5  ;;  %4070 = vrcp.f32 %v5950_v11  ;;  %v5961_v19 = vadd.f32 1.0, %v4065_v33 }
 0x26d   :  { %v2743_v47 = vsel %vm2740_vm8, %v2742_v1, %v2738_v30  ;;  %v4067_v18 = vpop.eup %4066  ;;  %4072 = vpow2.f32 %v3718_v2  ;;  %v3054_v48 = vand.u32 2147483647, %v5950_v11  ;;  %vm2750_vm13 = vweird.f32 %v5947_v7 }
 0x26e   :  { %v3034_v36 = vadd.f32 %v4059_v10, %v3033_v56  ;;  %3159 = vst.msk [vmem:[%s6203_s5 + $0x130] sm:$0xff] %vm3120_vm9, %v2743_v47  ;;  %v5963_v38 = vadd.f32 1.0, %v4067_v18  ;;  %4074 = vrcp.f32 %v5961_v19  ;;  %vm3050_vm14 = vweird.f32 %v5950_v11 }
 0x26f   :  { %v1772_v20 = vpop.xlane.xlu0 %1771  ;;  %vm5979_vm15 = vcmp.eq.f32.partialorder %v2754_v58, 8.507059e+37  ;;  %v3056_v57 = vand.u32 2147483648, %v5950_v11  ;;  %v2757_v63 = vor.u32 1.1754944e-38, %v2756_v27  ;;  %vm5984_vm1 = vcmp.eq.f32.partialorder %v3054_v48, 8.507059e+37 }
 0x270   :  { %v3038_v22 = vsel %vm3037_vm11, %v4059_v10, %v3034_v36  ;;  %v1882_v62 = vadd.f32 %v5849_v4, %v1772_v20  ;;  %4076 = vrcp.f32 %v5963_v38  ;;  %v2769_v6 = vand.u32 2147483647, %v5961_v19 }
 0x271   :  { %v3043_v3 = vsel %vm3040_vm12, %v3042_v51, %v3038_v22  ;;  %v4069_v41 = vpop.eup %4068  ;;  %v3057_v49 = vor.u32 1.1754944e-38, %v3056_v57  ;;  %v2771_v10 = vand.u32 2147483648, %v5961_v19  ;;  %v3069_v14 = vand.u32 2147483647, %v5963_v38 }
 0x272   :  { %3179 = vst.msk [vmem:[%s6203_s5 + $0x1d0] sm:$0xff] %vm3120_vm9, %v3043_v3  ;;  %v4071_v55 = vpop.eup %4070  ;;  %v2746_v13 = vmul.f32 %v4069_v41, %v5947_v7  ;;  %v3719_v40 = vmul.f32 -1.442695, %v1882_v62  ;;  %vm2751_vm2 = vweird.f32 %v4069_v41  ;;  %v3071_v35 = vand.u32 2147483648, %v5963_v38 }
 0x273   :  { %v3046_v23 = vmul.f32 %v4071_v55, %v5950_v11  ;;  %v4073_v28 = vpop.eup %4072  ;;  %vm3051_vm3 = vweird.f32 %v4071_v55  ;;  %vm2752_vm4 = vmor %vm2750_vm13, %vm2751_vm2  ;;  %vm2765_vm7 = vweird.f32 %v5961_v19  ;;  %v2772_v37 = vor.u32 1.1754944e-38, %v2771_v10 }
 0x274   :  { %v2747_v43 = vsub.f32 1.0, %v2746_v13  ;;  %v5988_v8 = vadd.f32 1.0, %v4073_v28  ;;  %v4075_v42 = vpop.eup %4074  ;;  %4078 = vpow2.f32 %v3719_v40  ;;  %vm3052_vm5 = vmor %vm3050_vm14, %vm3051_vm3  ;;  %vm3065_vm10 = vweird.f32 %v5963_v38 }
 0x275   :  { %v3047_v53 = vsub.f32 1.0, %v3046_v23  ;;  %v2761_v60 = vmul.f32 %v4075_v42, %v5961_v19  ;;  %vm2766_vm0 = vweird.f32 %v4075_v42  ;;  %vm2770_vm11 = vcmp.eq.f32.partialorder %v2769_v6, 8.507059e+37 }
 0x276   :  { %v2748_v25 = vmul.f32 %v4069_v41, %v2747_v43  ;;  %v4077_v32 = vpop.eup %4076  ;;  %4080 = vrcp.f32 %v5988_v8  ;;  %vm2767_vm8 = vmor %vm2765_vm7, %vm2766_vm0  ;;  %v3072_v61 = vor.u32 1.1754944e-38, %v3071_v35  ;;  %vm3070_vm13 = vcmp.eq.f32.partialorder %v3069_v14, 8.507059e+37 }
 0x277   :  { %v1775_v24 = vpop.xlane.xlu1 %1774  ;;  %v3048_v50 = vmul.f32 %v4071_v55, %v3047_v53  ;;  %v3061_v52 = vmul.f32 %v4077_v32, %v5963_v38  ;;  %v2762_v16 = vsub.f32 1.0, %v2761_v60  ;;  %vm3066_vm6 = vweird.f32 %v4077_v32 }
 0x278   :  { %v1883_v46 = vadd.f32 %v5849_v4, %v1775_v24  ;;  %v2749_v29 = vadd.f32 %v4069_v41, %v2748_v25  ;;  %vm3067_vm12 = vmor %vm3065_vm10, %vm3066_vm6  ;;  %v2786_v20 = vand.u32 2147483648, %v5988_v8  ;;  %v2784_v22 = vand.u32 2147483647, %v5988_v8 }
 0x279   :  { %v3049_v59 = vadd.f32 %v4071_v55, %v3048_v50  ;;  %v3062_v34 = vsub.f32 1.0, %v3061_v52  ;;  %v2763_v26 = vmul.f32 %v4075_v42, %v2762_v16 }
 0x27a   :  { %v2753_v45 = vsel %vm2752_vm4, %v4069_v41, %v2749_v29  ;;  %v3720_v54 = vmul.f32 -1.442695, %v1883_v46  ;;  %v4079_v0 = vpop.eup %4078  ;;  %v2787_v27 = vor.u32 1.1754944e-38, %v2786_v20  ;;  %vm2785_vm2 = vcmp.eq.f32.partialorder %v2784_v22, 8.507059e+37 }
 0x27b   :  { %v2758_v39 = vsel %vm5979_vm15, %v2757_v63, %v2753_v45  ;;  %v3053_v21 = vsel %vm3052_vm5, %v4071_v55, %v3049_v59  ;;  %v3063_v12 = vmul.f32 %v4077_v32, %v3062_v34  ;;  %v2764_v15 = vadd.f32 %v4075_v42, %v2763_v26 }
 0x27c   :  { %3160 = vst.msk [vmem:[%s6203_s5 + $0x138] sm:$0xff] %vm3120_vm9, %v2758_v39  ;;  %v3058_v9 = vsel %vm5984_vm1, %v3057_v49, %v3053_v21  ;;  %4082 = vpow2.f32 %v3720_v54  ;;  %v4081_v1 = vpop.eup %4080  ;;  %v6015_v7 = vadd.f32 1.0, %v4079_v0  ;;  %vm2780_vm15 = vweird.f32 %v5988_v8 }
 0x27d   :  { %3180 = vst.msk [vmem:[%s6203_s5 + $0x1d8] sm:$0xff] %vm3120_vm9, %v3058_v9  ;;  %v3064_v11 = vadd.f32 %v4077_v32, %v3063_v12  ;;  %v2776_v2 = vmul.f32 %v4081_v1, %v5988_v8  ;;  %v2768_v56 = vsel %vm2767_vm8, %v4075_v42, %v2764_v15  ;;  %vm2781_vm14 = vweird.f32 %v4081_v1 }
 0x27e   :  { %4084 = vrcp.f32 %v6015_v7  ;;  %v2773_v33 = vsel %vm2770_vm11, %v2772_v37, %v2768_v56  ;;  %vm2782_vm1 = vmor %vm2780_vm15, %vm2781_vm14  ;;  %v2801_v31 = vand.u32 2147483648, %v6015_v7  ;;  %v2799_v40 = vand.u32 2147483647, %v6015_v7 }
 0x27f   :  { %v1778_v44 = vpop.xlane.xlu2 %1777  ;;  %v3068_v30 = vsel %vm3067_vm12, %v4077_v32, %v3064_v11  ;;  %v2777_v47 = vsub.f32 1.0, %v2776_v2  ;;  %3161 = vst.msk [vmem:[%s6203_s5 + $0x140] sm:$0xff] %vm3120_vm9, %v2773_v33  ;;  %vm2795_vm4 = vweird.f32 %v6015_v7 }
 0x280   :  { %v1884_v5 = vadd.f32 %v5849_v4, %v1778_v44  ;;  %v3073_v36 = vsel %vm3070_vm13, %v3072_v61, %v3068_v30  ;;  %v2802_v46 = vor.u32 1.1754944e-38, %v2801_v31  ;;  %vm2800_vm0 = vcmp.eq.f32.partialorder %v2799_v40, 8.507059e+37 }
 0x281   :  { %3181 = vst.msk [vmem:[%s6203_s5 + $0x1e0] sm:$0xff] %vm3120_vm9, %v3073_v36  ;;  %v2778_v19 = vmul.f32 %v4081_v1, %v2777_v47 }
 0x282   :  { %v3721_v18 = vmul.f32 -1.442695, %v1884_v5  ;;  %v4083_v51 = vpop.eup %4082 }
 0x283   :  { %v2139_v3 = vadd.f32 1.0, %v4083_v51  ;;  %v2779_v62 = vadd.f32 %v4081_v1, %v2778_v19 }
 0x284   :  { %4086 = vpow2.f32 %v3721_v18  ;;  %v4085_v41 = vpop.eup %4084 }
 0x285   :  { %4088 = vrcp.f32 %v2139_v3  ;;  %v2783_v48 = vsel %vm2782_vm1, %v4081_v1, %v2779_v62  ;;  %v2791_v55 = vmul.f32 %v4085_v41, %v6015_v7  ;;  %vm2796_vm3 = vweird.f32 %v4085_v41 }
 0x286   :  { %v2788_v23 = vsel %vm2785_vm2, %v2787_v27, %v2783_v48  ;;  %vm2797_vm5 = vmor %vm2795_vm4, %vm2796_vm3  ;;  %v2814_v52 = vand.u32 2147483647, %v2139_v3  ;;  %v2816_v59 = vand.u32 2147483648, %v2139_v3  ;;  %vm2810_vm7 = vweird.f32 %v2139_v3 }
 0x287   :  { %v1781_v38 = vpop.xlane.xlu0 %1780  ;;  %3162 = vst.msk [vmem:[%s6203_s5 + $0x148] sm:$0xff] %vm3120_vm9, %v2788_v23  ;;  %v2792_v28 = vsub.f32 1.0, %v2791_v55 }
 0x288   :  { %v1885_v58 = vadd.f32 %v5849_v4, %v1781_v38  ;;  %v2817_v39 = vor.u32 1.1754944e-38, %v2816_v59  ;;  %vm2815_vm10 = vcmp.eq.f32.partialorder %v2814_v52, 8.507059e+37 }
 0x289   :  { %v2793_v57 = vmul.f32 %v4085_v41, %v2792_v28 }
 0x28a   :  { %v3722_v13 = vmul.f32 -1.442695, %v1885_v58  ;;  %v4087_v43 = vpop.eup %4086 }
 0x28b   :  { %v6041_v24 = vadd.f32 1.0, %v4087_v43  ;;  %v4089_v53 = vpop.eup %4088  ;;  %v2794_v42 = vadd.f32 %v4085_v41, %v2793_v57 }
 0x28c   :  { %4090 = vpow2.f32 %v3722_v13  ;;  %v2806_v25 = vmul.f32 %v4089_v53, %v2139_v3  ;;  %vm2811_vm6 = vweird.f32 %v4089_v53 }
 0x28d   :  { %4092 = vrcp.f32 %v6041_v24  ;;  %v2798_v60 = vsel %vm2797_vm5, %v4085_v41, %v2794_v42  ;;  %vm2812_vm8 = vmor %vm2810_vm7, %vm2811_vm6  ;;  %v2831_v15 = vand.u32 2147483648, %v6041_v24  ;;  %v2829_v2 = vand.u32 2147483647, %v6041_v24 }
 0x28e   :  { %v2807_v29 = vsub.f32 1.0, %v2806_v25  ;;  %v2803_v6 = vsel %vm2800_vm0, %v2802_v46, %v2798_v60  ;;  %vm2825_vm12 = vweird.f32 %v6041_v24 }
 0x28f   :  { %v1790_v63 = vpop.xlane.xlu0 %1789  ;;  %v1784_v17 = vpop.xlane.xlu1 %1783  ;;  %3163 = vst.msk [vmem:[%s6203_s5 + $0x150] sm:$0xff] %vm3120_vm9, %v2803_v6  ;;  %v2832_v47 = vor.u32 1.1754944e-38, %v2831_v15  ;;  %vm2830_vm14 = vcmp.eq.f32.partialorder %v2829_v2, 8.507059e+37 }
 0x290   :  { %v1888_v8 = vadd.f32 %v5849_v4, %v1790_v63  ;;  %v1886_v32 = vadd.f32 %v5849_v4, %v1784_v17  ;;  %v2808_v10 = vmul.f32 %v4089_v53, %v2807_v29 }
 0x292   :  { %v4091_v50 = vpop.eup %4090  ;;  %v3725_v49 = vmul.f32 -1.442695, %v1888_v8  ;;  %v3723_v14 = vmul.f32 -1.442695, %v1886_v32  ;;  %v2809_v35 = vadd.f32 %v4089_v53, %v2808_v10 }
 0x293   :  { %v6047_v16 = vadd.f32 1.0, %v4091_v50  ;;  %v4093_v34 = vpop.eup %4092 }
 0x294   :  { %4094 = vpow2.f32 %v3725_v49  ;;  %v2821_v21 = vmul.f32 %v4093_v34, %v6041_v24  ;;  %v2813_v44 = vsel %vm2812_vm8, %v4089_v53, %v2809_v35  ;;  %vm2826_vm11 = vweird.f32 %v4093_v34 }
 0x295   :  { %4096 = vrcp.f32 %v6047_v16  ;;  %v2818_v12 = vsel %vm2815_vm10, %v2817_v39, %v2813_v44  ;;  %vm2827_vm13 = vmor %vm2825_vm12, %vm2826_vm11  ;;  %v2844_v51 = vand.u32 2147483647, %v6047_v16  ;;  %v2846_v19 = vand.u32 2147483648, %v6047_v16 }
 0x296   :  { %4098 = vpow2.f32 %v3723_v14  ;;  %v2822_v1 = vsub.f32 1.0, %v2821_v21  ;;  %3164 = vst.msk [vmem:[%s6203_s5 + $0x158] sm:$0xff] %vm3120_vm9, %v2818_v12  ;;  %vm2840_vm1 = vweird.f32 %v6047_v16 }
 0x297   :  { %v1787_v45 = vpop.xlane.xlu2 %1786  ;;  %v1793_v26 = vpop.xlane.xlu1 %1792  ;;  %vm2845_vm2 = vcmp.eq.f32.partialorder %v2844_v51, 8.507059e+37  ;;  %v2847_v28 = vor.u32 1.1754944e-38, %v2846_v19 }
 0x298   :  { %v1887_v54 = vadd.f32 %v5849_v4, %v1787_v45  ;;  %v1889_v9 = vadd.f32 %v5849_v4, %v1793_v26  ;;  %v2823_v11 = vmul.f32 %v4093_v34, %v2822_v1 }
 0x29a   :  { %v3724_v0 = vmul.f32 -1.442695, %v1887_v54  ;;  %v4095_v7 = vpop.eup %4094  ;;  %v3726_v5 = vmul.f32 -1.442695, %v1889_v9  ;;  %v2824_v30 = vadd.f32 %v4093_v34, %v2823_v11 }
 0x29b   :  { %v4097_v37 = vpop.eup %4096  ;;  %v6063_v56 = vadd.f32 1.0, %v4095_v7 }
 0x29c   :  { %4100 = vpow2.f32 %v3724_v0  ;;  %v4099_v61 = vpop.eup %4098  ;;  %v2836_v33 = vmul.f32 %v4097_v37, %v6047_v16  ;;  %v2828_v3 = vsel %vm2827_vm13, %v4093_v34, %v2824_v30  ;;  %vm2841_vm15 = vweird.f32 %v4097_v37 }
 0x29d   :  { %4102 = vpow2.f32 %v3726_v5  ;;  %v6067_v36 = vadd.f32 1.0, %v4099_v61  ;;  %v2833_v62 = vsel %vm2830_vm14, %v2832_v47, %v2828_v3  ;;  %vm2885_vm3 = vweird.f32 %v6063_v56  ;;  %vm2842_vm4 = vmor %vm2840_vm1, %vm2841_vm15 }
 0x29e   :  { %4104 = vrcp.f32 %v6063_v56  ;;  %v2837_v18 = vsub.f32 1.0, %v2836_v33  ;;  %3165 = vst.msk [vmem:[%s6203_s5 + $0x160] sm:$0xff] %vm3120_vm9, %v2833_v62  ;;  %v2889_v57 = vand.u32 2147483647, %v6063_v56  ;;  %v2891_v46 = vand.u32 2147483648, %v6063_v56 }
 0x29f   :  { %v1796_v20 = vpop.xlane.xlu2 %1795  ;;  %4106 = vrcp.f32 %v6067_v36  ;;  %v1829_v27 = vpop.xlane.xlu1 %1828  ;;  %v2859_v31 = vand.u32 2147483647, %v6067_v36  ;;  %v2861_v25 = vand.u32 2147483648, %v6067_v36  ;;  %vm2855_vm5 = vweird.f32 %v6067_v36 }
 0x2a0   :  { %v1890_v22 = vadd.f32 %v5849_v4, %v1796_v20  ;;  %v2838_v41 = vmul.f32 %v4097_v37, %v2837_v18  ;;  %v1901_v40 = vadd.f32 %v5849_v4, %v1829_v27  ;;  %vm6103_vm7 = vcmp.eq.f32.partialorder %v2889_v57, 8.507059e+37 }
 0x2a1   :  { %v1799_v38 = vpop.xlane.xlu0 %1798  ;;  %vm6099_vm0 = vcmp.eq.f32.partialorder %v2859_v31, 8.507059e+37  ;;  %v2862_v34 = vor.u32 1.1754944e-38, %v2861_v25  ;;  %v2892_v35 = vor.u32 1.1754944e-38, %v2891_v46 }
 0x2a2   :  { %v4101_v58 = vpop.eup %4100  ;;  %v3727_v55 = vmul.f32 -1.442695, %v1890_v22  ;;  %v2839_v23 = vadd.f32 %v4097_v37, %v2838_v41  ;;  %v1891_v17 = vadd.f32 %v5849_v4, %v1799_v38  ;;  %v3738_v52 = vmul.f32 -1.442695, %v1901_v40 }
 0x2a3   :  { %v6079_v48 = vadd.f32 1.0, %v4101_v58  ;;  %v4103_v13 = vpop.eup %4102 }
 0x2a4   :  { %v4105_v43 = vpop.eup %4104  ;;  %v2843_v24 = vsel %vm2842_vm4, %v4097_v37, %v2839_v23  ;;  %v6087_v53 = vadd.f32 1.0, %v4103_v13  ;;  %v3728_v10 = vmul.f32 -1.442695, %v1891_v17 }
 0x2a5   :  { %4108 = vrcp.f32 %v6079_v48  ;;  %v2881_v63 = vmul.f32 %v4105_v43, %v6063_v56  ;;  %v4107_v8 = vpop.eup %4106  ;;  %v2848_v42 = vsel %vm2845_vm2, %v2847_v28, %v2843_v24  ;;  %vm2886_vm6 = vweird.f32 %v4105_v43 }
 0x2a6   :  { %4110 = vpow2.f32 %v3727_v55  ;;  %3166 = vst.msk [vmem:[%s6203_s5 + $0x168] sm:$0xff] %vm3120_vm9, %v2848_v42  ;;  %v2851_v50 = vmul.f32 %v4107_v8, %v6067_v36  ;;  %vm2856_vm8 = vweird.f32 %v4107_v8  ;;  %vm2887_vm10 = vmor %vm2885_vm3, %vm2886_vm6  ;;  %v2874_v0 = vand.u32 2147483647, %v6079_v48 }
 0x2a7   :  { %v1832_v32 = vpop.xlane.xlu2 %1831  ;;  %v2882_v60 = vsub.f32 1.0, %v2881_v63  ;;  %4112 = vrcp.f32 %v6087_v53  ;;  %vm2857_vm11 = vmor %vm2855_vm5, %vm2856_vm8  ;;  %v2876_v11 = vand.u32 2147483648, %v6079_v48  ;;  %vm2870_vm13 = vweird.f32 %v6079_v48 }
 0x2a8   :  { %v2852_v59 = vsub.f32 1.0, %v2851_v50  ;;  %v1902_v14 = vadd.f32 %v5849_v4, %v1832_v32  ;;  %4114 = vpow2.f32 %v3738_v52  ;;  %v2906_v20 = vand.u32 2147483648, %v6087_v53 }
 0x2a9   :  { %v1835_v29 = vpop.xlane.xlu0 %1834  ;;  %v2883_v16 = vmul.f32 %v4105_v43, %v2882_v60  ;;  %4116 = vpow2.f32 %v3728_v10  ;;  %v2877_v19 = vor.u32 1.1754944e-38, %v2876_v11  ;;  %v2904_v38 = vand.u32 2147483647, %v6087_v53 }
 0x2aa   :  { %v1903_v54 = vadd.f32 %v5849_v4, %v1835_v29  ;;  %v2853_v39 = vmul.f32 %v4107_v8, %v2852_v59  ;;  %v3739_v9 = vmul.f32 -1.442695, %v1902_v14  ;;  %vm2875_vm1 = vcmp.eq.f32.partialorder %v2874_v0, 8.507059e+37 }
 0x2ab   :  { %v4109_v45 = vpop.eup %4108  ;;  %v2884_v21 = vadd.f32 %v4105_v43, %v2883_v16  ;;  %vm2900_vm2 = vweird.f32 %v6087_v53  ;;  %v2907_v55 = vor.u32 1.1754944e-38, %v2906_v20  ;;  %vm2905_vm4 = vcmp.eq.f32.partialorder %v2904_v38, 8.507059e+37 }
 0x2ac   :  { %v2866_v26 = vmul.f32 %v4109_v45, %v6079_v48  ;;  %v4111_v44 = vpop.eup %4110  ;;  %v3740_v12 = vmul.f32 -1.442695, %v1903_v54  ;;  %v2854_v15 = vadd.f32 %v4107_v8, %v2853_v39  ;;  %4118 = vpow2.f32 %v3739_v9 }
 0x2ad   :  { %v4113_v1 = vpop.eup %4112  ;;  %v2888_v7 = vsel %vm2887_vm10, %v4105_v43, %v2884_v21  ;;  %v6114_v4 = vadd.f32 1.0, %v4111_v44  ;;  %vm2871_vm12 = vweird.f32 %v4109_v45 }
 0x2ae   :  { %v2867_v5 = vsub.f32 1.0, %v2866_v26  ;;  %v2893_v37 = vsel %vm6103_vm7, %v2892_v35, %v2888_v7  ;;  %v2896_v2 = vmul.f32 %v4113_v1, %v6087_v53  ;;  %v2858_v56 = vsel %vm2857_vm11, %v4107_v8, %v2854_v15  ;;  %v4115_v33 = vpop.eup %4114  ;;  %vm2872_vm14 = vmor %vm2870_vm13, %vm2871_vm12 }
 0x2af   :  { %3169 = vst.msk [vmem:[%s6203_s5 + $0x180] sm:$0xff] %vm3120_vm9, %v2893_v37  ;;  %4120 = vrcp.f32 %v6114_v4  ;;  %v2863_v30 = vsel %vm6099_vm0, %v2862_v34, %v2858_v56  ;;  %v2157_v18 = vadd.f32 1.0, %v4115_v33  ;;  %v4117_v51 = vpop.eup %4116  ;;  %vm2901_vm15 = vweird.f32 %v4113_v1 }
 0x2b0   :  { %v2868_v61 = vmul.f32 %v4109_v45, %v2867_v5  ;;  %v2897_v47 = vsub.f32 1.0, %v2896_v2  ;;  %3167 = vst.msk [vmem:[%s6203_s5 + $0x170] sm:$0xff] %vm3120_vm9, %v2863_v30  ;;  %4122 = vpow2.f32 %v3740_v12  ;;  %v6137_v27 = vadd.f32 1.0, %v4117_v51  ;;  %vm2902_vm3 = vmor %vm2900_vm2, %vm2901_vm15 }
 0x2b1   :  { %4124 = vrcp.f32 %v2157_v18  ;;  %v2919_v24 = vand.u32 2147483647, %v6114_v4  ;;  %v2921_v63 = vand.u32 2147483648, %v6114_v4  ;;  %v3084_v42 = vand.u32 2147483647, %v2157_v18 }
 0x2b2   :  { %v2869_v36 = vadd.f32 %v4109_v45, %v2868_v61  ;;  %v2898_v22 = vmul.f32 %v4113_v1, %v2897_v47  ;;  %v4119_v58 = vpop.eup %4118  ;;  %4126 = vrcp.f32 %v6137_v27  ;;  %vm2915_vm0 = vweird.f32 %v6114_v4 }
 0x2b3   :  { %v6143_v13 = vadd.f32 1.0, %v4119_v58  ;;  %v3086_v32 = vand.u32 2147483648, %v2157_v18  ;;  %vm2920_vm7 = vcmp.eq.f32.partialorder %v2919_v24, 8.507059e+37  ;;  %v2922_v60 = vor.u32 1.1754944e-38, %v2921_v63 }
 0x2b4   :  { %v2873_v3 = vsel %vm2872_vm14, %v4109_v45, %v2869_v36  ;;  %v2899_v41 = vadd.f32 %v4113_v1, %v2898_v22  ;;  %vm3080_vm10 = vweird.f32 %v2157_v18  ;;  %vm6159_vm11 = vcmp.eq.f32.partialorder %v3084_v42, 8.507059e+37 }
 0x2b5   :  { %v2878_v62 = vsel %vm2875_vm1, %v2877_v19, %v2873_v3  ;;  %v4121_v48 = vpop.eup %4120  ;;  %4128 = vrcp.f32 %v6143_v13  ;;  %v3087_v45 = vor.u32 1.1754944e-38, %v3086_v32  ;;  %v2934_v35 = vand.u32 2147483647, %v6137_v27 }
 0x2b6   :  { %3168 = vst.msk [vmem:[%s6203_s5 + $0x178] sm:$0xff] %vm3120_vm9, %v2878_v62  ;;  %v2903_v23 = vsel %vm2902_vm3, %v4113_v1, %v2899_v41  ;;  %v2911_v28 = vmul.f32 %v4121_v48, %v6114_v4  ;;  %v4123_v43 = vpop.eup %4122  ;;  %vm2916_vm5 = vweird.f32 %v4121_v48  ;;  %vm2930_vm13 = vweird.f32 %v6137_v27 }
 0x2b7   :  { %v2908_v31 = vsel %vm2905_vm4, %v2907_v55, %v2903_v23  ;;  %v4125_v40 = vpop.eup %4124  ;;  %v6154_v53 = vadd.f32 1.0, %v4123_v43  ;;  %vm2917_vm6 = vmor %vm2915_vm0, %vm2916_vm5  ;;  %v2936_v39 = vand.u32 2147483648, %v6137_v27  ;;  %v3101_v26 = vand.u32 2147483648, %v6143_v13 }
 0x2b8   :  { %3170 = vst.msk [vmem:[%s6203_s5 + $0x188] sm:$0xff] %vm3120_vm9, %v2908_v31  ;;  %v2912_v57 = vsub.f32 1.0, %v2911_v28  ;;  %v3076_v8 = vmul.f32 %v4125_v40, %v2157_v18  ;;  %v4127_v50 = vpop.eup %4126  ;;  %vm3081_vm8 = vweird.f32 %v4125_v40  ;;  %v3099_v15 = vand.u32 2147483647, %v6143_v13 }
 0x2b9   :  { %4130 = vrcp.f32 %v6154_v53  ;;  %v2926_v52 = vmul.f32 %v4127_v50, %v6137_v27  ;;  %vm3082_vm12 = vmor %vm3080_vm10, %vm3081_vm8  ;;  %vm2931_vm14 = vweird.f32 %v4127_v50  ;;  %vm2935_vm1 = vcmp.eq.f32.partialorder %v2934_v35, 8.507059e+37 }
 0x2ba   :  { %v2913_v17 = vmul.f32 %v4121_v48, %v2912_v57  ;;  %v3077_v46 = vsub.f32 1.0, %v3076_v8  ;;  %vm3095_vm2 = vweird.f32 %v6143_v13  ;;  %vm2932_vm3 = vmor %vm2930_vm13, %vm2931_vm14  ;;  %v2937_v4 = vor.u32 1.1754944e-38, %v2936_v39 }
 0x2bb   :  { %v4129_v29 = vpop.eup %4128  ;;  %v2927_v34 = vsub.f32 1.0, %v2926_v52  ;;  %v3102_v11 = vor.u32 1.1754944e-38, %v3101_v26  ;;  %v3116_v2 = vand.u32 2147483648, %v6154_v53  ;;  %v3114_v33 = vand.u32 2147483647, %v6154_v53 }
 0x2bc   :  { %v2914_v25 = vadd.f32 %v4121_v48, %v2913_v17  ;;  %v3078_v6 = vmul.f32 %v4125_v40, %v3077_v46  ;;  %v3091_v10 = vmul.f32 %v4129_v29, %v6143_v13  ;;  %vm3096_vm15 = vweird.f32 %v4129_v29 }
 0x2bd   :  { %v2928_v0 = vmul.f32 %v4127_v50, %v2927_v34  ;;  %vm3097_vm4 = vmor %vm3095_vm2, %vm3096_vm15  ;;  %vm3100_vm0 = vcmp.eq.f32.partialorder %v3099_v15, 8.507059e+37  ;;  %v3117_v18 = vor.u32 1.1754944e-38, %v3116_v2  ;;  %vm3115_vm8 = vcmp.eq.f32.partialorder %v3114_v33, 8.507059e+37 }
 0x2be   :  { %v2918_v49 = vsel %vm2917_vm6, %v4121_v48, %v2914_v25  ;;  %v3079_v14 = vadd.f32 %v4125_v40, %v3078_v6  ;;  %v3092_v21 = vsub.f32 1.0, %v3091_v10  ;;  %vm3110_vm6 = vweird.f32 %v6154_v53 }
 0x2bf   :  { %v2923_v59 = vsel %vm2920_vm7, %v2922_v60, %v2918_v49  ;;  %v4131_v54 = vpop.eup %4130  ;;  %v2929_v7 = vadd.f32 %v4127_v50, %v2928_v0 }
 0x2c0   :  { %3171 = vst.msk [vmem:[%s6203_s5 + $0x190] sm:$0xff] %vm3120_vm9, %v2923_v59  ;;  %v3083_v44 = vsel %vm3082_vm12, %v4125_v40, %v3079_v14  ;;  %v3106_v9 = vmul.f32 %v4131_v54, %v6154_v53  ;;  %v3093_v1 = vmul.f32 %v4129_v29, %v3092_v21  ;;  %vm3111_vm5 = vweird.f32 %v4131_v54 }
 0x2c1   :  { %v3088_v12 = vsel %vm6159_vm11, %v3087_v45, %v3083_v44  ;;  %v2933_v56 = vsel %vm2932_vm3, %v4127_v50, %v2929_v7  ;;  %vm3112_vm7 = vmor %vm3110_vm6, %vm3111_vm5 }
 0x2c2   :  { %3182 = vst.msk [vmem:[%s6203_s5 + $0x1e8] sm:$0xff] %vm3120_vm9, %v3088_v12  ;;  %v3107_v5 = vsub.f32 1.0, %v3106_v9  ;;  %v3094_v37 = vadd.f32 %v4129_v29, %v3093_v1  ;;  %v2938_v30 = vsel %vm2935_vm1, %v2937_v4, %v2933_v56 }
 0x2c3   :  { %3172 = vst.msk [vmem:[%s6203_s5 + $0x198] sm:$0xff] %vm3120_vm9, %v2938_v30 }
 0x2c4   :  { %v3108_v61 = vmul.f32 %v4131_v54, %v3107_v5  ;;  %v3098_v47 = vsel %vm3097_vm4, %v4129_v29, %v3094_v37 }
 0x2c5   :  { %v3103_v36 = vsel %vm3100_vm0, %v3102_v11, %v3098_v47 }
 0x2c6   :  { %v3109_v20 = vadd.f32 %v4131_v54, %v3108_v61  ;;  %3183 = vst.msk [vmem:[%s6203_s5 + $0x1f0] sm:$0xff] %vm3120_vm9, %v3103_v36 }
 0x2c8   :  { %v3113_v51 = vsel %vm3112_vm7, %v4131_v54, %v3109_v20 }
 0x2c9   :  { %v3118_v19 = vsel %vm3115_vm8, %v3117_v18, %v3113_v51 }
 0x2ca   :  { %3184 = vst.msk [vmem:[%s6203_s5 + $0x1f8] sm:$0xff] %vm3120_vm9, %v3118_v19 }

</bundles_post_ra>
